<compile_context>
chip_gen: v7x
topology: tpu7x:2x2x1
jax: 0.10.0
libtpu: 0.0.40
codegen_flags: <defaults>
</compile_context>

<pallas_src>
import jax
import jax.numpy as jnp
from jax.experimental import pallas as pl
from jax.experimental.pallas import tpu as pltpu

# ---- model / test dimensions (small but consistent with the module) ----------
B = 2                        # batch
L = 66                       # seq_len  -> conv out length 64
E = 128                      # embedding_dim (reduced from 768 for a small test)
C = 64                       # conv_out_channels
K = 5                        # kernel_size
PAD = 1                      # conv padding
H = 64                       # lstm hidden_dim (per direction)
O = 6                        # output_dim
OP = 128                     # padded logit lanes (lane-dense output store)
T = 32                       # AdaptiveMaxPool1d(output_size=32)
L_OUT = L + 2 * PAD - K + 1  # 64
WIN = L_OUT // T             # 2   (uniform pool windows)
KE = K * E                   # 640 (im2col width)
G = 8 * H                    # 512 = 4 gates x (fwd 64 | bwd 64) lanes


def _sigmoid(x):
    # single-EUP form: sigmoid(x) = 0.5 * tanh(0.5 * x) + 0.5
    return 0.5 * jnp.tanh(0.5 * x) + 0.5


def hybrid_kernel(xcol_ref, convw_ref, convb_ref,
                  wih_ref, bih_ref, whh_ref,
                  wattn_ref, battn_ref, wcls_ref, bcls_ref,
                  out_ref,
                  gin_ref, lstm_ref):
    # ---- Conv1d as one im2col matmul (one-shot, f32) -------------------------
    # xcol rows are ordered (pool window, pool step, batch) so AdaptiveMaxPool
    # becomes a plain elementwise max between the two row halves.
    conv = jnp.dot(xcol_ref[...], convw_ref[...],
                   preferred_element_type=jnp.float32) + convb_ref[...]  # [B*L_OUT, C]

    # ---- AdaptiveMaxPool1d(32) + ReLU -----------------------------------------
    pooled = jnp.maximum(conv[0:B * T, :], conv[B * T:2 * B * T, :])      # [B*T, C]
    h_in = jnp.maximum(pooled, 0.0)                                       # time-major rows t*B+b

    # ---- fused input projection for BOTH directions (lane-packed gates) ------
    # gin row t*B+b, gate g: lanes [g*128, g*128+64) = fwd, [g*128+64, (g+1)*128) = bwd
    gin_ref[...] = jnp.dot(h_in, wih_ref[...],
                           preferred_element_type=jnp.float32) + bih_ref[...]

    # loop-invariant fwd/bwd lane-half mask (computed once, hoisted)
    lane = jax.lax.broadcasted_iota(jnp.int32, (B, G), 1)
    fwd_mask = (lane % (2 * H)) < H

    # ---- BiLSTM: direction-lane-packed recurrence, vreg-carried state --------
    h_pk = jnp.zeros((B, 2 * H), jnp.float32)   # lanes [h_f | h_b]
    c_pk = jnp.zeros((B, 2 * H), jnp.float32)

    for t in range(T):                 # fully unrolled; all slices are static
        tb = T - 1 - t
        # whh is block-diagonal inside each 128-lane gate, so fwd lanes depend
        # only on h_f and bwd lanes only on h_b.
        g_rec = jnp.dot(h_pk.astype(jnp.bfloat16), whh_ref[...],
                        preferred_element_type=jnp.float32)               # [B, G]
        g_in = jnp.where(fwd_mask,
                         gin_ref[t * B:t * B + B, :],                     # fwd @ t
                         gin_ref[tb * B:tb * B + B, :])                   # bwd @ T-1-t
        g = g_rec + g_in

        i_g = _sigmoid(g[:, 0:2 * H])
        f_g = _sigmoid(g[:, 2 * H:4 * H])
        g_g = jnp.tanh(g[:, 4 * H:6 * H])
        o_g = _sigmoid(g[:, 6 * H:8 * H])
        c_pk = f_g * c_pk + i_g * g_g
        h_pk = o_g * jnp.tanh(c_pk)

        # time-aligned store (batch-major rows b*T + time); these stores are off
        # the serial h/c critical path and hide under the next step's matmul.
        for b in range(B):
            lstm_ref[b * T + t:b * T + t + 1, 0:H] = h_pk[b:b + 1, 0:H]
            lstm_ref[b * T + tb:b * T + tb + 1, H:2 * H] = h_pk[b:b + 1, H:2 * H]

    # ---- attention pooling (softmax over time) + batched classifier ----------
    attn_rows = []
    for b in range(B):
        lo = lstm_ref[b * T:(b + 1) * T, :]                               # [T, 2H]
        s = jnp.sum(lo * wattn_ref[...], axis=-1, keepdims=True) + battn_ref[...]
        s = s - jnp.max(s, axis=0, keepdims=True)
        e = jnp.exp(s)
        w = e / jnp.sum(e, axis=0, keepdims=True)
        attn_rows.append(jnp.sum(lo * w, axis=0, keepdims=True))          # [1, 2H]
    attn = jnp.concatenate(attn_rows, axis=0)                             # [B, 2H]
    out_ref[...] = jnp.dot(attn, wcls_ref[...],
                           preferred_element_type=jnp.float32) + bcls_ref[...]


# ------------------------- one-time weight plumbing ----------------------------
def _pack_dir_lanes(wf, wb):
    """[in, 4*H] fwd & bwd -> [in, 4*2H]: per gate [fwd(0:H) | bwd(H:2H)] lanes."""
    parts = []
    for g in range(4):
        parts.append(wf[:, g * H:(g + 1) * H])
        parts.append(wb[:, g * H:(g + 1) * H])
    return jnp.concatenate(parts, axis=1)


def prepare_weights(p):
    """Pad / pack / cast the weights once, off the per-call inference path."""
    convw = p["conv_w"].reshape(KE, C)                       # [K*E, C] f32
    convb = p["conv_b"]                                      # [1, C]

    wih = _pack_dir_lanes(p["wih_f"], p["wih_b"])            # [C, G] f32
    bih = _pack_dir_lanes(p["b_f"], p["b_b"])                # [1, G] f32

    # per-gate block-diagonal recurrence weight: rows 0:H (h_f) feed the fwd
    # half-lanes, rows H:2H (h_b) feed the bwd half-lanes.
    whh = jnp.zeros((2 * H, G), jnp.float32)
    for g in range(4):
        whh = whh.at[0:H, g * 2 * H:g * 2 * H + H].set(p["whh_f"][:, g * H:(g + 1) * H])
        whh = whh.at[H:2 * H, g * 2 * H + H:(g + 1) * 2 * H].set(p["whh_b"][:, g * H:(g + 1) * H])
    whh = whh.astype(jnp.bfloat16)                           # critical-path matmul -> bf16

    wattn = p["w_attn"].T                                    # [1, 2H]; lanes already [fwd|bwd]
    battn = p["b_attn"]                                      # [1, 1]
    wcls = jnp.pad(p["w_cls"], ((0, 0), (0, OP - O)))        # [2H, OP]
    bcls = jnp.pad(p["b_cls"], ((0, 0), (0, OP - O)))        # [1, OP]

    return (convw, convb, wih, bih, whh, wattn, battn, wcls, bcls)


def _im2col(x):
    """x [B, L, E] -> [B*L_OUT, K*E] f32, rows ordered (pool window, pool step, batch)."""
    xp = jnp.pad(x, ((0, 0), (PAD, PAD), (0, 0)))                         # conv pad=1
    cols = jnp.concatenate([xp[:, k:k + L_OUT, :] for k in range(K)], axis=-1)
    cols = cols.reshape(B, T, WIN, KE).transpose(2, 1, 0, 3).reshape(B * L_OUT, KE)
    return cols


def hybrid_forward(x, weights):
    """x: [B, L, E] float32, weights from prepare_weights -> logits [B, O] f32."""
    xcol = _im2col(x)
    z2 = lambda i: (0, 0)
    grid_spec = pltpu.PrefetchScalarGridSpec(
        num_scalar_prefetch=0,
        grid=(1,),
        in_specs=[
            pl.BlockSpec((B * L_OUT, KE), z2),    # im2col activations (f32)
            pl.BlockSpec((KE, C), z2),            # conv weight
            pl.BlockSpec((1, C), z2),             # conv bias
            pl.BlockSpec((C, G), z2),             # lane-packed W_ih (both dirs)
            pl.BlockSpec((1, G), z2),             # lane-packed bias (b_ih + b_hh)
            pl.BlockSpec((2 * H, G), z2),         # per-gate block-diag W_hh (bf16)
            pl.BlockSpec((1, 2 * H), z2),         # attn weight (row layout)
            pl.BlockSpec((1, 1), z2),             # attn bias
            pl.BlockSpec((2 * H, OP), z2),        # classifier weight (lane-padded)
            pl.BlockSpec((1, OP), z2),            # classifier bias (lane-padded)
        ],
        out_specs=pl.BlockSpec((B, OP), z2),
        scratch_shapes=[
            pltpu.VMEM((B * T, G), jnp.float32),       # precomputed input gates
            pltpu.VMEM((B * T, 2 * H), jnp.float32),   # BiLSTM outputs (time-aligned)
        ],
    )

    out = pl.pallas_call(
        hybrid_kernel,
        out_shape=jax.ShapeDtypeStruct((B, OP), jnp.float32),
        grid_spec=grid_spec,
        compiler_params=pltpu.CompilerParams(
            dimension_semantics=("arbitrary",)),
    )(xcol, *weights)
    return out[:, :O]


# ---------------------------- pure-JAX reference -------------------------------
def reference_forward(x, p):
    b, l, e = x.shape
    xp = jnp.pad(x, ((0, 0), (PAD, PAD), (0, 0)))
    l_out = l + 2 * PAD - K + 1
    conv = jnp.zeros((b, l_out, C), jnp.float32)
    for k in range(K):
        conv = conv + jnp.einsum("ble,ec->blc", xp[:, k:k + l_out, :], p["conv_w"][k])
    conv = conv + p["conv_b"]
    win = l_out // T
    h_in = jnp.maximum(conv.reshape(b, T, win, C).max(axis=2), 0.0)

    def run_dir(wih, whh, bias, reverse):
        xs = jnp.swapaxes(h_in, 0, 1)                         # [T, B, C]

        def step(carry, x_t):
            h, c = carry
            g = x_t @ wih + h @ whh + bias
            i_g = jax.nn.sigmoid(g[:, :H])
            f_g = jax.nn.sigmoid(g[:, H:2 * H])
            g_g = jnp.tanh(g[:, 2 * H:3 * H])
            o_g = jax.nn.sigmoid(g[:, 3 * H:4 * H])
            c = f_g * c + i_g * g_g
            h = o_g * jnp.tanh(c)
            return (h, c), h

        init = (jnp.zeros((b, H), jnp.float32), jnp.zeros((b, H), jnp.float32))
        _, hs = jax.lax.scan(step, init, xs, reverse=reverse)
        return jnp.swapaxes(hs, 0, 1)                         # [B, T, H]

    lstm_o = jnp.concatenate(
        [run_dir(p["wih_f"], p["whh_f"], p["b_f"], False),
         run_dir(p["wih_b"], p["whh_b"], p["b_b"], True)], axis=-1)
    scores = lstm_o @ p["w_attn"] + p["b_attn"]               # [B, T, 1]
    attw = jax.nn.softmax(scores, axis=1)
    attn = jnp.sum(lstm_o * attw, axis=1)                     # [B, 2H]
    return attn @ p["w_cls"] + p["b_cls"]                     # [B, O]


# ------------------------------- parameters ------------------------------------
def init_params(key):
    ks = jax.random.split(key, 12)

    def init(k, shape, fan_in):
        return (jax.random.normal(k, shape, jnp.float32) /
                jnp.sqrt(jnp.float32(fan_in)))

    return dict(
        conv_w=init(ks[0], (K, E, C), E * K),
        conv_b=init(ks[1], (1, C), E * K),
        wih_f=init(ks[2], (C, 4 * H), C),
        whh_f=init(ks[3], (H, 4 * H), H),
        b_f=init(ks[4], (1, 4 * H), H),        # b_ih + b_hh combined
        wih_b=init(ks[5], (C, 4 * H), C),
        whh_b=init(ks[6], (H, 4 * H), H),
        b_b=init(ks[7], (1, 4 * H), H),
        w_attn=init(ks[8], (2 * H, 1), 2 * H),
        b_attn=init(ks[9], (1, 1), 2 * H),
        w_cls=init(ks[10], (2 * H, O), 2 * H),
        b_cls=init(ks[11], (1, O), 2 * H),
    )


if __name__ == "__main__":
    key = jax.random.PRNGKey(0)
    kx, kp = jax.random.split(key)
    x = jax.random.normal(kx, (B, L, E), jnp.float32)
    params = init_params(kp)

    weights = prepare_weights(params)          # one-time weight plumbing (off hot path)
    fwd = jax.jit(hybrid_forward)

    out = jax.block_until_ready(fwd(x, weights))
    ref = reference_forward(x, params)

    assert out.shape == (B, O), out.shape
    # bf16 recurrence operands (f32 accumulate) -> small error vs f32 reference.
    err = float(jnp.max(jnp.abs(out - ref)))
    assert err < 3e-2, f"max abs err {err}"
    print("KERNEL_OK")
</pallas_src>

<mosaic_0001>
module attributes {stable_mosaic.version = 11 : i64} {
  func.func @hybrid_kernel(%arg0: i32, %arg1: memref<128x640xf32, #tpu.memory_space<vmem>>, %arg2: memref<640x64xf32, #tpu.memory_space<vmem>>, %arg3: memref<1x64xf32, #tpu.memory_space<vmem>>, %arg4: memref<64x512xf32, #tpu.memory_space<vmem>>, %arg5: memref<1x512xf32, #tpu.memory_space<vmem>>, %arg6: memref<128x512xbf16, #tpu.memory_space<vmem>>, %arg7: memref<1x128xf32, #tpu.memory_space<vmem>>, %arg8: memref<1x1xf32, #tpu.memory_space<vmem>>, %arg9: memref<128x128xf32, #tpu.memory_space<vmem>>, %arg10: memref<1x128xf32, #tpu.memory_space<vmem>>, %arg11: memref<2x128xf32, #tpu.memory_space<vmem>>, %arg12: memref<64x512xf32, #tpu.memory_space<vmem>>, %arg13: memref<64x128xf32, #tpu.memory_space<vmem>>) attributes {dimension_semantics = [#tpu.dimension_semantics<arbitrary>], iteration_bounds = array<i64: 1>, scalar_prefetch = 0 : i64, scratch_operands = 2 : i64, tpu.core_type = #tpu.core_type<tc>, window_params = [{pipeline_mode = #tpu.pipeline_mode<synchronous>, transform_indices = @transform_0, window_bounds = array<i64: 128, 640>}, {pipeline_mode = #tpu.pipeline_mode<synchronous>, transform_indices = @transform_1, window_bounds = array<i64: 640, 64>}, {pipeline_mode = #tpu.pipeline_mode<synchronous>, transform_indices = @transform_2, window_bounds = array<i64: 1, 64>}, {pipeline_mode = #tpu.pipeline_mode<synchronous>, transform_indices = @transform_3, window_bounds = array<i64: 64, 512>}, {pipeline_mode = #tpu.pipeline_mode<synchronous>, transform_indices = @transform_4, window_bounds = array<i64: 1, 512>}, {pipeline_mode = #tpu.pipeline_mode<synchronous>, transform_indices = @transform_5, window_bounds = array<i64: 128, 512>}, {pipeline_mode = #tpu.pipeline_mode<synchronous>, transform_indices = @transform_6, window_bounds = array<i64: 1, 128>}, {pipeline_mode = #tpu.pipeline_mode<synchronous>, transform_indices = @transform_7, window_bounds = array<i64: 1, 1>}, {pipeline_mode = #tpu.pipeline_mode<synchronous>, transform_indices = @transform_8, window_bounds = array<i64: 128, 128>}, {pipeline_mode = #tpu.pipeline_mode<synchronous>, transform_indices = @transform_9, window_bounds = array<i64: 1, 128>}, {pipeline_mode = #tpu.pipeline_mode<synchronous>, transform_indices = @transform_10, window_bounds = array<i64: 2, 128>}]} {
    %c0 = arith.constant 0 : index
    %c0_0 = arith.constant 0 : index
    %0 = vector.load %arg1[%c0, %c0_0] : memref<128x640xf32, #tpu.memory_space<vmem>>, vector<128x640xf32>
    %c0_1 = arith.constant 0 : index
    %c0_2 = arith.constant 0 : index
    %1 = vector.load %arg2[%c0_1, %c0_2] : memref<640x64xf32, #tpu.memory_space<vmem>>, vector<640x64xf32>
    %cst = arith.constant dense<0.000000e+00> : vector<128x64xf32>
    %2 = tpu.matmul %0, %1, %cst {dimension_numbers = #tpu.dot_dimension_numbers<[1], [0], [0], [1], [0, 0, 1, 1], [], []>} : vector<128x640xf32>, vector<640x64xf32>, vector<128x64xf32> -> vector<128x64xf32>
    %c0_3 = arith.constant 0 : index
    %c0_4 = arith.constant 0 : index
    %3 = vector.load %arg3[%c0_3, %c0_4] : memref<1x64xf32, #tpu.memory_space<vmem>>, vector<1x64xf32>
    %4 = vector.broadcast %3 : vector<1x64xf32> to vector<128x64xf32>
    %5 = arith.addf %2, %4 : vector<128x64xf32>
    %6 = vector.extract_strided_slice %5 {offsets = [0, 0], sizes = [64, 64], strides = [1, 1]} : vector<128x64xf32> to vector<64x64xf32>
    %7 = vector.extract_strided_slice %5 {offsets = [64, 0], sizes = [64, 64], strides = [1, 1]} : vector<128x64xf32> to vector<64x64xf32>
    %8 = arith.maximumf %6, %7 : vector<64x64xf32>
    %cst_5 = arith.constant 0.000000e+00 : f32
    %9 = vector.broadcast %cst_5 : f32 to vector<64x64xf32>
    %10 = arith.maximumf %8, %9 : vector<64x64xf32>
    %c0_6 = arith.constant 0 : index
    %c0_7 = arith.constant 0 : index
    %11 = vector.load %arg4[%c0_6, %c0_7] : memref<64x512xf32, #tpu.memory_space<vmem>>, vector<64x512xf32>
    %cst_8 = arith.constant dense<0.000000e+00> : vector<64x512xf32>
    %12 = tpu.matmul %10, %11, %cst_8 {dimension_numbers = #tpu.dot_dimension_numbers<[1], [0], [0], [1], [0, 0, 1, 1], [], []>} : vector<64x64xf32>, vector<64x512xf32>, vector<64x512xf32> -> vector<64x512xf32>
    %c0_9 = arith.constant 0 : index
    %c0_10 = arith.constant 0 : index
    %13 = vector.load %arg5[%c0_9, %c0_10] : memref<1x512xf32, #tpu.memory_space<vmem>>, vector<1x512xf32>
    %14 = vector.broadcast %13 : vector<1x512xf32> to vector<64x512xf32>
    %15 = arith.addf %12, %14 : vector<64x512xf32>
    %c0_11 = arith.constant 0 : index
    %c0_12 = arith.constant 0 : index
    %16 = vector.load %arg12[%c0_11, %c0_12] : memref<64x512xf32, #tpu.memory_space<vmem>>, vector<64x512xf32>
    tpu.vector_store %arg12[%c0_11, %c0_12], %15 {strides = array<i32>} : memref<64x512xf32, #tpu.memory_space<vmem>>, vector<64x512xf32>,
    %17 = tpu.iota {dimensions = array<i32: 1>} : vector<2x512xi32>
    %c128_i32 = arith.constant 128 : i32
    %c0_i32 = arith.constant 0 : i32
    %18 = arith.cmpi eq, %c128_i32, %c0_i32 : i32
    %c1_i32 = arith.constant 1 : i32
    %19 = arith.select %18, %c1_i32, %c128_i32 : i32
    %20 = vector.broadcast %19 : i32 to vector<2x512xi32>
    %21 = arith.remsi %17, %20 : vector<2x512xi32>
    %c0_i32_13 = arith.constant 0 : i32
    %22 = vector.broadcast %c0_i32_13 : i32 to vector<2x512xi32>
    %23 = arith.cmpi ne, %21, %22 : vector<2x512xi32>
    %c0_i32_14 = arith.constant 0 : i32
    %24 = vector.broadcast %c0_i32_14 : i32 to vector<2x512xi32>
    %25 = arith.cmpi slt, %21, %24 : vector<2x512xi32>
    %c0_i32_15 = arith.constant 0 : i32
    %26 = arith.cmpi slt, %19, %c0_i32_15 : i32
    %27 = vector.broadcast %26 : i1 to vector<2x512xi1>
    %28 = vector.broadcast %27 : vector<2x512xi1> to vector<2x512xi1>
    %29 = arith.xori %25, %28 : vector<2x512xi1>
    %30 = arith.andi %29, %23 : vector<2x512xi1>
    %31 = vector.broadcast %19 : i32 to vector<2x512xi32>
    %32 = arith.addi %21, %31 : vector<2x512xi32>
    %33 = arith.select %30, %32, %21 : vector<2x512xi1>, vector<2x512xi32>
    %c64_i32 = arith.constant 64 : i32
    %34 = vector.broadcast %c64_i32 : i32 to vector<2x512xi32>
    %35 = arith.cmpi slt, %33, %34 : vector<2x512xi32>
    %cst_16 = arith.constant 0.000000e+00 : f32
    %36 = vector.broadcast %cst_16 : f32 to vector<2x128xf32>
    %cst_17 = arith.constant 0.000000e+00 : f32
    %37 = vector.broadcast %cst_17 : f32 to vector<2x128xf32>
    %38 = arith.truncf %36 : vector<2x128xf32> to vector<2x128xbf16>
    %c0_18 = arith.constant 0 : index
    %c0_19 = arith.constant 0 : index
    %39 = vector.load %arg6[%c0_18, %c0_19] : memref<128x512xbf16, #tpu.memory_space<vmem>>, vector<128x512xbf16>
    %cst_20 = arith.constant dense<0.000000e+00> : vector<2x512xf32>
    %40 = tpu.matmul %38, %39, %cst_20 {dimension_numbers = #tpu.dot_dimension_numbers<[1], [0], [0], [1], [0, 0, 1, 1], [], []>} : vector<2x128xbf16>, vector<128x512xbf16>, vector<2x512xf32> -> vector<2x512xf32>
    %c0_21 = arith.constant 0 : index
    %c0_22 = arith.constant 0 : index
    %41 = vector.load %arg12[%c0_21, %c0_22] : memref<64x512xf32, #tpu.memory_space<vmem>>, vector<2x512xf32>
    %c62 = arith.constant 62 : index
    %c0_23 = arith.constant 0 : index
    %42 = vector.load %arg12[%c62, %c0_23] : memref<64x512xf32, #tpu.memory_space<vmem>>, vector<2x512xf32>
    %43 = arith.select %35, %41, %42 : vector<2x512xi1>, vector<2x512xf32>
    %44 = arith.addf %40, %43 : vector<2x512xf32>
    %45 = vector.extract_strided_slice %44 {offsets = [0, 0], sizes = [2, 128], strides = [1, 1]} : vector<2x512xf32> to vector<2x128xf32>
    %cst_24 = arith.constant 5.000000e-01 : f32
    %46 = vector.broadcast %cst_24 : f32 to vector<2x128xf32>
    %47 = arith.mulf %46, %45 : vector<2x128xf32>
    %48 = math.tanh %47 : vector<2x128xf32>
    %cst_25 = arith.constant 5.000000e-01 : f32
    %49 = vector.broadcast %cst_25 : f32 to vector<2x128xf32>
    %50 = arith.mulf %49, %48 : vector<2x128xf32>
    %cst_26 = arith.constant 5.000000e-01 : f32
    %51 = vector.broadcast %cst_26 : f32 to vector<2x128xf32>
    %52 = arith.addf %50, %51 : vector<2x128xf32>
    %53 = vector.extract_strided_slice %44 {offsets = [0, 128], sizes = [2, 128], strides = [1, 1]} : vector<2x512xf32> to vector<2x128xf32>
    %cst_27 = arith.constant 5.000000e-01 : f32
    %54 = vector.broadcast %cst_27 : f32 to vector<2x128xf32>
    %55 = arith.mulf %54, %53 : vector<2x128xf32>
    %56 = math.tanh %55 : vector<2x128xf32>
    %cst_28 = arith.constant 5.000000e-01 : f32
    %57 = vector.broadcast %cst_28 : f32 to vector<2x128xf32>
    %58 = arith.mulf %57, %56 : vector<2x128xf32>
    %cst_29 = arith.constant 5.000000e-01 : f32
    %59 = vector.broadcast %cst_29 : f32 to vector<2x128xf32>
    %60 = arith.addf %58, %59 : vector<2x128xf32>
    %61 = vector.extract_strided_slice %44 {offsets = [0, 256], sizes = [2, 128], strides = [1, 1]} : vector<2x512xf32> to vector<2x128xf32>
    %62 = math.tanh %61 : vector<2x128xf32>
    %63 = vector.extract_strided_slice %44 {offsets = [0, 384], sizes = [2, 128], strides = [1, 1]} : vector<2x512xf32> to vector<2x128xf32>
    %cst_30 = arith.constant 5.000000e-01 : f32
    %64 = vector.broadcast %cst_30 : f32 to vector<2x128xf32>
    %65 = arith.mulf %64, %63 : vector<2x128xf32>
    %66 = math.tanh %65 : vector<2x128xf32>
    %cst_31 = arith.constant 5.000000e-01 : f32
    %67 = vector.broadcast %cst_31 : f32 to vector<2x128xf32>
    %68 = arith.mulf %67, %66 : vector<2x128xf32>
    %cst_32 = arith.constant 5.000000e-01 : f32
    %69 = vector.broadcast %cst_32 : f32 to vector<2x128xf32>
    %70 = arith.addf %68, %69 : vector<2x128xf32>
    %71 = arith.mulf %60, %37 : vector<2x128xf32>
    %72 = arith.mulf %52, %62 : vector<2x128xf32>
    %73 = arith.addf %71, %72 : vector<2x128xf32>
    %74 = math.tanh %73 : vector<2x128xf32>
    %75 = arith.mulf %70, %74 : vector<2x128xf32>
    %76 = vector.extract_strided_slice %75 {offsets = [0, 0], sizes = [1, 64], strides = [1, 1]} : vector<2x128xf32> to vector<1x64xf32>
    %c0_33 = arith.constant 0 : index
    %c0_34 = arith.constant 0 : index
    %77 = vector.load %arg13[%c0_33, %c0_34] : memref<64x128xf32, #tpu.memory_space<vmem>>, vector<1x64xf32>
    tpu.vector_store %arg13[%c0_33, %c0_34], %76 {strides = array<i32>} : memref<64x128xf32, #tpu.memory_space<vmem>>, vector<1x64xf32>,
    %78 = vector.extract_strided_slice %75 {offsets = [0, 64], sizes = [1, 64], strides = [1, 1]} : vector<2x128xf32> to vector<1x64xf32>
    %c31 = arith.constant 31 : index
    %c64 = arith.constant 64 : index
    %79 = vector.load %arg13[%c31, %c64] : memref<64x128xf32, #tpu.memory_space<vmem>>, vector<1x64xf32>
    tpu.vector_store %arg13[%c31, %c64], %78 {strides = array<i32>} : memref<64x128xf32, #tpu.memory_space<vmem>>, vector<1x64xf32>,
    %80 = vector.extract_strided_slice %75 {offsets = [1, 0], sizes = [1, 64], strides = [1, 1]} : vector<2x128xf32> to vector<1x64xf32>
    %c32 = arith.constant 32 : index
    %c0_35 = arith.constant 0 : index
    %81 = vector.load %arg13[%c32, %c0_35] : memref<64x128xf32, #tpu.memory_space<vmem>>, vector<1x64xf32>
    tpu.vector_store %arg13[%c32, %c0_35], %80 {strides = array<i32>} : memref<64x128xf32, #tpu.memory_space<vmem>>, vector<1x64xf32>,
    %82 = vector.extract_strided_slice %75 {offsets = [1, 64], sizes = [1, 64], strides = [1, 1]} : vector<2x128xf32> to vector<1x64xf32>
    %c63 = arith.constant 63 : index
    %c64_36 = arith.constant 64 : index
    %83 = vector.load %arg13[%c63, %c64_36] : memref<64x128xf32, #tpu.memory_space<vmem>>, vector<1x64xf32>
    tpu.vector_store %arg13[%c63, %c64_36], %82 {strides = array<i32>} : memref<64x128xf32, #tpu.memory_space<vmem>>, vector<1x64xf32>,
    %84 = arith.truncf %75 : vector<2x128xf32> to vector<2x128xbf16>
    %c0_37 = arith.constant 0 : index
    %c0_38 = arith.constant 0 : index
    %85 = vector.load %arg6[%c0_37, %c0_38] : memref<128x512xbf16, #tpu.memory_space<vmem>>, vector<128x512xbf16>
    %cst_39 = arith.constant dense<0.000000e+00> : vector<2x512xf32>
    %86 = tpu.matmul %84, %85, %cst_39 {dimension_numbers = #tpu.dot_dimension_numbers<[1], [0], [0], [1], [0, 0, 1, 1], [], []>} : vector<2x128xbf16>, vector<128x512xbf16>, vector<2x512xf32> -> vector<2x512xf32>
    %c2 = arith.constant 2 : index
    %c0_40 = arith.constant 0 : index
    %87 = vector.load %arg12[%c2, %c0_40] : memref<64x512xf32, #tpu.memory_space<vmem>>, vector<2x512xf32>
    %c60 = arith.constant 60 : index
    %c0_41 = arith.constant 0 : index
    %88 = vector.load %arg12[%c60, %c0_41] : memref<64x512xf32, #tpu.memory_space<vmem>>, vector<2x512xf32>
    %89 = arith.select %35, %87, %88 : vector<2x512xi1>, vector<2x512xf32>
    %90 = arith.addf %86, %89 : vector<2x512xf32>
    %91 = vector.extract_strided_slice %90 {offsets = [0, 0], sizes = [2, 128], strides = [1, 1]} : vector<2x512xf32> to vector<2x128xf32>
    %cst_42 = arith.constant 5.000000e-01 : f32
    %92 = vector.broadcast %cst_42 : f32 to vector<2x128xf32>
    %93 = arith.mulf %92, %91 : vector<2x128xf32>
    %94 = math.tanh %93 : vector<2x128xf32>
    %cst_43 = arith.constant 5.000000e-01 : f32
    %95 = vector.broadcast %cst_43 : f32 to vector<2x128xf32>
    %96 = arith.mulf %95, %94 : vector<2x128xf32>
    %cst_44 = arith.constant 5.000000e-01 : f32
    %97 = vector.broadcast %cst_44 : f32 to vector<2x128xf32>
    %98 = arith.addf %96, %97 : vector<2x128xf32>
    %99 = vector.extract_strided_slice %90 {offsets = [0, 128], sizes = [2, 128], strides = [1, 1]} : vector<2x512xf32> to vector<2x128xf32>
    %cst_45 = arith.constant 5.000000e-01 : f32
    %100 = vector.broadcast %cst_45 : f32 to vector<2x128xf32>
    %101 = arith.mulf %100, %99 : vector<2x128xf32>
    %102 = math.tanh %101 : vector<2x128xf32>
    %cst_46 = arith.constant 5.000000e-01 : f32
    %103 = vector.broadcast %cst_46 : f32 to vector<2x128xf32>
    %104 = arith.mulf %103, %102 : vector<2x128xf32>
    %cst_47 = arith.constant 5.000000e-01 : f32
    %105 = vector.broadcast %cst_47 : f32 to vector<2x128xf32>
    %106 = arith.addf %104, %105 : vector<2x128xf32>
    %107 = vector.extract_strided_slice %90 {offsets = [0, 256], sizes = [2, 128], strides = [1, 1]} : vector<2x512xf32> to vector<2x128xf32>
    %108 = math.tanh %107 : vector<2x128xf32>
    %109 = vector.extract_strided_slice %90 {offsets = [0, 384], sizes = [2, 128], strides = [1, 1]} : vector<2x512xf32> to vector<2x128xf32>
    %cst_48 = arith.constant 5.000000e-01 : f32
    %110 = vector.broadcast %cst_48 : f32 to vector<2x128xf32>
    %111 = arith.mulf %110, %109 : vector<2x128xf32>
    %112 = math.tanh %111 : vector<2x128xf32>
    %cst_49 = arith.constant 5.000000e-01 : f32
    %113 = vector.broadcast %cst_49 : f32 to vector<2x128xf32>
    %114 = arith.mulf %113, %112 : vector<2x128xf32>
    %cst_50 = arith.constant 5.000000e-01 : f32
    %115 = vector.broadcast %cst_50 : f32 to vector<2x128xf32>
    %116 = arith.addf %114, %115 : vector<2x128xf32>
    %117 = arith.mulf %106, %73 : vector<2x128xf32>
    %118 = arith.mulf %98, %108 : vector<2x128xf32>
    %119 = arith.addf %117, %118 : vector<2x128xf32>
    %120 = math.tanh %119 : vector<2x128xf32>
    %121 = arith.mulf %116, %120 : vector<2x128xf32>
    %122 = vector.extract_strided_slice %121 {offsets = [0, 0], sizes = [1, 64], strides = [1, 1]} : vector<2x128xf32> to vector<1x64xf32>
    %c1 = arith.constant 1 : index
    %c0_51 = arith.constant 0 : index
    %123 = vector.load %arg13[%c1, %c0_51] : memref<64x128xf32, #tpu.memory_space<vmem>>, vector<1x64xf32>
    tpu.vector_store %arg13[%c1, %c0_51], %122 {strides = array<i32>} : memref<64x128xf32, #tpu.memory_space<vmem>>, vector<1x64xf32>,
    %124 = vector.extract_strided_slice %121 {offsets = [0, 64], sizes = [1, 64], strides = [1, 1]} : vector<2x128xf32> to vector<1x64xf32>
    %c30 = arith.constant 30 : index
    %c64_52 = arith.constant 64 : index
    %125 = vector.load %arg13[%c30, %c64_52] : memref<64x128xf32, #tpu.memory_space<vmem>>, vector<1x64xf32>
    tpu.vector_store %arg13[%c30, %c64_52], %124 {strides = array<i32>} : memref<64x128xf32, #tpu.memory_space<vmem>>, vector<1x64xf32>,
    %126 = vector.extract_strided_slice %121 {offsets = [1, 0], sizes = [1, 64], strides = [1, 1]} : vector<2x128xf32> to vector<1x64xf32>
    %c33 = arith.constant 33 : index
    %c0_53 = arith.constant 0 : index
    %127 = vector.load %arg13[%c33, %c0_53] : memref<64x128xf32, #tpu.memory_space<vmem>>, vector<1x64xf32>
    tpu.vector_store %arg13[%c33, %c0_53], %126 {strides = array<i32>} : memref<64x128xf32, #tpu.memory_space<vmem>>, vector<1x64xf32>,
    %128 = vector.extract_strided_slice %121 {offsets = [1, 64], sizes = [1, 64], strides = [1, 1]} : vector<2x128xf32> to vector<1x64xf32>
    %c62_54 = arith.constant 62 : index
    %c64_55 = arith.constant 64 : index
    %129 = vector.load %arg13[%c62_54, %c64_55] : memref<64x128xf32, #tpu.memory_space<vmem>>, vector<1x64xf32>
    tpu.vector_store %arg13[%c62_54, %c64_55], %128 {strides = array<i32>} : memref<64x128xf32, #tpu.memory_space<vmem>>, vector<1x64xf32>,
    %130 = arith.truncf %121 : vector<2x128xf32> to vector<2x128xbf16>
    %c0_56 = arith.constant 0 : index
    %c0_57 = arith.constant 0 : index
    %131 = vector.load %arg6[%c0_56, %c0_57] : memref<128x512xbf16, #tpu.memory_space<vmem>>, vector<128x512xbf16>
    %cst_58 = arith.constant dense<0.000000e+00> : vector<2x512xf32>
    %132 = tpu.matmul %130, %131, %cst_58 {dimension_numbers = #tpu.dot_dimension_numbers<[1], [0], [0], [1], [0, 0, 1, 1], [], []>} : vector<2x128xbf16>, vector<128x512xbf16>, vector<2x512xf32> -> vector<2x512xf32>
    %c4 = arith.constant 4 : index
    %c0_59 = arith.constant 0 : index
    %133 = vector.load %arg12[%c4, %c0_59] : memref<64x512xf32, #tpu.memory_space<vmem>>, vector<2x512xf32>
    %c58 = arith.constant 58 : index
    %c0_60 = arith.constant 0 : index
    %134 = vector.load %arg12[%c58, %c0_60] : memref<64x512xf32, #tpu.memory_space<vmem>>, vector<2x512xf32>
    %135 = arith.select %35, %133, %134 : vector<2x512xi1>, vector<2x512xf32>
    %136 = arith.addf %132, %135 : vector<2x512xf32>
    %137 = vector.extract_strided_slice %136 {offsets = [0, 0], sizes = [2, 128], strides = [1, 1]} : vector<2x512xf32> to vector<2x128xf32>
    %cst_61 = arith.constant 5.000000e-01 : f32
    %138 = vector.broadcast %cst_61 : f32 to vector<2x128xf32>
    %139 = arith.mulf %138, %137 : vector<2x128xf32>
    %140 = math.tanh %139 : vector<2x128xf32>
    %cst_62 = arith.constant 5.000000e-01 : f32
    %141 = vector.broadcast %cst_62 : f32 to vector<2x128xf32>
    %142 = arith.mulf %141, %140 : vector<2x128xf32>
    %cst_63 = arith.constant 5.000000e-01 : f32
    %143 = vector.broadcast %cst_63 : f32 to vector<2x128xf32>
    %144 = arith.addf %142, %143 : vector<2x128xf32>
    %145 = vector.extract_strided_slice %136 {offsets = [0, 128], sizes = [2, 128], strides = [1, 1]} : vector<2x512xf32> to vector<2x128xf32>
    %cst_64 = arith.constant 5.000000e-01 : f32
    %146 = vector.broadcast %cst_64 : f32 to vector<2x128xf32>
    %147 = arith.mulf %146, %145 : vector<2x128xf32>
    %148 = math.tanh %147 : vector<2x128xf32>
    %cst_65 = arith.constant 5.000000e-01 : f32
    %149 = vector.broadcast %cst_65 : f32 to vector<2x128xf32>
    %150 = arith.mulf %149, %148 : vector<2x128xf32>
    %cst_66 = arith.constant 5.000000e-01 : f32
    %151 = vector.broadcast %cst_66 : f32 to vector<2x128xf32>
    %152 = arith.addf %150, %151 : vector<2x128xf32>
    %153 = vector.extract_strided_slice %136 {offsets = [0, 256], sizes = [2, 128], strides = [1, 1]} : vector<2x512xf32> to vector<2x128xf32>
    %154 = math.tanh %153 : vector<2x128xf32>
    %155 = vector.extract_strided_slice %136 {offsets = [0, 384], sizes = [2, 128], strides = [1, 1]} : vector<2x512xf32> to vector<2x128xf32>
    %cst_67 = arith.constant 5.000000e-01 : f32
    %156 = vector.broadcast %cst_67 : f32 to vector<2x128xf32>
    %157 = arith.mulf %156, %155 : vector<2x128xf32>
    %158 = math.tanh %157 : vector<2x128xf32>
    %cst_68 = arith.constant 5.000000e-01 : f32
    %159 = vector.broadcast %cst_68 : f32 to vector<2x128xf32>
    %160 = arith.mulf %159, %158 : vector<2x128xf32>
    %cst_69 = arith.constant 5.000000e-01 : f32
    %161 = vector.broadcast %cst_69 : f32 to vector<2x128xf32>
    %162 = arith.addf %160, %161 : vector<2x128xf32>
    %163 = arith.mulf %152, %119 : vector<2x128xf32>
    %164 = arith.mulf %144, %154 : vector<2x128xf32>
    %165 = arith.addf %163, %164 : vector<2x128xf32>
    %166 = math.tanh %165 : vector<2x128xf32>
    %167 = arith.mulf %162, %166 : vector<2x128xf32>
    %168 = vector.extract_strided_slice %167 {offsets = [0, 0], sizes = [1, 64], strides = [1, 1]} : vector<2x128xf32> to vector<1x64xf32>
    %c2_70 = arith.constant 2 : index
    %c0_71 = arith.constant 0 : index
    %169 = vector.load %arg13[%c2_70, %c0_71] : memref<64x128xf32, #tpu.memory_space<vmem>>, vector<1x64xf32>
    tpu.vector_store %arg13[%c2_70, %c0_71], %168 {strides = array<i32>} : memref<64x128xf32, #tpu.memory_space<vmem>>, vector<1x64xf32>,
    %170 = vector.extract_strided_slice %167 {offsets = [0, 64], sizes = [1, 64], strides = [1, 1]} : vector<2x128xf32> to vector<1x64xf32>
    %c29 = arith.constant 29 : index
    %c64_72 = arith.constant 64 : index
    %171 = vector.load %arg13[%c29, %c64_72] : memref<64x128xf32, #tpu.memory_space<vmem>>, vector<1x64xf32>
    tpu.vector_store %arg13[%c29, %c64_72], %170 {strides = array<i32>} : memref<64x128xf32, #tpu.memory_space<vmem>>, vector<1x64xf32>,
    %172 = vector.extract_strided_slice %167 {offsets = [1, 0], sizes = [1, 64], strides = [1, 1]} : vector<2x128xf32> to vector<1x64xf32>
    %c34 = arith.constant 34 : index
    %c0_73 = arith.constant 0 : index
    %173 = vector.load %arg13[%c34, %c0_73] : memref<64x128xf32, #tpu.memory_space<vmem>>, vector<1x64xf32>
    tpu.vector_store %arg13[%c34, %c0_73], %172 {strides = array<i32>} : memref<64x128xf32, #tpu.memory_space<vmem>>, vector<1x64xf32>,
    %174 = vector.extract_strided_slice %167 {offsets = [1, 64], sizes = [1, 64], strides = [1, 1]} : vector<2x128xf32> to vector<1x64xf32>
    %c61 = arith.constant 61 : index
    %c64_74 = arith.constant 64 : index
    %175 = vector.load %arg13[%c61, %c64_74] : memref<64x128xf32, #tpu.memory_space<vmem>>, vector<1x64xf32>
    tpu.vector_store %arg13[%c61, %c64_74], %174 {strides = array<i32>} : memref<64x128xf32, #tpu.memory_space<vmem>>, vector<1x64xf32>,
    %176 = arith.truncf %167 : vector<2x128xf32> to vector<2x128xbf16>
    %c0_75 = arith.constant 0 : index
    %c0_76 = arith.constant 0 : index
    %177 = vector.load %arg6[%c0_75, %c0_76] : memref<128x512xbf16, #tpu.memory_space<vmem>>, vector<128x512xbf16>
    %cst_77 = arith.constant dense<0.000000e+00> : vector<2x512xf32>
    %178 = tpu.matmul %176, %177, %cst_77 {dimension_numbers = #tpu.dot_dimension_numbers<[1], [0], [0], [1], [0, 0, 1, 1], [], []>} : vector<2x128xbf16>, vector<128x512xbf16>, vector<2x512xf32> -> vector<2x512xf32>
    %c6 = arith.constant 6 : index
    %c0_78 = arith.constant 0 : index
    %179 = vector.load %arg12[%c6, %c0_78] : memref<64x512xf32, #tpu.memory_space<vmem>>, vector<2x512xf32>
    %c56 = arith.constant 56 : index
    %c0_79 = arith.constant 0 : index
    %180 = vector.load %arg12[%c56, %c0_79] : memref<64x512xf32, #tpu.memory_space<vmem>>, vector<2x512xf32>
    %181 = arith.select %35, %179, %180 : vector<2x512xi1>, vector<2x512xf32>
    %182 = arith.addf %178, %181 : vector<2x512xf32>
    %183 = vector.extract_strided_slice %182 {offsets = [0, 0], sizes = [2, 128], strides = [1, 1]} : vector<2x512xf32> to vector<2x128xf32>
    %cst_80 = arith.constant 5.000000e-01 : f32
    %184 = vector.broadcast %cst_80 : f32 to vector<2x128xf32>
    %185 = arith.mulf %184, %183 : vector<2x128xf32>
    %186 = math.tanh %185 : vector<2x128xf32>
    %cst_81 = arith.constant 5.000000e-01 : f32
    %187 = vector.broadcast %cst_81 : f32 to vector<2x128xf32>
    %188 = arith.mulf %187, %186 : vector<2x128xf32>
    %cst_82 = arith.constant 5.000000e-01 : f32
    %189 = vector.broadcast %cst_82 : f32 to vector<2x128xf32>
    %190 = arith.addf %188, %189 : vector<2x128xf32>
    %191 = vector.extract_strided_slice %182 {offsets = [0, 128], sizes = [2, 128], strides = [1, 1]} : vector<2x512xf32> to vector<2x128xf32>
    %cst_83 = arith.constant 5.000000e-01 : f32
    %192 = vector.broadcast %cst_83 : f32 to vector<2x128xf32>
    %193 = arith.mulf %192, %191 : vector<2x128xf32>
    %194 = math.tanh %193 : vector<2x128xf32>
    %cst_84 = arith.constant 5.000000e-01 : f32
    %195 = vector.broadcast %cst_84 : f32 to vector<2x128xf32>
    %196 = arith.mulf %195, %194 : vector<2x128xf32>
    %cst_85 = arith.constant 5.000000e-01 : f32
    %197 = vector.broadcast %cst_85 : f32 to vector<2x128xf32>
    %198 = arith.addf %196, %197 : vector<2x128xf32>
    %199 = vector.extract_strided_slice %182 {offsets = [0, 256], sizes = [2, 128], strides = [1, 1]} : vector<2x512xf32> to vector<2x128xf32>
    %200 = math.tanh %199 : vector<2x128xf32>
    %201 = vector.extract_strided_slice %182 {offsets = [0, 384], sizes = [2, 128], strides = [1, 1]} : vector<2x512xf32> to vector<2x128xf32>
    %cst_86 = arith.constant 5.000000e-01 : f32
    %202 = vector.broadcast %cst_86 : f32 to vector<2x128xf32>
    %203 = arith.mulf %202, %201 : vector<2x128xf32>
    %204 = math.tanh %203 : vector<2x128xf32>
    %cst_87 = arith.constant 5.000000e-01 : f32
    %205 = vector.broadcast %cst_87 : f32 to vector<2x128xf32>
    %206 = arith.mulf %205, %204 : vector<2x128xf32>
    %cst_88 = arith.constant 5.000000e-01 : f32
    %207 = vector.broadcast %cst_88 : f32 to vector<2x128xf32>
    %208 = arith.addf %206, %207 : vector<2x128xf32>
    %209 = arith.mulf %198, %165 : vector<2x128xf32>
    %210 = arith.mulf %190, %200 : vector<2x128xf32>
    %211 = arith.addf %209, %210 : vector<2x128xf32>
    %212 = math.tanh %211 : vector<2x128xf32>
    %213 = arith.mulf %208, %212 : vector<2x128xf32>
    %214 = vector.extract_strided_slice %213 {offsets = [0, 0], sizes = [1, 64], strides = [1, 1]} : vector<2x128xf32> to vector<1x64xf32>
    %c3 = arith.constant 3 : index
    %c0_89 = arith.constant 0 : index
    %215 = vector.load %arg13[%c3, %c0_89] : memref<64x128xf32, #tpu.memory_space<vmem>>, vector<1x64xf32>
    tpu.vector_store %arg13[%c3, %c0_89], %214 {strides = array<i32>} : memref<64x128xf32, #tpu.memory_space<vmem>>, vector<1x64xf32>,
    %216 = vector.extract_strided_slice %213 {offsets = [0, 64], sizes = [1, 64], strides = [1, 1]} : vector<2x128xf32> to vector<1x64xf32>
    %c28 = arith.constant 28 : index
    %c64_90 = arith.constant 64 : index
    %217 = vector.load %arg13[%c28, %c64_90] : memref<64x128xf32, #tpu.memory_space<vmem>>, vector<1x64xf32>
    tpu.vector_store %arg13[%c28, %c64_90], %216 {strides = array<i32>} : memref<64x128xf32, #tpu.memory_space<vmem>>, vector<1x64xf32>,
    %218 = vector.extract_strided_slice %213 {offsets = [1, 0], sizes = [1, 64], strides = [1, 1]} : vector<2x128xf32> to vector<1x64xf32>
    %c35 = arith.constant 35 : index
    %c0_91 = arith.constant 0 : index
    %219 = vector.load %arg13[%c35, %c0_91] : memref<64x128xf32, #tpu.memory_space<vmem>>, vector<1x64xf32>
    tpu.vector_store %arg13[%c35, %c0_91], %218 {strides = array<i32>} : memref<64x128xf32, #tpu.memory_space<vmem>>, vector<1x64xf32>,
    %220 = vector.extract_strided_slice %213 {offsets = [1, 64], sizes = [1, 64], strides = [1, 1]} : vector<2x128xf32> to vector<1x64xf32>
    %c60_92 = arith.constant 60 : index
    %c64_93 = arith.constant 64 : index
    %221 = vector.load %arg13[%c60_92, %c64_93] : memref<64x128xf32, #tpu.memory_space<vmem>>, vector<1x64xf32>
    tpu.vector_store %arg13[%c60_92, %c64_93], %220 {strides = array<i32>} : memref<64x128xf32, #tpu.memory_space<vmem>>, vector<1x64xf32>,
    %222 = arith.truncf %213 : vector<2x128xf32> to vector<2x128xbf16>
    %c0_94 = arith.constant 0 : index
    %c0_95 = arith.constant 0 : index
    %223 = vector.load %arg6[%c0_94, %c0_95] : memref<128x512xbf16, #tpu.memory_space<vmem>>, vector<128x512xbf16>
    %cst_96 = arith.constant dense<0.000000e+00> : vector<2x512xf32>
    %224 = tpu.matmul %222, %223, %cst_96 {dimension_numbers = #tpu.dot_dimension_numbers<[1], [0], [0], [1], [0, 0, 1, 1], [], []>} : vector<2x128xbf16>, vector<128x512xbf16>, vector<2x512xf32> -> vector<2x512xf32>
    %c8 = arith.constant 8 : index
    %c0_97 = arith.constant 0 : index
    %225 = vector.load %arg12[%c8, %c0_97] : memref<64x512xf32, #tpu.memory_space<vmem>>, vector<2x512xf32>
    %c54 = arith.constant 54 : index
    %c0_98 = arith.constant 0 : index
    %226 = vector.load %arg12[%c54, %c0_98] : memref<64x512xf32, #tpu.memory_space<vmem>>, vector<2x512xf32>
    %227 = arith.select %35, %225, %226 : vector<2x512xi1>, vector<2x512xf32>
    %228 = arith.addf %224, %227 : vector<2x512xf32>
    %229 = vector.extract_strided_slice %228 {offsets = [0, 0], sizes = [2, 128], strides = [1, 1]} : vector<2x512xf32> to vector<2x128xf32>
    %cst_99 = arith.constant 5.000000e-01 : f32
    %230 = vector.broadcast %cst_99 : f32 to vector<2x128xf32>
    %231 = arith.mulf %230, %229 : vector<2x128xf32>
    %232 = math.tanh %231 : vector<2x128xf32>
    %cst_100 = arith.constant 5.000000e-01 : f32
    %233 = vector.broadcast %cst_100 : f32 to vector<2x128xf32>
    %234 = arith.mulf %233, %232 : vector<2x128xf32>
    %cst_101 = arith.constant 5.000000e-01 : f32
    %235 = vector.broadcast %cst_101 : f32 to vector<2x128xf32>
    %236 = arith.addf %234, %235 : vector<2x128xf32>
    %237 = vector.extract_strided_slice %228 {offsets = [0, 128], sizes = [2, 128], strides = [1, 1]} : vector<2x512xf32> to vector<2x128xf32>
    %cst_102 = arith.constant 5.000000e-01 : f32
    %238 = vector.broadcast %cst_102 : f32 to vector<2x128xf32>
    %239 = arith.mulf %238, %237 : vector<2x128xf32>
    %240 = math.tanh %239 : vector<2x128xf32>
    %cst_103 = arith.constant 5.000000e-01 : f32
    %241 = vector.broadcast %cst_103 : f32 to vector<2x128xf32>
    %242 = arith.mulf %241, %240 : vector<2x128xf32>
    %cst_104 = arith.constant 5.000000e-01 : f32
    %243 = vector.broadcast %cst_104 : f32 to vector<2x128xf32>
    %244 = arith.addf %242, %243 : vector<2x128xf32>
    %245 = vector.extract_strided_slice %228 {offsets = [0, 256], sizes = [2, 128], strides = [1, 1]} : vector<2x512xf32> to vector<2x128xf32>
    %246 = math.tanh %245 : vector<2x128xf32>
    %247 = vector.extract_strided_slice %228 {offsets = [0, 384], sizes = [2, 128], strides = [1, 1]} : vector<2x512xf32> to vector<2x128xf32>
    %cst_105 = arith.constant 5.000000e-01 : f32
    %248 = vector.broadcast %cst_105 : f32 to vector<2x128xf32>
    %249 = arith.mulf %248, %247 : vector<2x128xf32>
    %250 = math.tanh %249 : vector<2x128xf32>
    %cst_106 = arith.constant 5.000000e-01 : f32
    %251 = vector.broadcast %cst_106 : f32 to vector<2x128xf32>
    %252 = arith.mulf %251, %250 : vector<2x128xf32>
    %cst_107 = arith.constant 5.000000e-01 : f32
    %253 = vector.broadcast %cst_107 : f32 to vector<2x128xf32>
    %254 = arith.addf %252, %253 : vector<2x128xf32>
    %255 = arith.mulf %244, %211 : vector<2x128xf32>
    %256 = arith.mulf %236, %246 : vector<2x128xf32>
    %257 = arith.addf %255, %256 : vector<2x128xf32>
    %258 = math.tanh %257 : vector<2x128xf32>
    %259 = arith.mulf %254, %258 : vector<2x128xf32>
    %260 = vector.extract_strided_slice %259 {offsets = [0, 0], sizes = [1, 64], strides = [1, 1]} : vector<2x128xf32> to vector<1x64xf32>
    %c4_108 = arith.constant 4 : index
    %c0_109 = arith.constant 0 : index
    %261 = vector.load %arg13[%c4_108, %c0_109] : memref<64x128xf32, #tpu.memory_space<vmem>>, vector<1x64xf32>
    tpu.vector_store %arg13[%c4_108, %c0_109], %260 {strides = array<i32>} : memref<64x128xf32, #tpu.memory_space<vmem>>, vector<1x64xf32>,
    %262 = vector.extract_strided_slice %259 {offsets = [0, 64], sizes = [1, 64], strides = [1, 1]} : vector<2x128xf32> to vector<1x64xf32>
    %c27 = arith.constant 27 : index
    %c64_110 = arith.constant 64 : index
    %263 = vector.load %arg13[%c27, %c64_110] : memref<64x128xf32, #tpu.memory_space<vmem>>, vector<1x64xf32>
    tpu.vector_store %arg13[%c27, %c64_110], %262 {strides = array<i32>} : memref<64x128xf32, #tpu.memory_space<vmem>>, vector<1x64xf32>,
    %264 = vector.extract_strided_slice %259 {offsets = [1, 0], sizes = [1, 64], strides = [1, 1]} : vector<2x128xf32> to vector<1x64xf32>
    %c36 = arith.constant 36 : index
    %c0_111 = arith.constant 0 : index
    %265 = vector.load %arg13[%c36, %c0_111] : memref<64x128xf32, #tpu.memory_space<vmem>>, vector<1x64xf32>
    tpu.vector_store %arg13[%c36, %c0_111], %264 {strides = array<i32>} : memref<64x128xf32, #tpu.memory_space<vmem>>, vector<1x64xf32>,
    %266 = vector.extract_strided_slice %259 {offsets = [1, 64], sizes = [1, 64], strides = [1, 1]} : vector<2x128xf32> to vector<1x64xf32>
    %c59 = arith.constant 59 : index
    %c64_112 = arith.constant 64 : index
    %267 = vector.load %arg13[%c59, %c64_112] : memref<64x128xf32, #tpu.memory_space<vmem>>, vector<1x64xf32>
    tpu.vector_store %arg13[%c59, %c64_112], %266 {strides = array<i32>} : memref<64x128xf32, #tpu.memory_space<vmem>>, vector<1x64xf32>,
    %268 = arith.truncf %259 : vector<2x128xf32> to vector<2x128xbf16>
    %c0_113 = arith.constant 0 : index
    %c0_114 = arith.constant 0 : index
    %269 = vector.load %arg6[%c0_113, %c0_114] : memref<128x512xbf16, #tpu.memory_space<vmem>>, vector<128x512xbf16>
    %cst_115 = arith.constant dense<0.000000e+00> : vector<2x512xf32>
    %270 = tpu.matmul %268, %269, %cst_115 {dimension_numbers = #tpu.dot_dimension_numbers<[1], [0], [0], [1], [0, 0, 1, 1], [], []>} : vector<2x128xbf16>, vector<128x512xbf16>, vector<2x512xf32> -> vector<2x512xf32>
    %c10 = arith.constant 10 : index
    %c0_116 = arith.constant 0 : index
    %271 = vector.load %arg12[%c10, %c0_116] : memref<64x512xf32, #tpu.memory_space<vmem>>, vector<2x512xf32>
    %c52 = arith.constant 52 : index
    %c0_117 = arith.constant 0 : index
    %272 = vector.load %arg12[%c52, %c0_117] : memref<64x512xf32, #tpu.memory_space<vmem>>, vector<2x512xf32>
    %273 = arith.select %35, %271, %272 : vector<2x512xi1>, vector<2x512xf32>
    %274 = arith.addf %270, %273 : vector<2x512xf32>
    %275 = vector.extract_strided_slice %274 {offsets = [0, 0], sizes = [2, 128], strides = [1, 1]} : vector<2x512xf32> to vector<2x128xf32>
    %cst_118 = arith.constant 5.000000e-01 : f32
    %276 = vector.broadcast %cst_118 : f32 to vector<2x128xf32>
    %277 = arith.mulf %276, %275 : vector<2x128xf32>
    %278 = math.tanh %277 : vector<2x128xf32>
    %cst_119 = arith.constant 5.000000e-01 : f32
    %279 = vector.broadcast %cst_119 : f32 to vector<2x128xf32>
    %280 = arith.mulf %279, %278 : vector<2x128xf32>
    %cst_120 = arith.constant 5.000000e-01 : f32
    %281 = vector.broadcast %cst_120 : f32 to vector<2x128xf32>
    %282 = arith.addf %280, %281 : vector<2x128xf32>
    %283 = vector.extract_strided_slice %274 {offsets = [0, 128], sizes = [2, 128], strides = [1, 1]} : vector<2x512xf32> to vector<2x128xf32>
    %cst_121 = arith.constant 5.000000e-01 : f32
    %284 = vector.broadcast %cst_121 : f32 to vector<2x128xf32>
    %285 = arith.mulf %284, %283 : vector<2x128xf32>
    %286 = math.tanh %285 : vector<2x128xf32>
    %cst_122 = arith.constant 5.000000e-01 : f32
    %287 = vector.broadcast %cst_122 : f32 to vector<2x128xf32>
    %288 = arith.mulf %287, %286 : vector<2x128xf32>
    %cst_123 = arith.constant 5.000000e-01 : f32
    %289 = vector.broadcast %cst_123 : f32 to vector<2x128xf32>
    %290 = arith.addf %288, %289 : vector<2x128xf32>
    %291 = vector.extract_strided_slice %274 {offsets = [0, 256], sizes = [2, 128], strides = [1, 1]} : vector<2x512xf32> to vector<2x128xf32>
    %292 = math.tanh %291 : vector<2x128xf32>
    %293 = vector.extract_strided_slice %274 {offsets = [0, 384], sizes = [2, 128], strides = [1, 1]} : vector<2x512xf32> to vector<2x128xf32>
    %cst_124 = arith.constant 5.000000e-01 : f32
    %294 = vector.broadcast %cst_124 : f32 to vector<2x128xf32>
    %295 = arith.mulf %294, %293 : vector<2x128xf32>
    %296 = math.tanh %295 : vector<2x128xf32>
    %cst_125 = arith.constant 5.000000e-01 : f32
    %297 = vector.broadcast %cst_125 : f32 to vector<2x128xf32>
    %298 = arith.mulf %297, %296 : vector<2x128xf32>
    %cst_126 = arith.constant 5.000000e-01 : f32
    %299 = vector.broadcast %cst_126 : f32 to vector<2x128xf32>
    %300 = arith.addf %298, %299 : vector<2x128xf32>
    %301 = arith.mulf %290, %257 : vector<2x128xf32>
    %302 = arith.mulf %282, %292 : vector<2x128xf32>
    %303 = arith.addf %301, %302 : vector<2x128xf32>
    %304 = math.tanh %303 : vector<2x128xf32>
    %305 = arith.mulf %300, %304 : vector<2x128xf32>
    %306 = vector.extract_strided_slice %305 {offsets = [0, 0], sizes = [1, 64], strides = [1, 1]} : vector<2x128xf32> to vector<1x64xf32>
    %c5 = arith.constant 5 : index
    %c0_127 = arith.constant 0 : index
    %307 = vector.load %arg13[%c5, %c0_127] : memref<64x128xf32, #tpu.memory_space<vmem>>, vector<1x64xf32>
    tpu.vector_store %arg13[%c5, %c0_127], %306 {strides = array<i32>} : memref<64x128xf32, #tpu.memory_space<vmem>>, vector<1x64xf32>,
    %308 = vector.extract_strided_slice %305 {offsets = [0, 64], sizes = [1, 64], strides = [1, 1]} : vector<2x128xf32> to vector<1x64xf32>
    %c26 = arith.constant 26 : index
    %c64_128 = arith.constant 64 : index
    %309 = vector.load %arg13[%c26, %c64_128] : memref<64x128xf32, #tpu.memory_space<vmem>>, vector<1x64xf32>
    tpu.vector_store %arg13[%c26, %c64_128], %308 {strides = array<i32>} : memref<64x128xf32, #tpu.memory_space<vmem>>, vector<1x64xf32>,
    %310 = vector.extract_strided_slice %305 {offsets = [1, 0], sizes = [1, 64], strides = [1, 1]} : vector<2x128xf32> to vector<1x64xf32>
    %c37 = arith.constant 37 : index
    %c0_129 = arith.constant 0 : index
    %311 = vector.load %arg13[%c37, %c0_129] : memref<64x128xf32, #tpu.memory_space<vmem>>, vector<1x64xf32>
    tpu.vector_store %arg13[%c37, %c0_129], %310 {strides = array<i32>} : memref<64x128xf32, #tpu.memory_space<vmem>>, vector<1x64xf32>,
    %312 = vector.extract_strided_slice %305 {offsets = [1, 64], sizes = [1, 64], strides = [1, 1]} : vector<2x128xf32> to vector<1x64xf32>
    %c58_130 = arith.constant 58 : index
    %c64_131 = arith.constant 64 : index
    %313 = vector.load %arg13[%c58_130, %c64_131] : memref<64x128xf32, #tpu.memory_space<vmem>>, vector<1x64xf32>
    tpu.vector_store %arg13[%c58_130, %c64_131], %312 {strides = array<i32>} : memref<64x128xf32, #tpu.memory_space<vmem>>, vector<1x64xf32>,
    %314 = arith.truncf %305 : vector<2x128xf32> to vector<2x128xbf16>
    %c0_132 = arith.constant 0 : index
    %c0_133 = arith.constant 0 : index
    %315 = vector.load %arg6[%c0_132, %c0_133] : memref<128x512xbf16, #tpu.memory_space<vmem>>, vector<128x512xbf16>
    %cst_134 = arith.constant dense<0.000000e+00> : vector<2x512xf32>
    %316 = tpu.matmul %314, %315, %cst_134 {dimension_numbers = #tpu.dot_dimension_numbers<[1], [0], [0], [1], [0, 0, 1, 1], [], []>} : vector<2x128xbf16>, vector<128x512xbf16>, vector<2x512xf32> -> vector<2x512xf32>
    %c12 = arith.constant 12 : index
    %c0_135 = arith.constant 0 : index
    %317 = vector.load %arg12[%c12, %c0_135] : memref<64x512xf32, #tpu.memory_space<vmem>>, vector<2x512xf32>
    %c50 = arith.constant 50 : index
    %c0_136 = arith.constant 0 : index
    %318 = vector.load %arg12[%c50, %c0_136] : memref<64x512xf32, #tpu.memory_space<vmem>>, vector<2x512xf32>
    %319 = arith.select %35, %317, %318 : vector<2x512xi1>, vector<2x512xf32>
    %320 = arith.addf %316, %319 : vector<2x512xf32>
    %321 = vector.extract_strided_slice %320 {offsets = [0, 0], sizes = [2, 128], strides = [1, 1]} : vector<2x512xf32> to vector<2x128xf32>
    %cst_137 = arith.constant 5.000000e-01 : f32
    %322 = vector.broadcast %cst_137 : f32 to vector<2x128xf32>
    %323 = arith.mulf %322, %321 : vector<2x128xf32>
    %324 = math.tanh %323 : vector<2x128xf32>
    %cst_138 = arith.constant 5.000000e-01 : f32
    %325 = vector.broadcast %cst_138 : f32 to vector<2x128xf32>
    %326 = arith.mulf %325, %324 : vector<2x128xf32>
    %cst_139 = arith.constant 5.000000e-01 : f32
    %327 = vector.broadcast %cst_139 : f32 to vector<2x128xf32>
    %328 = arith.addf %326, %327 : vector<2x128xf32>
    %329 = vector.extract_strided_slice %320 {offsets = [0, 128], sizes = [2, 128], strides = [1, 1]} : vector<2x512xf32> to vector<2x128xf32>
    %cst_140 = arith.constant 5.000000e-01 : f32
    %330 = vector.broadcast %cst_140 : f32 to vector<2x128xf32>
    %331 = arith.mulf %330, %329 : vector<2x128xf32>
    %332 = math.tanh %331 : vector<2x128xf32>
    %cst_141 = arith.constant 5.000000e-01 : f32
    %333 = vector.broadcast %cst_141 : f32 to vector<2x128xf32>
    %334 = arith.mulf %333, %332 : vector<2x128xf32>
    %cst_142 = arith.constant 5.000000e-01 : f32
    %335 = vector.broadcast %cst_142 : f32 to vector<2x128xf32>
    %336 = arith.addf %334, %335 : vector<2x128xf32>
    %337 = vector.extract_strided_slice %320 {offsets = [0, 256], sizes = [2, 128], strides = [1, 1]} : vector<2x512xf32> to vector<2x128xf32>
    %338 = math.tanh %337 : vector<2x128xf32>
    %339 = vector.extract_strided_slice %320 {offsets = [0, 384], sizes = [2, 128], strides = [1, 1]} : vector<2x512xf32> to vector<2x128xf32>
    %cst_143 = arith.constant 5.000000e-01 : f32
    %340 = vector.broadcast %cst_143 : f32 to vector<2x128xf32>
    %341 = arith.mulf %340, %339 : vector<2x128xf32>
    %342 = math.tanh %341 : vector<2x128xf32>
    %cst_144 = arith.constant 5.000000e-01 : f32
    %343 = vector.broadcast %cst_144 : f32 to vector<2x128xf32>
    %344 = arith.mulf %343, %342 : vector<2x128xf32>
    %cst_145 = arith.constant 5.000000e-01 : f32
    %345 = vector.broadcast %cst_145 : f32 to vector<2x128xf32>
    %346 = arith.addf %344, %345 : vector<2x128xf32>
    %347 = arith.mulf %336, %303 : vector<2x128xf32>
    %348 = arith.mulf %328, %338 : vector<2x128xf32>
    %349 = arith.addf %347, %348 : vector<2x128xf32>
    %350 = math.tanh %349 : vector<2x128xf32>
    %351 = arith.mulf %346, %350 : vector<2x128xf32>
    %352 = vector.extract_strided_slice %351 {offsets = [0, 0], sizes = [1, 64], strides = [1, 1]} : vector<2x128xf32> to vector<1x64xf32>
    %c6_146 = arith.constant 6 : index
    %c0_147 = arith.constant 0 : index
    %353 = vector.load %arg13[%c6_146, %c0_147] : memref<64x128xf32, #tpu.memory_space<vmem>>, vector<1x64xf32>
    tpu.vector_store %arg13[%c6_146, %c0_147], %352 {strides = array<i32>} : memref<64x128xf32, #tpu.memory_space<vmem>>, vector<1x64xf32>,
    %354 = vector.extract_strided_slice %351 {offsets = [0, 64], sizes = [1, 64], strides = [1, 1]} : vector<2x128xf32> to vector<1x64xf32>
    %c25 = arith.constant 25 : index
    %c64_148 = arith.constant 64 : index
    %355 = vector.load %arg13[%c25, %c64_148] : memref<64x128xf32, #tpu.memory_space<vmem>>, vector<1x64xf32>
    tpu.vector_store %arg13[%c25, %c64_148], %354 {strides = array<i32>} : memref<64x128xf32, #tpu.memory_space<vmem>>, vector<1x64xf32>,
    %356 = vector.extract_strided_slice %351 {offsets = [1, 0], sizes = [1, 64], strides = [1, 1]} : vector<2x128xf32> to vector<1x64xf32>
    %c38 = arith.constant 38 : index
    %c0_149 = arith.constant 0 : index
    %357 = vector.load %arg13[%c38, %c0_149] : memref<64x128xf32, #tpu.memory_space<vmem>>, vector<1x64xf32>
    tpu.vector_store %arg13[%c38, %c0_149], %356 {strides = array<i32>} : memref<64x128xf32, #tpu.memory_space<vmem>>, vector<1x64xf32>,
    %358 = vector.extract_strided_slice %351 {offsets = [1, 64], sizes = [1, 64], strides = [1, 1]} : vector<2x128xf32> to vector<1x64xf32>
    %c57 = arith.constant 57 : index
    %c64_150 = arith.constant 64 : index
    %359 = vector.load %arg13[%c57, %c64_150] : memref<64x128xf32, #tpu.memory_space<vmem>>, vector<1x64xf32>
    tpu.vector_store %arg13[%c57, %c64_150], %358 {strides = array<i32>} : memref<64x128xf32, #tpu.memory_space<vmem>>, vector<1x64xf32>,
    %360 = arith.truncf %351 : vector<2x128xf32> to vector<2x128xbf16>
    %c0_151 = arith.constant 0 : index
    %c0_152 = arith.constant 0 : index
    %361 = vector.load %arg6[%c0_151, %c0_152] : memref<128x512xbf16, #tpu.memory_space<vmem>>, vector<128x512xbf16>
    %cst_153 = arith.constant dense<0.000000e+00> : vector<2x512xf32>
    %362 = tpu.matmul %360, %361, %cst_153 {dimension_numbers = #tpu.dot_dimension_numbers<[1], [0], [0], [1], [0, 0, 1, 1], [], []>} : vector<2x128xbf16>, vector<128x512xbf16>, vector<2x512xf32> -> vector<2x512xf32>
    %c14 = arith.constant 14 : index
    %c0_154 = arith.constant 0 : index
    %363 = vector.load %arg12[%c14, %c0_154] : memref<64x512xf32, #tpu.memory_space<vmem>>, vector<2x512xf32>
    %c48 = arith.constant 48 : index
    %c0_155 = arith.constant 0 : index
    %364 = vector.load %arg12[%c48, %c0_155] : memref<64x512xf32, #tpu.memory_space<vmem>>, vector<2x512xf32>
    %365 = arith.select %35, %363, %364 : vector<2x512xi1>, vector<2x512xf32>
    %366 = arith.addf %362, %365 : vector<2x512xf32>
    %367 = vector.extract_strided_slice %366 {offsets = [0, 0], sizes = [2, 128], strides = [1, 1]} : vector<2x512xf32> to vector<2x128xf32>
    %cst_156 = arith.constant 5.000000e-01 : f32
    %368 = vector.broadcast %cst_156 : f32 to vector<2x128xf32>
    %369 = arith.mulf %368, %367 : vector<2x128xf32>
    %370 = math.tanh %369 : vector<2x128xf32>
    %cst_157 = arith.constant 5.000000e-01 : f32
    %371 = vector.broadcast %cst_157 : f32 to vector<2x128xf32>
    %372 = arith.mulf %371, %370 : vector<2x128xf32>
    %cst_158 = arith.constant 5.000000e-01 : f32
    %373 = vector.broadcast %cst_158 : f32 to vector<2x128xf32>
    %374 = arith.addf %372, %373 : vector<2x128xf32>
    %375 = vector.extract_strided_slice %366 {offsets = [0, 128], sizes = [2, 128], strides = [1, 1]} : vector<2x512xf32> to vector<2x128xf32>
    %cst_159 = arith.constant 5.000000e-01 : f32
    %376 = vector.broadcast %cst_159 : f32 to vector<2x128xf32>
    %377 = arith.mulf %376, %375 : vector<2x128xf32>
    %378 = math.tanh %377 : vector<2x128xf32>
    %cst_160 = arith.constant 5.000000e-01 : f32
    %379 = vector.broadcast %cst_160 : f32 to vector<2x128xf32>
    %380 = arith.mulf %379, %378 : vector<2x128xf32>
    %cst_161 = arith.constant 5.000000e-01 : f32
    %381 = vector.broadcast %cst_161 : f32 to vector<2x128xf32>
    %382 = arith.addf %380, %381 : vector<2x128xf32>
    %383 = vector.extract_strided_slice %366 {offsets = [0, 256], sizes = [2, 128], strides = [1, 1]} : vector<2x512xf32> to vector<2x128xf32>
    %384 = math.tanh %383 : vector<2x128xf32>
    %385 = vector.extract_strided_slice %366 {offsets = [0, 384], sizes = [2, 128], strides = [1, 1]} : vector<2x512xf32> to vector<2x128xf32>
    %cst_162 = arith.constant 5.000000e-01 : f32
    %386 = vector.broadcast %cst_162 : f32 to vector<2x128xf32>
    %387 = arith.mulf %386, %385 : vector<2x128xf32>
    %388 = math.tanh %387 : vector<2x128xf32>
    %cst_163 = arith.constant 5.000000e-01 : f32
    %389 = vector.broadcast %cst_163 : f32 to vector<2x128xf32>
    %390 = arith.mulf %389, %388 : vector<2x128xf32>
    %cst_164 = arith.constant 5.000000e-01 : f32
    %391 = vector.broadcast %cst_164 : f32 to vector<2x128xf32>
    %392 = arith.addf %390, %391 : vector<2x128xf32>
    %393 = arith.mulf %382, %349 : vector<2x128xf32>
    %394 = arith.mulf %374, %384 : vector<2x128xf32>
    %395 = arith.addf %393, %394 : vector<2x128xf32>
    %396 = math.tanh %395 : vector<2x128xf32>
    %397 = arith.mulf %392, %396 : vector<2x128xf32>
    %398 = vector.extract_strided_slice %397 {offsets = [0, 0], sizes = [1, 64], strides = [1, 1]} : vector<2x128xf32> to vector<1x64xf32>
    %c7 = arith.constant 7 : index
    %c0_165 = arith.constant 0 : index
    %399 = vector.load %arg13[%c7, %c0_165] : memref<64x128xf32, #tpu.memory_space<vmem>>, vector<1x64xf32>
    tpu.vector_store %arg13[%c7, %c0_165], %398 {strides = array<i32>} : memref<64x128xf32, #tpu.memory_space<vmem>>, vector<1x64xf32>,
    %400 = vector.extract_strided_slice %397 {offsets = [0, 64], sizes = [1, 64], strides = [1, 1]} : vector<2x128xf32> to vector<1x64xf32>
    %c24 = arith.constant 24 : index
    %c64_166 = arith.constant 64 : index
    %401 = vector.load %arg13[%c24, %c64_166] : memref<64x128xf32, #tpu.memory_space<vmem>>, vector<1x64xf32>
    tpu.vector_store %arg13[%c24, %c64_166], %400 {strides = array<i32>} : memref<64x128xf32, #tpu.memory_space<vmem>>, vector<1x64xf32>,
    %402 = vector.extract_strided_slice %397 {offsets = [1, 0], sizes = [1, 64], strides = [1, 1]} : vector<2x128xf32> to vector<1x64xf32>
    %c39 = arith.constant 39 : index
    %c0_167 = arith.constant 0 : index
    %403 = vector.load %arg13[%c39, %c0_167] : memref<64x128xf32, #tpu.memory_space<vmem>>, vector<1x64xf32>
    tpu.vector_store %arg13[%c39, %c0_167], %402 {strides = array<i32>} : memref<64x128xf32, #tpu.memory_space<vmem>>, vector<1x64xf32>,
    %404 = vector.extract_strided_slice %397 {offsets = [1, 64], sizes = [1, 64], strides = [1, 1]} : vector<2x128xf32> to vector<1x64xf32>
    %c56_168 = arith.constant 56 : index
    %c64_169 = arith.constant 64 : index
    %405 = vector.load %arg13[%c56_168, %c64_169] : memref<64x128xf32, #tpu.memory_space<vmem>>, vector<1x64xf32>
    tpu.vector_store %arg13[%c56_168, %c64_169], %404 {strides = array<i32>} : memref<64x128xf32, #tpu.memory_space<vmem>>, vector<1x64xf32>,
    %406 = arith.truncf %397 : vector<2x128xf32> to vector<2x128xbf16>
    %c0_170 = arith.constant 0 : index
    %c0_171 = arith.constant 0 : index
    %407 = vector.load %arg6[%c0_170, %c0_171] : memref<128x512xbf16, #tpu.memory_space<vmem>>, vector<128x512xbf16>
    %cst_172 = arith.constant dense<0.000000e+00> : vector<2x512xf32>
    %408 = tpu.matmul %406, %407, %cst_172 {dimension_numbers = #tpu.dot_dimension_numbers<[1], [0], [0], [1], [0, 0, 1, 1], [], []>} : vector<2x128xbf16>, vector<128x512xbf16>, vector<2x512xf32> -> vector<2x512xf32>
    %c16 = arith.constant 16 : index
    %c0_173 = arith.constant 0 : index
    %409 = vector.load %arg12[%c16, %c0_173] : memref<64x512xf32, #tpu.memory_space<vmem>>, vector<2x512xf32>
    %c46 = arith.constant 46 : index
    %c0_174 = arith.constant 0 : index
    %410 = vector.load %arg12[%c46, %c0_174] : memref<64x512xf32, #tpu.memory_space<vmem>>, vector<2x512xf32>
    %411 = arith.select %35, %409, %410 : vector<2x512xi1>, vector<2x512xf32>
    %412 = arith.addf %408, %411 : vector<2x512xf32>
    %413 = vector.extract_strided_slice %412 {offsets = [0, 0], sizes = [2, 128], strides = [1, 1]} : vector<2x512xf32> to vector<2x128xf32>
    %cst_175 = arith.constant 5.000000e-01 : f32
    %414 = vector.broadcast %cst_175 : f32 to vector<2x128xf32>
    %415 = arith.mulf %414, %413 : vector<2x128xf32>
    %416 = math.tanh %415 : vector<2x128xf32>
    %cst_176 = arith.constant 5.000000e-01 : f32
    %417 = vector.broadcast %cst_176 : f32 to vector<2x128xf32>
    %418 = arith.mulf %417, %416 : vector<2x128xf32>
    %cst_177 = arith.constant 5.000000e-01 : f32
    %419 = vector.broadcast %cst_177 : f32 to vector<2x128xf32>
    %420 = arith.addf %418, %419 : vector<2x128xf32>
    %421 = vector.extract_strided_slice %412 {offsets = [0, 128], sizes = [2, 128], strides = [1, 1]} : vector<2x512xf32> to vector<2x128xf32>
    %cst_178 = arith.constant 5.000000e-01 : f32
    %422 = vector.broadcast %cst_178 : f32 to vector<2x128xf32>
    %423 = arith.mulf %422, %421 : vector<2x128xf32>
    %424 = math.tanh %423 : vector<2x128xf32>
    %cst_179 = arith.constant 5.000000e-01 : f32
    %425 = vector.broadcast %cst_179 : f32 to vector<2x128xf32>
    %426 = arith.mulf %425, %424 : vector<2x128xf32>
    %cst_180 = arith.constant 5.000000e-01 : f32
    %427 = vector.broadcast %cst_180 : f32 to vector<2x128xf32>
    %428 = arith.addf %426, %427 : vector<2x128xf32>
    %429 = vector.extract_strided_slice %412 {offsets = [0, 256], sizes = [2, 128], strides = [1, 1]} : vector<2x512xf32> to vector<2x128xf32>
    %430 = math.tanh %429 : vector<2x128xf32>
    %431 = vector.extract_strided_slice %412 {offsets = [0, 384], sizes = [2, 128], strides = [1, 1]} : vector<2x512xf32> to vector<2x128xf32>
    %cst_181 = arith.constant 5.000000e-01 : f32
    %432 = vector.broadcast %cst_181 : f32 to vector<2x128xf32>
    %433 = arith.mulf %432, %431 : vector<2x128xf32>
    %434 = math.tanh %433 : vector<2x128xf32>
    %cst_182 = arith.constant 5.000000e-01 : f32
    %435 = vector.broadcast %cst_182 : f32 to vector<2x128xf32>
    %436 = arith.mulf %435, %434 : vector<2x128xf32>
    %cst_183 = arith.constant 5.000000e-01 : f32
    %437 = vector.broadcast %cst_183 : f32 to vector<2x128xf32>
    %438 = arith.addf %436, %437 : vector<2x128xf32>
    %439 = arith.mulf %428, %395 : vector<2x128xf32>
    %440 = arith.mulf %420, %430 : vector<2x128xf32>
    %441 = arith.addf %439, %440 : vector<2x128xf32>
    %442 = math.tanh %441 : vector<2x128xf32>
    %443 = arith.mulf %438, %442 : vector<2x128xf32>
    %444 = vector.extract_strided_slice %443 {offsets = [0, 0], sizes = [1, 64], strides = [1, 1]} : vector<2x128xf32> to vector<1x64xf32>
    %c8_184 = arith.constant 8 : index
    %c0_185 = arith.constant 0 : index
    %445 = vector.load %arg13[%c8_184, %c0_185] : memref<64x128xf32, #tpu.memory_space<vmem>>, vector<1x64xf32>
    tpu.vector_store %arg13[%c8_184, %c0_185], %444 {strides = array<i32>} : memref<64x128xf32, #tpu.memory_space<vmem>>, vector<1x64xf32>,
    %446 = vector.extract_strided_slice %443 {offsets = [0, 64], sizes = [1, 64], strides = [1, 1]} : vector<2x128xf32> to vector<1x64xf32>
    %c23 = arith.constant 23 : index
    %c64_186 = arith.constant 64 : index
    %447 = vector.load %arg13[%c23, %c64_186] : memref<64x128xf32, #tpu.memory_space<vmem>>, vector<1x64xf32>
    tpu.vector_store %arg13[%c23, %c64_186], %446 {strides = array<i32>} : memref<64x128xf32, #tpu.memory_space<vmem>>, vector<1x64xf32>,
    %448 = vector.extract_strided_slice %443 {offsets = [1, 0], sizes = [1, 64], strides = [1, 1]} : vector<2x128xf32> to vector<1x64xf32>
    %c40 = arith.constant 40 : index
    %c0_187 = arith.constant 0 : index
    %449 = vector.load %arg13[%c40, %c0_187] : memref<64x128xf32, #tpu.memory_space<vmem>>, vector<1x64xf32>
    tpu.vector_store %arg13[%c40, %c0_187], %448 {strides = array<i32>} : memref<64x128xf32, #tpu.memory_space<vmem>>, vector<1x64xf32>,
    %450 = vector.extract_strided_slice %443 {offsets = [1, 64], sizes = [1, 64], strides = [1, 1]} : vector<2x128xf32> to vector<1x64xf32>
    %c55 = arith.constant 55 : index
    %c64_188 = arith.constant 64 : index
    %451 = vector.load %arg13[%c55, %c64_188] : memref<64x128xf32, #tpu.memory_space<vmem>>, vector<1x64xf32>
    tpu.vector_store %arg13[%c55, %c64_188], %450 {strides = array<i32>} : memref<64x128xf32, #tpu.memory_space<vmem>>, vector<1x64xf32>,
    %452 = arith.truncf %443 : vector<2x128xf32> to vector<2x128xbf16>
    %c0_189 = arith.constant 0 : index
    %c0_190 = arith.constant 0 : index
    %453 = vector.load %arg6[%c0_189, %c0_190] : memref<128x512xbf16, #tpu.memory_space<vmem>>, vector<128x512xbf16>
    %cst_191 = arith.constant dense<0.000000e+00> : vector<2x512xf32>
    %454 = tpu.matmul %452, %453, %cst_191 {dimension_numbers = #tpu.dot_dimension_numbers<[1], [0], [0], [1], [0, 0, 1, 1], [], []>} : vector<2x128xbf16>, vector<128x512xbf16>, vector<2x512xf32> -> vector<2x512xf32>
    %c18 = arith.constant 18 : index
    %c0_192 = arith.constant 0 : index
    %455 = vector.load %arg12[%c18, %c0_192] : memref<64x512xf32, #tpu.memory_space<vmem>>, vector<2x512xf32>
    %c44 = arith.constant 44 : index
    %c0_193 = arith.constant 0 : index
    %456 = vector.load %arg12[%c44, %c0_193] : memref<64x512xf32, #tpu.memory_space<vmem>>, vector<2x512xf32>
    %457 = arith.select %35, %455, %456 : vector<2x512xi1>, vector<2x512xf32>
    %458 = arith.addf %454, %457 : vector<2x512xf32>
    %459 = vector.extract_strided_slice %458 {offsets = [0, 0], sizes = [2, 128], strides = [1, 1]} : vector<2x512xf32> to vector<2x128xf32>
    %cst_194 = arith.constant 5.000000e-01 : f32
    %460 = vector.broadcast %cst_194 : f32 to vector<2x128xf32>
    %461 = arith.mulf %460, %459 : vector<2x128xf32>
    %462 = math.tanh %461 : vector<2x128xf32>
    %cst_195 = arith.constant 5.000000e-01 : f32
    %463 = vector.broadcast %cst_195 : f32 to vector<2x128xf32>
    %464 = arith.mulf %463, %462 : vector<2x128xf32>
    %cst_196 = arith.constant 5.000000e-01 : f32
    %465 = vector.broadcast %cst_196 : f32 to vector<2x128xf32>
    %466 = arith.addf %464, %465 : vector<2x128xf32>
    %467 = vector.extract_strided_slice %458 {offsets = [0, 128], sizes = [2, 128], strides = [1, 1]} : vector<2x512xf32> to vector<2x128xf32>
    %cst_197 = arith.constant 5.000000e-01 : f32
    %468 = vector.broadcast %cst_197 : f32 to vector<2x128xf32>
    %469 = arith.mulf %468, %467 : vector<2x128xf32>
    %470 = math.tanh %469 : vector<2x128xf32>
    %cst_198 = arith.constant 5.000000e-01 : f32
    %471 = vector.broadcast %cst_198 : f32 to vector<2x128xf32>
    %472 = arith.mulf %471, %470 : vector<2x128xf32>
    %cst_199 = arith.constant 5.000000e-01 : f32
    %473 = vector.broadcast %cst_199 : f32 to vector<2x128xf32>
    %474 = arith.addf %472, %473 : vector<2x128xf32>
    %475 = vector.extract_strided_slice %458 {offsets = [0, 256], sizes = [2, 128], strides = [1, 1]} : vector<2x512xf32> to vector<2x128xf32>
    %476 = math.tanh %475 : vector<2x128xf32>
    %477 = vector.extract_strided_slice %458 {offsets = [0, 384], sizes = [2, 128], strides = [1, 1]} : vector<2x512xf32> to vector<2x128xf32>
    %cst_200 = arith.constant 5.000000e-01 : f32
    %478 = vector.broadcast %cst_200 : f32 to vector<2x128xf32>
    %479 = arith.mulf %478, %477 : vector<2x128xf32>
    %480 = math.tanh %479 : vector<2x128xf32>
    %cst_201 = arith.constant 5.000000e-01 : f32
    %481 = vector.broadcast %cst_201 : f32 to vector<2x128xf32>
    %482 = arith.mulf %481, %480 : vector<2x128xf32>
    %cst_202 = arith.constant 5.000000e-01 : f32
    %483 = vector.broadcast %cst_202 : f32 to vector<2x128xf32>
    %484 = arith.addf %482, %483 : vector<2x128xf32>
    %485 = arith.mulf %474, %441 : vector<2x128xf32>
    %486 = arith.mulf %466, %476 : vector<2x128xf32>
    %487 = arith.addf %485, %486 : vector<2x128xf32>
    %488 = math.tanh %487 : vector<2x128xf32>
    %489 = arith.mulf %484, %488 : vector<2x128xf32>
    %490 = vector.extract_strided_slice %489 {offsets = [0, 0], sizes = [1, 64], strides = [1, 1]} : vector<2x128xf32> to vector<1x64xf32>
    %c9 = arith.constant 9 : index
    %c0_203 = arith.constant 0 : index
    %491 = vector.load %arg13[%c9, %c0_203] : memref<64x128xf32, #tpu.memory_space<vmem>>, vector<1x64xf32>
    tpu.vector_store %arg13[%c9, %c0_203], %490 {strides = array<i32>} : memref<64x128xf32, #tpu.memory_space<vmem>>, vector<1x64xf32>,
    %492 = vector.extract_strided_slice %489 {offsets = [0, 64], sizes = [1, 64], strides = [1, 1]} : vector<2x128xf32> to vector<1x64xf32>
    %c22 = arith.constant 22 : index
    %c64_204 = arith.constant 64 : index
    %493 = vector.load %arg13[%c22, %c64_204] : memref<64x128xf32, #tpu.memory_space<vmem>>, vector<1x64xf32>
    tpu.vector_store %arg13[%c22, %c64_204], %492 {strides = array<i32>} : memref<64x128xf32, #tpu.memory_space<vmem>>, vector<1x64xf32>,
    %494 = vector.extract_strided_slice %489 {offsets = [1, 0], sizes = [1, 64], strides = [1, 1]} : vector<2x128xf32> to vector<1x64xf32>
    %c41 = arith.constant 41 : index
    %c0_205 = arith.constant 0 : index
    %495 = vector.load %arg13[%c41, %c0_205] : memref<64x128xf32, #tpu.memory_space<vmem>>, vector<1x64xf32>
    tpu.vector_store %arg13[%c41, %c0_205], %494 {strides = array<i32>} : memref<64x128xf32, #tpu.memory_space<vmem>>, vector<1x64xf32>,
    %496 = vector.extract_strided_slice %489 {offsets = [1, 64], sizes = [1, 64], strides = [1, 1]} : vector<2x128xf32> to vector<1x64xf32>
    %c54_206 = arith.constant 54 : index
    %c64_207 = arith.constant 64 : index
    %497 = vector.load %arg13[%c54_206, %c64_207] : memref<64x128xf32, #tpu.memory_space<vmem>>, vector<1x64xf32>
    tpu.vector_store %arg13[%c54_206, %c64_207], %496 {strides = array<i32>} : memref<64x128xf32, #tpu.memory_space<vmem>>, vector<1x64xf32>,
    %498 = arith.truncf %489 : vector<2x128xf32> to vector<2x128xbf16>
    %c0_208 = arith.constant 0 : index
    %c0_209 = arith.constant 0 : index
    %499 = vector.load %arg6[%c0_208, %c0_209] : memref<128x512xbf16, #tpu.memory_space<vmem>>, vector<128x512xbf16>
    %cst_210 = arith.constant dense<0.000000e+00> : vector<2x512xf32>
    %500 = tpu.matmul %498, %499, %cst_210 {dimension_numbers = #tpu.dot_dimension_numbers<[1], [0], [0], [1], [0, 0, 1, 1], [], []>} : vector<2x128xbf16>, vector<128x512xbf16>, vector<2x512xf32> -> vector<2x512xf32>
    %c20 = arith.constant 20 : index
    %c0_211 = arith.constant 0 : index
    %501 = vector.load %arg12[%c20, %c0_211] : memref<64x512xf32, #tpu.memory_space<vmem>>, vector<2x512xf32>
    %c42 = arith.constant 42 : index
    %c0_212 = arith.constant 0 : index
    %502 = vector.load %arg12[%c42, %c0_212] : memref<64x512xf32, #tpu.memory_space<vmem>>, vector<2x512xf32>
    %503 = arith.select %35, %501, %502 : vector<2x512xi1>, vector<2x512xf32>
    %504 = arith.addf %500, %503 : vector<2x512xf32>
    %505 = vector.extract_strided_slice %504 {offsets = [0, 0], sizes = [2, 128], strides = [1, 1]} : vector<2x512xf32> to vector<2x128xf32>
    %cst_213 = arith.constant 5.000000e-01 : f32
    %506 = vector.broadcast %cst_213 : f32 to vector<2x128xf32>
    %507 = arith.mulf %506, %505 : vector<2x128xf32>
    %508 = math.tanh %507 : vector<2x128xf32>
    %cst_214 = arith.constant 5.000000e-01 : f32
    %509 = vector.broadcast %cst_214 : f32 to vector<2x128xf32>
    %510 = arith.mulf %509, %508 : vector<2x128xf32>
    %cst_215 = arith.constant 5.000000e-01 : f32
    %511 = vector.broadcast %cst_215 : f32 to vector<2x128xf32>
    %512 = arith.addf %510, %511 : vector<2x128xf32>
    %513 = vector.extract_strided_slice %504 {offsets = [0, 128], sizes = [2, 128], strides = [1, 1]} : vector<2x512xf32> to vector<2x128xf32>
    %cst_216 = arith.constant 5.000000e-01 : f32
    %514 = vector.broadcast %cst_216 : f32 to vector<2x128xf32>
    %515 = arith.mulf %514, %513 : vector<2x128xf32>
    %516 = math.tanh %515 : vector<2x128xf32>
    %cst_217 = arith.constant 5.000000e-01 : f32
    %517 = vector.broadcast %cst_217 : f32 to vector<2x128xf32>
    %518 = arith.mulf %517, %516 : vector<2x128xf32>
    %cst_218 = arith.constant 5.000000e-01 : f32
    %519 = vector.broadcast %cst_218 : f32 to vector<2x128xf32>
    %520 = arith.addf %518, %519 : vector<2x128xf32>
    %521 = vector.extract_strided_slice %504 {offsets = [0, 256], sizes = [2, 128], strides = [1, 1]} : vector<2x512xf32> to vector<2x128xf32>
    %522 = math.tanh %521 : vector<2x128xf32>
    %523 = vector.extract_strided_slice %504 {offsets = [0, 384], sizes = [2, 128], strides = [1, 1]} : vector<2x512xf32> to vector<2x128xf32>
    %cst_219 = arith.constant 5.000000e-01 : f32
    %524 = vector.broadcast %cst_219 : f32 to vector<2x128xf32>
    %525 = arith.mulf %524, %523 : vector<2x128xf32>
    %526 = math.tanh %525 : vector<2x128xf32>
    %cst_220 = arith.constant 5.000000e-01 : f32
    %527 = vector.broadcast %cst_220 : f32 to vector<2x128xf32>
    %528 = arith.mulf %527, %526 : vector<2x128xf32>
    %cst_221 = arith.constant 5.000000e-01 : f32
    %529 = vector.broadcast %cst_221 : f32 to vector<2x128xf32>
    %530 = arith.addf %528, %529 : vector<2x128xf32>
    %531 = arith.mulf %520, %487 : vector<2x128xf32>
    %532 = arith.mulf %512, %522 : vector<2x128xf32>
    %533 = arith.addf %531, %532 : vector<2x128xf32>
    %534 = math.tanh %533 : vector<2x128xf32>
    %535 = arith.mulf %530, %534 : vector<2x128xf32>
    %536 = vector.extract_strided_slice %535 {offsets = [0, 0], sizes = [1, 64], strides = [1, 1]} : vector<2x128xf32> to vector<1x64xf32>
    %c10_222 = arith.constant 10 : index
    %c0_223 = arith.constant 0 : index
    %537 = vector.load %arg13[%c10_222, %c0_223] : memref<64x128xf32, #tpu.memory_space<vmem>>, vector<1x64xf32>
    tpu.vector_store %arg13[%c10_222, %c0_223], %536 {strides = array<i32>} : memref<64x128xf32, #tpu.memory_space<vmem>>, vector<1x64xf32>,
    %538 = vector.extract_strided_slice %535 {offsets = [0, 64], sizes = [1, 64], strides = [1, 1]} : vector<2x128xf32> to vector<1x64xf32>
    %c21 = arith.constant 21 : index
    %c64_224 = arith.constant 64 : index
    %539 = vector.load %arg13[%c21, %c64_224] : memref<64x128xf32, #tpu.memory_space<vmem>>, vector<1x64xf32>
    tpu.vector_store %arg13[%c21, %c64_224], %538 {strides = array<i32>} : memref<64x128xf32, #tpu.memory_space<vmem>>, vector<1x64xf32>,
    %540 = vector.extract_strided_slice %535 {offsets = [1, 0], sizes = [1, 64], strides = [1, 1]} : vector<2x128xf32> to vector<1x64xf32>
    %c42_225 = arith.constant 42 : index
    %c0_226 = arith.constant 0 : index
    %541 = vector.load %arg13[%c42_225, %c0_226] : memref<64x128xf32, #tpu.memory_space<vmem>>, vector<1x64xf32>
    tpu.vector_store %arg13[%c42_225, %c0_226], %540 {strides = array<i32>} : memref<64x128xf32, #tpu.memory_space<vmem>>, vector<1x64xf32>,
    %542 = vector.extract_strided_slice %535 {offsets = [1, 64], sizes = [1, 64], strides = [1, 1]} : vector<2x128xf32> to vector<1x64xf32>
    %c53 = arith.constant 53 : index
    %c64_227 = arith.constant 64 : index
    %543 = vector.load %arg13[%c53, %c64_227] : memref<64x128xf32, #tpu.memory_space<vmem>>, vector<1x64xf32>
    tpu.vector_store %arg13[%c53, %c64_227], %542 {strides = array<i32>} : memref<64x128xf32, #tpu.memory_space<vmem>>, vector<1x64xf32>,
    %544 = arith.truncf %535 : vector<2x128xf32> to vector<2x128xbf16>
    %c0_228 = arith.constant 0 : index
    %c0_229 = arith.constant 0 : index
    %545 = vector.load %arg6[%c0_228, %c0_229] : memref<128x512xbf16, #tpu.memory_space<vmem>>, vector<128x512xbf16>
    %cst_230 = arith.constant dense<0.000000e+00> : vector<2x512xf32>
    %546 = tpu.matmul %544, %545, %cst_230 {dimension_numbers = #tpu.dot_dimension_numbers<[1], [0], [0], [1], [0, 0, 1, 1], [], []>} : vector<2x128xbf16>, vector<128x512xbf16>, vector<2x512xf32> -> vector<2x512xf32>
    %c22_231 = arith.constant 22 : index
    %c0_232 = arith.constant 0 : index
    %547 = vector.load %arg12[%c22_231, %c0_232] : memref<64x512xf32, #tpu.memory_space<vmem>>, vector<2x512xf32>
    %c40_233 = arith.constant 40 : index
    %c0_234 = arith.constant 0 : index
    %548 = vector.load %arg12[%c40_233, %c0_234] : memref<64x512xf32, #tpu.memory_space<vmem>>, vector<2x512xf32>
    %549 = arith.select %35, %547, %548 : vector<2x512xi1>, vector<2x512xf32>
    %550 = arith.addf %546, %549 : vector<2x512xf32>
    %551 = vector.extract_strided_slice %550 {offsets = [0, 0], sizes = [2, 128], strides = [1, 1]} : vector<2x512xf32> to vector<2x128xf32>
    %cst_235 = arith.constant 5.000000e-01 : f32
    %552 = vector.broadcast %cst_235 : f32 to vector<2x128xf32>
    %553 = arith.mulf %552, %551 : vector<2x128xf32>
    %554 = math.tanh %553 : vector<2x128xf32>
    %cst_236 = arith.constant 5.000000e-01 : f32
    %555 = vector.broadcast %cst_236 : f32 to vector<2x128xf32>
    %556 = arith.mulf %555, %554 : vector<2x128xf32>
    %cst_237 = arith.constant 5.000000e-01 : f32
    %557 = vector.broadcast %cst_237 : f32 to vector<2x128xf32>
    %558 = arith.addf %556, %557 : vector<2x128xf32>
    %559 = vector.extract_strided_slice %550 {offsets = [0, 128], sizes = [2, 128], strides = [1, 1]} : vector<2x512xf32> to vector<2x128xf32>
    %cst_238 = arith.constant 5.000000e-01 : f32
    %560 = vector.broadcast %cst_238 : f32 to vector<2x128xf32>
    %561 = arith.mulf %560, %559 : vector<2x128xf32>
    %562 = math.tanh %561 : vector<2x128xf32>
    %cst_239 = arith.constant 5.000000e-01 : f32
    %563 = vector.broadcast %cst_239 : f32 to vector<2x128xf32>
    %564 = arith.mulf %563, %562 : vector<2x128xf32>
    %cst_240 = arith.constant 5.000000e-01 : f32
    %565 = vector.broadcast %cst_240 : f32 to vector<2x128xf32>
    %566 = arith.addf %564, %565 : vector<2x128xf32>
    %567 = vector.extract_strided_slice %550 {offsets = [0, 256], sizes = [2, 128], strides = [1, 1]} : vector<2x512xf32> to vector<2x128xf32>
    %568 = math.tanh %567 : vector<2x128xf32>
    %569 = vector.extract_strided_slice %550 {offsets = [0, 384], sizes = [2, 128], strides = [1, 1]} : vector<2x512xf32> to vector<2x128xf32>
    %cst_241 = arith.constant 5.000000e-01 : f32
    %570 = vector.broadcast %cst_241 : f32 to vector<2x128xf32>
    %571 = arith.mulf %570, %569 : vector<2x128xf32>
    %572 = math.tanh %571 : vector<2x128xf32>
    %cst_242 = arith.constant 5.000000e-01 : f32
    %573 = vector.broadcast %cst_242 : f32 to vector<2x128xf32>
    %574 = arith.mulf %573, %572 : vector<2x128xf32>
    %cst_243 = arith.constant 5.000000e-01 : f32
    %575 = vector.broadcast %cst_243 : f32 to vector<2x128xf32>
    %576 = arith.addf %574, %575 : vector<2x128xf32>
    %577 = arith.mulf %566, %533 : vector<2x128xf32>
    %578 = arith.mulf %558, %568 : vector<2x128xf32>
    %579 = arith.addf %577, %578 : vector<2x128xf32>
    %580 = math.tanh %579 : vector<2x128xf32>
    %581 = arith.mulf %576, %580 : vector<2x128xf32>
    %582 = vector.extract_strided_slice %581 {offsets = [0, 0], sizes = [1, 64], strides = [1, 1]} : vector<2x128xf32> to vector<1x64xf32>
    %c11 = arith.constant 11 : index
    %c0_244 = arith.constant 0 : index
    %583 = vector.load %arg13[%c11, %c0_244] : memref<64x128xf32, #tpu.memory_space<vmem>>, vector<1x64xf32>
    tpu.vector_store %arg13[%c11, %c0_244], %582 {strides = array<i32>} : memref<64x128xf32, #tpu.memory_space<vmem>>, vector<1x64xf32>,
    %584 = vector.extract_strided_slice %581 {offsets = [0, 64], sizes = [1, 64], strides = [1, 1]} : vector<2x128xf32> to vector<1x64xf32>
    %c20_245 = arith.constant 20 : index
    %c64_246 = arith.constant 64 : index
    %585 = vector.load %arg13[%c20_245, %c64_246] : memref<64x128xf32, #tpu.memory_space<vmem>>, vector<1x64xf32>
    tpu.vector_store %arg13[%c20_245, %c64_246], %584 {strides = array<i32>} : memref<64x128xf32, #tpu.memory_space<vmem>>, vector<1x64xf32>,
    %586 = vector.extract_strided_slice %581 {offsets = [1, 0], sizes = [1, 64], strides = [1, 1]} : vector<2x128xf32> to vector<1x64xf32>
    %c43 = arith.constant 43 : index
    %c0_247 = arith.constant 0 : index
    %587 = vector.load %arg13[%c43, %c0_247] : memref<64x128xf32, #tpu.memory_space<vmem>>, vector<1x64xf32>
    tpu.vector_store %arg13[%c43, %c0_247], %586 {strides = array<i32>} : memref<64x128xf32, #tpu.memory_space<vmem>>, vector<1x64xf32>,
    %588 = vector.extract_strided_slice %581 {offsets = [1, 64], sizes = [1, 64], strides = [1, 1]} : vector<2x128xf32> to vector<1x64xf32>
    %c52_248 = arith.constant 52 : index
    %c64_249 = arith.constant 64 : index
    %589 = vector.load %arg13[%c52_248, %c64_249] : memref<64x128xf32, #tpu.memory_space<vmem>>, vector<1x64xf32>
    tpu.vector_store %arg13[%c52_248, %c64_249], %588 {strides = array<i32>} : memref<64x128xf32, #tpu.memory_space<vmem>>, vector<1x64xf32>,
    %590 = arith.truncf %581 : vector<2x128xf32> to vector<2x128xbf16>
    %c0_250 = arith.constant 0 : index
    %c0_251 = arith.constant 0 : index
    %591 = vector.load %arg6[%c0_250, %c0_251] : memref<128x512xbf16, #tpu.memory_space<vmem>>, vector<128x512xbf16>
    %cst_252 = arith.constant dense<0.000000e+00> : vector<2x512xf32>
    %592 = tpu.matmul %590, %591, %cst_252 {dimension_numbers = #tpu.dot_dimension_numbers<[1], [0], [0], [1], [0, 0, 1, 1], [], []>} : vector<2x128xbf16>, vector<128x512xbf16>, vector<2x512xf32> -> vector<2x512xf32>
    %c24_253 = arith.constant 24 : index
    %c0_254 = arith.constant 0 : index
    %593 = vector.load %arg12[%c24_253, %c0_254] : memref<64x512xf32, #tpu.memory_space<vmem>>, vector<2x512xf32>
    %c38_255 = arith.constant 38 : index
    %c0_256 = arith.constant 0 : index
    %594 = vector.load %arg12[%c38_255, %c0_256] : memref<64x512xf32, #tpu.memory_space<vmem>>, vector<2x512xf32>
    %595 = arith.select %35, %593, %594 : vector<2x512xi1>, vector<2x512xf32>
    %596 = arith.addf %592, %595 : vector<2x512xf32>
    %597 = vector.extract_strided_slice %596 {offsets = [0, 0], sizes = [2, 128], strides = [1, 1]} : vector<2x512xf32> to vector<2x128xf32>
    %cst_257 = arith.constant 5.000000e-01 : f32
    %598 = vector.broadcast %cst_257 : f32 to vector<2x128xf32>
    %599 = arith.mulf %598, %597 : vector<2x128xf32>
    %600 = math.tanh %599 : vector<2x128xf32>
    %cst_258 = arith.constant 5.000000e-01 : f32
    %601 = vector.broadcast %cst_258 : f32 to vector<2x128xf32>
    %602 = arith.mulf %601, %600 : vector<2x128xf32>
    %cst_259 = arith.constant 5.000000e-01 : f32
    %603 = vector.broadcast %cst_259 : f32 to vector<2x128xf32>
    %604 = arith.addf %602, %603 : vector<2x128xf32>
    %605 = vector.extract_strided_slice %596 {offsets = [0, 128], sizes = [2, 128], strides = [1, 1]} : vector<2x512xf32> to vector<2x128xf32>
    %cst_260 = arith.constant 5.000000e-01 : f32
    %606 = vector.broadcast %cst_260 : f32 to vector<2x128xf32>
    %607 = arith.mulf %606, %605 : vector<2x128xf32>
    %608 = math.tanh %607 : vector<2x128xf32>
    %cst_261 = arith.constant 5.000000e-01 : f32
    %609 = vector.broadcast %cst_261 : f32 to vector<2x128xf32>
    %610 = arith.mulf %609, %608 : vector<2x128xf32>
    %cst_262 = arith.constant 5.000000e-01 : f32
    %611 = vector.broadcast %cst_262 : f32 to vector<2x128xf32>
    %612 = arith.addf %610, %611 : vector<2x128xf32>
    %613 = vector.extract_strided_slice %596 {offsets = [0, 256], sizes = [2, 128], strides = [1, 1]} : vector<2x512xf32> to vector<2x128xf32>
    %614 = math.tanh %613 : vector<2x128xf32>
    %615 = vector.extract_strided_slice %596 {offsets = [0, 384], sizes = [2, 128], strides = [1, 1]} : vector<2x512xf32> to vector<2x128xf32>
    %cst_263 = arith.constant 5.000000e-01 : f32
    %616 = vector.broadcast %cst_263 : f32 to vector<2x128xf32>
    %617 = arith.mulf %616, %615 : vector<2x128xf32>
    %618 = math.tanh %617 : vector<2x128xf32>
    %cst_264 = arith.constant 5.000000e-01 : f32
    %619 = vector.broadcast %cst_264 : f32 to vector<2x128xf32>
    %620 = arith.mulf %619, %618 : vector<2x128xf32>
    %cst_265 = arith.constant 5.000000e-01 : f32
    %621 = vector.broadcast %cst_265 : f32 to vector<2x128xf32>
    %622 = arith.addf %620, %621 : vector<2x128xf32>
    %623 = arith.mulf %612, %579 : vector<2x128xf32>
    %624 = arith.mulf %604, %614 : vector<2x128xf32>
    %625 = arith.addf %623, %624 : vector<2x128xf32>
    %626 = math.tanh %625 : vector<2x128xf32>
    %627 = arith.mulf %622, %626 : vector<2x128xf32>
    %628 = vector.extract_strided_slice %627 {offsets = [0, 0], sizes = [1, 64], strides = [1, 1]} : vector<2x128xf32> to vector<1x64xf32>
    %c12_266 = arith.constant 12 : index
    %c0_267 = arith.constant 0 : index
    %629 = vector.load %arg13[%c12_266, %c0_267] : memref<64x128xf32, #tpu.memory_space<vmem>>, vector<1x64xf32>
    tpu.vector_store %arg13[%c12_266, %c0_267], %628 {strides = array<i32>} : memref<64x128xf32, #tpu.memory_space<vmem>>, vector<1x64xf32>,
    %630 = vector.extract_strided_slice %627 {offsets = [0, 64], sizes = [1, 64], strides = [1, 1]} : vector<2x128xf32> to vector<1x64xf32>
    %c19 = arith.constant 19 : index
    %c64_268 = arith.constant 64 : index
    %631 = vector.load %arg13[%c19, %c64_268] : memref<64x128xf32, #tpu.memory_space<vmem>>, vector<1x64xf32>
    tpu.vector_store %arg13[%c19, %c64_268], %630 {strides = array<i32>} : memref<64x128xf32, #tpu.memory_space<vmem>>, vector<1x64xf32>,
    %632 = vector.extract_strided_slice %627 {offsets = [1, 0], sizes = [1, 64], strides = [1, 1]} : vector<2x128xf32> to vector<1x64xf32>
    %c44_269 = arith.constant 44 : index
    %c0_270 = arith.constant 0 : index
    %633 = vector.load %arg13[%c44_269, %c0_270] : memref<64x128xf32, #tpu.memory_space<vmem>>, vector<1x64xf32>
    tpu.vector_store %arg13[%c44_269, %c0_270], %632 {strides = array<i32>} : memref<64x128xf32, #tpu.memory_space<vmem>>, vector<1x64xf32>,
    %634 = vector.extract_strided_slice %627 {offsets = [1, 64], sizes = [1, 64], strides = [1, 1]} : vector<2x128xf32> to vector<1x64xf32>
    %c51 = arith.constant 51 : index
    %c64_271 = arith.constant 64 : index
    %635 = vector.load %arg13[%c51, %c64_271] : memref<64x128xf32, #tpu.memory_space<vmem>>, vector<1x64xf32>
    tpu.vector_store %arg13[%c51, %c64_271], %634 {strides = array<i32>} : memref<64x128xf32, #tpu.memory_space<vmem>>, vector<1x64xf32>,
    %636 = arith.truncf %627 : vector<2x128xf32> to vector<2x128xbf16>
    %c0_272 = arith.constant 0 : index
    %c0_273 = arith.constant 0 : index
    %637 = vector.load %arg6[%c0_272, %c0_273] : memref<128x512xbf16, #tpu.memory_space<vmem>>, vector<128x512xbf16>
    %cst_274 = arith.constant dense<0.000000e+00> : vector<2x512xf32>
    %638 = tpu.matmul %636, %637, %cst_274 {dimension_numbers = #tpu.dot_dimension_numbers<[1], [0], [0], [1], [0, 0, 1, 1], [], []>} : vector<2x128xbf16>, vector<128x512xbf16>, vector<2x512xf32> -> vector<2x512xf32>
    %c26_275 = arith.constant 26 : index
    %c0_276 = arith.constant 0 : index
    %639 = vector.load %arg12[%c26_275, %c0_276] : memref<64x512xf32, #tpu.memory_space<vmem>>, vector<2x512xf32>
    %c36_277 = arith.constant 36 : index
    %c0_278 = arith.constant 0 : index
    %640 = vector.load %arg12[%c36_277, %c0_278] : memref<64x512xf32, #tpu.memory_space<vmem>>, vector<2x512xf32>
    %641 = arith.select %35, %639, %640 : vector<2x512xi1>, vector<2x512xf32>
    %642 = arith.addf %638, %641 : vector<2x512xf32>
    %643 = vector.extract_strided_slice %642 {offsets = [0, 0], sizes = [2, 128], strides = [1, 1]} : vector<2x512xf32> to vector<2x128xf32>
    %cst_279 = arith.constant 5.000000e-01 : f32
    %644 = vector.broadcast %cst_279 : f32 to vector<2x128xf32>
    %645 = arith.mulf %644, %643 : vector<2x128xf32>
    %646 = math.tanh %645 : vector<2x128xf32>
    %cst_280 = arith.constant 5.000000e-01 : f32
    %647 = vector.broadcast %cst_280 : f32 to vector<2x128xf32>
    %648 = arith.mulf %647, %646 : vector<2x128xf32>
    %cst_281 = arith.constant 5.000000e-01 : f32
    %649 = vector.broadcast %cst_281 : f32 to vector<2x128xf32>
    %650 = arith.addf %648, %649 : vector<2x128xf32>
    %651 = vector.extract_strided_slice %642 {offsets = [0, 128], sizes = [2, 128], strides = [1, 1]} : vector<2x512xf32> to vector<2x128xf32>
    %cst_282 = arith.constant 5.000000e-01 : f32
    %652 = vector.broadcast %cst_282 : f32 to vector<2x128xf32>
    %653 = arith.mulf %652, %651 : vector<2x128xf32>
    %654 = math.tanh %653 : vector<2x128xf32>
    %cst_283 = arith.constant 5.000000e-01 : f32
    %655 = vector.broadcast %cst_283 : f32 to vector<2x128xf32>
    %656 = arith.mulf %655, %654 : vector<2x128xf32>
    %cst_284 = arith.constant 5.000000e-01 : f32
    %657 = vector.broadcast %cst_284 : f32 to vector<2x128xf32>
    %658 = arith.addf %656, %657 : vector<2x128xf32>
    %659 = vector.extract_strided_slice %642 {offsets = [0, 256], sizes = [2, 128], strides = [1, 1]} : vector<2x512xf32> to vector<2x128xf32>
    %660 = math.tanh %659 : vector<2x128xf32>
    %661 = vector.extract_strided_slice %642 {offsets = [0, 384], sizes = [2, 128], strides = [1, 1]} : vector<2x512xf32> to vector<2x128xf32>
    %cst_285 = arith.constant 5.000000e-01 : f32
    %662 = vector.broadcast %cst_285 : f32 to vector<2x128xf32>
    %663 = arith.mulf %662, %661 : vector<2x128xf32>
    %664 = math.tanh %663 : vector<2x128xf32>
    %cst_286 = arith.constant 5.000000e-01 : f32
    %665 = vector.broadcast %cst_286 : f32 to vector<2x128xf32>
    %666 = arith.mulf %665, %664 : vector<2x128xf32>
    %cst_287 = arith.constant 5.000000e-01 : f32
    %667 = vector.broadcast %cst_287 : f32 to vector<2x128xf32>
    %668 = arith.addf %666, %667 : vector<2x128xf32>
    %669 = arith.mulf %658, %625 : vector<2x128xf32>
    %670 = arith.mulf %650, %660 : vector<2x128xf32>
    %671 = arith.addf %669, %670 : vector<2x128xf32>
    %672 = math.tanh %671 : vector<2x128xf32>
    %673 = arith.mulf %668, %672 : vector<2x128xf32>
    %674 = vector.extract_strided_slice %673 {offsets = [0, 0], sizes = [1, 64], strides = [1, 1]} : vector<2x128xf32> to vector<1x64xf32>
    %c13 = arith.constant 13 : index
    %c0_288 = arith.constant 0 : index
    %675 = vector.load %arg13[%c13, %c0_288] : memref<64x128xf32, #tpu.memory_space<vmem>>, vector<1x64xf32>
    tpu.vector_store %arg13[%c13, %c0_288], %674 {strides = array<i32>} : memref<64x128xf32, #tpu.memory_space<vmem>>, vector<1x64xf32>,
    %676 = vector.extract_strided_slice %673 {offsets = [0, 64], sizes = [1, 64], strides = [1, 1]} : vector<2x128xf32> to vector<1x64xf32>
    %c18_289 = arith.constant 18 : index
    %c64_290 = arith.constant 64 : index
    %677 = vector.load %arg13[%c18_289, %c64_290] : memref<64x128xf32, #tpu.memory_space<vmem>>, vector<1x64xf32>
    tpu.vector_store %arg13[%c18_289, %c64_290], %676 {strides = array<i32>} : memref<64x128xf32, #tpu.memory_space<vmem>>, vector<1x64xf32>,
    %678 = vector.extract_strided_slice %673 {offsets = [1, 0], sizes = [1, 64], strides = [1, 1]} : vector<2x128xf32> to vector<1x64xf32>
    %c45 = arith.constant 45 : index
    %c0_291 = arith.constant 0 : index
    %679 = vector.load %arg13[%c45, %c0_291] : memref<64x128xf32, #tpu.memory_space<vmem>>, vector<1x64xf32>
    tpu.vector_store %arg13[%c45, %c0_291], %678 {strides = array<i32>} : memref<64x128xf32, #tpu.memory_space<vmem>>, vector<1x64xf32>,
    %680 = vector.extract_strided_slice %673 {offsets = [1, 64], sizes = [1, 64], strides = [1, 1]} : vector<2x128xf32> to vector<1x64xf32>
    %c50_292 = arith.constant 50 : index
    %c64_293 = arith.constant 64 : index
    %681 = vector.load %arg13[%c50_292, %c64_293] : memref<64x128xf32, #tpu.memory_space<vmem>>, vector<1x64xf32>
    tpu.vector_store %arg13[%c50_292, %c64_293], %680 {strides = array<i32>} : memref<64x128xf32, #tpu.memory_space<vmem>>, vector<1x64xf32>,
    %682 = arith.truncf %673 : vector<2x128xf32> to vector<2x128xbf16>
    %c0_294 = arith.constant 0 : index
    %c0_295 = arith.constant 0 : index
    %683 = vector.load %arg6[%c0_294, %c0_295] : memref<128x512xbf16, #tpu.memory_space<vmem>>, vector<128x512xbf16>
    %cst_296 = arith.constant dense<0.000000e+00> : vector<2x512xf32>
    %684 = tpu.matmul %682, %683, %cst_296 {dimension_numbers = #tpu.dot_dimension_numbers<[1], [0], [0], [1], [0, 0, 1, 1], [], []>} : vector<2x128xbf16>, vector<128x512xbf16>, vector<2x512xf32> -> vector<2x512xf32>
    %c28_297 = arith.constant 28 : index
    %c0_298 = arith.constant 0 : index
    %685 = vector.load %arg12[%c28_297, %c0_298] : memref<64x512xf32, #tpu.memory_space<vmem>>, vector<2x512xf32>
    %c34_299 = arith.constant 34 : index
    %c0_300 = arith.constant 0 : index
    %686 = vector.load %arg12[%c34_299, %c0_300] : memref<64x512xf32, #tpu.memory_space<vmem>>, vector<2x512xf32>
    %687 = arith.select %35, %685, %686 : vector<2x512xi1>, vector<2x512xf32>
    %688 = arith.addf %684, %687 : vector<2x512xf32>
    %689 = vector.extract_strided_slice %688 {offsets = [0, 0], sizes = [2, 128], strides = [1, 1]} : vector<2x512xf32> to vector<2x128xf32>
    %cst_301 = arith.constant 5.000000e-01 : f32
    %690 = vector.broadcast %cst_301 : f32 to vector<2x128xf32>
    %691 = arith.mulf %690, %689 : vector<2x128xf32>
    %692 = math.tanh %691 : vector<2x128xf32>
    %cst_302 = arith.constant 5.000000e-01 : f32
    %693 = vector.broadcast %cst_302 : f32 to vector<2x128xf32>
    %694 = arith.mulf %693, %692 : vector<2x128xf32>
    %cst_303 = arith.constant 5.000000e-01 : f32
    %695 = vector.broadcast %cst_303 : f32 to vector<2x128xf32>
    %696 = arith.addf %694, %695 : vector<2x128xf32>
    %697 = vector.extract_strided_slice %688 {offsets = [0, 128], sizes = [2, 128], strides = [1, 1]} : vector<2x512xf32> to vector<2x128xf32>
    %cst_304 = arith.constant 5.000000e-01 : f32
    %698 = vector.broadcast %cst_304 : f32 to vector<2x128xf32>
    %699 = arith.mulf %698, %697 : vector<2x128xf32>
    %700 = math.tanh %699 : vector<2x128xf32>
    %cst_305 = arith.constant 5.000000e-01 : f32
    %701 = vector.broadcast %cst_305 : f32 to vector<2x128xf32>
    %702 = arith.mulf %701, %700 : vector<2x128xf32>
    %cst_306 = arith.constant 5.000000e-01 : f32
    %703 = vector.broadcast %cst_306 : f32 to vector<2x128xf32>
    %704 = arith.addf %702, %703 : vector<2x128xf32>
    %705 = vector.extract_strided_slice %688 {offsets = [0, 256], sizes = [2, 128], strides = [1, 1]} : vector<2x512xf32> to vector<2x128xf32>
    %706 = math.tanh %705 : vector<2x128xf32>
    %707 = vector.extract_strided_slice %688 {offsets = [0, 384], sizes = [2, 128], strides = [1, 1]} : vector<2x512xf32> to vector<2x128xf32>
    %cst_307 = arith.constant 5.000000e-01 : f32
    %708 = vector.broadcast %cst_307 : f32 to vector<2x128xf32>
    %709 = arith.mulf %708, %707 : vector<2x128xf32>
    %710 = math.tanh %709 : vector<2x128xf32>
    %cst_308 = arith.constant 5.000000e-01 : f32
    %711 = vector.broadcast %cst_308 : f32 to vector<2x128xf32>
    %712 = arith.mulf %711, %710 : vector<2x128xf32>
    %cst_309 = arith.constant 5.000000e-01 : f32
    %713 = vector.broadcast %cst_309 : f32 to vector<2x128xf32>
    %714 = arith.addf %712, %713 : vector<2x128xf32>
    %715 = arith.mulf %704, %671 : vector<2x128xf32>
    %716 = arith.mulf %696, %706 : vector<2x128xf32>
    %717 = arith.addf %715, %716 : vector<2x128xf32>
    %718 = math.tanh %717 : vector<2x128xf32>
    %719 = arith.mulf %714, %718 : vector<2x128xf32>
    %720 = vector.extract_strided_slice %719 {offsets = [0, 0], sizes = [1, 64], strides = [1, 1]} : vector<2x128xf32> to vector<1x64xf32>
    %c14_310 = arith.constant 14 : index
    %c0_311 = arith.constant 0 : index
    %721 = vector.load %arg13[%c14_310, %c0_311] : memref<64x128xf32, #tpu.memory_space<vmem>>, vector<1x64xf32>
    tpu.vector_store %arg13[%c14_310, %c0_311], %720 {strides = array<i32>} : memref<64x128xf32, #tpu.memory_space<vmem>>, vector<1x64xf32>,
    %722 = vector.extract_strided_slice %719 {offsets = [0, 64], sizes = [1, 64], strides = [1, 1]} : vector<2x128xf32> to vector<1x64xf32>
    %c17 = arith.constant 17 : index
    %c64_312 = arith.constant 64 : index
    %723 = vector.load %arg13[%c17, %c64_312] : memref<64x128xf32, #tpu.memory_space<vmem>>, vector<1x64xf32>
    tpu.vector_store %arg13[%c17, %c64_312], %722 {strides = array<i32>} : memref<64x128xf32, #tpu.memory_space<vmem>>, vector<1x64xf32>,
    %724 = vector.extract_strided_slice %719 {offsets = [1, 0], sizes = [1, 64], strides = [1, 1]} : vector<2x128xf32> to vector<1x64xf32>
    %c46_313 = arith.constant 46 : index
    %c0_314 = arith.constant 0 : index
    %725 = vector.load %arg13[%c46_313, %c0_314] : memref<64x128xf32, #tpu.memory_space<vmem>>, vector<1x64xf32>
    tpu.vector_store %arg13[%c46_313, %c0_314], %724 {strides = array<i32>} : memref<64x128xf32, #tpu.memory_space<vmem>>, vector<1x64xf32>,
    %726 = vector.extract_strided_slice %719 {offsets = [1, 64], sizes = [1, 64], strides = [1, 1]} : vector<2x128xf32> to vector<1x64xf32>
    %c49 = arith.constant 49 : index
    %c64_315 = arith.constant 64 : index
    %727 = vector.load %arg13[%c49, %c64_315] : memref<64x128xf32, #tpu.memory_space<vmem>>, vector<1x64xf32>
    tpu.vector_store %arg13[%c49, %c64_315], %726 {strides = array<i32>} : memref<64x128xf32, #tpu.memory_space<vmem>>, vector<1x64xf32>,
    %728 = arith.truncf %719 : vector<2x128xf32> to vector<2x128xbf16>
    %c0_316 = arith.constant 0 : index
    %c0_317 = arith.constant 0 : index
    %729 = vector.load %arg6[%c0_316, %c0_317] : memref<128x512xbf16, #tpu.memory_space<vmem>>, vector<128x512xbf16>
    %cst_318 = arith.constant dense<0.000000e+00> : vector<2x512xf32>
    %730 = tpu.matmul %728, %729, %cst_318 {dimension_numbers = #tpu.dot_dimension_numbers<[1], [0], [0], [1], [0, 0, 1, 1], [], []>} : vector<2x128xbf16>, vector<128x512xbf16>, vector<2x512xf32> -> vector<2x512xf32>
    %c30_319 = arith.constant 30 : index
    %c0_320 = arith.constant 0 : index
    %731 = vector.load %arg12[%c30_319, %c0_320] : memref<64x512xf32, #tpu.memory_space<vmem>>, vector<2x512xf32>
    %c32_321 = arith.constant 32 : index
    %c0_322 = arith.constant 0 : index
    %732 = vector.load %arg12[%c32_321, %c0_322] : memref<64x512xf32, #tpu.memory_space<vmem>>, vector<2x512xf32>
    %733 = arith.select %35, %731, %732 : vector<2x512xi1>, vector<2x512xf32>
    %734 = arith.addf %730, %733 : vector<2x512xf32>
    %735 = vector.extract_strided_slice %734 {offsets = [0, 0], sizes = [2, 128], strides = [1, 1]} : vector<2x512xf32> to vector<2x128xf32>
    %cst_323 = arith.constant 5.000000e-01 : f32
    %736 = vector.broadcast %cst_323 : f32 to vector<2x128xf32>
    %737 = arith.mulf %736, %735 : vector<2x128xf32>
    %738 = math.tanh %737 : vector<2x128xf32>
    %cst_324 = arith.constant 5.000000e-01 : f32
    %739 = vector.broadcast %cst_324 : f32 to vector<2x128xf32>
    %740 = arith.mulf %739, %738 : vector<2x128xf32>
    %cst_325 = arith.constant 5.000000e-01 : f32
    %741 = vector.broadcast %cst_325 : f32 to vector<2x128xf32>
    %742 = arith.addf %740, %741 : vector<2x128xf32>
    %743 = vector.extract_strided_slice %734 {offsets = [0, 128], sizes = [2, 128], strides = [1, 1]} : vector<2x512xf32> to vector<2x128xf32>
    %cst_326 = arith.constant 5.000000e-01 : f32
    %744 = vector.broadcast %cst_326 : f32 to vector<2x128xf32>
    %745 = arith.mulf %744, %743 : vector<2x128xf32>
    %746 = math.tanh %745 : vector<2x128xf32>
    %cst_327 = arith.constant 5.000000e-01 : f32
    %747 = vector.broadcast %cst_327 : f32 to vector<2x128xf32>
    %748 = arith.mulf %747, %746 : vector<2x128xf32>
    %cst_328 = arith.constant 5.000000e-01 : f32
    %749 = vector.broadcast %cst_328 : f32 to vector<2x128xf32>
    %750 = arith.addf %748, %749 : vector<2x128xf32>
    %751 = vector.extract_strided_slice %734 {offsets = [0, 256], sizes = [2, 128], strides = [1, 1]} : vector<2x512xf32> to vector<2x128xf32>
    %752 = math.tanh %751 : vector<2x128xf32>
    %753 = vector.extract_strided_slice %734 {offsets = [0, 384], sizes = [2, 128], strides = [1, 1]} : vector<2x512xf32> to vector<2x128xf32>
    %cst_329 = arith.constant 5.000000e-01 : f32
    %754 = vector.broadcast %cst_329 : f32 to vector<2x128xf32>
    %755 = arith.mulf %754, %753 : vector<2x128xf32>
    %756 = math.tanh %755 : vector<2x128xf32>
    %cst_330 = arith.constant 5.000000e-01 : f32
    %757 = vector.broadcast %cst_330 : f32 to vector<2x128xf32>
    %758 = arith.mulf %757, %756 : vector<2x128xf32>
    %cst_331 = arith.constant 5.000000e-01 : f32
    %759 = vector.broadcast %cst_331 : f32 to vector<2x128xf32>
    %760 = arith.addf %758, %759 : vector<2x128xf32>
    %761 = arith.mulf %750, %717 : vector<2x128xf32>
    %762 = arith.mulf %742, %752 : vector<2x128xf32>
    %763 = arith.addf %761, %762 : vector<2x128xf32>
    %764 = math.tanh %763 : vector<2x128xf32>
    %765 = arith.mulf %760, %764 : vector<2x128xf32>
    %766 = vector.extract_strided_slice %765 {offsets = [0, 0], sizes = [1, 64], strides = [1, 1]} : vector<2x128xf32> to vector<1x64xf32>
    %c15 = arith.constant 15 : index
    %c0_332 = arith.constant 0 : index
    %767 = vector.load %arg13[%c15, %c0_332] : memref<64x128xf32, #tpu.memory_space<vmem>>, vector<1x64xf32>
    tpu.vector_store %arg13[%c15, %c0_332], %766 {strides = array<i32>} : memref<64x128xf32, #tpu.memory_space<vmem>>, vector<1x64xf32>,
    %768 = vector.extract_strided_slice %765 {offsets = [0, 64], sizes = [1, 64], strides = [1, 1]} : vector<2x128xf32> to vector<1x64xf32>
    %c16_333 = arith.constant 16 : index
    %c64_334 = arith.constant 64 : index
    %769 = vector.load %arg13[%c16_333, %c64_334] : memref<64x128xf32, #tpu.memory_space<vmem>>, vector<1x64xf32>
    tpu.vector_store %arg13[%c16_333, %c64_334], %768 {strides = array<i32>} : memref<64x128xf32, #tpu.memory_space<vmem>>, vector<1x64xf32>,
    %770 = vector.extract_strided_slice %765 {offsets = [1, 0], sizes = [1, 64], strides = [1, 1]} : vector<2x128xf32> to vector<1x64xf32>
    %c47 = arith.constant 47 : index
    %c0_335 = arith.constant 0 : index
    %771 = vector.load %arg13[%c47, %c0_335] : memref<64x128xf32, #tpu.memory_space<vmem>>, vector<1x64xf32>
    tpu.vector_store %arg13[%c47, %c0_335], %770 {strides = array<i32>} : memref<64x128xf32, #tpu.memory_space<vmem>>, vector<1x64xf32>,
    %772 = vector.extract_strided_slice %765 {offsets = [1, 64], sizes = [1, 64], strides = [1, 1]} : vector<2x128xf32> to vector<1x64xf32>
    %c48_336 = arith.constant 48 : index
    %c64_337 = arith.constant 64 : index
    %773 = vector.load %arg13[%c48_336, %c64_337] : memref<64x128xf32, #tpu.memory_space<vmem>>, vector<1x64xf32>
    tpu.vector_store %arg13[%c48_336, %c64_337], %772 {strides = array<i32>} : memref<64x128xf32, #tpu.memory_space<vmem>>, vector<1x64xf32>,
    %774 = arith.truncf %765 : vector<2x128xf32> to vector<2x128xbf16>
    %c0_338 = arith.constant 0 : index
    %c0_339 = arith.constant 0 : index
    %775 = vector.load %arg6[%c0_338, %c0_339] : memref<128x512xbf16, #tpu.memory_space<vmem>>, vector<128x512xbf16>
    %cst_340 = arith.constant dense<0.000000e+00> : vector<2x512xf32>
    %776 = tpu.matmul %774, %775, %cst_340 {dimension_numbers = #tpu.dot_dimension_numbers<[1], [0], [0], [1], [0, 0, 1, 1], [], []>} : vector<2x128xbf16>, vector<128x512xbf16>, vector<2x512xf32> -> vector<2x512xf32>
    %c32_341 = arith.constant 32 : index
    %c0_342 = arith.constant 0 : index
    %777 = vector.load %arg12[%c32_341, %c0_342] : memref<64x512xf32, #tpu.memory_space<vmem>>, vector<2x512xf32>
    %c30_343 = arith.constant 30 : index
    %c0_344 = arith.constant 0 : index
    %778 = vector.load %arg12[%c30_343, %c0_344] : memref<64x512xf32, #tpu.memory_space<vmem>>, vector<2x512xf32>
    %779 = arith.select %35, %777, %778 : vector<2x512xi1>, vector<2x512xf32>
    %780 = arith.addf %776, %779 : vector<2x512xf32>
    %781 = vector.extract_strided_slice %780 {offsets = [0, 0], sizes = [2, 128], strides = [1, 1]} : vector<2x512xf32> to vector<2x128xf32>
    %cst_345 = arith.constant 5.000000e-01 : f32
    %782 = vector.broadcast %cst_345 : f32 to vector<2x128xf32>
    %783 = arith.mulf %782, %781 : vector<2x128xf32>
    %784 = math.tanh %783 : vector<2x128xf32>
    %cst_346 = arith.constant 5.000000e-01 : f32
    %785 = vector.broadcast %cst_346 : f32 to vector<2x128xf32>
    %786 = arith.mulf %785, %784 : vector<2x128xf32>
    %cst_347 = arith.constant 5.000000e-01 : f32
    %787 = vector.broadcast %cst_347 : f32 to vector<2x128xf32>
    %788 = arith.addf %786, %787 : vector<2x128xf32>
    %789 = vector.extract_strided_slice %780 {offsets = [0, 128], sizes = [2, 128], strides = [1, 1]} : vector<2x512xf32> to vector<2x128xf32>
    %cst_348 = arith.constant 5.000000e-01 : f32
    %790 = vector.broadcast %cst_348 : f32 to vector<2x128xf32>
    %791 = arith.mulf %790, %789 : vector<2x128xf32>
    %792 = math.tanh %791 : vector<2x128xf32>
    %cst_349 = arith.constant 5.000000e-01 : f32
    %793 = vector.broadcast %cst_349 : f32 to vector<2x128xf32>
    %794 = arith.mulf %793, %792 : vector<2x128xf32>
    %cst_350 = arith.constant 5.000000e-01 : f32
    %795 = vector.broadcast %cst_350 : f32 to vector<2x128xf32>
    %796 = arith.addf %794, %795 : vector<2x128xf32>
    %797 = vector.extract_strided_slice %780 {offsets = [0, 256], sizes = [2, 128], strides = [1, 1]} : vector<2x512xf32> to vector<2x128xf32>
    %798 = math.tanh %797 : vector<2x128xf32>
    %799 = vector.extract_strided_slice %780 {offsets = [0, 384], sizes = [2, 128], strides = [1, 1]} : vector<2x512xf32> to vector<2x128xf32>
    %cst_351 = arith.constant 5.000000e-01 : f32
    %800 = vector.broadcast %cst_351 : f32 to vector<2x128xf32>
    %801 = arith.mulf %800, %799 : vector<2x128xf32>
    %802 = math.tanh %801 : vector<2x128xf32>
    %cst_352 = arith.constant 5.000000e-01 : f32
    %803 = vector.broadcast %cst_352 : f32 to vector<2x128xf32>
    %804 = arith.mulf %803, %802 : vector<2x128xf32>
    %cst_353 = arith.constant 5.000000e-01 : f32
    %805 = vector.broadcast %cst_353 : f32 to vector<2x128xf32>
    %806 = arith.addf %804, %805 : vector<2x128xf32>
    %807 = arith.mulf %796, %763 : vector<2x128xf32>
    %808 = arith.mulf %788, %798 : vector<2x128xf32>
    %809 = arith.addf %807, %808 : vector<2x128xf32>
    %810 = math.tanh %809 : vector<2x128xf32>
    %811 = arith.mulf %806, %810 : vector<2x128xf32>
    %812 = vector.extract_strided_slice %811 {offsets = [0, 0], sizes = [1, 64], strides = [1, 1]} : vector<2x128xf32> to vector<1x64xf32>
    %c16_354 = arith.constant 16 : index
    %c0_355 = arith.constant 0 : index
    %813 = vector.load %arg13[%c16_354, %c0_355] : memref<64x128xf32, #tpu.memory_space<vmem>>, vector<1x64xf32>
    tpu.vector_store %arg13[%c16_354, %c0_355], %812 {strides = array<i32>} : memref<64x128xf32, #tpu.memory_space<vmem>>, vector<1x64xf32>,
    %814 = vector.extract_strided_slice %811 {offsets = [0, 64], sizes = [1, 64], strides = [1, 1]} : vector<2x128xf32> to vector<1x64xf32>
    %c15_356 = arith.constant 15 : index
    %c64_357 = arith.constant 64 : index
    %815 = vector.load %arg13[%c15_356, %c64_357] : memref<64x128xf32, #tpu.memory_space<vmem>>, vector<1x64xf32>
    tpu.vector_store %arg13[%c15_356, %c64_357], %814 {strides = array<i32>} : memref<64x128xf32, #tpu.memory_space<vmem>>, vector<1x64xf32>,
    %816 = vector.extract_strided_slice %811 {offsets = [1, 0], sizes = [1, 64], strides = [1, 1]} : vector<2x128xf32> to vector<1x64xf32>
    %c48_358 = arith.constant 48 : index
    %c0_359 = arith.constant 0 : index
    %817 = vector.load %arg13[%c48_358, %c0_359] : memref<64x128xf32, #tpu.memory_space<vmem>>, vector<1x64xf32>
    tpu.vector_store %arg13[%c48_358, %c0_359], %816 {strides = array<i32>} : memref<64x128xf32, #tpu.memory_space<vmem>>, vector<1x64xf32>,
    %818 = vector.extract_strided_slice %811 {offsets = [1, 64], sizes = [1, 64], strides = [1, 1]} : vector<2x128xf32> to vector<1x64xf32>
    %c47_360 = arith.constant 47 : index
    %c64_361 = arith.constant 64 : index
    %819 = vector.load %arg13[%c47_360, %c64_361] : memref<64x128xf32, #tpu.memory_space<vmem>>, vector<1x64xf32>
    tpu.vector_store %arg13[%c47_360, %c64_361], %818 {strides = array<i32>} : memref<64x128xf32, #tpu.memory_space<vmem>>, vector<1x64xf32>,
    %820 = arith.truncf %811 : vector<2x128xf32> to vector<2x128xbf16>
    %c0_362 = arith.constant 0 : index
    %c0_363 = arith.constant 0 : index
    %821 = vector.load %arg6[%c0_362, %c0_363] : memref<128x512xbf16, #tpu.memory_space<vmem>>, vector<128x512xbf16>
    %cst_364 = arith.constant dense<0.000000e+00> : vector<2x512xf32>
    %822 = tpu.matmul %820, %821, %cst_364 {dimension_numbers = #tpu.dot_dimension_numbers<[1], [0], [0], [1], [0, 0, 1, 1], [], []>} : vector<2x128xbf16>, vector<128x512xbf16>, vector<2x512xf32> -> vector<2x512xf32>
    %c34_365 = arith.constant 34 : index
    %c0_366 = arith.constant 0 : index
    %823 = vector.load %arg12[%c34_365, %c0_366] : memref<64x512xf32, #tpu.memory_space<vmem>>, vector<2x512xf32>
    %c28_367 = arith.constant 28 : index
    %c0_368 = arith.constant 0 : index
    %824 = vector.load %arg12[%c28_367, %c0_368] : memref<64x512xf32, #tpu.memory_space<vmem>>, vector<2x512xf32>
    %825 = arith.select %35, %823, %824 : vector<2x512xi1>, vector<2x512xf32>
    %826 = arith.addf %822, %825 : vector<2x512xf32>
    %827 = vector.extract_strided_slice %826 {offsets = [0, 0], sizes = [2, 128], strides = [1, 1]} : vector<2x512xf32> to vector<2x128xf32>
    %cst_369 = arith.constant 5.000000e-01 : f32
    %828 = vector.broadcast %cst_369 : f32 to vector<2x128xf32>
    %829 = arith.mulf %828, %827 : vector<2x128xf32>
    %830 = math.tanh %829 : vector<2x128xf32>
    %cst_370 = arith.constant 5.000000e-01 : f32
    %831 = vector.broadcast %cst_370 : f32 to vector<2x128xf32>
    %832 = arith.mulf %831, %830 : vector<2x128xf32>
    %cst_371 = arith.constant 5.000000e-01 : f32
    %833 = vector.broadcast %cst_371 : f32 to vector<2x128xf32>
    %834 = arith.addf %832, %833 : vector<2x128xf32>
    %835 = vector.extract_strided_slice %826 {offsets = [0, 128], sizes = [2, 128], strides = [1, 1]} : vector<2x512xf32> to vector<2x128xf32>
    %cst_372 = arith.constant 5.000000e-01 : f32
    %836 = vector.broadcast %cst_372 : f32 to vector<2x128xf32>
    %837 = arith.mulf %836, %835 : vector<2x128xf32>
    %838 = math.tanh %837 : vector<2x128xf32>
    %cst_373 = arith.constant 5.000000e-01 : f32
    %839 = vector.broadcast %cst_373 : f32 to vector<2x128xf32>
    %840 = arith.mulf %839, %838 : vector<2x128xf32>
    %cst_374 = arith.constant 5.000000e-01 : f32
    %841 = vector.broadcast %cst_374 : f32 to vector<2x128xf32>
    %842 = arith.addf %840, %841 : vector<2x128xf32>
    %843 = vector.extract_strided_slice %826 {offsets = [0, 256], sizes = [2, 128], strides = [1, 1]} : vector<2x512xf32> to vector<2x128xf32>
    %844 = math.tanh %843 : vector<2x128xf32>
    %845 = vector.extract_strided_slice %826 {offsets = [0, 384], sizes = [2, 128], strides = [1, 1]} : vector<2x512xf32> to vector<2x128xf32>
    %cst_375 = arith.constant 5.000000e-01 : f32
    %846 = vector.broadcast %cst_375 : f32 to vector<2x128xf32>
    %847 = arith.mulf %846, %845 : vector<2x128xf32>
    %848 = math.tanh %847 : vector<2x128xf32>
    %cst_376 = arith.constant 5.000000e-01 : f32
    %849 = vector.broadcast %cst_376 : f32 to vector<2x128xf32>
    %850 = arith.mulf %849, %848 : vector<2x128xf32>
    %cst_377 = arith.constant 5.000000e-01 : f32
    %851 = vector.broadcast %cst_377 : f32 to vector<2x128xf32>
    %852 = arith.addf %850, %851 : vector<2x128xf32>
    %853 = arith.mulf %842, %809 : vector<2x128xf32>
    %854 = arith.mulf %834, %844 : vector<2x128xf32>
    %855 = arith.addf %853, %854 : vector<2x128xf32>
    %856 = math.tanh %855 : vector<2x128xf32>
    %857 = arith.mulf %852, %856 : vector<2x128xf32>
    %858 = vector.extract_strided_slice %857 {offsets = [0, 0], sizes = [1, 64], strides = [1, 1]} : vector<2x128xf32> to vector<1x64xf32>
    %c17_378 = arith.constant 17 : index
    %c0_379 = arith.constant 0 : index
    %859 = vector.load %arg13[%c17_378, %c0_379] : memref<64x128xf32, #tpu.memory_space<vmem>>, vector<1x64xf32>
    tpu.vector_store %arg13[%c17_378, %c0_379], %858 {strides = array<i32>} : memref<64x128xf32, #tpu.memory_space<vmem>>, vector<1x64xf32>,
    %860 = vector.extract_strided_slice %857 {offsets = [0, 64], sizes = [1, 64], strides = [1, 1]} : vector<2x128xf32> to vector<1x64xf32>
    %c14_380 = arith.constant 14 : index
    %c64_381 = arith.constant 64 : index
    %861 = vector.load %arg13[%c14_380, %c64_381] : memref<64x128xf32, #tpu.memory_space<vmem>>, vector<1x64xf32>
    tpu.vector_store %arg13[%c14_380, %c64_381], %860 {strides = array<i32>} : memref<64x128xf32, #tpu.memory_space<vmem>>, vector<1x64xf32>,
    %862 = vector.extract_strided_slice %857 {offsets = [1, 0], sizes = [1, 64], strides = [1, 1]} : vector<2x128xf32> to vector<1x64xf32>
    %c49_382 = arith.constant 49 : index
    %c0_383 = arith.constant 0 : index
    %863 = vector.load %arg13[%c49_382, %c0_383] : memref<64x128xf32, #tpu.memory_space<vmem>>, vector<1x64xf32>
    tpu.vector_store %arg13[%c49_382, %c0_383], %862 {strides = array<i32>} : memref<64x128xf32, #tpu.memory_space<vmem>>, vector<1x64xf32>,
    %864 = vector.extract_strided_slice %857 {offsets = [1, 64], sizes = [1, 64], strides = [1, 1]} : vector<2x128xf32> to vector<1x64xf32>
    %c46_384 = arith.constant 46 : index
    %c64_385 = arith.constant 64 : index
    %865 = vector.load %arg13[%c46_384, %c64_385] : memref<64x128xf32, #tpu.memory_space<vmem>>, vector<1x64xf32>
    tpu.vector_store %arg13[%c46_384, %c64_385], %864 {strides = array<i32>} : memref<64x128xf32, #tpu.memory_space<vmem>>, vector<1x64xf32>,
    %866 = arith.truncf %857 : vector<2x128xf32> to vector<2x128xbf16>
    %c0_386 = arith.constant 0 : index
    %c0_387 = arith.constant 0 : index
    %867 = vector.load %arg6[%c0_386, %c0_387] : memref<128x512xbf16, #tpu.memory_space<vmem>>, vector<128x512xbf16>
    %cst_388 = arith.constant dense<0.000000e+00> : vector<2x512xf32>
    %868 = tpu.matmul %866, %867, %cst_388 {dimension_numbers = #tpu.dot_dimension_numbers<[1], [0], [0], [1], [0, 0, 1, 1], [], []>} : vector<2x128xbf16>, vector<128x512xbf16>, vector<2x512xf32> -> vector<2x512xf32>
    %c36_389 = arith.constant 36 : index
    %c0_390 = arith.constant 0 : index
    %869 = vector.load %arg12[%c36_389, %c0_390] : memref<64x512xf32, #tpu.memory_space<vmem>>, vector<2x512xf32>
    %c26_391 = arith.constant 26 : index
    %c0_392 = arith.constant 0 : index
    %870 = vector.load %arg12[%c26_391, %c0_392] : memref<64x512xf32, #tpu.memory_space<vmem>>, vector<2x512xf32>
    %871 = arith.select %35, %869, %870 : vector<2x512xi1>, vector<2x512xf32>
    %872 = arith.addf %868, %871 : vector<2x512xf32>
    %873 = vector.extract_strided_slice %872 {offsets = [0, 0], sizes = [2, 128], strides = [1, 1]} : vector<2x512xf32> to vector<2x128xf32>
    %cst_393 = arith.constant 5.000000e-01 : f32
    %874 = vector.broadcast %cst_393 : f32 to vector<2x128xf32>
    %875 = arith.mulf %874, %873 : vector<2x128xf32>
    %876 = math.tanh %875 : vector<2x128xf32>
    %cst_394 = arith.constant 5.000000e-01 : f32
    %877 = vector.broadcast %cst_394 : f32 to vector<2x128xf32>
    %878 = arith.mulf %877, %876 : vector<2x128xf32>
    %cst_395 = arith.constant 5.000000e-01 : f32
    %879 = vector.broadcast %cst_395 : f32 to vector<2x128xf32>
    %880 = arith.addf %878, %879 : vector<2x128xf32>
    %881 = vector.extract_strided_slice %872 {offsets = [0, 128], sizes = [2, 128], strides = [1, 1]} : vector<2x512xf32> to vector<2x128xf32>
    %cst_396 = arith.constant 5.000000e-01 : f32
    %882 = vector.broadcast %cst_396 : f32 to vector<2x128xf32>
    %883 = arith.mulf %882, %881 : vector<2x128xf32>
    %884 = math.tanh %883 : vector<2x128xf32>
    %cst_397 = arith.constant 5.000000e-01 : f32
    %885 = vector.broadcast %cst_397 : f32 to vector<2x128xf32>
    %886 = arith.mulf %885, %884 : vector<2x128xf32>
    %cst_398 = arith.constant 5.000000e-01 : f32
    %887 = vector.broadcast %cst_398 : f32 to vector<2x128xf32>
    %888 = arith.addf %886, %887 : vector<2x128xf32>
    %889 = vector.extract_strided_slice %872 {offsets = [0, 256], sizes = [2, 128], strides = [1, 1]} : vector<2x512xf32> to vector<2x128xf32>
    %890 = math.tanh %889 : vector<2x128xf32>
    %891 = vector.extract_strided_slice %872 {offsets = [0, 384], sizes = [2, 128], strides = [1, 1]} : vector<2x512xf32> to vector<2x128xf32>
    %cst_399 = arith.constant 5.000000e-01 : f32
    %892 = vector.broadcast %cst_399 : f32 to vector<2x128xf32>
    %893 = arith.mulf %892, %891 : vector<2x128xf32>
    %894 = math.tanh %893 : vector<2x128xf32>
    %cst_400 = arith.constant 5.000000e-01 : f32
    %895 = vector.broadcast %cst_400 : f32 to vector<2x128xf32>
    %896 = arith.mulf %895, %894 : vector<2x128xf32>
    %cst_401 = arith.constant 5.000000e-01 : f32
    %897 = vector.broadcast %cst_401 : f32 to vector<2x128xf32>
    %898 = arith.addf %896, %897 : vector<2x128xf32>
    %899 = arith.mulf %888, %855 : vector<2x128xf32>
    %900 = arith.mulf %880, %890 : vector<2x128xf32>
    %901 = arith.addf %899, %900 : vector<2x128xf32>
    %902 = math.tanh %901 : vector<2x128xf32>
    %903 = arith.mulf %898, %902 : vector<2x128xf32>
    %904 = vector.extract_strided_slice %903 {offsets = [0, 0], sizes = [1, 64], strides = [1, 1]} : vector<2x128xf32> to vector<1x64xf32>
    %c18_402 = arith.constant 18 : index
    %c0_403 = arith.constant 0 : index
    %905 = vector.load %arg13[%c18_402, %c0_403] : memref<64x128xf32, #tpu.memory_space<vmem>>, vector<1x64xf32>
    tpu.vector_store %arg13[%c18_402, %c0_403], %904 {strides = array<i32>} : memref<64x128xf32, #tpu.memory_space<vmem>>, vector<1x64xf32>,
    %906 = vector.extract_strided_slice %903 {offsets = [0, 64], sizes = [1, 64], strides = [1, 1]} : vector<2x128xf32> to vector<1x64xf32>
    %c13_404 = arith.constant 13 : index
    %c64_405 = arith.constant 64 : index
    %907 = vector.load %arg13[%c13_404, %c64_405] : memref<64x128xf32, #tpu.memory_space<vmem>>, vector<1x64xf32>
    tpu.vector_store %arg13[%c13_404, %c64_405], %906 {strides = array<i32>} : memref<64x128xf32, #tpu.memory_space<vmem>>, vector<1x64xf32>,
    %908 = vector.extract_strided_slice %903 {offsets = [1, 0], sizes = [1, 64], strides = [1, 1]} : vector<2x128xf32> to vector<1x64xf32>
    %c50_406 = arith.constant 50 : index
    %c0_407 = arith.constant 0 : index
    %909 = vector.load %arg13[%c50_406, %c0_407] : memref<64x128xf32, #tpu.memory_space<vmem>>, vector<1x64xf32>
    tpu.vector_store %arg13[%c50_406, %c0_407], %908 {strides = array<i32>} : memref<64x128xf32, #tpu.memory_space<vmem>>, vector<1x64xf32>,
    %910 = vector.extract_strided_slice %903 {offsets = [1, 64], sizes = [1, 64], strides = [1, 1]} : vector<2x128xf32> to vector<1x64xf32>
    %c45_408 = arith.constant 45 : index
    %c64_409 = arith.constant 64 : index
    %911 = vector.load %arg13[%c45_408, %c64_409] : memref<64x128xf32, #tpu.memory_space<vmem>>, vector<1x64xf32>
    tpu.vector_store %arg13[%c45_408, %c64_409], %910 {strides = array<i32>} : memref<64x128xf32, #tpu.memory_space<vmem>>, vector<1x64xf32>,
    %912 = arith.truncf %903 : vector<2x128xf32> to vector<2x128xbf16>
    %c0_410 = arith.constant 0 : index
    %c0_411 = arith.constant 0 : index
    %913 = vector.load %arg6[%c0_410, %c0_411] : memref<128x512xbf16, #tpu.memory_space<vmem>>, vector<128x512xbf16>
    %cst_412 = arith.constant dense<0.000000e+00> : vector<2x512xf32>
    %914 = tpu.matmul %912, %913, %cst_412 {dimension_numbers = #tpu.dot_dimension_numbers<[1], [0], [0], [1], [0, 0, 1, 1], [], []>} : vector<2x128xbf16>, vector<128x512xbf16>, vector<2x512xf32> -> vector<2x512xf32>
    %c38_413 = arith.constant 38 : index
    %c0_414 = arith.constant 0 : index
    %915 = vector.load %arg12[%c38_413, %c0_414] : memref<64x512xf32, #tpu.memory_space<vmem>>, vector<2x512xf32>
    %c24_415 = arith.constant 24 : index
    %c0_416 = arith.constant 0 : index
    %916 = vector.load %arg12[%c24_415, %c0_416] : memref<64x512xf32, #tpu.memory_space<vmem>>, vector<2x512xf32>
    %917 = arith.select %35, %915, %916 : vector<2x512xi1>, vector<2x512xf32>
    %918 = arith.addf %914, %917 : vector<2x512xf32>
    %919 = vector.extract_strided_slice %918 {offsets = [0, 0], sizes = [2, 128], strides = [1, 1]} : vector<2x512xf32> to vector<2x128xf32>
    %cst_417 = arith.constant 5.000000e-01 : f32
    %920 = vector.broadcast %cst_417 : f32 to vector<2x128xf32>
    %921 = arith.mulf %920, %919 : vector<2x128xf32>
    %922 = math.tanh %921 : vector<2x128xf32>
    %cst_418 = arith.constant 5.000000e-01 : f32
    %923 = vector.broadcast %cst_418 : f32 to vector<2x128xf32>
    %924 = arith.mulf %923, %922 : vector<2x128xf32>
    %cst_419 = arith.constant 5.000000e-01 : f32
    %925 = vector.broadcast %cst_419 : f32 to vector<2x128xf32>
    %926 = arith.addf %924, %925 : vector<2x128xf32>
    %927 = vector.extract_strided_slice %918 {offsets = [0, 128], sizes = [2, 128], strides = [1, 1]} : vector<2x512xf32> to vector<2x128xf32>
    %cst_420 = arith.constant 5.000000e-01 : f32
    %928 = vector.broadcast %cst_420 : f32 to vector<2x128xf32>
    %929 = arith.mulf %928, %927 : vector<2x128xf32>
    %930 = math.tanh %929 : vector<2x128xf32>
    %cst_421 = arith.constant 5.000000e-01 : f32
    %931 = vector.broadcast %cst_421 : f32 to vector<2x128xf32>
    %932 = arith.mulf %931, %930 : vector<2x128xf32>
    %cst_422 = arith.constant 5.000000e-01 : f32
    %933 = vector.broadcast %cst_422 : f32 to vector<2x128xf32>
    %934 = arith.addf %932, %933 : vector<2x128xf32>
    %935 = vector.extract_strided_slice %918 {offsets = [0, 256], sizes = [2, 128], strides = [1, 1]} : vector<2x512xf32> to vector<2x128xf32>
    %936 = math.tanh %935 : vector<2x128xf32>
    %937 = vector.extract_strided_slice %918 {offsets = [0, 384], sizes = [2, 128], strides = [1, 1]} : vector<2x512xf32> to vector<2x128xf32>
    %cst_423 = arith.constant 5.000000e-01 : f32
    %938 = vector.broadcast %cst_423 : f32 to vector<2x128xf32>
    %939 = arith.mulf %938, %937 : vector<2x128xf32>
    %940 = math.tanh %939 : vector<2x128xf32>
    %cst_424 = arith.constant 5.000000e-01 : f32
    %941 = vector.broadcast %cst_424 : f32 to vector<2x128xf32>
    %942 = arith.mulf %941, %940 : vector<2x128xf32>
    %cst_425 = arith.constant 5.000000e-01 : f32
    %943 = vector.broadcast %cst_425 : f32 to vector<2x128xf32>
    %944 = arith.addf %942, %943 : vector<2x128xf32>
    %945 = arith.mulf %934, %901 : vector<2x128xf32>
    %946 = arith.mulf %926, %936 : vector<2x128xf32>
    %947 = arith.addf %945, %946 : vector<2x128xf32>
    %948 = math.tanh %947 : vector<2x128xf32>
    %949 = arith.mulf %944, %948 : vector<2x128xf32>
    %950 = vector.extract_strided_slice %949 {offsets = [0, 0], sizes = [1, 64], strides = [1, 1]} : vector<2x128xf32> to vector<1x64xf32>
    %c19_426 = arith.constant 19 : index
    %c0_427 = arith.constant 0 : index
    %951 = vector.load %arg13[%c19_426, %c0_427] : memref<64x128xf32, #tpu.memory_space<vmem>>, vector<1x64xf32>
    tpu.vector_store %arg13[%c19_426, %c0_427], %950 {strides = array<i32>} : memref<64x128xf32, #tpu.memory_space<vmem>>, vector<1x64xf32>,
    %952 = vector.extract_strided_slice %949 {offsets = [0, 64], sizes = [1, 64], strides = [1, 1]} : vector<2x128xf32> to vector<1x64xf32>
    %c12_428 = arith.constant 12 : index
    %c64_429 = arith.constant 64 : index
    %953 = vector.load %arg13[%c12_428, %c64_429] : memref<64x128xf32, #tpu.memory_space<vmem>>, vector<1x64xf32>
    tpu.vector_store %arg13[%c12_428, %c64_429], %952 {strides = array<i32>} : memref<64x128xf32, #tpu.memory_space<vmem>>, vector<1x64xf32>,
    %954 = vector.extract_strided_slice %949 {offsets = [1, 0], sizes = [1, 64], strides = [1, 1]} : vector<2x128xf32> to vector<1x64xf32>
    %c51_430 = arith.constant 51 : index
    %c0_431 = arith.constant 0 : index
    %955 = vector.load %arg13[%c51_430, %c0_431] : memref<64x128xf32, #tpu.memory_space<vmem>>, vector<1x64xf32>
    tpu.vector_store %arg13[%c51_430, %c0_431], %954 {strides = array<i32>} : memref<64x128xf32, #tpu.memory_space<vmem>>, vector<1x64xf32>,
    %956 = vector.extract_strided_slice %949 {offsets = [1, 64], sizes = [1, 64], strides = [1, 1]} : vector<2x128xf32> to vector<1x64xf32>
    %c44_432 = arith.constant 44 : index
    %c64_433 = arith.constant 64 : index
    %957 = vector.load %arg13[%c44_432, %c64_433] : memref<64x128xf32, #tpu.memory_space<vmem>>, vector<1x64xf32>
    tpu.vector_store %arg13[%c44_432, %c64_433], %956 {strides = array<i32>} : memref<64x128xf32, #tpu.memory_space<vmem>>, vector<1x64xf32>,
    %958 = arith.truncf %949 : vector<2x128xf32> to vector<2x128xbf16>
    %c0_434 = arith.constant 0 : index
    %c0_435 = arith.constant 0 : index
    %959 = vector.load %arg6[%c0_434, %c0_435] : memref<128x512xbf16, #tpu.memory_space<vmem>>, vector<128x512xbf16>
    %cst_436 = arith.constant dense<0.000000e+00> : vector<2x512xf32>
    %960 = tpu.matmul %958, %959, %cst_436 {dimension_numbers = #tpu.dot_dimension_numbers<[1], [0], [0], [1], [0, 0, 1, 1], [], []>} : vector<2x128xbf16>, vector<128x512xbf16>, vector<2x512xf32> -> vector<2x512xf32>
    %c40_437 = arith.constant 40 : index
    %c0_438 = arith.constant 0 : index
    %961 = vector.load %arg12[%c40_437, %c0_438] : memref<64x512xf32, #tpu.memory_space<vmem>>, vector<2x512xf32>
    %c22_439 = arith.constant 22 : index
    %c0_440 = arith.constant 0 : index
    %962 = vector.load %arg12[%c22_439, %c0_440] : memref<64x512xf32, #tpu.memory_space<vmem>>, vector<2x512xf32>
    %963 = arith.select %35, %961, %962 : vector<2x512xi1>, vector<2x512xf32>
    %964 = arith.addf %960, %963 : vector<2x512xf32>
    %965 = vector.extract_strided_slice %964 {offsets = [0, 0], sizes = [2, 128], strides = [1, 1]} : vector<2x512xf32> to vector<2x128xf32>
    %cst_441 = arith.constant 5.000000e-01 : f32
    %966 = vector.broadcast %cst_441 : f32 to vector<2x128xf32>
    %967 = arith.mulf %966, %965 : vector<2x128xf32>
    %968 = math.tanh %967 : vector<2x128xf32>
    %cst_442 = arith.constant 5.000000e-01 : f32
    %969 = vector.broadcast %cst_442 : f32 to vector<2x128xf32>
    %970 = arith.mulf %969, %968 : vector<2x128xf32>
    %cst_443 = arith.constant 5.000000e-01 : f32
    %971 = vector.broadcast %cst_443 : f32 to vector<2x128xf32>
    %972 = arith.addf %970, %971 : vector<2x128xf32>
    %973 = vector.extract_strided_slice %964 {offsets = [0, 128], sizes = [2, 128], strides = [1, 1]} : vector<2x512xf32> to vector<2x128xf32>
    %cst_444 = arith.constant 5.000000e-01 : f32
    %974 = vector.broadcast %cst_444 : f32 to vector<2x128xf32>
    %975 = arith.mulf %974, %973 : vector<2x128xf32>
    %976 = math.tanh %975 : vector<2x128xf32>
    %cst_445 = arith.constant 5.000000e-01 : f32
    %977 = vector.broadcast %cst_445 : f32 to vector<2x128xf32>
    %978 = arith.mulf %977, %976 : vector<2x128xf32>
    %cst_446 = arith.constant 5.000000e-01 : f32
    %979 = vector.broadcast %cst_446 : f32 to vector<2x128xf32>
    %980 = arith.addf %978, %979 : vector<2x128xf32>
    %981 = vector.extract_strided_slice %964 {offsets = [0, 256], sizes = [2, 128], strides = [1, 1]} : vector<2x512xf32> to vector<2x128xf32>
    %982 = math.tanh %981 : vector<2x128xf32>
    %983 = vector.extract_strided_slice %964 {offsets = [0, 384], sizes = [2, 128], strides = [1, 1]} : vector<2x512xf32> to vector<2x128xf32>
    %cst_447 = arith.constant 5.000000e-01 : f32
    %984 = vector.broadcast %cst_447 : f32 to vector<2x128xf32>
    %985 = arith.mulf %984, %983 : vector<2x128xf32>
    %986 = math.tanh %985 : vector<2x128xf32>
    %cst_448 = arith.constant 5.000000e-01 : f32
    %987 = vector.broadcast %cst_448 : f32 to vector<2x128xf32>
    %988 = arith.mulf %987, %986 : vector<2x128xf32>
    %cst_449 = arith.constant 5.000000e-01 : f32
    %989 = vector.broadcast %cst_449 : f32 to vector<2x128xf32>
    %990 = arith.addf %988, %989 : vector<2x128xf32>
    %991 = arith.mulf %980, %947 : vector<2x128xf32>
    %992 = arith.mulf %972, %982 : vector<2x128xf32>
    %993 = arith.addf %991, %992 : vector<2x128xf32>
    %994 = math.tanh %993 : vector<2x128xf32>
    %995 = arith.mulf %990, %994 : vector<2x128xf32>
    %996 = vector.extract_strided_slice %995 {offsets = [0, 0], sizes = [1, 64], strides = [1, 1]} : vector<2x128xf32> to vector<1x64xf32>
    %c20_450 = arith.constant 20 : index
    %c0_451 = arith.constant 0 : index
    %997 = vector.load %arg13[%c20_450, %c0_451] : memref<64x128xf32, #tpu.memory_space<vmem>>, vector<1x64xf32>
    tpu.vector_store %arg13[%c20_450, %c0_451], %996 {strides = array<i32>} : memref<64x128xf32, #tpu.memory_space<vmem>>, vector<1x64xf32>,
    %998 = vector.extract_strided_slice %995 {offsets = [0, 64], sizes = [1, 64], strides = [1, 1]} : vector<2x128xf32> to vector<1x64xf32>
    %c11_452 = arith.constant 11 : index
    %c64_453 = arith.constant 64 : index
    %999 = vector.load %arg13[%c11_452, %c64_453] : memref<64x128xf32, #tpu.memory_space<vmem>>, vector<1x64xf32>
    tpu.vector_store %arg13[%c11_452, %c64_453], %998 {strides = array<i32>} : memref<64x128xf32, #tpu.memory_space<vmem>>, vector<1x64xf32>,
    %1000 = vector.extract_strided_slice %995 {offsets = [1, 0], sizes = [1, 64], strides = [1, 1]} : vector<2x128xf32> to vector<1x64xf32>
    %c52_454 = arith.constant 52 : index
    %c0_455 = arith.constant 0 : index
    %1001 = vector.load %arg13[%c52_454, %c0_455] : memref<64x128xf32, #tpu.memory_space<vmem>>, vector<1x64xf32>
    tpu.vector_store %arg13[%c52_454, %c0_455], %1000 {strides = array<i32>} : memref<64x128xf32, #tpu.memory_space<vmem>>, vector<1x64xf32>,
    %1002 = vector.extract_strided_slice %995 {offsets = [1, 64], sizes = [1, 64], strides = [1, 1]} : vector<2x128xf32> to vector<1x64xf32>
    %c43_456 = arith.constant 43 : index
    %c64_457 = arith.constant 64 : index
    %1003 = vector.load %arg13[%c43_456, %c64_457] : memref<64x128xf32, #tpu.memory_space<vmem>>, vector<1x64xf32>
    tpu.vector_store %arg13[%c43_456, %c64_457], %1002 {strides = array<i32>} : memref<64x128xf32, #tpu.memory_space<vmem>>, vector<1x64xf32>,
    %1004 = arith.truncf %995 : vector<2x128xf32> to vector<2x128xbf16>
    %c0_458 = arith.constant 0 : index
    %c0_459 = arith.constant 0 : index
    %1005 = vector.load %arg6[%c0_458, %c0_459] : memref<128x512xbf16, #tpu.memory_space<vmem>>, vector<128x512xbf16>
    %cst_460 = arith.constant dense<0.000000e+00> : vector<2x512xf32>
    %1006 = tpu.matmul %1004, %1005, %cst_460 {dimension_numbers = #tpu.dot_dimension_numbers<[1], [0], [0], [1], [0, 0, 1, 1], [], []>} : vector<2x128xbf16>, vector<128x512xbf16>, vector<2x512xf32> -> vector<2x512xf32>
    %c42_461 = arith.constant 42 : index
    %c0_462 = arith.constant 0 : index
    %1007 = vector.load %arg12[%c42_461, %c0_462] : memref<64x512xf32, #tpu.memory_space<vmem>>, vector<2x512xf32>
    %c20_463 = arith.constant 20 : index
    %c0_464 = arith.constant 0 : index
    %1008 = vector.load %arg12[%c20_463, %c0_464] : memref<64x512xf32, #tpu.memory_space<vmem>>, vector<2x512xf32>
    %1009 = arith.select %35, %1007, %1008 : vector<2x512xi1>, vector<2x512xf32>
    %1010 = arith.addf %1006, %1009 : vector<2x512xf32>
    %1011 = vector.extract_strided_slice %1010 {offsets = [0, 0], sizes = [2, 128], strides = [1, 1]} : vector<2x512xf32> to vector<2x128xf32>
    %cst_465 = arith.constant 5.000000e-01 : f32
    %1012 = vector.broadcast %cst_465 : f32 to vector<2x128xf32>
    %1013 = arith.mulf %1012, %1011 : vector<2x128xf32>
    %1014 = math.tanh %1013 : vector<2x128xf32>
    %cst_466 = arith.constant 5.000000e-01 : f32
    %1015 = vector.broadcast %cst_466 : f32 to vector<2x128xf32>
    %1016 = arith.mulf %1015, %1014 : vector<2x128xf32>
    %cst_467 = arith.constant 5.000000e-01 : f32
    %1017 = vector.broadcast %cst_467 : f32 to vector<2x128xf32>
    %1018 = arith.addf %1016, %1017 : vector<2x128xf32>
    %1019 = vector.extract_strided_slice %1010 {offsets = [0, 128], sizes = [2, 128], strides = [1, 1]} : vector<2x512xf32> to vector<2x128xf32>
    %cst_468 = arith.constant 5.000000e-01 : f32
    %1020 = vector.broadcast %cst_468 : f32 to vector<2x128xf32>
    %1021 = arith.mulf %1020, %1019 : vector<2x128xf32>
    %1022 = math.tanh %1021 : vector<2x128xf32>
    %cst_469 = arith.constant 5.000000e-01 : f32
    %1023 = vector.broadcast %cst_469 : f32 to vector<2x128xf32>
    %1024 = arith.mulf %1023, %1022 : vector<2x128xf32>
    %cst_470 = arith.constant 5.000000e-01 : f32
    %1025 = vector.broadcast %cst_470 : f32 to vector<2x128xf32>
    %1026 = arith.addf %1024, %1025 : vector<2x128xf32>
    %1027 = vector.extract_strided_slice %1010 {offsets = [0, 256], sizes = [2, 128], strides = [1, 1]} : vector<2x512xf32> to vector<2x128xf32>
    %1028 = math.tanh %1027 : vector<2x128xf32>
    %1029 = vector.extract_strided_slice %1010 {offsets = [0, 384], sizes = [2, 128], strides = [1, 1]} : vector<2x512xf32> to vector<2x128xf32>
    %cst_471 = arith.constant 5.000000e-01 : f32
    %1030 = vector.broadcast %cst_471 : f32 to vector<2x128xf32>
    %1031 = arith.mulf %1030, %1029 : vector<2x128xf32>
    %1032 = math.tanh %1031 : vector<2x128xf32>
    %cst_472 = arith.constant 5.000000e-01 : f32
    %1033 = vector.broadcast %cst_472 : f32 to vector<2x128xf32>
    %1034 = arith.mulf %1033, %1032 : vector<2x128xf32>
    %cst_473 = arith.constant 5.000000e-01 : f32
    %1035 = vector.broadcast %cst_473 : f32 to vector<2x128xf32>
    %1036 = arith.addf %1034, %1035 : vector<2x128xf32>
    %1037 = arith.mulf %1026, %993 : vector<2x128xf32>
    %1038 = arith.mulf %1018, %1028 : vector<2x128xf32>
    %1039 = arith.addf %1037, %1038 : vector<2x128xf32>
    %1040 = math.tanh %1039 : vector<2x128xf32>
    %1041 = arith.mulf %1036, %1040 : vector<2x128xf32>
    %1042 = vector.extract_strided_slice %1041 {offsets = [0, 0], sizes = [1, 64], strides = [1, 1]} : vector<2x128xf32> to vector<1x64xf32>
    %c21_474 = arith.constant 21 : index
    %c0_475 = arith.constant 0 : index
    %1043 = vector.load %arg13[%c21_474, %c0_475] : memref<64x128xf32, #tpu.memory_space<vmem>>, vector<1x64xf32>
    tpu.vector_store %arg13[%c21_474, %c0_475], %1042 {strides = array<i32>} : memref<64x128xf32, #tpu.memory_space<vmem>>, vector<1x64xf32>,
    %1044 = vector.extract_strided_slice %1041 {offsets = [0, 64], sizes = [1, 64], strides = [1, 1]} : vector<2x128xf32> to vector<1x64xf32>
    %c10_476 = arith.constant 10 : index
    %c64_477 = arith.constant 64 : index
    %1045 = vector.load %arg13[%c10_476, %c64_477] : memref<64x128xf32, #tpu.memory_space<vmem>>, vector<1x64xf32>
    tpu.vector_store %arg13[%c10_476, %c64_477], %1044 {strides = array<i32>} : memref<64x128xf32, #tpu.memory_space<vmem>>, vector<1x64xf32>,
    %1046 = vector.extract_strided_slice %1041 {offsets = [1, 0], sizes = [1, 64], strides = [1, 1]} : vector<2x128xf32> to vector<1x64xf32>
    %c53_478 = arith.constant 53 : index
    %c0_479 = arith.constant 0 : index
    %1047 = vector.load %arg13[%c53_478, %c0_479] : memref<64x128xf32, #tpu.memory_space<vmem>>, vector<1x64xf32>
    tpu.vector_store %arg13[%c53_478, %c0_479], %1046 {strides = array<i32>} : memref<64x128xf32, #tpu.memory_space<vmem>>, vector<1x64xf32>,
    %1048 = vector.extract_strided_slice %1041 {offsets = [1, 64], sizes = [1, 64], strides = [1, 1]} : vector<2x128xf32> to vector<1x64xf32>
    %c42_480 = arith.constant 42 : index
    %c64_481 = arith.constant 64 : index
    %1049 = vector.load %arg13[%c42_480, %c64_481] : memref<64x128xf32, #tpu.memory_space<vmem>>, vector<1x64xf32>
    tpu.vector_store %arg13[%c42_480, %c64_481], %1048 {strides = array<i32>} : memref<64x128xf32, #tpu.memory_space<vmem>>, vector<1x64xf32>,
    %1050 = arith.truncf %1041 : vector<2x128xf32> to vector<2x128xbf16>
    %c0_482 = arith.constant 0 : index
    %c0_483 = arith.constant 0 : index
    %1051 = vector.load %arg6[%c0_482, %c0_483] : memref<128x512xbf16, #tpu.memory_space<vmem>>, vector<128x512xbf16>
    %cst_484 = arith.constant dense<0.000000e+00> : vector<2x512xf32>
    %1052 = tpu.matmul %1050, %1051, %cst_484 {dimension_numbers = #tpu.dot_dimension_numbers<[1], [0], [0], [1], [0, 0, 1, 1], [], []>} : vector<2x128xbf16>, vector<128x512xbf16>, vector<2x512xf32> -> vector<2x512xf32>
    %c44_485 = arith.constant 44 : index
    %c0_486 = arith.constant 0 : index
    %1053 = vector.load %arg12[%c44_485, %c0_486] : memref<64x512xf32, #tpu.memory_space<vmem>>, vector<2x512xf32>
    %c18_487 = arith.constant 18 : index
    %c0_488 = arith.constant 0 : index
    %1054 = vector.load %arg12[%c18_487, %c0_488] : memref<64x512xf32, #tpu.memory_space<vmem>>, vector<2x512xf32>
    %1055 = arith.select %35, %1053, %1054 : vector<2x512xi1>, vector<2x512xf32>
    %1056 = arith.addf %1052, %1055 : vector<2x512xf32>
    %1057 = vector.extract_strided_slice %1056 {offsets = [0, 0], sizes = [2, 128], strides = [1, 1]} : vector<2x512xf32> to vector<2x128xf32>
    %cst_489 = arith.constant 5.000000e-01 : f32
    %1058 = vector.broadcast %cst_489 : f32 to vector<2x128xf32>
    %1059 = arith.mulf %1058, %1057 : vector<2x128xf32>
    %1060 = math.tanh %1059 : vector<2x128xf32>
    %cst_490 = arith.constant 5.000000e-01 : f32
    %1061 = vector.broadcast %cst_490 : f32 to vector<2x128xf32>
    %1062 = arith.mulf %1061, %1060 : vector<2x128xf32>
    %cst_491 = arith.constant 5.000000e-01 : f32
    %1063 = vector.broadcast %cst_491 : f32 to vector<2x128xf32>
    %1064 = arith.addf %1062, %1063 : vector<2x128xf32>
    %1065 = vector.extract_strided_slice %1056 {offsets = [0, 128], sizes = [2, 128], strides = [1, 1]} : vector<2x512xf32> to vector<2x128xf32>
    %cst_492 = arith.constant 5.000000e-01 : f32
    %1066 = vector.broadcast %cst_492 : f32 to vector<2x128xf32>
    %1067 = arith.mulf %1066, %1065 : vector<2x128xf32>
    %1068 = math.tanh %1067 : vector<2x128xf32>
    %cst_493 = arith.constant 5.000000e-01 : f32
    %1069 = vector.broadcast %cst_493 : f32 to vector<2x128xf32>
    %1070 = arith.mulf %1069, %1068 : vector<2x128xf32>
    %cst_494 = arith.constant 5.000000e-01 : f32
    %1071 = vector.broadcast %cst_494 : f32 to vector<2x128xf32>
    %1072 = arith.addf %1070, %1071 : vector<2x128xf32>
    %1073 = vector.extract_strided_slice %1056 {offsets = [0, 256], sizes = [2, 128], strides = [1, 1]} : vector<2x512xf32> to vector<2x128xf32>
    %1074 = math.tanh %1073 : vector<2x128xf32>
    %1075 = vector.extract_strided_slice %1056 {offsets = [0, 384], sizes = [2, 128], strides = [1, 1]} : vector<2x512xf32> to vector<2x128xf32>
    %cst_495 = arith.constant 5.000000e-01 : f32
    %1076 = vector.broadcast %cst_495 : f32 to vector<2x128xf32>
    %1077 = arith.mulf %1076, %1075 : vector<2x128xf32>
    %1078 = math.tanh %1077 : vector<2x128xf32>
    %cst_496 = arith.constant 5.000000e-01 : f32
    %1079 = vector.broadcast %cst_496 : f32 to vector<2x128xf32>
    %1080 = arith.mulf %1079, %1078 : vector<2x128xf32>
    %cst_497 = arith.constant 5.000000e-01 : f32
    %1081 = vector.broadcast %cst_497 : f32 to vector<2x128xf32>
    %1082 = arith.addf %1080, %1081 : vector<2x128xf32>
    %1083 = arith.mulf %1072, %1039 : vector<2x128xf32>
    %1084 = arith.mulf %1064, %1074 : vector<2x128xf32>
    %1085 = arith.addf %1083, %1084 : vector<2x128xf32>
    %1086 = math.tanh %1085 : vector<2x128xf32>
    %1087 = arith.mulf %1082, %1086 : vector<2x128xf32>
    %1088 = vector.extract_strided_slice %1087 {offsets = [0, 0], sizes = [1, 64], strides = [1, 1]} : vector<2x128xf32> to vector<1x64xf32>
    %c22_498 = arith.constant 22 : index
    %c0_499 = arith.constant 0 : index
    %1089 = vector.load %arg13[%c22_498, %c0_499] : memref<64x128xf32, #tpu.memory_space<vmem>>, vector<1x64xf32>
    tpu.vector_store %arg13[%c22_498, %c0_499], %1088 {strides = array<i32>} : memref<64x128xf32, #tpu.memory_space<vmem>>, vector<1x64xf32>,
    %1090 = vector.extract_strided_slice %1087 {offsets = [0, 64], sizes = [1, 64], strides = [1, 1]} : vector<2x128xf32> to vector<1x64xf32>
    %c9_500 = arith.constant 9 : index
    %c64_501 = arith.constant 64 : index
    %1091 = vector.load %arg13[%c9_500, %c64_501] : memref<64x128xf32, #tpu.memory_space<vmem>>, vector<1x64xf32>
    tpu.vector_store %arg13[%c9_500, %c64_501], %1090 {strides = array<i32>} : memref<64x128xf32, #tpu.memory_space<vmem>>, vector<1x64xf32>,
    %1092 = vector.extract_strided_slice %1087 {offsets = [1, 0], sizes = [1, 64], strides = [1, 1]} : vector<2x128xf32> to vector<1x64xf32>
    %c54_502 = arith.constant 54 : index
    %c0_503 = arith.constant 0 : index
    %1093 = vector.load %arg13[%c54_502, %c0_503] : memref<64x128xf32, #tpu.memory_space<vmem>>, vector<1x64xf32>
    tpu.vector_store %arg13[%c54_502, %c0_503], %1092 {strides = array<i32>} : memref<64x128xf32, #tpu.memory_space<vmem>>, vector<1x64xf32>,
    %1094 = vector.extract_strided_slice %1087 {offsets = [1, 64], sizes = [1, 64], strides = [1, 1]} : vector<2x128xf32> to vector<1x64xf32>
    %c41_504 = arith.constant 41 : index
    %c64_505 = arith.constant 64 : index
    %1095 = vector.load %arg13[%c41_504, %c64_505] : memref<64x128xf32, #tpu.memory_space<vmem>>, vector<1x64xf32>
    tpu.vector_store %arg13[%c41_504, %c64_505], %1094 {strides = array<i32>} : memref<64x128xf32, #tpu.memory_space<vmem>>, vector<1x64xf32>,
    %1096 = arith.truncf %1087 : vector<2x128xf32> to vector<2x128xbf16>
    %c0_506 = arith.constant 0 : index
    %c0_507 = arith.constant 0 : index
    %1097 = vector.load %arg6[%c0_506, %c0_507] : memref<128x512xbf16, #tpu.memory_space<vmem>>, vector<128x512xbf16>
    %cst_508 = arith.constant dense<0.000000e+00> : vector<2x512xf32>
    %1098 = tpu.matmul %1096, %1097, %cst_508 {dimension_numbers = #tpu.dot_dimension_numbers<[1], [0], [0], [1], [0, 0, 1, 1], [], []>} : vector<2x128xbf16>, vector<128x512xbf16>, vector<2x512xf32> -> vector<2x512xf32>
    %c46_509 = arith.constant 46 : index
    %c0_510 = arith.constant 0 : index
    %1099 = vector.load %arg12[%c46_509, %c0_510] : memref<64x512xf32, #tpu.memory_space<vmem>>, vector<2x512xf32>
    %c16_511 = arith.constant 16 : index
    %c0_512 = arith.constant 0 : index
    %1100 = vector.load %arg12[%c16_511, %c0_512] : memref<64x512xf32, #tpu.memory_space<vmem>>, vector<2x512xf32>
    %1101 = arith.select %35, %1099, %1100 : vector<2x512xi1>, vector<2x512xf32>
    %1102 = arith.addf %1098, %1101 : vector<2x512xf32>
    %1103 = vector.extract_strided_slice %1102 {offsets = [0, 0], sizes = [2, 128], strides = [1, 1]} : vector<2x512xf32> to vector<2x128xf32>
    %cst_513 = arith.constant 5.000000e-01 : f32
    %1104 = vector.broadcast %cst_513 : f32 to vector<2x128xf32>
    %1105 = arith.mulf %1104, %1103 : vector<2x128xf32>
    %1106 = math.tanh %1105 : vector<2x128xf32>
    %cst_514 = arith.constant 5.000000e-01 : f32
    %1107 = vector.broadcast %cst_514 : f32 to vector<2x128xf32>
    %1108 = arith.mulf %1107, %1106 : vector<2x128xf32>
    %cst_515 = arith.constant 5.000000e-01 : f32
    %1109 = vector.broadcast %cst_515 : f32 to vector<2x128xf32>
    %1110 = arith.addf %1108, %1109 : vector<2x128xf32>
    %1111 = vector.extract_strided_slice %1102 {offsets = [0, 128], sizes = [2, 128], strides = [1, 1]} : vector<2x512xf32> to vector<2x128xf32>
    %cst_516 = arith.constant 5.000000e-01 : f32
    %1112 = vector.broadcast %cst_516 : f32 to vector<2x128xf32>
    %1113 = arith.mulf %1112, %1111 : vector<2x128xf32>
    %1114 = math.tanh %1113 : vector<2x128xf32>
    %cst_517 = arith.constant 5.000000e-01 : f32
    %1115 = vector.broadcast %cst_517 : f32 to vector<2x128xf32>
    %1116 = arith.mulf %1115, %1114 : vector<2x128xf32>
    %cst_518 = arith.constant 5.000000e-01 : f32
    %1117 = vector.broadcast %cst_518 : f32 to vector<2x128xf32>
    %1118 = arith.addf %1116, %1117 : vector<2x128xf32>
    %1119 = vector.extract_strided_slice %1102 {offsets = [0, 256], sizes = [2, 128], strides = [1, 1]} : vector<2x512xf32> to vector<2x128xf32>
    %1120 = math.tanh %1119 : vector<2x128xf32>
    %1121 = vector.extract_strided_slice %1102 {offsets = [0, 384], sizes = [2, 128], strides = [1, 1]} : vector<2x512xf32> to vector<2x128xf32>
    %cst_519 = arith.constant 5.000000e-01 : f32
    %1122 = vector.broadcast %cst_519 : f32 to vector<2x128xf32>
    %1123 = arith.mulf %1122, %1121 : vector<2x128xf32>
    %1124 = math.tanh %1123 : vector<2x128xf32>
    %cst_520 = arith.constant 5.000000e-01 : f32
    %1125 = vector.broadcast %cst_520 : f32 to vector<2x128xf32>
    %1126 = arith.mulf %1125, %1124 : vector<2x128xf32>
    %cst_521 = arith.constant 5.000000e-01 : f32
    %1127 = vector.broadcast %cst_521 : f32 to vector<2x128xf32>
    %1128 = arith.addf %1126, %1127 : vector<2x128xf32>
    %1129 = arith.mulf %1118, %1085 : vector<2x128xf32>
    %1130 = arith.mulf %1110, %1120 : vector<2x128xf32>
    %1131 = arith.addf %1129, %1130 : vector<2x128xf32>
    %1132 = math.tanh %1131 : vector<2x128xf32>
    %1133 = arith.mulf %1128, %1132 : vector<2x128xf32>
    %1134 = vector.extract_strided_slice %1133 {offsets = [0, 0], sizes = [1, 64], strides = [1, 1]} : vector<2x128xf32> to vector<1x64xf32>
    %c23_522 = arith.constant 23 : index
    %c0_523 = arith.constant 0 : index
    %1135 = vector.load %arg13[%c23_522, %c0_523] : memref<64x128xf32, #tpu.memory_space<vmem>>, vector<1x64xf32>
    tpu.vector_store %arg13[%c23_522, %c0_523], %1134 {strides = array<i32>} : memref<64x128xf32, #tpu.memory_space<vmem>>, vector<1x64xf32>,
    %1136 = vector.extract_strided_slice %1133 {offsets = [0, 64], sizes = [1, 64], strides = [1, 1]} : vector<2x128xf32> to vector<1x64xf32>
    %c8_524 = arith.constant 8 : index
    %c64_525 = arith.constant 64 : index
    %1137 = vector.load %arg13[%c8_524, %c64_525] : memref<64x128xf32, #tpu.memory_space<vmem>>, vector<1x64xf32>
    tpu.vector_store %arg13[%c8_524, %c64_525], %1136 {strides = array<i32>} : memref<64x128xf32, #tpu.memory_space<vmem>>, vector<1x64xf32>,
    %1138 = vector.extract_strided_slice %1133 {offsets = [1, 0], sizes = [1, 64], strides = [1, 1]} : vector<2x128xf32> to vector<1x64xf32>
    %c55_526 = arith.constant 55 : index
    %c0_527 = arith.constant 0 : index
    %1139 = vector.load %arg13[%c55_526, %c0_527] : memref<64x128xf32, #tpu.memory_space<vmem>>, vector<1x64xf32>
    tpu.vector_store %arg13[%c55_526, %c0_527], %1138 {strides = array<i32>} : memref<64x128xf32, #tpu.memory_space<vmem>>, vector<1x64xf32>,
    %1140 = vector.extract_strided_slice %1133 {offsets = [1, 64], sizes = [1, 64], strides = [1, 1]} : vector<2x128xf32> to vector<1x64xf32>
    %c40_528 = arith.constant 40 : index
    %c64_529 = arith.constant 64 : index
    %1141 = vector.load %arg13[%c40_528, %c64_529] : memref<64x128xf32, #tpu.memory_space<vmem>>, vector<1x64xf32>
    tpu.vector_store %arg13[%c40_528, %c64_529], %1140 {strides = array<i32>} : memref<64x128xf32, #tpu.memory_space<vmem>>, vector<1x64xf32>,
    %1142 = arith.truncf %1133 : vector<2x128xf32> to vector<2x128xbf16>
    %c0_530 = arith.constant 0 : index
    %c0_531 = arith.constant 0 : index
    %1143 = vector.load %arg6[%c0_530, %c0_531] : memref<128x512xbf16, #tpu.memory_space<vmem>>, vector<128x512xbf16>
    %cst_532 = arith.constant dense<0.000000e+00> : vector<2x512xf32>
    %1144 = tpu.matmul %1142, %1143, %cst_532 {dimension_numbers = #tpu.dot_dimension_numbers<[1], [0], [0], [1], [0, 0, 1, 1], [], []>} : vector<2x128xbf16>, vector<128x512xbf16>, vector<2x512xf32> -> vector<2x512xf32>
    %c48_533 = arith.constant 48 : index
    %c0_534 = arith.constant 0 : index
    %1145 = vector.load %arg12[%c48_533, %c0_534] : memref<64x512xf32, #tpu.memory_space<vmem>>, vector<2x512xf32>
    %c14_535 = arith.constant 14 : index
    %c0_536 = arith.constant 0 : index
    %1146 = vector.load %arg12[%c14_535, %c0_536] : memref<64x512xf32, #tpu.memory_space<vmem>>, vector<2x512xf32>
    %1147 = arith.select %35, %1145, %1146 : vector<2x512xi1>, vector<2x512xf32>
    %1148 = arith.addf %1144, %1147 : vector<2x512xf32>
    %1149 = vector.extract_strided_slice %1148 {offsets = [0, 0], sizes = [2, 128], strides = [1, 1]} : vector<2x512xf32> to vector<2x128xf32>
    %cst_537 = arith.constant 5.000000e-01 : f32
    %1150 = vector.broadcast %cst_537 : f32 to vector<2x128xf32>
    %1151 = arith.mulf %1150, %1149 : vector<2x128xf32>
    %1152 = math.tanh %1151 : vector<2x128xf32>
    %cst_538 = arith.constant 5.000000e-01 : f32
    %1153 = vector.broadcast %cst_538 : f32 to vector<2x128xf32>
    %1154 = arith.mulf %1153, %1152 : vector<2x128xf32>
    %cst_539 = arith.constant 5.000000e-01 : f32
    %1155 = vector.broadcast %cst_539 : f32 to vector<2x128xf32>
    %1156 = arith.addf %1154, %1155 : vector<2x128xf32>
    %1157 = vector.extract_strided_slice %1148 {offsets = [0, 128], sizes = [2, 128], strides = [1, 1]} : vector<2x512xf32> to vector<2x128xf32>
    %cst_540 = arith.constant 5.000000e-01 : f32
    %1158 = vector.broadcast %cst_540 : f32 to vector<2x128xf32>
    %1159 = arith.mulf %1158, %1157 : vector<2x128xf32>
    %1160 = math.tanh %1159 : vector<2x128xf32>
    %cst_541 = arith.constant 5.000000e-01 : f32
    %1161 = vector.broadcast %cst_541 : f32 to vector<2x128xf32>
    %1162 = arith.mulf %1161, %1160 : vector<2x128xf32>
    %cst_542 = arith.constant 5.000000e-01 : f32
    %1163 = vector.broadcast %cst_542 : f32 to vector<2x128xf32>
    %1164 = arith.addf %1162, %1163 : vector<2x128xf32>
    %1165 = vector.extract_strided_slice %1148 {offsets = [0, 256], sizes = [2, 128], strides = [1, 1]} : vector<2x512xf32> to vector<2x128xf32>
    %1166 = math.tanh %1165 : vector<2x128xf32>
    %1167 = vector.extract_strided_slice %1148 {offsets = [0, 384], sizes = [2, 128], strides = [1, 1]} : vector<2x512xf32> to vector<2x128xf32>
    %cst_543 = arith.constant 5.000000e-01 : f32
    %1168 = vector.broadcast %cst_543 : f32 to vector<2x128xf32>
    %1169 = arith.mulf %1168, %1167 : vector<2x128xf32>
    %1170 = math.tanh %1169 : vector<2x128xf32>
    %cst_544 = arith.constant 5.000000e-01 : f32
    %1171 = vector.broadcast %cst_544 : f32 to vector<2x128xf32>
    %1172 = arith.mulf %1171, %1170 : vector<2x128xf32>
    %cst_545 = arith.constant 5.000000e-01 : f32
    %1173 = vector.broadcast %cst_545 : f32 to vector<2x128xf32>
    %1174 = arith.addf %1172, %1173 : vector<2x128xf32>
    %1175 = arith.mulf %1164, %1131 : vector<2x128xf32>
    %1176 = arith.mulf %1156, %1166 : vector<2x128xf32>
    %1177 = arith.addf %1175, %1176 : vector<2x128xf32>
    %1178 = math.tanh %1177 : vector<2x128xf32>
    %1179 = arith.mulf %1174, %1178 : vector<2x128xf32>
    %1180 = vector.extract_strided_slice %1179 {offsets = [0, 0], sizes = [1, 64], strides = [1, 1]} : vector<2x128xf32> to vector<1x64xf32>
    %c24_546 = arith.constant 24 : index
    %c0_547 = arith.constant 0 : index
    %1181 = vector.load %arg13[%c24_546, %c0_547] : memref<64x128xf32, #tpu.memory_space<vmem>>, vector<1x64xf32>
    tpu.vector_store %arg13[%c24_546, %c0_547], %1180 {strides = array<i32>} : memref<64x128xf32, #tpu.memory_space<vmem>>, vector<1x64xf32>,
    %1182 = vector.extract_strided_slice %1179 {offsets = [0, 64], sizes = [1, 64], strides = [1, 1]} : vector<2x128xf32> to vector<1x64xf32>
    %c7_548 = arith.constant 7 : index
    %c64_549 = arith.constant 64 : index
    %1183 = vector.load %arg13[%c7_548, %c64_549] : memref<64x128xf32, #tpu.memory_space<vmem>>, vector<1x64xf32>
    tpu.vector_store %arg13[%c7_548, %c64_549], %1182 {strides = array<i32>} : memref<64x128xf32, #tpu.memory_space<vmem>>, vector<1x64xf32>,
    %1184 = vector.extract_strided_slice %1179 {offsets = [1, 0], sizes = [1, 64], strides = [1, 1]} : vector<2x128xf32> to vector<1x64xf32>
    %c56_550 = arith.constant 56 : index
    %c0_551 = arith.constant 0 : index
    %1185 = vector.load %arg13[%c56_550, %c0_551] : memref<64x128xf32, #tpu.memory_space<vmem>>, vector<1x64xf32>
    tpu.vector_store %arg13[%c56_550, %c0_551], %1184 {strides = array<i32>} : memref<64x128xf32, #tpu.memory_space<vmem>>, vector<1x64xf32>,
    %1186 = vector.extract_strided_slice %1179 {offsets = [1, 64], sizes = [1, 64], strides = [1, 1]} : vector<2x128xf32> to vector<1x64xf32>
    %c39_552 = arith.constant 39 : index
    %c64_553 = arith.constant 64 : index
    %1187 = vector.load %arg13[%c39_552, %c64_553] : memref<64x128xf32, #tpu.memory_space<vmem>>, vector<1x64xf32>
    tpu.vector_store %arg13[%c39_552, %c64_553], %1186 {strides = array<i32>} : memref<64x128xf32, #tpu.memory_space<vmem>>, vector<1x64xf32>,
    %1188 = arith.truncf %1179 : vector<2x128xf32> to vector<2x128xbf16>
    %c0_554 = arith.constant 0 : index
    %c0_555 = arith.constant 0 : index
    %1189 = vector.load %arg6[%c0_554, %c0_555] : memref<128x512xbf16, #tpu.memory_space<vmem>>, vector<128x512xbf16>
    %cst_556 = arith.constant dense<0.000000e+00> : vector<2x512xf32>
    %1190 = tpu.matmul %1188, %1189, %cst_556 {dimension_numbers = #tpu.dot_dimension_numbers<[1], [0], [0], [1], [0, 0, 1, 1], [], []>} : vector<2x128xbf16>, vector<128x512xbf16>, vector<2x512xf32> -> vector<2x512xf32>
    %c50_557 = arith.constant 50 : index
    %c0_558 = arith.constant 0 : index
    %1191 = vector.load %arg12[%c50_557, %c0_558] : memref<64x512xf32, #tpu.memory_space<vmem>>, vector<2x512xf32>
    %c12_559 = arith.constant 12 : index
    %c0_560 = arith.constant 0 : index
    %1192 = vector.load %arg12[%c12_559, %c0_560] : memref<64x512xf32, #tpu.memory_space<vmem>>, vector<2x512xf32>
    %1193 = arith.select %35, %1191, %1192 : vector<2x512xi1>, vector<2x512xf32>
    %1194 = arith.addf %1190, %1193 : vector<2x512xf32>
    %1195 = vector.extract_strided_slice %1194 {offsets = [0, 0], sizes = [2, 128], strides = [1, 1]} : vector<2x512xf32> to vector<2x128xf32>
    %cst_561 = arith.constant 5.000000e-01 : f32
    %1196 = vector.broadcast %cst_561 : f32 to vector<2x128xf32>
    %1197 = arith.mulf %1196, %1195 : vector<2x128xf32>
    %1198 = math.tanh %1197 : vector<2x128xf32>
    %cst_562 = arith.constant 5.000000e-01 : f32
    %1199 = vector.broadcast %cst_562 : f32 to vector<2x128xf32>
    %1200 = arith.mulf %1199, %1198 : vector<2x128xf32>
    %cst_563 = arith.constant 5.000000e-01 : f32
    %1201 = vector.broadcast %cst_563 : f32 to vector<2x128xf32>
    %1202 = arith.addf %1200, %1201 : vector<2x128xf32>
    %1203 = vector.extract_strided_slice %1194 {offsets = [0, 128], sizes = [2, 128], strides = [1, 1]} : vector<2x512xf32> to vector<2x128xf32>
    %cst_564 = arith.constant 5.000000e-01 : f32
    %1204 = vector.broadcast %cst_564 : f32 to vector<2x128xf32>
    %1205 = arith.mulf %1204, %1203 : vector<2x128xf32>
    %1206 = math.tanh %1205 : vector<2x128xf32>
    %cst_565 = arith.constant 5.000000e-01 : f32
    %1207 = vector.broadcast %cst_565 : f32 to vector<2x128xf32>
    %1208 = arith.mulf %1207, %1206 : vector<2x128xf32>
    %cst_566 = arith.constant 5.000000e-01 : f32
    %1209 = vector.broadcast %cst_566 : f32 to vector<2x128xf32>
    %1210 = arith.addf %1208, %1209 : vector<2x128xf32>
    %1211 = vector.extract_strided_slice %1194 {offsets = [0, 256], sizes = [2, 128], strides = [1, 1]} : vector<2x512xf32> to vector<2x128xf32>
    %1212 = math.tanh %1211 : vector<2x128xf32>
    %1213 = vector.extract_strided_slice %1194 {offsets = [0, 384], sizes = [2, 128], strides = [1, 1]} : vector<2x512xf32> to vector<2x128xf32>
    %cst_567 = arith.constant 5.000000e-01 : f32
    %1214 = vector.broadcast %cst_567 : f32 to vector<2x128xf32>
    %1215 = arith.mulf %1214, %1213 : vector<2x128xf32>
    %1216 = math.tanh %1215 : vector<2x128xf32>
    %cst_568 = arith.constant 5.000000e-01 : f32
    %1217 = vector.broadcast %cst_568 : f32 to vector<2x128xf32>
    %1218 = arith.mulf %1217, %1216 : vector<2x128xf32>
    %cst_569 = arith.constant 5.000000e-01 : f32
    %1219 = vector.broadcast %cst_569 : f32 to vector<2x128xf32>
    %1220 = arith.addf %1218, %1219 : vector<2x128xf32>
    %1221 = arith.mulf %1210, %1177 : vector<2x128xf32>
    %1222 = arith.mulf %1202, %1212 : vector<2x128xf32>
    %1223 = arith.addf %1221, %1222 : vector<2x128xf32>
    %1224 = math.tanh %1223 : vector<2x128xf32>
    %1225 = arith.mulf %1220, %1224 : vector<2x128xf32>
    %1226 = vector.extract_strided_slice %1225 {offsets = [0, 0], sizes = [1, 64], strides = [1, 1]} : vector<2x128xf32> to vector<1x64xf32>
    %c25_570 = arith.constant 25 : index
    %c0_571 = arith.constant 0 : index
    %1227 = vector.load %arg13[%c25_570, %c0_571] : memref<64x128xf32, #tpu.memory_space<vmem>>, vector<1x64xf32>
    tpu.vector_store %arg13[%c25_570, %c0_571], %1226 {strides = array<i32>} : memref<64x128xf32, #tpu.memory_space<vmem>>, vector<1x64xf32>,
    %1228 = vector.extract_strided_slice %1225 {offsets = [0, 64], sizes = [1, 64], strides = [1, 1]} : vector<2x128xf32> to vector<1x64xf32>
    %c6_572 = arith.constant 6 : index
    %c64_573 = arith.constant 64 : index
    %1229 = vector.load %arg13[%c6_572, %c64_573] : memref<64x128xf32, #tpu.memory_space<vmem>>, vector<1x64xf32>
    tpu.vector_store %arg13[%c6_572, %c64_573], %1228 {strides = array<i32>} : memref<64x128xf32, #tpu.memory_space<vmem>>, vector<1x64xf32>,
    %1230 = vector.extract_strided_slice %1225 {offsets = [1, 0], sizes = [1, 64], strides = [1, 1]} : vector<2x128xf32> to vector<1x64xf32>
    %c57_574 = arith.constant 57 : index
    %c0_575 = arith.constant 0 : index
    %1231 = vector.load %arg13[%c57_574, %c0_575] : memref<64x128xf32, #tpu.memory_space<vmem>>, vector<1x64xf32>
    tpu.vector_store %arg13[%c57_574, %c0_575], %1230 {strides = array<i32>} : memref<64x128xf32, #tpu.memory_space<vmem>>, vector<1x64xf32>,
    %1232 = vector.extract_strided_slice %1225 {offsets = [1, 64], sizes = [1, 64], strides = [1, 1]} : vector<2x128xf32> to vector<1x64xf32>
    %c38_576 = arith.constant 38 : index
    %c64_577 = arith.constant 64 : index
    %1233 = vector.load %arg13[%c38_576, %c64_577] : memref<64x128xf32, #tpu.memory_space<vmem>>, vector<1x64xf32>
    tpu.vector_store %arg13[%c38_576, %c64_577], %1232 {strides = array<i32>} : memref<64x128xf32, #tpu.memory_space<vmem>>, vector<1x64xf32>,
    %1234 = arith.truncf %1225 : vector<2x128xf32> to vector<2x128xbf16>
    %c0_578 = arith.constant 0 : index
    %c0_579 = arith.constant 0 : index
    %1235 = vector.load %arg6[%c0_578, %c0_579] : memref<128x512xbf16, #tpu.memory_space<vmem>>, vector<128x512xbf16>
    %cst_580 = arith.constant dense<0.000000e+00> : vector<2x512xf32>
    %1236 = tpu.matmul %1234, %1235, %cst_580 {dimension_numbers = #tpu.dot_dimension_numbers<[1], [0], [0], [1], [0, 0, 1, 1], [], []>} : vector<2x128xbf16>, vector<128x512xbf16>, vector<2x512xf32> -> vector<2x512xf32>
    %c52_581 = arith.constant 52 : index
    %c0_582 = arith.constant 0 : index
    %1237 = vector.load %arg12[%c52_581, %c0_582] : memref<64x512xf32, #tpu.memory_space<vmem>>, vector<2x512xf32>
    %c10_583 = arith.constant 10 : index
    %c0_584 = arith.constant 0 : index
    %1238 = vector.load %arg12[%c10_583, %c0_584] : memref<64x512xf32, #tpu.memory_space<vmem>>, vector<2x512xf32>
    %1239 = arith.select %35, %1237, %1238 : vector<2x512xi1>, vector<2x512xf32>
    %1240 = arith.addf %1236, %1239 : vector<2x512xf32>
    %1241 = vector.extract_strided_slice %1240 {offsets = [0, 0], sizes = [2, 128], strides = [1, 1]} : vector<2x512xf32> to vector<2x128xf32>
    %cst_585 = arith.constant 5.000000e-01 : f32
    %1242 = vector.broadcast %cst_585 : f32 to vector<2x128xf32>
    %1243 = arith.mulf %1242, %1241 : vector<2x128xf32>
    %1244 = math.tanh %1243 : vector<2x128xf32>
    %cst_586 = arith.constant 5.000000e-01 : f32
    %1245 = vector.broadcast %cst_586 : f32 to vector<2x128xf32>
    %1246 = arith.mulf %1245, %1244 : vector<2x128xf32>
    %cst_587 = arith.constant 5.000000e-01 : f32
    %1247 = vector.broadcast %cst_587 : f32 to vector<2x128xf32>
    %1248 = arith.addf %1246, %1247 : vector<2x128xf32>
    %1249 = vector.extract_strided_slice %1240 {offsets = [0, 128], sizes = [2, 128], strides = [1, 1]} : vector<2x512xf32> to vector<2x128xf32>
    %cst_588 = arith.constant 5.000000e-01 : f32
    %1250 = vector.broadcast %cst_588 : f32 to vector<2x128xf32>
    %1251 = arith.mulf %1250, %1249 : vector<2x128xf32>
    %1252 = math.tanh %1251 : vector<2x128xf32>
    %cst_589 = arith.constant 5.000000e-01 : f32
    %1253 = vector.broadcast %cst_589 : f32 to vector<2x128xf32>
    %1254 = arith.mulf %1253, %1252 : vector<2x128xf32>
    %cst_590 = arith.constant 5.000000e-01 : f32
    %1255 = vector.broadcast %cst_590 : f32 to vector<2x128xf32>
    %1256 = arith.addf %1254, %1255 : vector<2x128xf32>
    %1257 = vector.extract_strided_slice %1240 {offsets = [0, 256], sizes = [2, 128], strides = [1, 1]} : vector<2x512xf32> to vector<2x128xf32>
    %1258 = math.tanh %1257 : vector<2x128xf32>
    %1259 = vector.extract_strided_slice %1240 {offsets = [0, 384], sizes = [2, 128], strides = [1, 1]} : vector<2x512xf32> to vector<2x128xf32>
    %cst_591 = arith.constant 5.000000e-01 : f32
    %1260 = vector.broadcast %cst_591 : f32 to vector<2x128xf32>
    %1261 = arith.mulf %1260, %1259 : vector<2x128xf32>
    %1262 = math.tanh %1261 : vector<2x128xf32>
    %cst_592 = arith.constant 5.000000e-01 : f32
    %1263 = vector.broadcast %cst_592 : f32 to vector<2x128xf32>
    %1264 = arith.mulf %1263, %1262 : vector<2x128xf32>
    %cst_593 = arith.constant 5.000000e-01 : f32
    %1265 = vector.broadcast %cst_593 : f32 to vector<2x128xf32>
    %1266 = arith.addf %1264, %1265 : vector<2x128xf32>
    %1267 = arith.mulf %1256, %1223 : vector<2x128xf32>
    %1268 = arith.mulf %1248, %1258 : vector<2x128xf32>
    %1269 = arith.addf %1267, %1268 : vector<2x128xf32>
    %1270 = math.tanh %1269 : vector<2x128xf32>
    %1271 = arith.mulf %1266, %1270 : vector<2x128xf32>
    %1272 = vector.extract_strided_slice %1271 {offsets = [0, 0], sizes = [1, 64], strides = [1, 1]} : vector<2x128xf32> to vector<1x64xf32>
    %c26_594 = arith.constant 26 : index
    %c0_595 = arith.constant 0 : index
    %1273 = vector.load %arg13[%c26_594, %c0_595] : memref<64x128xf32, #tpu.memory_space<vmem>>, vector<1x64xf32>
    tpu.vector_store %arg13[%c26_594, %c0_595], %1272 {strides = array<i32>} : memref<64x128xf32, #tpu.memory_space<vmem>>, vector<1x64xf32>,
    %1274 = vector.extract_strided_slice %1271 {offsets = [0, 64], sizes = [1, 64], strides = [1, 1]} : vector<2x128xf32> to vector<1x64xf32>
    %c5_596 = arith.constant 5 : index
    %c64_597 = arith.constant 64 : index
    %1275 = vector.load %arg13[%c5_596, %c64_597] : memref<64x128xf32, #tpu.memory_space<vmem>>, vector<1x64xf32>
    tpu.vector_store %arg13[%c5_596, %c64_597], %1274 {strides = array<i32>} : memref<64x128xf32, #tpu.memory_space<vmem>>, vector<1x64xf32>,
    %1276 = vector.extract_strided_slice %1271 {offsets = [1, 0], sizes = [1, 64], strides = [1, 1]} : vector<2x128xf32> to vector<1x64xf32>
    %c58_598 = arith.constant 58 : index
    %c0_599 = arith.constant 0 : index
    %1277 = vector.load %arg13[%c58_598, %c0_599] : memref<64x128xf32, #tpu.memory_space<vmem>>, vector<1x64xf32>
    tpu.vector_store %arg13[%c58_598, %c0_599], %1276 {strides = array<i32>} : memref<64x128xf32, #tpu.memory_space<vmem>>, vector<1x64xf32>,
    %1278 = vector.extract_strided_slice %1271 {offsets = [1, 64], sizes = [1, 64], strides = [1, 1]} : vector<2x128xf32> to vector<1x64xf32>
    %c37_600 = arith.constant 37 : index
    %c64_601 = arith.constant 64 : index
    %1279 = vector.load %arg13[%c37_600, %c64_601] : memref<64x128xf32, #tpu.memory_space<vmem>>, vector<1x64xf32>
    tpu.vector_store %arg13[%c37_600, %c64_601], %1278 {strides = array<i32>} : memref<64x128xf32, #tpu.memory_space<vmem>>, vector<1x64xf32>,
    %1280 = arith.truncf %1271 : vector<2x128xf32> to vector<2x128xbf16>
    %c0_602 = arith.constant 0 : index
    %c0_603 = arith.constant 0 : index
    %1281 = vector.load %arg6[%c0_602, %c0_603] : memref<128x512xbf16, #tpu.memory_space<vmem>>, vector<128x512xbf16>
    %cst_604 = arith.constant dense<0.000000e+00> : vector<2x512xf32>
    %1282 = tpu.matmul %1280, %1281, %cst_604 {dimension_numbers = #tpu.dot_dimension_numbers<[1], [0], [0], [1], [0, 0, 1, 1], [], []>} : vector<2x128xbf16>, vector<128x512xbf16>, vector<2x512xf32> -> vector<2x512xf32>
    %c54_605 = arith.constant 54 : index
    %c0_606 = arith.constant 0 : index
    %1283 = vector.load %arg12[%c54_605, %c0_606] : memref<64x512xf32, #tpu.memory_space<vmem>>, vector<2x512xf32>
    %c8_607 = arith.constant 8 : index
    %c0_608 = arith.constant 0 : index
    %1284 = vector.load %arg12[%c8_607, %c0_608] : memref<64x512xf32, #tpu.memory_space<vmem>>, vector<2x512xf32>
    %1285 = arith.select %35, %1283, %1284 : vector<2x512xi1>, vector<2x512xf32>
    %1286 = arith.addf %1282, %1285 : vector<2x512xf32>
    %1287 = vector.extract_strided_slice %1286 {offsets = [0, 0], sizes = [2, 128], strides = [1, 1]} : vector<2x512xf32> to vector<2x128xf32>
    %cst_609 = arith.constant 5.000000e-01 : f32
    %1288 = vector.broadcast %cst_609 : f32 to vector<2x128xf32>
    %1289 = arith.mulf %1288, %1287 : vector<2x128xf32>
    %1290 = math.tanh %1289 : vector<2x128xf32>
    %cst_610 = arith.constant 5.000000e-01 : f32
    %1291 = vector.broadcast %cst_610 : f32 to vector<2x128xf32>
    %1292 = arith.mulf %1291, %1290 : vector<2x128xf32>
    %cst_611 = arith.constant 5.000000e-01 : f32
    %1293 = vector.broadcast %cst_611 : f32 to vector<2x128xf32>
    %1294 = arith.addf %1292, %1293 : vector<2x128xf32>
    %1295 = vector.extract_strided_slice %1286 {offsets = [0, 128], sizes = [2, 128], strides = [1, 1]} : vector<2x512xf32> to vector<2x128xf32>
    %cst_612 = arith.constant 5.000000e-01 : f32
    %1296 = vector.broadcast %cst_612 : f32 to vector<2x128xf32>
    %1297 = arith.mulf %1296, %1295 : vector<2x128xf32>
    %1298 = math.tanh %1297 : vector<2x128xf32>
    %cst_613 = arith.constant 5.000000e-01 : f32
    %1299 = vector.broadcast %cst_613 : f32 to vector<2x128xf32>
    %1300 = arith.mulf %1299, %1298 : vector<2x128xf32>
    %cst_614 = arith.constant 5.000000e-01 : f32
    %1301 = vector.broadcast %cst_614 : f32 to vector<2x128xf32>
    %1302 = arith.addf %1300, %1301 : vector<2x128xf32>
    %1303 = vector.extract_strided_slice %1286 {offsets = [0, 256], sizes = [2, 128], strides = [1, 1]} : vector<2x512xf32> to vector<2x128xf32>
    %1304 = math.tanh %1303 : vector<2x128xf32>
    %1305 = vector.extract_strided_slice %1286 {offsets = [0, 384], sizes = [2, 128], strides = [1, 1]} : vector<2x512xf32> to vector<2x128xf32>
    %cst_615 = arith.constant 5.000000e-01 : f32
    %1306 = vector.broadcast %cst_615 : f32 to vector<2x128xf32>
    %1307 = arith.mulf %1306, %1305 : vector<2x128xf32>
    %1308 = math.tanh %1307 : vector<2x128xf32>
    %cst_616 = arith.constant 5.000000e-01 : f32
    %1309 = vector.broadcast %cst_616 : f32 to vector<2x128xf32>
    %1310 = arith.mulf %1309, %1308 : vector<2x128xf32>
    %cst_617 = arith.constant 5.000000e-01 : f32
    %1311 = vector.broadcast %cst_617 : f32 to vector<2x128xf32>
    %1312 = arith.addf %1310, %1311 : vector<2x128xf32>
    %1313 = arith.mulf %1302, %1269 : vector<2x128xf32>
    %1314 = arith.mulf %1294, %1304 : vector<2x128xf32>
    %1315 = arith.addf %1313, %1314 : vector<2x128xf32>
    %1316 = math.tanh %1315 : vector<2x128xf32>
    %1317 = arith.mulf %1312, %1316 : vector<2x128xf32>
    %1318 = vector.extract_strided_slice %1317 {offsets = [0, 0], sizes = [1, 64], strides = [1, 1]} : vector<2x128xf32> to vector<1x64xf32>
    %c27_618 = arith.constant 27 : index
    %c0_619 = arith.constant 0 : index
    %1319 = vector.load %arg13[%c27_618, %c0_619] : memref<64x128xf32, #tpu.memory_space<vmem>>, vector<1x64xf32>
    tpu.vector_store %arg13[%c27_618, %c0_619], %1318 {strides = array<i32>} : memref<64x128xf32, #tpu.memory_space<vmem>>, vector<1x64xf32>,
    %1320 = vector.extract_strided_slice %1317 {offsets = [0, 64], sizes = [1, 64], strides = [1, 1]} : vector<2x128xf32> to vector<1x64xf32>
    %c4_620 = arith.constant 4 : index
    %c64_621 = arith.constant 64 : index
    %1321 = vector.load %arg13[%c4_620, %c64_621] : memref<64x128xf32, #tpu.memory_space<vmem>>, vector<1x64xf32>
    tpu.vector_store %arg13[%c4_620, %c64_621], %1320 {strides = array<i32>} : memref<64x128xf32, #tpu.memory_space<vmem>>, vector<1x64xf32>,
    %1322 = vector.extract_strided_slice %1317 {offsets = [1, 0], sizes = [1, 64], strides = [1, 1]} : vector<2x128xf32> to vector<1x64xf32>
    %c59_622 = arith.constant 59 : index
    %c0_623 = arith.constant 0 : index
    %1323 = vector.load %arg13[%c59_622, %c0_623] : memref<64x128xf32, #tpu.memory_space<vmem>>, vector<1x64xf32>
    tpu.vector_store %arg13[%c59_622, %c0_623], %1322 {strides = array<i32>} : memref<64x128xf32, #tpu.memory_space<vmem>>, vector<1x64xf32>,
    %1324 = vector.extract_strided_slice %1317 {offsets = [1, 64], sizes = [1, 64], strides = [1, 1]} : vector<2x128xf32> to vector<1x64xf32>
    %c36_624 = arith.constant 36 : index
    %c64_625 = arith.constant 64 : index
    %1325 = vector.load %arg13[%c36_624, %c64_625] : memref<64x128xf32, #tpu.memory_space<vmem>>, vector<1x64xf32>
    tpu.vector_store %arg13[%c36_624, %c64_625], %1324 {strides = array<i32>} : memref<64x128xf32, #tpu.memory_space<vmem>>, vector<1x64xf32>,
    %1326 = arith.truncf %1317 : vector<2x128xf32> to vector<2x128xbf16>
    %c0_626 = arith.constant 0 : index
    %c0_627 = arith.constant 0 : index
    %1327 = vector.load %arg6[%c0_626, %c0_627] : memref<128x512xbf16, #tpu.memory_space<vmem>>, vector<128x512xbf16>
    %cst_628 = arith.constant dense<0.000000e+00> : vector<2x512xf32>
    %1328 = tpu.matmul %1326, %1327, %cst_628 {dimension_numbers = #tpu.dot_dimension_numbers<[1], [0], [0], [1], [0, 0, 1, 1], [], []>} : vector<2x128xbf16>, vector<128x512xbf16>, vector<2x512xf32> -> vector<2x512xf32>
    %c56_629 = arith.constant 56 : index
    %c0_630 = arith.constant 0 : index
    %1329 = vector.load %arg12[%c56_629, %c0_630] : memref<64x512xf32, #tpu.memory_space<vmem>>, vector<2x512xf32>
    %c6_631 = arith.constant 6 : index
    %c0_632 = arith.constant 0 : index
    %1330 = vector.load %arg12[%c6_631, %c0_632] : memref<64x512xf32, #tpu.memory_space<vmem>>, vector<2x512xf32>
    %1331 = arith.select %35, %1329, %1330 : vector<2x512xi1>, vector<2x512xf32>
    %1332 = arith.addf %1328, %1331 : vector<2x512xf32>
    %1333 = vector.extract_strided_slice %1332 {offsets = [0, 0], sizes = [2, 128], strides = [1, 1]} : vector<2x512xf32> to vector<2x128xf32>
    %cst_633 = arith.constant 5.000000e-01 : f32
    %1334 = vector.broadcast %cst_633 : f32 to vector<2x128xf32>
    %1335 = arith.mulf %1334, %1333 : vector<2x128xf32>
    %1336 = math.tanh %1335 : vector<2x128xf32>
    %cst_634 = arith.constant 5.000000e-01 : f32
    %1337 = vector.broadcast %cst_634 : f32 to vector<2x128xf32>
    %1338 = arith.mulf %1337, %1336 : vector<2x128xf32>
    %cst_635 = arith.constant 5.000000e-01 : f32
    %1339 = vector.broadcast %cst_635 : f32 to vector<2x128xf32>
    %1340 = arith.addf %1338, %1339 : vector<2x128xf32>
    %1341 = vector.extract_strided_slice %1332 {offsets = [0, 128], sizes = [2, 128], strides = [1, 1]} : vector<2x512xf32> to vector<2x128xf32>
    %cst_636 = arith.constant 5.000000e-01 : f32
    %1342 = vector.broadcast %cst_636 : f32 to vector<2x128xf32>
    %1343 = arith.mulf %1342, %1341 : vector<2x128xf32>
    %1344 = math.tanh %1343 : vector<2x128xf32>
    %cst_637 = arith.constant 5.000000e-01 : f32
    %1345 = vector.broadcast %cst_637 : f32 to vector<2x128xf32>
    %1346 = arith.mulf %1345, %1344 : vector<2x128xf32>
    %cst_638 = arith.constant 5.000000e-01 : f32
    %1347 = vector.broadcast %cst_638 : f32 to vector<2x128xf32>
    %1348 = arith.addf %1346, %1347 : vector<2x128xf32>
    %1349 = vector.extract_strided_slice %1332 {offsets = [0, 256], sizes = [2, 128], strides = [1, 1]} : vector<2x512xf32> to vector<2x128xf32>
    %1350 = math.tanh %1349 : vector<2x128xf32>
    %1351 = vector.extract_strided_slice %1332 {offsets = [0, 384], sizes = [2, 128], strides = [1, 1]} : vector<2x512xf32> to vector<2x128xf32>
    %cst_639 = arith.constant 5.000000e-01 : f32
    %1352 = vector.broadcast %cst_639 : f32 to vector<2x128xf32>
    %1353 = arith.mulf %1352, %1351 : vector<2x128xf32>
    %1354 = math.tanh %1353 : vector<2x128xf32>
    %cst_640 = arith.constant 5.000000e-01 : f32
    %1355 = vector.broadcast %cst_640 : f32 to vector<2x128xf32>
    %1356 = arith.mulf %1355, %1354 : vector<2x128xf32>
    %cst_641 = arith.constant 5.000000e-01 : f32
    %1357 = vector.broadcast %cst_641 : f32 to vector<2x128xf32>
    %1358 = arith.addf %1356, %1357 : vector<2x128xf32>
    %1359 = arith.mulf %1348, %1315 : vector<2x128xf32>
    %1360 = arith.mulf %1340, %1350 : vector<2x128xf32>
    %1361 = arith.addf %1359, %1360 : vector<2x128xf32>
    %1362 = math.tanh %1361 : vector<2x128xf32>
    %1363 = arith.mulf %1358, %1362 : vector<2x128xf32>
    %1364 = vector.extract_strided_slice %1363 {offsets = [0, 0], sizes = [1, 64], strides = [1, 1]} : vector<2x128xf32> to vector<1x64xf32>
    %c28_642 = arith.constant 28 : index
    %c0_643 = arith.constant 0 : index
    %1365 = vector.load %arg13[%c28_642, %c0_643] : memref<64x128xf32, #tpu.memory_space<vmem>>, vector<1x64xf32>
    tpu.vector_store %arg13[%c28_642, %c0_643], %1364 {strides = array<i32>} : memref<64x128xf32, #tpu.memory_space<vmem>>, vector<1x64xf32>,
    %1366 = vector.extract_strided_slice %1363 {offsets = [0, 64], sizes = [1, 64], strides = [1, 1]} : vector<2x128xf32> to vector<1x64xf32>
    %c3_644 = arith.constant 3 : index
    %c64_645 = arith.constant 64 : index
    %1367 = vector.load %arg13[%c3_644, %c64_645] : memref<64x128xf32, #tpu.memory_space<vmem>>, vector<1x64xf32>
    tpu.vector_store %arg13[%c3_644, %c64_645], %1366 {strides = array<i32>} : memref<64x128xf32, #tpu.memory_space<vmem>>, vector<1x64xf32>,
    %1368 = vector.extract_strided_slice %1363 {offsets = [1, 0], sizes = [1, 64], strides = [1, 1]} : vector<2x128xf32> to vector<1x64xf32>
    %c60_646 = arith.constant 60 : index
    %c0_647 = arith.constant 0 : index
    %1369 = vector.load %arg13[%c60_646, %c0_647] : memref<64x128xf32, #tpu.memory_space<vmem>>, vector<1x64xf32>
    tpu.vector_store %arg13[%c60_646, %c0_647], %1368 {strides = array<i32>} : memref<64x128xf32, #tpu.memory_space<vmem>>, vector<1x64xf32>,
    %1370 = vector.extract_strided_slice %1363 {offsets = [1, 64], sizes = [1, 64], strides = [1, 1]} : vector<2x128xf32> to vector<1x64xf32>
    %c35_648 = arith.constant 35 : index
    %c64_649 = arith.constant 64 : index
    %1371 = vector.load %arg13[%c35_648, %c64_649] : memref<64x128xf32, #tpu.memory_space<vmem>>, vector<1x64xf32>
    tpu.vector_store %arg13[%c35_648, %c64_649], %1370 {strides = array<i32>} : memref<64x128xf32, #tpu.memory_space<vmem>>, vector<1x64xf32>,
    %1372 = arith.truncf %1363 : vector<2x128xf32> to vector<2x128xbf16>
    %c0_650 = arith.constant 0 : index
    %c0_651 = arith.constant 0 : index
    %1373 = vector.load %arg6[%c0_650, %c0_651] : memref<128x512xbf16, #tpu.memory_space<vmem>>, vector<128x512xbf16>
    %cst_652 = arith.constant dense<0.000000e+00> : vector<2x512xf32>
    %1374 = tpu.matmul %1372, %1373, %cst_652 {dimension_numbers = #tpu.dot_dimension_numbers<[1], [0], [0], [1], [0, 0, 1, 1], [], []>} : vector<2x128xbf16>, vector<128x512xbf16>, vector<2x512xf32> -> vector<2x512xf32>
    %c58_653 = arith.constant 58 : index
    %c0_654 = arith.constant 0 : index
    %1375 = vector.load %arg12[%c58_653, %c0_654] : memref<64x512xf32, #tpu.memory_space<vmem>>, vector<2x512xf32>
    %c4_655 = arith.constant 4 : index
    %c0_656 = arith.constant 0 : index
    %1376 = vector.load %arg12[%c4_655, %c0_656] : memref<64x512xf32, #tpu.memory_space<vmem>>, vector<2x512xf32>
    %1377 = arith.select %35, %1375, %1376 : vector<2x512xi1>, vector<2x512xf32>
    %1378 = arith.addf %1374, %1377 : vector<2x512xf32>
    %1379 = vector.extract_strided_slice %1378 {offsets = [0, 0], sizes = [2, 128], strides = [1, 1]} : vector<2x512xf32> to vector<2x128xf32>
    %cst_657 = arith.constant 5.000000e-01 : f32
    %1380 = vector.broadcast %cst_657 : f32 to vector<2x128xf32>
    %1381 = arith.mulf %1380, %1379 : vector<2x128xf32>
    %1382 = math.tanh %1381 : vector<2x128xf32>
    %cst_658 = arith.constant 5.000000e-01 : f32
    %1383 = vector.broadcast %cst_658 : f32 to vector<2x128xf32>
    %1384 = arith.mulf %1383, %1382 : vector<2x128xf32>
    %cst_659 = arith.constant 5.000000e-01 : f32
    %1385 = vector.broadcast %cst_659 : f32 to vector<2x128xf32>
    %1386 = arith.addf %1384, %1385 : vector<2x128xf32>
    %1387 = vector.extract_strided_slice %1378 {offsets = [0, 128], sizes = [2, 128], strides = [1, 1]} : vector<2x512xf32> to vector<2x128xf32>
    %cst_660 = arith.constant 5.000000e-01 : f32
    %1388 = vector.broadcast %cst_660 : f32 to vector<2x128xf32>
    %1389 = arith.mulf %1388, %1387 : vector<2x128xf32>
    %1390 = math.tanh %1389 : vector<2x128xf32>
    %cst_661 = arith.constant 5.000000e-01 : f32
    %1391 = vector.broadcast %cst_661 : f32 to vector<2x128xf32>
    %1392 = arith.mulf %1391, %1390 : vector<2x128xf32>
    %cst_662 = arith.constant 5.000000e-01 : f32
    %1393 = vector.broadcast %cst_662 : f32 to vector<2x128xf32>
    %1394 = arith.addf %1392, %1393 : vector<2x128xf32>
    %1395 = vector.extract_strided_slice %1378 {offsets = [0, 256], sizes = [2, 128], strides = [1, 1]} : vector<2x512xf32> to vector<2x128xf32>
    %1396 = math.tanh %1395 : vector<2x128xf32>
    %1397 = vector.extract_strided_slice %1378 {offsets = [0, 384], sizes = [2, 128], strides = [1, 1]} : vector<2x512xf32> to vector<2x128xf32>
    %cst_663 = arith.constant 5.000000e-01 : f32
    %1398 = vector.broadcast %cst_663 : f32 to vector<2x128xf32>
    %1399 = arith.mulf %1398, %1397 : vector<2x128xf32>
    %1400 = math.tanh %1399 : vector<2x128xf32>
    %cst_664 = arith.constant 5.000000e-01 : f32
    %1401 = vector.broadcast %cst_664 : f32 to vector<2x128xf32>
    %1402 = arith.mulf %1401, %1400 : vector<2x128xf32>
    %cst_665 = arith.constant 5.000000e-01 : f32
    %1403 = vector.broadcast %cst_665 : f32 to vector<2x128xf32>
    %1404 = arith.addf %1402, %1403 : vector<2x128xf32>
    %1405 = arith.mulf %1394, %1361 : vector<2x128xf32>
    %1406 = arith.mulf %1386, %1396 : vector<2x128xf32>
    %1407 = arith.addf %1405, %1406 : vector<2x128xf32>
    %1408 = math.tanh %1407 : vector<2x128xf32>
    %1409 = arith.mulf %1404, %1408 : vector<2x128xf32>
    %1410 = vector.extract_strided_slice %1409 {offsets = [0, 0], sizes = [1, 64], strides = [1, 1]} : vector<2x128xf32> to vector<1x64xf32>
    %c29_666 = arith.constant 29 : index
    %c0_667 = arith.constant 0 : index
    %1411 = vector.load %arg13[%c29_666, %c0_667] : memref<64x128xf32, #tpu.memory_space<vmem>>, vector<1x64xf32>
    tpu.vector_store %arg13[%c29_666, %c0_667], %1410 {strides = array<i32>} : memref<64x128xf32, #tpu.memory_space<vmem>>, vector<1x64xf32>,
    %1412 = vector.extract_strided_slice %1409 {offsets = [0, 64], sizes = [1, 64], strides = [1, 1]} : vector<2x128xf32> to vector<1x64xf32>
    %c2_668 = arith.constant 2 : index
    %c64_669 = arith.constant 64 : index
    %1413 = vector.load %arg13[%c2_668, %c64_669] : memref<64x128xf32, #tpu.memory_space<vmem>>, vector<1x64xf32>
    tpu.vector_store %arg13[%c2_668, %c64_669], %1412 {strides = array<i32>} : memref<64x128xf32, #tpu.memory_space<vmem>>, vector<1x64xf32>,
    %1414 = vector.extract_strided_slice %1409 {offsets = [1, 0], sizes = [1, 64], strides = [1, 1]} : vector<2x128xf32> to vector<1x64xf32>
    %c61_670 = arith.constant 61 : index
    %c0_671 = arith.constant 0 : index
    %1415 = vector.load %arg13[%c61_670, %c0_671] : memref<64x128xf32, #tpu.memory_space<vmem>>, vector<1x64xf32>
    tpu.vector_store %arg13[%c61_670, %c0_671], %1414 {strides = array<i32>} : memref<64x128xf32, #tpu.memory_space<vmem>>, vector<1x64xf32>,
    %1416 = vector.extract_strided_slice %1409 {offsets = [1, 64], sizes = [1, 64], strides = [1, 1]} : vector<2x128xf32> to vector<1x64xf32>
    %c34_672 = arith.constant 34 : index
    %c64_673 = arith.constant 64 : index
    %1417 = vector.load %arg13[%c34_672, %c64_673] : memref<64x128xf32, #tpu.memory_space<vmem>>, vector<1x64xf32>
    tpu.vector_store %arg13[%c34_672, %c64_673], %1416 {strides = array<i32>} : memref<64x128xf32, #tpu.memory_space<vmem>>, vector<1x64xf32>,
    %1418 = arith.truncf %1409 : vector<2x128xf32> to vector<2x128xbf16>
    %c0_674 = arith.constant 0 : index
    %c0_675 = arith.constant 0 : index
    %1419 = vector.load %arg6[%c0_674, %c0_675] : memref<128x512xbf16, #tpu.memory_space<vmem>>, vector<128x512xbf16>
    %cst_676 = arith.constant dense<0.000000e+00> : vector<2x512xf32>
    %1420 = tpu.matmul %1418, %1419, %cst_676 {dimension_numbers = #tpu.dot_dimension_numbers<[1], [0], [0], [1], [0, 0, 1, 1], [], []>} : vector<2x128xbf16>, vector<128x512xbf16>, vector<2x512xf32> -> vector<2x512xf32>
    %c60_677 = arith.constant 60 : index
    %c0_678 = arith.constant 0 : index
    %1421 = vector.load %arg12[%c60_677, %c0_678] : memref<64x512xf32, #tpu.memory_space<vmem>>, vector<2x512xf32>
    %c2_679 = arith.constant 2 : index
    %c0_680 = arith.constant 0 : index
    %1422 = vector.load %arg12[%c2_679, %c0_680] : memref<64x512xf32, #tpu.memory_space<vmem>>, vector<2x512xf32>
    %1423 = arith.select %35, %1421, %1422 : vector<2x512xi1>, vector<2x512xf32>
    %1424 = arith.addf %1420, %1423 : vector<2x512xf32>
    %1425 = vector.extract_strided_slice %1424 {offsets = [0, 0], sizes = [2, 128], strides = [1, 1]} : vector<2x512xf32> to vector<2x128xf32>
    %cst_681 = arith.constant 5.000000e-01 : f32
    %1426 = vector.broadcast %cst_681 : f32 to vector<2x128xf32>
    %1427 = arith.mulf %1426, %1425 : vector<2x128xf32>
    %1428 = math.tanh %1427 : vector<2x128xf32>
    %cst_682 = arith.constant 5.000000e-01 : f32
    %1429 = vector.broadcast %cst_682 : f32 to vector<2x128xf32>
    %1430 = arith.mulf %1429, %1428 : vector<2x128xf32>
    %cst_683 = arith.constant 5.000000e-01 : f32
    %1431 = vector.broadcast %cst_683 : f32 to vector<2x128xf32>
    %1432 = arith.addf %1430, %1431 : vector<2x128xf32>
    %1433 = vector.extract_strided_slice %1424 {offsets = [0, 128], sizes = [2, 128], strides = [1, 1]} : vector<2x512xf32> to vector<2x128xf32>
    %cst_684 = arith.constant 5.000000e-01 : f32
    %1434 = vector.broadcast %cst_684 : f32 to vector<2x128xf32>
    %1435 = arith.mulf %1434, %1433 : vector<2x128xf32>
    %1436 = math.tanh %1435 : vector<2x128xf32>
    %cst_685 = arith.constant 5.000000e-01 : f32
    %1437 = vector.broadcast %cst_685 : f32 to vector<2x128xf32>
    %1438 = arith.mulf %1437, %1436 : vector<2x128xf32>
    %cst_686 = arith.constant 5.000000e-01 : f32
    %1439 = vector.broadcast %cst_686 : f32 to vector<2x128xf32>
    %1440 = arith.addf %1438, %1439 : vector<2x128xf32>
    %1441 = vector.extract_strided_slice %1424 {offsets = [0, 256], sizes = [2, 128], strides = [1, 1]} : vector<2x512xf32> to vector<2x128xf32>
    %1442 = math.tanh %1441 : vector<2x128xf32>
    %1443 = vector.extract_strided_slice %1424 {offsets = [0, 384], sizes = [2, 128], strides = [1, 1]} : vector<2x512xf32> to vector<2x128xf32>
    %cst_687 = arith.constant 5.000000e-01 : f32
    %1444 = vector.broadcast %cst_687 : f32 to vector<2x128xf32>
    %1445 = arith.mulf %1444, %1443 : vector<2x128xf32>
    %1446 = math.tanh %1445 : vector<2x128xf32>
    %cst_688 = arith.constant 5.000000e-01 : f32
    %1447 = vector.broadcast %cst_688 : f32 to vector<2x128xf32>
    %1448 = arith.mulf %1447, %1446 : vector<2x128xf32>
    %cst_689 = arith.constant 5.000000e-01 : f32
    %1449 = vector.broadcast %cst_689 : f32 to vector<2x128xf32>
    %1450 = arith.addf %1448, %1449 : vector<2x128xf32>
    %1451 = arith.mulf %1440, %1407 : vector<2x128xf32>
    %1452 = arith.mulf %1432, %1442 : vector<2x128xf32>
    %1453 = arith.addf %1451, %1452 : vector<2x128xf32>
    %1454 = math.tanh %1453 : vector<2x128xf32>
    %1455 = arith.mulf %1450, %1454 : vector<2x128xf32>
    %1456 = vector.extract_strided_slice %1455 {offsets = [0, 0], sizes = [1, 64], strides = [1, 1]} : vector<2x128xf32> to vector<1x64xf32>
    %c30_690 = arith.constant 30 : index
    %c0_691 = arith.constant 0 : index
    %1457 = vector.load %arg13[%c30_690, %c0_691] : memref<64x128xf32, #tpu.memory_space<vmem>>, vector<1x64xf32>
    tpu.vector_store %arg13[%c30_690, %c0_691], %1456 {strides = array<i32>} : memref<64x128xf32, #tpu.memory_space<vmem>>, vector<1x64xf32>,
    %1458 = vector.extract_strided_slice %1455 {offsets = [0, 64], sizes = [1, 64], strides = [1, 1]} : vector<2x128xf32> to vector<1x64xf32>
    %c1_692 = arith.constant 1 : index
    %c64_693 = arith.constant 64 : index
    %1459 = vector.load %arg13[%c1_692, %c64_693] : memref<64x128xf32, #tpu.memory_space<vmem>>, vector<1x64xf32>
    tpu.vector_store %arg13[%c1_692, %c64_693], %1458 {strides = array<i32>} : memref<64x128xf32, #tpu.memory_space<vmem>>, vector<1x64xf32>,
    %1460 = vector.extract_strided_slice %1455 {offsets = [1, 0], sizes = [1, 64], strides = [1, 1]} : vector<2x128xf32> to vector<1x64xf32>
    %c62_694 = arith.constant 62 : index
    %c0_695 = arith.constant 0 : index
    %1461 = vector.load %arg13[%c62_694, %c0_695] : memref<64x128xf32, #tpu.memory_space<vmem>>, vector<1x64xf32>
    tpu.vector_store %arg13[%c62_694, %c0_695], %1460 {strides = array<i32>} : memref<64x128xf32, #tpu.memory_space<vmem>>, vector<1x64xf32>,
    %1462 = vector.extract_strided_slice %1455 {offsets = [1, 64], sizes = [1, 64], strides = [1, 1]} : vector<2x128xf32> to vector<1x64xf32>
    %c33_696 = arith.constant 33 : index
    %c64_697 = arith.constant 64 : index
    %1463 = vector.load %arg13[%c33_696, %c64_697] : memref<64x128xf32, #tpu.memory_space<vmem>>, vector<1x64xf32>
    tpu.vector_store %arg13[%c33_696, %c64_697], %1462 {strides = array<i32>} : memref<64x128xf32, #tpu.memory_space<vmem>>, vector<1x64xf32>,
    %1464 = arith.truncf %1455 : vector<2x128xf32> to vector<2x128xbf16>
    %c0_698 = arith.constant 0 : index
    %c0_699 = arith.constant 0 : index
    %1465 = vector.load %arg6[%c0_698, %c0_699] : memref<128x512xbf16, #tpu.memory_space<vmem>>, vector<128x512xbf16>
    %cst_700 = arith.constant dense<0.000000e+00> : vector<2x512xf32>
    %1466 = tpu.matmul %1464, %1465, %cst_700 {dimension_numbers = #tpu.dot_dimension_numbers<[1], [0], [0], [1], [0, 0, 1, 1], [], []>} : vector<2x128xbf16>, vector<128x512xbf16>, vector<2x512xf32> -> vector<2x512xf32>
    %c62_701 = arith.constant 62 : index
    %c0_702 = arith.constant 0 : index
    %1467 = vector.load %arg12[%c62_701, %c0_702] : memref<64x512xf32, #tpu.memory_space<vmem>>, vector<2x512xf32>
    %c0_703 = arith.constant 0 : index
    %c0_704 = arith.constant 0 : index
    %1468 = vector.load %arg12[%c0_703, %c0_704] : memref<64x512xf32, #tpu.memory_space<vmem>>, vector<2x512xf32>
    %1469 = arith.select %35, %1467, %1468 : vector<2x512xi1>, vector<2x512xf32>
    %1470 = arith.addf %1466, %1469 : vector<2x512xf32>
    %1471 = vector.extract_strided_slice %1470 {offsets = [0, 0], sizes = [2, 128], strides = [1, 1]} : vector<2x512xf32> to vector<2x128xf32>
    %cst_705 = arith.constant 5.000000e-01 : f32
    %1472 = vector.broadcast %cst_705 : f32 to vector<2x128xf32>
    %1473 = arith.mulf %1472, %1471 : vector<2x128xf32>
    %1474 = math.tanh %1473 : vector<2x128xf32>
    %cst_706 = arith.constant 5.000000e-01 : f32
    %1475 = vector.broadcast %cst_706 : f32 to vector<2x128xf32>
    %1476 = arith.mulf %1475, %1474 : vector<2x128xf32>
    %cst_707 = arith.constant 5.000000e-01 : f32
    %1477 = vector.broadcast %cst_707 : f32 to vector<2x128xf32>
    %1478 = arith.addf %1476, %1477 : vector<2x128xf32>
    %1479 = vector.extract_strided_slice %1470 {offsets = [0, 128], sizes = [2, 128], strides = [1, 1]} : vector<2x512xf32> to vector<2x128xf32>
    %cst_708 = arith.constant 5.000000e-01 : f32
    %1480 = vector.broadcast %cst_708 : f32 to vector<2x128xf32>
    %1481 = arith.mulf %1480, %1479 : vector<2x128xf32>
    %1482 = math.tanh %1481 : vector<2x128xf32>
    %cst_709 = arith.constant 5.000000e-01 : f32
    %1483 = vector.broadcast %cst_709 : f32 to vector<2x128xf32>
    %1484 = arith.mulf %1483, %1482 : vector<2x128xf32>
    %cst_710 = arith.constant 5.000000e-01 : f32
    %1485 = vector.broadcast %cst_710 : f32 to vector<2x128xf32>
    %1486 = arith.addf %1484, %1485 : vector<2x128xf32>
    %1487 = vector.extract_strided_slice %1470 {offsets = [0, 256], sizes = [2, 128], strides = [1, 1]} : vector<2x512xf32> to vector<2x128xf32>
    %1488 = math.tanh %1487 : vector<2x128xf32>
    %1489 = vector.extract_strided_slice %1470 {offsets = [0, 384], sizes = [2, 128], strides = [1, 1]} : vector<2x512xf32> to vector<2x128xf32>
    %cst_711 = arith.constant 5.000000e-01 : f32
    %1490 = vector.broadcast %cst_711 : f32 to vector<2x128xf32>
    %1491 = arith.mulf %1490, %1489 : vector<2x128xf32>
    %1492 = math.tanh %1491 : vector<2x128xf32>
    %cst_712 = arith.constant 5.000000e-01 : f32
    %1493 = vector.broadcast %cst_712 : f32 to vector<2x128xf32>
    %1494 = arith.mulf %1493, %1492 : vector<2x128xf32>
    %cst_713 = arith.constant 5.000000e-01 : f32
    %1495 = vector.broadcast %cst_713 : f32 to vector<2x128xf32>
    %1496 = arith.addf %1494, %1495 : vector<2x128xf32>
    %1497 = arith.mulf %1486, %1453 : vector<2x128xf32>
    %1498 = arith.mulf %1478, %1488 : vector<2x128xf32>
    %1499 = arith.addf %1497, %1498 : vector<2x128xf32>
    %1500 = math.tanh %1499 : vector<2x128xf32>
    %1501 = arith.mulf %1496, %1500 : vector<2x128xf32>
    %1502 = vector.extract_strided_slice %1501 {offsets = [0, 0], sizes = [1, 64], strides = [1, 1]} : vector<2x128xf32> to vector<1x64xf32>
    %c31_714 = arith.constant 31 : index
    %c0_715 = arith.constant 0 : index
    %1503 = vector.load %arg13[%c31_714, %c0_715] : memref<64x128xf32, #tpu.memory_space<vmem>>, vector<1x64xf32>
    tpu.vector_store %arg13[%c31_714, %c0_715], %1502 {strides = array<i32>} : memref<64x128xf32, #tpu.memory_space<vmem>>, vector<1x64xf32>,
    %1504 = vector.extract_strided_slice %1501 {offsets = [0, 64], sizes = [1, 64], strides = [1, 1]} : vector<2x128xf32> to vector<1x64xf32>
    %c0_716 = arith.constant 0 : index
    %c64_717 = arith.constant 64 : index
    %1505 = vector.load %arg13[%c0_716, %c64_717] : memref<64x128xf32, #tpu.memory_space<vmem>>, vector<1x64xf32>
    tpu.vector_store %arg13[%c0_716, %c64_717], %1504 {strides = array<i32>} : memref<64x128xf32, #tpu.memory_space<vmem>>, vector<1x64xf32>,
    %1506 = vector.extract_strided_slice %1501 {offsets = [1, 0], sizes = [1, 64], strides = [1, 1]} : vector<2x128xf32> to vector<1x64xf32>
    %c63_718 = arith.constant 63 : index
    %c0_719 = arith.constant 0 : index
    %1507 = vector.load %arg13[%c63_718, %c0_719] : memref<64x128xf32, #tpu.memory_space<vmem>>, vector<1x64xf32>
    tpu.vector_store %arg13[%c63_718, %c0_719], %1506 {strides = array<i32>} : memref<64x128xf32, #tpu.memory_space<vmem>>, vector<1x64xf32>,
    %1508 = vector.extract_strided_slice %1501 {offsets = [1, 64], sizes = [1, 64], strides = [1, 1]} : vector<2x128xf32> to vector<1x64xf32>
    %c32_720 = arith.constant 32 : index
    %c64_721 = arith.constant 64 : index
    %1509 = vector.load %arg13[%c32_720, %c64_721] : memref<64x128xf32, #tpu.memory_space<vmem>>, vector<1x64xf32>
    tpu.vector_store %arg13[%c32_720, %c64_721], %1508 {strides = array<i32>} : memref<64x128xf32, #tpu.memory_space<vmem>>, vector<1x64xf32>,
    %c0_722 = arith.constant 0 : index
    %c0_723 = arith.constant 0 : index
    %1510 = vector.load %arg13[%c0_722, %c0_723] : memref<64x128xf32, #tpu.memory_space<vmem>>, vector<32x128xf32>
    %c0_724 = arith.constant 0 : index
    %c0_725 = arith.constant 0 : index
    %1511 = vector.load %arg7[%c0_724, %c0_725] : memref<1x128xf32, #tpu.memory_space<vmem>>, vector<1x128xf32>
    %1512 = vector.broadcast %1511 : vector<1x128xf32> to vector<32x128xf32>
    %1513 = arith.mulf %1510, %1512 : vector<32x128xf32>
    %cst_726 = arith.constant dense<0.000000e+00> : vector<32xf32>
    %1514 = vector.multi_reduction <add>, %1513, %cst_726 [1] : vector<32x128xf32> to vector<32xf32>
    %1515 = vector.shape_cast %1514 : vector<32xf32> to vector<32x1xf32>
    %c0_727 = arith.constant 0 : index
    %c0_728 = arith.constant 0 : index
    %1516 = vector.load %arg8[%c0_727, %c0_728] : memref<1x1xf32, #tpu.memory_space<vmem>>, vector<1x1xf32>
    %1517 = vector.broadcast %1516 : vector<1x1xf32> to vector<32x1xf32>
    %1518 = arith.addf %1515, %1517 : vector<32x1xf32>
    %cst_729 = arith.constant dense<0xFF800000> : vector<1xf32>
    %1519 = vector.multi_reduction <maximumf>, %1518, %cst_729 [0] : vector<32x1xf32> to vector<1xf32>
    %1520 = vector.shape_cast %1519 : vector<1xf32> to vector<1x1xf32>
    %1521 = vector.broadcast %1520 : vector<1x1xf32> to vector<32x1xf32>
    %1522 = arith.subf %1518, %1521 : vector<32x1xf32>
    %1523 = math.exp %1522 : vector<32x1xf32>
    %cst_730 = arith.constant dense<0.000000e+00> : vector<1xf32>
    %1524 = vector.multi_reduction <add>, %1523, %cst_730 [0] : vector<32x1xf32> to vector<1xf32>
    %1525 = vector.shape_cast %1524 : vector<1xf32> to vector<1x1xf32>
    %1526 = vector.broadcast %1525 : vector<1x1xf32> to vector<32x1xf32>
    %1527 = arith.divf %1523, %1526 : vector<32x1xf32>
    %1528 = vector.broadcast %1527 : vector<32x1xf32> to vector<32x128xf32>
    %1529 = arith.mulf %1510, %1528 : vector<32x128xf32>
    %cst_731 = arith.constant dense<0.000000e+00> : vector<128xf32>
    %1530 = vector.multi_reduction <add>, %1529, %cst_731 [0] : vector<32x128xf32> to vector<128xf32>
    %1531 = vector.shape_cast %1530 : vector<128xf32> to vector<1x128xf32>
    %c32_732 = arith.constant 32 : index
    %c0_733 = arith.constant 0 : index
    %1532 = vector.load %arg13[%c32_732, %c0_733] : memref<64x128xf32, #tpu.memory_space<vmem>>, vector<32x128xf32>
    %c0_734 = arith.constant 0 : index
    %c0_735 = arith.constant 0 : index
    %1533 = vector.load %arg7[%c0_734, %c0_735] : memref<1x128xf32, #tpu.memory_space<vmem>>, vector<1x128xf32>
    %1534 = vector.broadcast %1533 : vector<1x128xf32> to vector<32x128xf32>
    %1535 = arith.mulf %1532, %1534 : vector<32x128xf32>
    %cst_736 = arith.constant dense<0.000000e+00> : vector<32xf32>
    %1536 = vector.multi_reduction <add>, %1535, %cst_736 [1] : vector<32x128xf32> to vector<32xf32>
    %1537 = vector.shape_cast %1536 : vector<32xf32> to vector<32x1xf32>
    %c0_737 = arith.constant 0 : index
    %c0_738 = arith.constant 0 : index
    %1538 = vector.load %arg8[%c0_737, %c0_738] : memref<1x1xf32, #tpu.memory_space<vmem>>, vector<1x1xf32>
    %1539 = vector.broadcast %1538 : vector<1x1xf32> to vector<32x1xf32>
    %1540 = arith.addf %1537, %1539 : vector<32x1xf32>
    %cst_739 = arith.constant dense<0xFF800000> : vector<1xf32>
    %1541 = vector.multi_reduction <maximumf>, %1540, %cst_739 [0] : vector<32x1xf32> to vector<1xf32>
    %1542 = vector.shape_cast %1541 : vector<1xf32> to vector<1x1xf32>
    %1543 = vector.broadcast %1542 : vector<1x1xf32> to vector<32x1xf32>
    %1544 = arith.subf %1540, %1543 : vector<32x1xf32>
    %1545 = math.exp %1544 : vector<32x1xf32>
    %cst_740 = arith.constant dense<0.000000e+00> : vector<1xf32>
    %1546 = vector.multi_reduction <add>, %1545, %cst_740 [0] : vector<32x1xf32> to vector<1xf32>
    %1547 = vector.shape_cast %1546 : vector<1xf32> to vector<1x1xf32>
    %1548 = vector.broadcast %1547 : vector<1x1xf32> to vector<32x1xf32>
    %1549 = arith.divf %1545, %1548 : vector<32x1xf32>
    %1550 = vector.broadcast %1549 : vector<32x1xf32> to vector<32x128xf32>
    %1551 = arith.mulf %1532, %1550 : vector<32x128xf32>
    %cst_741 = arith.constant dense<0.000000e+00> : vector<128xf32>
    %1552 = vector.multi_reduction <add>, %1551, %cst_741 [0] : vector<32x128xf32> to vector<128xf32>
    %1553 = vector.shape_cast %1552 : vector<128xf32> to vector<1x128xf32>
    %1554 = tpu.concatenate %1531, %1553 in 0 : vector<1x128xf32>, vector<1x128xf32> -> vector<2x128xf32>
    %c0_742 = arith.constant 0 : index
    %c0_743 = arith.constant 0 : index
    %1555 = vector.load %arg9[%c0_742, %c0_743] : memref<128x128xf32, #tpu.memory_space<vmem>>, vector<128x128xf32>
    %cst_744 = arith.constant dense<0.000000e+00> : vector<2x128xf32>
    %1556 = tpu.matmul %1554, %1555, %cst_744 {dimension_numbers = #tpu.dot_dimension_numbers<[1], [0], [0], [1], [0, 0, 1, 1], [], []>} : vector<2x128xf32>, vector<128x128xf32>, vector<2x128xf32> -> vector<2x128xf32>
    %c0_745 = arith.constant 0 : index
    %c0_746 = arith.constant 0 : index
    %1557 = vector.load %arg10[%c0_745, %c0_746] : memref<1x128xf32, #tpu.memory_space<vmem>>, vector<1x128xf32>
    %1558 = vector.broadcast %1557 : vector<1x128xf32> to vector<2x128xf32>
    %1559 = arith.addf %1556, %1558 : vector<2x128xf32>
    %c0_747 = arith.constant 0 : index
    %c0_748 = arith.constant 0 : index
    %1560 = vector.load %arg11[%c0_747, %c0_748] : memref<2x128xf32, #tpu.memory_space<vmem>>, vector<2x128xf32>
    tpu.vector_store %arg11[%c0_747, %c0_748], %1559 {strides = array<i32>} : memref<2x128xf32, #tpu.memory_space<vmem>>, vector<2x128xf32>,
    return
  }
  func.func @transform_0(%arg0: i32) -> (i32, i32) {
    %c0_i32 = arith.constant 0 : i32
    %c0_i32_0 = arith.constant 0 : i32
    %c0_i32_1 = arith.constant 0 : i32
    return %c0_i32, %c0_i32_0 : i32, i32
  }
  func.func @transform_1(%arg0: i32) -> (i32, i32) {
    %c0_i32 = arith.constant 0 : i32
    %c0_i32_0 = arith.constant 0 : i32
    %c0_i32_1 = arith.constant 0 : i32
    return %c0_i32, %c0_i32_0 : i32, i32
  }
  func.func @transform_2(%arg0: i32) -> (i32, i32) {
    %c0_i32 = arith.constant 0 : i32
    %c0_i32_0 = arith.constant 0 : i32
    %c0_i32_1 = arith.constant 0 : i32
    return %c0_i32, %c0_i32_0 : i32, i32
  }
  func.func @transform_3(%arg0: i32) -> (i32, i32) {
    %c0_i32 = arith.constant 0 : i32
    %c0_i32_0 = arith.constant 0 : i32
    %c0_i32_1 = arith.constant 0 : i32
    return %c0_i32, %c0_i32_0 : i32, i32
  }
  func.func @transform_4(%arg0: i32) -> (i32, i32) {
    %c0_i32 = arith.constant 0 : i32
    %c0_i32_0 = arith.constant 0 : i32
    %c0_i32_1 = arith.constant 0 : i32
    return %c0_i32, %c0_i32_0 : i32, i32
  }
  func.func @transform_5(%arg0: i32) -> (i32, i32) {
    %c0_i32 = arith.constant 0 : i32
    %c0_i32_0 = arith.constant 0 : i32
    %c0_i32_1 = arith.constant 0 : i32
    return %c0_i32, %c0_i32_0 : i32, i32
  }
  func.func @transform_6(%arg0: i32) -> (i32, i32) {
    %c0_i32 = arith.constant 0 : i32
    %c0_i32_0 = arith.constant 0 : i32
    %c0_i32_1 = arith.constant 0 : i32
    return %c0_i32, %c0_i32_0 : i32, i32
  }
  func.func @transform_7(%arg0: i32) -> (i32, i32) {
    %c0_i32 = arith.constant 0 : i32
    %c0_i32_0 = arith.constant 0 : i32
    %c0_i32_1 = arith.constant 0 : i32
    return %c0_i32, %c0_i32_0 : i32, i32
  }
  func.func @transform_8(%arg0: i32) -> (i32, i32) {
    %c0_i32 = arith.constant 0 : i32
    %c0_i32_0 = arith.constant 0 : i32
    %c0_i32_1 = arith.constant 0 : i32
    return %c0_i32, %c0_i32_0 : i32, i32
  }
  func.func @transform_9(%arg0: i32) -> (i32, i32) {
    %c0_i32 = arith.constant 0 : i32
    %c0_i32_0 = arith.constant 0 : i32
    %c0_i32_1 = arith.constant 0 : i32
    return %c0_i32, %c0_i32_0 : i32, i32
  }
  func.func @transform_10(%arg0: i32) -> (i32, i32) {
    %c0_i32 = arith.constant 0 : i32
    %c0_i32_0 = arith.constant 0 : i32
    %c0_i32_1 = arith.constant 0 : i32
    return %c0_i32, %c0_i32_0 : i32, i32
  }
}

</mosaic_0001>

<bundles_post_ra>
// kernel: hybrid_forward.1
= control target key start
LH: loop header
LB: loop body
LE: loop exit
PB: predicated region body
PF: predicated region fallthrough
CT: control target
= control target key end

     0   :  { %s18089_s0 = inlined_call_operand.vmem [shape: f32[128,640], index: 0, kind: input, shape index: {}]   ;;  %s18090_s1 = inlined_call_operand.vmem [shape: f32[640,64], index: 1, kind: input, shape index: {}]   ;;  %s18091_s2 = inlined_call_operand.vmem [shape: f32[1,64], index: 2, kind: input, shape index: {}]   ;;  %s18092_s3 = inlined_call_operand.vmem [shape: f32[64,512], index: 3, kind: input, shape index: {}]   ;;  %s18093_s4 = inlined_call_operand.vmem [shape: f32[1,512], index: 4, kind: input, shape index: {}]   ;;  %s18094_s5 = inlined_call_operand.vmem [shape: bf16[128,512], index: 5, kind: input, shape index: {}]   ;;  %s18095_s6 = inlined_call_operand.vmem [shape: f32[1,128], index: 6, kind: input, shape index: {}]   ;;  %s18096_s7 = inlined_call_operand.<no memory space> [shape: f32[1,1], index: 7, kind: input, shape index: {}]   ;;  %s18097_s8 = inlined_call_operand.vmem [shape: f32[128,128], index: 8, kind: input, shape index: {}]   ;;  %s18098_s9 = inlined_call_operand.vmem [shape: f32[1,128], index: 9, kind: input, shape index: {}]   ;;  %s18099_s10 = inlined_call_operand.hbm [shape: f32[2,128], index: 10, kind: output, shape index: {}]  }
   0x1   :  { %v15_v0 = vstv %s18096_s7 }
   0x2   :  { %16 = vst [vmem:[#allocation4] sm:$0x1] %v15_v0 }
   0x3   :  { %v135_v1 = vld [vmem:[%s18090_s1 + $0x80] sm:$0xff]  ;;  %v136_v2 = vld [vmem:[%s18090_s1 + $0x88] sm:$0xff]  ;;  %v137_v12 = vld [vmem:[%s18090_s1 + $0x90] sm:$0xff] }
   0x4   :  { %v119_v3 = vld [vmem:[%s18090_s1] sm:$0xff]  ;;  %v13275_v4 = vpack.c.bf16 %v136_v2, %v135_v1  ;;  %v120_v5 = vld [vmem:[%s18090_s1 + $0x8] sm:$0xff]  ;;  %v138_v14 = vld [vmem:[%s18090_s1 + $0x98] sm:$0xff] }
   0x5   :  { %v167_v6 = vld [vmem:[%s18090_s1 + $0x180] sm:$0xff]  ;;  %v168_v7 = vld [vmem:[%s18090_s1 + $0x188] sm:$0xff]  ;;  %v13277_v8 = vpack.c.bf16 %v120_v5, %v119_v3  ;;  %v121_v15 = vld [vmem:[%s18090_s1 + $0x10] sm:$0xff]  ;;  %v13279_v17 = vpack.c.bf16 %v138_v14, %v137_v12 }
   0x6   :  { %v13307_v9 = vpack.c.bf16 %v168_v7, %v167_v6  ;;  %v151_v10 = vld [vmem:[%s18090_s1 + $0x100] sm:$0xff]  ;;  %v152_v11 = vld [vmem:[%s18090_s1 + $0x108] sm:$0xff]  ;;  %13276 = vmatprep.subr.bf16.mxu0 %v13275_v4  ;;  %v122_v16 = vld [vmem:[%s18090_s1 + $0x18] sm:$0xff] }
   0x7   :  { %v13309_v13 = vpack.c.bf16 %v152_v11, %v151_v10  ;;  %13278 = vmatpush3.bf16.msra.mxu0 %v13277_v8  ;;  %v13281_v18 = vpack.c.bf16 %v122_v16, %v121_v15  ;;  %v169_v19 = vld [vmem:[%s18090_s1 + $0x190] sm:$0xff]  ;;  %v170_v20 = vld [vmem:[%s18090_s1 + $0x198] sm:$0xff]  ;;  %v139_v24 = vld [vmem:[%s18090_s1 + $0xa0] sm:$0xff] }
   0x8   :  { %13308 = vmatprep.subr.bf16.mxu1 %v13307_v9  ;;  %v153_v21 = vld [vmem:[%s18090_s1 + $0x110] sm:$0xff]  ;;  %v13311_v22 = vpack.c.bf16 %v170_v20, %v169_v19  ;;  %v154_v23 = vld [vmem:[%s18090_s1 + $0x118] sm:$0xff]  ;;  %v140_v25 = vld [vmem:[%s18090_s1 + $0xa8] sm:$0xff]  ;;  %13280 = vmatprep.subr.bf16.mxu0 %v13279_v17 }
   0x9   :  { %13310 = vmatpush3.bf16.msra.mxu1 %v13309_v13  ;;  %v13313_v26 = vpack.c.bf16 %v154_v23, %v153_v21  ;;  %v13283_v27 = vpack.c.bf16 %v140_v25, %v139_v24  ;;  %v123_v28 = vld [vmem:[%s18090_s1 + $0x20] sm:$0xff]  ;;  %v124_v29 = vld [vmem:[%s18090_s1 + $0x28] sm:$0xff]  ;;  %v141_v36 = vld [vmem:[%s18090_s1 + $0xb0] sm:$0xff] }
   0xa   :  { %v171_v30 = vld [vmem:[%s18090_s1 + $0x1a0] sm:$0xff]  ;;  %13312 = vmatprep.subr.bf16.mxu1 %v13311_v22  ;;  %v172_v31 = vld [vmem:[%s18090_s1 + $0x1a8] sm:$0xff]  ;;  %v13285_v34 = vpack.c.bf16 %v124_v29, %v123_v28  ;;  %v142_v37 = vld [vmem:[%s18090_s1 + $0xb8] sm:$0xff] }
   0xb   :  { %v155_v32 = vld [vmem:[%s18090_s1 + $0x120] sm:$0xff]  ;;  %v156_v33 = vld [vmem:[%s18090_s1 + $0x128] sm:$0xff]  ;;  %13282 = vmatpush3.bf16.msra.mxu0 %v13281_v18  ;;  %v13315_v35 = vpack.c.bf16 %v172_v31, %v171_v30  ;;  %v125_v38 = vld [vmem:[%s18090_s1 + $0x30] sm:$0xff]  ;;  %v13287_v40 = vpack.c.bf16 %v142_v37, %v141_v36 }
   0xc   :  { %13284 = vmatprep.subr.bf16.mxu0 %v13283_v27  ;;  %v13317_v39 = vpack.c.bf16 %v156_v33, %v155_v32  ;;  %v126_v41 = vld [vmem:[%s18090_s1 + $0x38] sm:$0xff]  ;;  %v173_v42 = vld [vmem:[%s18090_s1 + $0x1b0] sm:$0xff]  ;;  %v143_v47 = vld [vmem:[%s18090_s1 + $0xc0] sm:$0xff] }
   0xd   :  { %13314 = vmatpush3.bf16.msra.mxu1 %v13313_v26  ;;  %v174_v43 = vld [vmem:[%s18090_s1 + $0x1b8] sm:$0xff]  ;;  %v157_v45 = vld [vmem:[%s18090_s1 + $0x130] sm:$0xff]  ;;  %v144_v48 = vld [vmem:[%s18090_s1 + $0xc8] sm:$0xff]  ;;  %v13289_v49 = vpack.c.bf16 %v126_v41, %v125_v38 }
   0xe   :  { %13316 = vmatprep.subr.bf16.mxu1 %v13315_v35  ;;  %v13319_v44 = vpack.c.bf16 %v174_v43, %v173_v42  ;;  %v158_v46 = vld [vmem:[%s18090_s1 + $0x138] sm:$0xff]  ;;  %v175_v50 = vld [vmem:[%s18090_s1 + $0x1c0] sm:$0xff]  ;;  %v176_v51 = vld [vmem:[%s18090_s1 + $0x1c8] sm:$0xff]  ;;  %v13291_v53 = vpack.c.bf16 %v144_v48, %v143_v47 }
   0xf   :  { %13286 = vmatpush3.bf16.msra.mxu0 %v13285_v34  ;;  %v13321_v52 = vpack.c.bf16 %v158_v46, %v157_v45  ;;  %v127_v54 = vld [vmem:[%s18090_s1 + $0x40] sm:$0xff]  ;;  %v128_v55 = vld [vmem:[%s18090_s1 + $0x48] sm:$0xff]  ;;  %v13323_v57 = vpack.c.bf16 %v176_v51, %v175_v50  ;;  %v145_v59 = vld [vmem:[%s18090_s1 + $0xd0] sm:$0xff] }
  0x10   :  { %13288 = vmatprep.subr.bf16.mxu0 %v13287_v40  ;;  %v159_v56 = vld [vmem:[%s18090_s1 + $0x140] sm:$0xff]  ;;  %v160_v58 = vld [vmem:[%s18090_s1 + $0x148] sm:$0xff]  ;;  %v146_v60 = vld [vmem:[%s18090_s1 + $0xd8] sm:$0xff]  ;;  %v13293_v63 = vpack.c.bf16 %v128_v55, %v127_v54 }
  0x11   :  { %13318 = vmatpush3.bf16.msra.mxu1 %v13317_v39  ;;  %v177_v61 = vld [vmem:[%s18090_s1 + $0x1d0] sm:$0xff]  ;;  %v178_v62 = vld [vmem:[%s18090_s1 + $0x1d8] sm:$0xff]  ;;  %v13325_v0 = vpack.c.bf16 %v160_v58, %v159_v56  ;;  %v13295_v1 = vpack.c.bf16 %v146_v60, %v145_v59  ;;  %v147_v7 = vld [vmem:[%s18090_s1 + $0xe0] sm:$0xff] }
  0x12   :  { %13320 = vmatprep.subr.bf16.mxu1 %v13319_v44  ;;  %v129_v2 = vld [vmem:[%s18090_s1 + $0x50] sm:$0xff]  ;;  %v130_v3 = vld [vmem:[%s18090_s1 + $0x58] sm:$0xff]  ;;  %v13327_v5 = vpack.c.bf16 %v178_v62, %v177_v61  ;;  %v148_v8 = vld [vmem:[%s18090_s1 + $0xe8] sm:$0xff] }
  0x13   :  { %13290 = vmatpush3.bf16.msra.mxu0 %v13289_v49  ;;  %v161_v4 = vld [vmem:[%s18090_s1 + $0x150] sm:$0xff]  ;;  %v162_v6 = vld [vmem:[%s18090_s1 + $0x158] sm:$0xff]  ;;  %v179_v9 = vld [vmem:[%s18090_s1 + $0x1e0] sm:$0xff]  ;;  %v13297_v11 = vpack.c.bf16 %v130_v3, %v129_v2  ;;  %v13299_v15 = vpack.c.bf16 %v148_v8, %v147_v7 }
  0x14   :  { %13292 = vmatprep.subr.bf16.mxu0 %v13291_v53  ;;  %v180_v10 = vld [vmem:[%s18090_s1 + $0x1e8] sm:$0xff]  ;;  %v131_v12 = vld [vmem:[%s18090_s1 + $0x60] sm:$0xff]  ;;  %v13329_v14 = vpack.c.bf16 %v162_v6, %v161_v4  ;;  %v149_v20 = vld [vmem:[%s18090_s1 + $0xf0] sm:$0xff] }
  0x15   :  { %13322 = vmatpush3.bf16.msra.mxu1 %v13321_v52  ;;  %v40_v13 = vld [vmem:[%s18089_s0 + $0x8] sm:$0xff]  ;;  %v163_v17 = vld [vmem:[%s18090_s1 + $0x160] sm:$0xff]  ;;  %v13331_v19 = vpack.c.bf16 %v180_v10, %v179_v9  ;;  %v150_v21 = vld [vmem:[%s18090_s1 + $0xf8] sm:$0xff] }
  0x16   :  { %13324 = vmatprep.subr.bf16.mxu1 %v13323_v57  ;;  %v132_v16 = vld [vmem:[%s18090_s1 + $0x68] sm:$0xff]  ;;  %270 = vmatprep.mubr.f32.mxu0 %v40_v13  ;;  %v42_v22 = vld [vmem:[%s18089_s0 + $0x18] sm:$0xff]  ;;  %v181_v23 = vld [vmem:[%s18090_s1 + $0x1f0] sm:$0xff]  ;;  %v13303_v27 = vpack.c.bf16 %v150_v21, %v149_v20 }
  0x17   :  { %13294 = vmatpush3.bf16.msra.mxu0 %v13293_v63  ;;  %v164_v18 = vld [vmem:[%s18090_s1 + $0x168] sm:$0xff]  ;;  %v182_v24 = vld [vmem:[%s18090_s1 + $0x1f8] sm:$0xff]  ;;  %415 = vmatprep.mubr.f32.mxu1 %v42_v22  ;;  %v13301_v25 = vpack.c.bf16 %v132_v16, %v131_v12  ;;  %v133_v28 = vld [vmem:[%s18090_s1 + $0x70] sm:$0xff] }
  0x18   :  { %13296 = vmatprep.subr.bf16.mxu0 %v13295_v1  ;;  %v13333_v26 = vpack.c.bf16 %v164_v18, %v163_v17  ;;  %v134_v29 = vld [vmem:[%s18090_s1 + $0x78] sm:$0xff]  ;;  %v165_v30 = vld [vmem:[%s18090_s1 + $0x170] sm:$0xff]  ;;  %v13335_v31 = vpack.c.bf16 %v182_v24, %v181_v23  ;;  %v183_v33 = vld [vmem:[%s18090_s1 + $0x200] sm:$0xff] }
  0x19   :  { %13326 = vmatpush3.bf16.msra.mxu1 %v13325_v0  ;;  %v166_v32 = vld [vmem:[%s18090_s1 + $0x178] sm:$0xff]  ;;  %v184_v34 = vld [vmem:[%s18090_s1 + $0x208] sm:$0xff]  ;;  %v13305_v35 = vpack.c.bf16 %v134_v29, %v133_v28  ;;  %v185_v38 = vld [vmem:[%s18090_s1 + $0x210] sm:$0xff] }
  0x1a   :  { %13328 = vmatprep.subr.bf16.mxu1 %v13327_v5  ;;  %v13337_v36 = vpack.c.bf16 %v166_v32, %v165_v30  ;;  %v13339_v37 = vpack.c.bf16 %v184_v34, %v183_v33  ;;  %v186_v39 = vld [vmem:[%s18090_s1 + $0x218] sm:$0xff]  ;;  %v39_v40 = vld [vmem:[%s18089_s0] sm:$0xff]  ;;  %v41_v41 = vld [vmem:[%s18089_s0 + $0x10] sm:$0xff] }
  0x1b   :  { %13298 = vmatpush3.bf16.msra.mxu0 %v13297_v11  ;;  %v45_v42 = vld [vmem:[%s18089_s0 + $0x30] sm:$0xff]  ;;  %v47_v43 = vld [vmem:[%s18089_s0 + $0x40] sm:$0xff]  ;;  %v13343_v44 = vpack.c.bf16 %v186_v39, %v185_v38  ;;  %v188_v46 = vld [vmem:[%s18090_s1 + $0x228] sm:$0xff] }
  0x1c   :  { %13300 = vmatprep.subr.bf16.mxu0 %v13299_v15  ;;  %v187_v45 = vld [vmem:[%s18090_s1 + $0x220] sm:$0xff]  ;;  %v44_v47 = vld [vmem:[%s18089_s0 + $0x28] sm:$0xff]  ;;  %v46_v48 = vld [vmem:[%s18089_s0 + $0x38] sm:$0xff] }
  0x1d   :  { %13330 = vmatpush3.bf16.msra.mxu1 %v13329_v14  ;;  %v50_v49 = vld [vmem:[%s18089_s0 + $0x58] sm:$0xff]  ;;  %v52_v50 = vld [vmem:[%s18089_s0 + $0x68] sm:$0xff]  ;;  %v13347_v51 = vpack.c.bf16 %v188_v46, %v187_v45  ;;  %v189_v52 = vld [vmem:[%s18090_s1 + $0x230] sm:$0xff] }
  0x1e   :  { %13332 = vmatprep.subr.bf16.mxu1 %v13331_v19  ;;  %v190_v53 = vld [vmem:[%s18090_s1 + $0x238] sm:$0xff]  ;;  %v49_v54 = vld [vmem:[%s18089_s0 + $0x50] sm:$0xff]  ;;  %v51_v55 = vld [vmem:[%s18089_s0 + $0x60] sm:$0xff] }
  0x1f   :  { %13302 = vmatpush3.bf16.msra.mxu0 %v13301_v25  ;;  %v55_v56 = vld [vmem:[%s18089_s0 + $0x80] sm:$0xff]  ;;  %v57_v57 = vld [vmem:[%s18089_s0 + $0x90] sm:$0xff]  ;;  %v13351_v58 = vpack.c.bf16 %v190_v53, %v189_v52  ;;  %v192_v60 = vld [vmem:[%s18090_s1 + $0x248] sm:$0xff] }
  0x20   :  { %13304 = vmatprep.subr.bf16.mxu0 %v13303_v27  ;;  %v191_v59 = vld [vmem:[%s18090_s1 + $0x240] sm:$0xff]  ;;  %v54_v61 = vld [vmem:[%s18089_s0 + $0x78] sm:$0xff]  ;;  %v56_v62 = vld [vmem:[%s18089_s0 + $0x88] sm:$0xff] }
  0x21   :  { %13334 = vmatpush3.bf16.msra.mxu1 %v13333_v26  ;;  %v60_v63 = vld [vmem:[%s18089_s0 + $0xa8] sm:$0xff]  ;;  %v62_v0 = vld [vmem:[%s18089_s0 + $0xb8] sm:$0xff]  ;;  %v13355_v1 = vpack.c.bf16 %v192_v60, %v191_v59  ;;  %v193_v2 = vld [vmem:[%s18090_s1 + $0x250] sm:$0xff] }
  0x22   :  { %13336 = vmatprep.subr.bf16.mxu1 %v13335_v31  ;;  %v194_v3 = vld [vmem:[%s18090_s1 + $0x258] sm:$0xff]  ;;  %v59_v4 = vld [vmem:[%s18089_s0 + $0xa0] sm:$0xff]  ;;  %v61_v5 = vld [vmem:[%s18089_s0 + $0xb0] sm:$0xff] }
  0x23   :  { %13306 = vmatpush3.bf16.msra.mxu0 %v13305_v35  ;;  %v65_v6 = vld [vmem:[%s18089_s0 + $0xd0] sm:$0xff]  ;;  %v67_v7 = vld [vmem:[%s18089_s0 + $0xe0] sm:$0xff]  ;;  %v13359_v8 = vpack.c.bf16 %v194_v3, %v193_v2  ;;  %v64_v9 = vld [vmem:[%s18089_s0 + $0xc8] sm:$0xff] }
  0x24   :  { %13340 = vmatprep.subr.bf16.mxu0 %v13339_v37  ;;  %v195_v10 = vld [vmem:[%s18090_s1 + $0x260] sm:$0xff]  ;;  %v196_v11 = vld [vmem:[%s18090_s1 + $0x268] sm:$0xff]  ;;  %v66_v12 = vld [vmem:[%s18089_s0 + $0xd8] sm:$0xff] }
  0x25   :  { %13338 = vmatpush3.bf16.msra.mxu1 %v13337_v36  ;;  %v70_v13 = vld [vmem:[%s18089_s0 + $0xf8] sm:$0xff]  ;;  %v72_v14 = vld [vmem:[%s18089_s0 + $0x108] sm:$0xff]  ;;  %v197_v15 = vld [vmem:[%s18090_s1 + $0x270] sm:$0xff]  ;;  %v13363_v18 = vpack.c.bf16 %v196_v11, %v195_v10 }
  0x26   :  { %271 = vmatmul.mubr.f32.vlgmr.msra.gmra.mrb[0].mxu0 %v39_v40  ;;  %v198_v16 = vld [vmem:[%s18090_s1 + $0x278] sm:$0xff]  ;;  %v69_v17 = vld [vmem:[%s18089_s0 + $0xf0] sm:$0xff]  ;;  %v71_v19 = vld [vmem:[%s18089_s0 + $0x100] sm:$0xff] }
  0x27   :  { %13342 = vmatpush3.bf16.msra.mxu0 %v13339_v37  ;;  %275 = vmatprep.mubr.f32.mxu0 %v45_v42  ;;  %v75_v20 = vld [vmem:[%s18089_s0 + $0x120] sm:$0xff]  ;;  %v77_v21 = vld [vmem:[%s18089_s0 + $0x130] sm:$0xff]  ;;  %v74_v22 = vld [vmem:[%s18089_s0 + $0x118] sm:$0xff]  ;;  %v13367_v23 = vpack.c.bf16 %v198_v16, %v197_v15 }
  0x28   :  { %416 = vmatmul.mubr.f32.vlgmr.msra.gmra.mrb[0].mxu1 %v41_v41  ;;  %13344 = vmatprep.subr.bf16.mxu0 %v13343_v44  ;;  %v76_v24 = vld [vmem:[%s18089_s0 + $0x128] sm:$0xff]  ;;  %v82_v26 = vld [vmem:[%s18089_s0 + $0x158] sm:$0xff]  ;;  %v79_v27 = vld [vmem:[%s18089_s0 + $0x140] sm:$0xff] }
  0x29   :  { %420 = vmatprep.mubr.f32.mxu1 %v47_v43  ;;  %v80_v25 = vld [vmem:[%s18089_s0 + $0x148] sm:$0xff]  ;;  %v81_v28 = vld [vmem:[%s18089_s0 + $0x150] sm:$0xff]  ;;  %v87_v30 = vld [vmem:[%s18089_s0 + $0x180] sm:$0xff] }
  0x2a   :  { %276 = vmatmul.mubr.f32.gmra.mrb[2].mxu0 %v44_v47  ;;  %v85_v29 = vld [vmem:[%s18089_s0 + $0x170] sm:$0xff]  ;;  %v84_v31 = vld [vmem:[%s18089_s0 + $0x168] sm:$0xff]  ;;  %v86_v32 = vld [vmem:[%s18089_s0 + $0x178] sm:$0xff] }
  0x2b   :  { %280 = vmatprep.mubr.f32.mxu0 %v50_v49  ;;  %13346 = vmatpush3.bf16.msra.mxu0 %v13343_v44  ;;  %v90_v33 = vld [vmem:[%s18089_s0 + $0x198] sm:$0xff]  ;;  %v92_v34 = vld [vmem:[%s18089_s0 + $0x1a8] sm:$0xff]  ;;  %v89_v35 = vld [vmem:[%s18089_s0 + $0x190] sm:$0xff] }
  0x2c   :  { %421 = vmatmul.mubr.f32.gmra.mrb[2].mxu1 %v46_v48  ;;  %13348 = vmatprep.subr.bf16.mxu0 %v13347_v51  ;;  %v91_v36 = vld [vmem:[%s18089_s0 + $0x1a0] sm:$0xff]  ;;  %v97_v38 = vld [vmem:[%s18089_s0 + $0x1d0] sm:$0xff]  ;;  %v94_v39 = vld [vmem:[%s18089_s0 + $0x1b8] sm:$0xff] }
  0x2d   :  { %425 = vmatprep.mubr.f32.mxu1 %v52_v50  ;;  %v95_v37 = vld [vmem:[%s18089_s0 + $0x1c0] sm:$0xff]  ;;  %v96_v40 = vld [vmem:[%s18089_s0 + $0x1c8] sm:$0xff]  ;;  %v102_v42 = vld [vmem:[%s18089_s0 + $0x1f8] sm:$0xff] }
  0x2e   :  { %281 = vmatmul.mubr.f32.gmra.mrb[4].mxu0 %v49_v54  ;;  %v100_v41 = vld [vmem:[%s18089_s0 + $0x1e8] sm:$0xff]  ;;  %v99_v43 = vld [vmem:[%s18089_s0 + $0x1e0] sm:$0xff]  ;;  %v101_v44 = vld [vmem:[%s18089_s0 + $0x1f0] sm:$0xff] }
  0x2f   :  { %285 = vmatprep.mubr.f32.mxu0 %v55_v56  ;;  %13350 = vmatpush3.bf16.msra.mxu0 %v13347_v51  ;;  %v105_v45 = vld [vmem:[%s18089_s0 + $0x210] sm:$0xff]  ;;  %v107_v46 = vld [vmem:[%s18089_s0 + $0x220] sm:$0xff]  ;;  %v104_v47 = vld [vmem:[%s18089_s0 + $0x208] sm:$0xff] }
  0x30   :  { %426 = vmatmul.mubr.f32.gmra.mrb[4].mxu1 %v51_v55  ;;  %13352 = vmatprep.subr.bf16.mxu0 %v13351_v58  ;;  %v106_v48 = vld [vmem:[%s18089_s0 + $0x218] sm:$0xff]  ;;  %v112_v50 = vld [vmem:[%s18089_s0 + $0x248] sm:$0xff]  ;;  %v109_v51 = vld [vmem:[%s18089_s0 + $0x230] sm:$0xff] }
  0x31   :  { %430 = vmatprep.mubr.f32.mxu1 %v57_v57  ;;  %v110_v49 = vld [vmem:[%s18089_s0 + $0x238] sm:$0xff]  ;;  %v111_v52 = vld [vmem:[%s18089_s0 + $0x240] sm:$0xff]  ;;  %v117_v54 = vld [vmem:[%s18089_s0 + $0x270] sm:$0xff] }
  0x32   :  { %286 = vmatmul.mubr.f32.gmra.mrb[6].mxu0 %v54_v61  ;;  %v115_v53 = vld [vmem:[%s18089_s0 + $0x260] sm:$0xff]  ;;  %v114_v55 = vld [vmem:[%s18089_s0 + $0x258] sm:$0xff]  ;;  %v116_v56 = vld [vmem:[%s18089_s0 + $0x268] sm:$0xff] }
  0x33   :  { %290 = vmatprep.mubr.f32.mxu0 %v60_v63  ;;  %13354 = vmatpush3.bf16.msra.mxu0 %v13351_v58  ;;  %v43_v57 = vld [vmem:[%s18089_s0 + $0x20] sm:$0xff]  ;;  %v48_v58 = vld [vmem:[%s18089_s0 + $0x48] sm:$0xff]  ;;  %v53_v59 = vld [vmem:[%s18089_s0 + $0x70] sm:$0xff] }
  0x34   :  { %431 = vmatmul.mubr.f32.gmra.mrb[6].mxu1 %v56_v62  ;;  %13356 = vmatprep.subr.bf16.mxu0 %v13355_v1  ;;  %v58_v60 = vld [vmem:[%s18089_s0 + $0x98] sm:$0xff]  ;;  %v63_v61 = vld [vmem:[%s18089_s0 + $0xc0] sm:$0xff]  ;;  %v68_v62 = vld [vmem:[%s18089_s0 + $0xe8] sm:$0xff] }
  0x35   :  { %435 = vmatprep.mubr.f32.mxu1 %v62_v0  ;;  %v73_v63 = vld [vmem:[%s18089_s0 + $0x110] sm:$0xff]  ;;  %v78_v0 = vld [vmem:[%s18089_s0 + $0x138] sm:$0xff]  ;;  %v88_v2 = vld [vmem:[%s18089_s0 + $0x188] sm:$0xff] }
  0x36   :  { %291 = vmatmul.mubr.f32.gmra.mrb[8].mxu0 %v59_v4  ;;  %v93_v3 = vld [vmem:[%s18089_s0 + $0x1b0] sm:$0xff]  ;;  %v98_v4 = vld [vmem:[%s18089_s0 + $0x1d8] sm:$0xff]  ;;  %v662_v10 = vld [vmem:[%s18092_s3 + $0x28] sm:$0xff] }
  0x37   :  { %295 = vmatprep.mubr.f32.mxu0 %v65_v6  ;;  %13358 = vmatpush3.bf16.msra.mxu0 %v13355_v1  ;;  %v83_v1 = vld [vmem:[%s18089_s0 + $0x160] sm:$0xff]  ;;  %v108_v6 = vld [vmem:[%s18089_s0 + $0x228] sm:$0xff] }
  0x38   :  { %436 = vmatmul.mubr.f32.gmra.mrb[8].mxu1 %v61_v5  ;;  %13360 = vmatprep.subr.bf16.mxu0 %v13359_v8  ;;  %v103_v5 = vld [vmem:[%s18089_s0 + $0x200] sm:$0xff] }
  0x39   :  { %440 = vmatprep.mubr.f32.mxu1 %v67_v7  ;;  %v113_v7 = vld [vmem:[%s18089_s0 + $0x250] sm:$0xff] }
  0x3a   :  { %296 = vmatmul.mubr.f32.gmra.mrb[10].mxu0 %v64_v9  ;;  %v658_v9 = vld [vmem:[%s18092_s3 + $0x8] sm:$0xff] }
  0x3b   :  { %300 = vmatprep.mubr.f32.mxu0 %v70_v13  ;;  %13362 = vmatpush3.bf16.msra.mxu0 %v13359_v8  ;;  %v118_v8 = vld [vmem:[%s18089_s0 + $0x278] sm:$0xff]  ;;  %v13371_v11 = vpack.c.bf16 %v662_v10, %v658_v9  ;;  %v661_v13 = vld [vmem:[%s18092_s3 + $0x20] sm:$0xff] }
  0x3c   :  { %441 = vmatmul.mubr.f32.gmra.mrb[10].mxu1 %v66_v12  ;;  %13364 = vmatprep.subr.bf16.mxu0 %v13363_v18  ;;  %v657_v12 = vld [vmem:[%s18092_s3] sm:$0xff] }
  0x3d   :  { %445 = vmatprep.mubr.f32.mxu1 %v72_v14  ;;  %13372 = vmatprep.subr.bf16.mxu1 %v13371_v11  ;;  %v13373_v14 = vpack.c.bf16 %v661_v13, %v657_v12 }
  0x3e   :  { %301 = vmatmul.mubr.f32.gmra.mrb[12].mxu0 %v69_v17 }
  0x3f   :  { %305 = vmatprep.mubr.f32.mxu0 %v75_v20  ;;  %13366 = vmatpush3.bf16.msra.mxu0 %v13363_v18 }
  0x40   :  { %446 = vmatmul.mubr.f32.gmra.mrb[12].mxu1 %v71_v19  ;;  %13368 = vmatprep.subr.bf16.mxu0 %v13367_v23 }
  0x41   :  { %450 = vmatprep.mubr.f32.mxu1 %v77_v21  ;;  %13374 = vmatpush1.bf16.msra.mxu1 %v13373_v14 }
  0x42   :  { %306 = vmatmul.mubr.f32.gmra.mrb[14].mxu0 %v74_v22 }
  0x43   :  { %310 = vmatprep.mubr.f32.mxu0 %v80_v25  ;;  %13370 = vmatpush3.bf16.msra.mxu0 %v13367_v23 }
  0x44   :  { %451 = vmatmul.mubr.f32.gmra.mrb[14].mxu1 %v76_v24 }
  0x45   :  { %455 = vmatprep.mubr.f32.mxu1 %v82_v26 }
  0x46   :  { %311 = vmatmul.mubr.f32.gmra.mrb[16].mxu0 %v79_v27 }
  0x47   :  { %315 = vmatprep.mubr.f32.mxu0 %v85_v29 }
  0x48   :  { %456 = vmatmul.mubr.f32.gmra.mrb[16].mxu1 %v81_v28 }
  0x49   :  { %460 = vmatprep.mubr.f32.mxu1 %v87_v30 }
  0x4a   :  { %316 = vmatmul.mubr.f32.gmra.mrb[18].mxu0 %v84_v31 }
  0x4b   :  { %320 = vmatprep.mubr.f32.mxu0 %v90_v33 }
  0x4c   :  { %461 = vmatmul.mubr.f32.gmra.mrb[18].mxu1 %v86_v32 }
  0x4d   :  { %465 = vmatprep.mubr.f32.mxu1 %v92_v34 }
  0x4e   :  { %321 = vmatmul.mubr.f32.gmra.mrb[20].mxu0 %v89_v35 }
  0x4f   :  { %325 = vmatprep.mubr.f32.mxu0 %v95_v37 }
  0x50   :  { %466 = vmatmul.mubr.f32.gmra.mrb[20].mxu1 %v91_v36 }
  0x51   :  { %470 = vmatprep.mubr.f32.mxu1 %v97_v38 }
  0x52   :  { %326 = vmatmul.mubr.f32.gmra.mrb[22].mxu0 %v94_v39 }
  0x53   :  { %330 = vmatprep.mubr.f32.mxu0 %v100_v41 }
  0x54   :  { %471 = vmatmul.mubr.f32.gmra.mrb[22].mxu1 %v96_v40 }
  0x55   :  { %475 = vmatprep.mubr.f32.mxu1 %v102_v42 }
  0x56   :  { %331 = vmatmul.mubr.f32.gmra.mrb[24].mxu0 %v99_v43 }
  0x57   :  { %335 = vmatprep.mubr.f32.mxu0 %v105_v45 }
  0x58   :  { %476 = vmatmul.mubr.f32.gmra.mrb[24].mxu1 %v101_v44 }
  0x59   :  { %480 = vmatprep.mubr.f32.mxu1 %v107_v46 }
  0x5a   :  { %336 = vmatmul.mubr.f32.gmra.mrb[26].mxu0 %v104_v47 }
  0x5b   :  { %340 = vmatprep.mubr.f32.mxu0 %v110_v49 }
  0x5c   :  { %481 = vmatmul.mubr.f32.gmra.mrb[26].mxu1 %v106_v48 }
  0x5d   :  { %485 = vmatprep.mubr.f32.mxu1 %v112_v50 }
  0x5e   :  { %341 = vmatmul.mubr.f32.gmra.mrb[28].mxu0 %v109_v51 }
  0x5f   :  { %345 = vmatprep.mubr.f32.mxu0 %v115_v53 }
  0x60   :  { %486 = vmatmul.mubr.f32.gmra.mrb[28].mxu1 %v111_v52 }
  0x61   :  { %490 = vmatprep.mubr.f32.mxu1 %v117_v54 }
  0x62   :  { %346 = vmatmul.mubr.f32.gmra.mrb[30].mxu0 %v114_v55 }
  0x63   :  { %13216 = vmatprep.mubr.f32.mxu0 %v43_v57 }
  0x64   :  { %491 = vmatmul.mubr.f32.gmra.mrb[30].mxu1 %v116_v56 }
  0x66   :  { %13217 = vmatmul.mubr.f32.vlgmr.msra.gmra.mrb[32].mxu0 %v48_v58 }
  0x67   :  { %13219 = vmatprep.mubr.f32.mxu0 %v53_v59 }
  0x6a   :  { %13220 = vmatmul.mubr.f32.gmra.mrb[34].mxu0 %v58_v60 }
  0x6b   :  { %13222 = vmatprep.mubr.f32.mxu0 %v63_v61 }
  0x6e   :  { %13223 = vmatmul.mubr.f32.gmra.mrb[36].mxu0 %v68_v62 }
  0x6f   :  { %13225 = vmatprep.mubr.f32.mxu0 %v73_v63 }
  0x72   :  { %13226 = vmatmul.mubr.f32.gmra.mrb[38].mxu0 %v78_v0 }
  0x73   :  { %13228 = vmatprep.mubr.f32.mxu0 %v83_v1 }
  0x76   :  { %13229 = vmatmul.mubr.f32.gmra.mrb[40].mxu0 %v88_v2 }
  0x77   :  { %13231 = vmatprep.mubr.f32.mxu0 %v93_v3 }
  0x7a   :  { %13232 = vmatmul.mubr.f32.gmra.mrb[42].mxu0 %v98_v4 }
  0x7b   :  { %13234 = vmatprep.mubr.f32.mxu0 %v103_v5 }
  0x7e   :  { %13235 = vmatmul.mubr.f32.gmra.mrb[44].mxu0 %v108_v6 }
  0x7f   :  { %13237 = vmatprep.mubr.f32.mxu0 %v113_v7 }
  0x82   :  { %13238 = vmatmul.mubr.f32.gmra.mrb[46].mxu0 %v118_v8 }
  0x83   :  { %17 = vsyncpa [#allocation6], 0  ;;  %v666_v15 = vld [vmem:[%s18092_s3 + $0x48] sm:$0xff]  ;;  %v665_v18 = vld [vmem:[%s18092_s3 + $0x40] sm:$0xff]  ;;  %v14234_v57 = vmov 0.0   ;;  %v14235_v60 = vmov 0  }
  0x84   :  { %v670_v16 = vld [vmem:[%s18092_s3 + $0x68] sm:$0xff]  ;;  %v669_v19 = vld [vmem:[%s18092_s3 + $0x60] sm:$0xff]  ;;  %v660_v27 = vld [vmem:[%s18092_s3 + $0x18] sm:$0xff]  ;;  %800 = vmatprep.mubr.f32.mxu1 %v14234_v57  ;;  %913 = vmatprep.mubr.f32.mxu0 %v14234_v57  ;;  %vm711_vm0 = vcmask 523264   ;;  %vm1367_vm5 = vcmask 516096   ;;  %vm1369_vm6 = vcmask 1040896  }
  0x85   :  { %v13375_v17 = vpack.c.bf16 %v670_v16, %v666_v15  ;;  %v13377_v20 = vpack.c.bf16 %v669_v19, %v665_v18  ;;  %v674_v21 = vld [vmem:[%s18092_s3 + $0x88] sm:$0xff]  ;;  %v673_v24 = vld [vmem:[%s18092_s3 + $0x80] sm:$0xff]  ;;  %v664_v28 = vld [vmem:[%s18092_s3 + $0x38] sm:$0xff]  ;;  %13433 = vset.pattern.permute.xlu1 %v14235_v60  ;;  %13432 = vset.pattern.permute.xlu0 %v14235_v60  ;;  %vm1371_vm7 = vcmask 517121   ;;  %vm1373_vm8 = vcmask 1041921   ;;  %s14238_s7 = smov [#allocation5]  }
  0x86   :  { %v678_v22 = vld [vmem:[%s18092_s3 + $0xa8] sm:$0xff]  ;;  %v677_v25 = vld [vmem:[%s18092_s3 + $0xa0] sm:$0xff]  ;;  %v13387_v29 = vpack.c.bf16 %v664_v28, %v660_v27  ;;  %v659_v30 = vld [vmem:[%s18092_s3 + $0x10] sm:$0xff]  ;;  %vm11648_vm9 = vcmask 7168   ;;  %vm14237_vm10 = vmmov 0   ;;  %vm11821_vm11 = vcmask 1040384  }
  0x87   :  { %13376 = vmatprep.subr.bf16.mxu1 %v13375_v17  ;;  %v13379_v23 = vpack.c.bf16 %v678_v22, %v674_v21  ;;  %v13381_v26 = vpack.c.bf16 %v677_v25, %v673_v24  ;;  %v663_v31 = vld [vmem:[%s18092_s3 + $0x30] sm:$0xff]  ;;  %v668_v33 = vld [vmem:[%s18092_s3 + $0x58] sm:$0xff]  ;;  %v682_v36 = vld [vmem:[%s18092_s3 + $0xc8] sm:$0xff] }
  0x88   :  { %13378 = vmatpush1.bf16.msra.mxu1 %v13377_v20  ;;  %v13389_v32 = vpack.c.bf16 %v663_v31, %v659_v30  ;;  %13388 = vmatprep.subr.bf16.mxu0 %v13387_v29  ;;  %v672_v34 = vld [vmem:[%s18092_s3 + $0x78] sm:$0xff]  ;;  %v686_v37 = vld [vmem:[%s18092_s3 + $0xe8] sm:$0xff]  ;;  %v667_v38 = vld [vmem:[%s18092_s3 + $0x50] sm:$0xff] }
  0x89   :  { %13380 = vmatprep.subr.bf16.mxu1 %v13379_v23  ;;  %v13391_v35 = vpack.c.bf16 %v672_v34, %v668_v33  ;;  %v13383_v39 = vpack.c.bf16 %v686_v37, %v682_v36  ;;  %v671_v40 = vld [vmem:[%s18092_s3 + $0x70] sm:$0xff]  ;;  %v681_v41 = vld [vmem:[%s18092_s3 + $0xc0] sm:$0xff]  ;;  %v676_v45 = vld [vmem:[%s18092_s3 + $0x98] sm:$0xff] }
  0x8a   :  { %13390 = vmatpush1.bf16.msra.mxu0 %v13389_v32  ;;  %v685_v42 = vld [vmem:[%s18092_s3 + $0xe0] sm:$0xff]  ;;  %v13393_v43 = vpack.c.bf16 %v671_v40, %v667_v38  ;;  %v680_v46 = vld [vmem:[%s18092_s3 + $0xb8] sm:$0xff]  ;;  %v675_v48 = vld [vmem:[%s18092_s3 + $0x90] sm:$0xff] }
  0x8b   :  { %13392 = vmatprep.subr.bf16.mxu0 %v13391_v35  ;;  %v13385_v44 = vpack.c.bf16 %v685_v42, %v681_v41  ;;  %v13395_v47 = vpack.c.bf16 %v680_v46, %v676_v45  ;;  %v679_v49 = vld [vmem:[%s18092_s3 + $0xb0] sm:$0xff]  ;;  %v684_v51 = vld [vmem:[%s18092_s3 + $0xd8] sm:$0xff]  ;;  %v14892_v62 = vld [vmem:[%s18091_s2] ss:$0 sm:$0xff] }
  0x8c   :  { %13382 = vmatpush1.bf16.msra.mxu1 %v13381_v26  ;;  %v13397_v50 = vpack.c.bf16 %v679_v49, %v675_v48  ;;  %v688_v52 = vld [vmem:[%s18092_s3 + $0xf8] sm:$0xff]  ;;  %v683_v54 = vld [vmem:[%s18092_s3 + $0xd0] sm:$0xff] }
  0x8d   :  { %13384 = vmatprep.subr.bf16.mxu1 %v13383_v39  ;;  %v13399_v53 = vpack.c.bf16 %v688_v52, %v684_v51  ;;  %v687_v55 = vld [vmem:[%s18092_s3 + $0xf0] sm:$0xff]  ;;  %v14884_v59 = vld [vmem:[%s18094_s5 + $0xc] ss:$16 sps:$4 sm:$0xff]  }
  0x8e   :  { %13394 = vmatpush1.bf16.msra.mxu0 %v13393_v43  ;;  %v13401_v56 = vpack.c.bf16 %v687_v55, %v683_v54  ;;  %v14878_v58 = vld [vmem:[%s18094_s5 + $0x4] ss:$16 sps:$4 sm:$0xff]  }
  0x8f   :  { %13396 = vmatprep.subr.bf16.mxu0 %v13395_v47 }
  0x90   :  { %13386 = vmatpush1.bf16.msra.mxu1 %v13385_v44 }
  0x91   :  { %1267 = vmatprep.subr.bf16.mxu1 %v14878_v58 }
  0x92   :  { %13398 = vmatpush1.bf16.msra.mxu0 %v13397_v50 }
  0x93   :  { %13400 = vmatprep.subr.bf16.mxu0 %v13399_v53 }
  0x96   :  { %13402 = vmatpush1.bf16.msra.mxu0 %v13401_v56 }
  0x97   :  { %1308 = vmatprep.subr.bf16.mxu0 %v14884_v59 }
  0xf9   :  { %v13007_v61 = vpop.f32.mrb[0].mxu0 }
  0xfa   :  { %v13008_v63 = vpop.f32.mrb[1].mxu0 }
  0xfb   :  { %v13087_v0 = vpop.f32.mrb[0].mxu1  ;;  %v13009_v1 = vadd.f32 %v13008_v63, %v13007_v61 }
  0xfc   :  { %v13088_v2 = vpop.f32.mrb[1].mxu1 }
  0xfd   :  { %v13089_v3 = vadd.f32 %v13088_v2, %v13087_v0  ;;  %v273_v4 = vadd.f32 %v13009_v1, %v14892_v62  ;;  %v13010_v5 = vpop.f32.mrb[2].mxu0 }
  0xfe   :  { %v13011_v6 = vpop.f32.mrb[3].mxu0 }
  0xff   :  { %v13090_v7 = vpop.f32.mrb[2].mxu1  ;;  %v13012_v8 = vadd.f32 %v13011_v6, %v13010_v5  ;;  %v14895_v10 = vadd.f32 %v13089_v3, %v273_v4 }
 0x100   :  { %v13091_v9 = vpop.f32.mrb[3].mxu1 }
 0x101   :  { %v13092_v11 = vadd.f32 %v13091_v9, %v13090_v7  ;;  %v278_v12 = vadd.f32 %v13012_v8, %v14892_v62  ;;  %v13013_v13 = vpop.f32.mrb[4].mxu0 }
 0x102   :  { %v13014_v14 = vpop.f32.mrb[5].mxu0 }
 0x103   :  { %v13093_v15 = vpop.f32.mrb[4].mxu1  ;;  %v13015_v16 = vadd.f32 %v13014_v14, %v13013_v13  ;;  %v14898_v18 = vadd.f32 %v13092_v11, %v278_v12 }
 0x104   :  { %v13094_v17 = vpop.f32.mrb[5].mxu1 }
 0x105   :  { %v13095_v19 = vadd.f32 %v13094_v17, %v13093_v15  ;;  %v283_v20 = vadd.f32 %v13015_v16, %v14892_v62  ;;  %v13016_v21 = vpop.f32.mrb[6].mxu0 }
 0x106   :  { %v13017_v22 = vpop.f32.mrb[7].mxu0 }
 0x107   :  { %v13096_v23 = vpop.f32.mrb[6].mxu1  ;;  %v13018_v24 = vadd.f32 %v13017_v22, %v13016_v21  ;;  %v14901_v26 = vadd.f32 %v13095_v19, %v283_v20 }
 0x108   :  { %v13097_v25 = vpop.f32.mrb[7].mxu1 }
 0x109   :  { %v13098_v27 = vadd.f32 %v13097_v25, %v13096_v23  ;;  %v288_v28 = vadd.f32 %v13018_v24, %v14892_v62  ;;  %v13019_v29 = vpop.f32.mrb[8].mxu0 }
 0x10a   :  { %v13020_v30 = vpop.f32.mrb[9].mxu0 }
 0x10b   :  { %v13099_v31 = vpop.f32.mrb[8].mxu1  ;;  %v13021_v32 = vadd.f32 %v13020_v30, %v13019_v29  ;;  %v14904_v34 = vadd.f32 %v13098_v27, %v288_v28 }
 0x10c   :  { %v13100_v33 = vpop.f32.mrb[9].mxu1 }
 0x10d   :  { %v13101_v35 = vadd.f32 %v13100_v33, %v13099_v31  ;;  %v293_v36 = vadd.f32 %v13021_v32, %v14892_v62  ;;  %v13022_v37 = vpop.f32.mrb[10].mxu0 }
 0x10e   :  { %v13023_v38 = vpop.f32.mrb[11].mxu0 }
 0x10f   :  { %v13102_v39 = vpop.f32.mrb[10].mxu1  ;;  %v13024_v40 = vadd.f32 %v13023_v38, %v13022_v37  ;;  %v14907_v42 = vadd.f32 %v13101_v35, %v293_v36 }
 0x110   :  { %v13103_v41 = vpop.f32.mrb[11].mxu1 }
 0x111   :  { %v13104_v43 = vadd.f32 %v13103_v41, %v13102_v39  ;;  %v298_v44 = vadd.f32 %v13024_v40, %v14892_v62  ;;  %v13025_v45 = vpop.f32.mrb[12].mxu0 }
 0x112   :  { %v13026_v46 = vpop.f32.mrb[13].mxu0 }
 0x113   :  { %v13105_v47 = vpop.f32.mrb[12].mxu1  ;;  %v13027_v48 = vadd.f32 %v13026_v46, %v13025_v45  ;;  %v14910_v50 = vadd.f32 %v13104_v43, %v298_v44 }
 0x114   :  { %v13106_v49 = vpop.f32.mrb[13].mxu1 }
 0x115   :  { %v13107_v51 = vadd.f32 %v13106_v49, %v13105_v47  ;;  %v303_v52 = vadd.f32 %v13027_v48, %v14892_v62  ;;  %v13028_v53 = vpop.f32.mrb[14].mxu0 }
 0x116   :  { %v13029_v54 = vpop.f32.mrb[15].mxu0 }
 0x117   :  { %v13108_v55 = vpop.f32.mrb[14].mxu1  ;;  %v13030_v56 = vadd.f32 %v13029_v54, %v13028_v53  ;;  %v14913_v63 = vadd.f32 %v13107_v51, %v303_v52 }
 0x118   :  { %v13109_v61 = vpop.f32.mrb[15].mxu1 }
 0x119   :  { %v13110_v0 = vadd.f32 %v13109_v61, %v13108_v55  ;;  %v308_v1 = vadd.f32 %v13030_v56, %v14892_v62  ;;  %v13031_v2 = vpop.f32.mrb[16].mxu0 }
 0x11a   :  { %v13032_v3 = vpop.f32.mrb[17].mxu0 }
 0x11b   :  { %v13111_v4 = vpop.f32.mrb[16].mxu1  ;;  %v13033_v5 = vadd.f32 %v13032_v3, %v13031_v2  ;;  %v14916_v7 = vadd.f32 %v13110_v0, %v308_v1 }
 0x11c   :  { %v13112_v6 = vpop.f32.mrb[17].mxu1 }
 0x11d   :  { %v13113_v8 = vadd.f32 %v13112_v6, %v13111_v4  ;;  %v313_v9 = vadd.f32 %v13033_v5, %v14892_v62  ;;  %v13034_v11 = vpop.f32.mrb[18].mxu0 }
 0x11e   :  { %v13035_v12 = vpop.f32.mrb[19].mxu0 }
 0x11f   :  { %v13114_v13 = vpop.f32.mrb[18].mxu1  ;;  %v13036_v14 = vadd.f32 %v13035_v12, %v13034_v11  ;;  %v14919_v16 = vadd.f32 %v13113_v8, %v313_v9 }
 0x120   :  { %v13115_v15 = vpop.f32.mrb[19].mxu1 }
 0x121   :  { %v13116_v17 = vadd.f32 %v13115_v15, %v13114_v13  ;;  %v318_v19 = vadd.f32 %v13036_v14, %v14892_v62  ;;  %v13037_v20 = vpop.f32.mrb[20].mxu0 }
 0x122   :  { %v13038_v21 = vpop.f32.mrb[21].mxu0 }
 0x123   :  { %v13117_v22 = vpop.f32.mrb[20].mxu1  ;;  %v13039_v23 = vadd.f32 %v13038_v21, %v13037_v20  ;;  %v463_v25 = vadd.f32 %v13116_v17, %v318_v19 }
 0x124   :  { %v13118_v24 = vpop.f32.mrb[21].mxu1 }
 0x125   :  { %v13119_v27 = vadd.f32 %v13118_v24, %v13117_v22  ;;  %v323_v28 = vadd.f32 %v13039_v23, %v14892_v62  ;;  %v13040_v29 = vpop.f32.mrb[22].mxu0 }
 0x126   :  { %v13041_v30 = vpop.f32.mrb[23].mxu0 }
 0x127   :  { %v13120_v31 = vpop.f32.mrb[22].mxu1  ;;  %v13042_v32 = vadd.f32 %v13041_v30, %v13040_v29  ;;  %v14923_v35 = vadd.f32 %v13119_v27, %v323_v28 }
 0x128   :  { %v13121_v33 = vpop.f32.mrb[23].mxu1 }
 0x129   :  { %v13122_v36 = vadd.f32 %v13121_v33, %v13120_v31  ;;  %v328_v37 = vadd.f32 %v13042_v32, %v14892_v62  ;;  %v13043_v38 = vpop.f32.mrb[24].mxu0 }
 0x12a   :  { %v13044_v39 = vpop.f32.mrb[25].mxu0 }
 0x12b   :  { %v13123_v40 = vpop.f32.mrb[24].mxu1  ;;  %v13045_v41 = vadd.f32 %v13044_v39, %v13043_v38  ;;  %v473_v44 = vadd.f32 %v13122_v36, %v328_v37 }
 0x12c   :  { %v13124_v43 = vpop.f32.mrb[25].mxu1 }
 0x12d   :  { %v13125_v45 = vadd.f32 %v13124_v43, %v13123_v40  ;;  %v333_v46 = vadd.f32 %v13045_v41, %v14892_v62  ;;  %v13046_v47 = vpop.f32.mrb[26].mxu0 }
 0x12e   :  { %v13047_v48 = vpop.f32.mrb[27].mxu0 }
 0x12f   :  { %v13126_v49 = vpop.f32.mrb[26].mxu1  ;;  %v13048_v51 = vadd.f32 %v13047_v48, %v13046_v47  ;;  %v478_v53 = vadd.f32 %v13125_v45, %v333_v46 }
 0x130   :  { %v13127_v52 = vpop.f32.mrb[27].mxu1 }
 0x131   :  { %v13128_v54 = vadd.f32 %v13127_v52, %v13126_v49  ;;  %v338_v55 = vadd.f32 %v13048_v51, %v14892_v62  ;;  %v13049_v56 = vpop.f32.mrb[28].mxu0  ;;  %v14984_v51 = vld [vmem:[%s18094_s5 + $0x20] ss:$16 sps:$4 sm:$0xff]   ;;  %v14989_v52 = vld [vmem:[%s18094_s5 + $0x28] ss:$16 sps:$4 sm:$0xff]  }
 0x132   :  { %v13050_v61 = vpop.f32.mrb[29].mxu0 }
 0x133   :  { %v13129_v0 = vpop.f32.mrb[28].mxu1  ;;  %v13051_v1 = vadd.f32 %v13050_v61, %v13049_v56  ;;  %v483_v3 = vadd.f32 %v13128_v54, %v338_v55  ;;  %v15003_v55 = vld [vmem:[%s18094_s5 + $0x4c] ss:$16 sps:$4 sm:$0xff]  }
 0x134   :  { %v13130_v2 = vpop.f32.mrb[29].mxu1 }
 0x135   :  { %v13131_v4 = vadd.f32 %v13130_v2, %v13129_v0  ;;  %v343_v5 = vadd.f32 %v13051_v1, %v14892_v62  ;;  %v13052_v6 = vpop.f32.mrb[30].mxu0 }
 0x136   :  { %v13053_v8 = vpop.f32.mrb[31].mxu0 }
 0x137   :  { %v13132_v9 = vpop.f32.mrb[30].mxu1  ;;  %v13054_v11 = vadd.f32 %v13053_v8, %v13052_v6  ;;  %v14929_v13 = vadd.f32 %v13131_v4, %v343_v5  ;;  %v15018_v4 = vld [vmem:[%s18094_s5 + $0x40] ss:$16 sps:$4 sm:$0xff]   ;;  %v15023_v5 = vld [vmem:[%s18094_s5 + $0x48] ss:$16 sps:$4 sm:$0xff]  }
 0x138   :  { %v13133_v12 = vpop.f32.mrb[31].mxu1  ;;  %v15032_v8 = vld [vmem:[%s18094_s5 + $0x64] ss:$16 sps:$4 sm:$0xff]  }
 0x139   :  { %v13134_v14 = vadd.f32 %v13133_v12, %v13132_v9  ;;  %v348_v15 = vadd.f32 %v13054_v11, %v14892_v62  ;;  %v13218_v17 = vpop.f32.mrb[32].mxu0  ;;  %v15037_v9 = vld [vmem:[%s18094_s5 + $0x6c] ss:$16 sps:$4 sm:$0xff]  }
 0x13a   :  { %v568_v19 = vadd.f32 %v13218_v17, %v14898_v18  ;;  %v562_v20 = vpop.f32.mrb[33].mxu0  ;;  %v15066_v17 = vld [vmem:[%s18094_s5 + $0x8c] ss:$16 sps:$4 sm:$0xff]  }
 0x13b   :  { %v563_v21 = vadd.f32 %v562_v20, %v14895_v10  ;;  %v493_v22 = vadd.f32 %v13134_v14, %v348_v15  ;;  %v15054_v14 = vld [vmem:[%s18094_s5 + $0x68] ss:$16 sps:$4 sm:$0xff]   ;;  %v15061_v15 = vld [vmem:[%s18094_s5 + $0x84] ss:$16 sps:$4 sm:$0xff]   ;;  %v15077_v20 = vld [vmem:[%s18094_s5 + $0x80] ss:$16 sps:$4 sm:$0xff]  }
 0x13d   :  { %v13221_v23 = vpop.f32.mrb[34].mxu0 }
 0x13e   :  { %v14935_v24 = vadd.f32 %v13221_v23, %v14904_v34  ;;  %v572_v27 = vpop.f32.mrb[35].mxu0  ;;  %v15094_v23 = vld [vmem:[%s18094_s5 + $0xac] ss:$16 sps:$4 sm:$0xff]  }
 0x13f   :  { %v573_v28 = vadd.f32 %v572_v27, %v14901_v26  ;;  %v15105_v27 = vld [vmem:[%s18094_s5 + $0xa0] ss:$16 sps:$4 sm:$0xff]  }
 0x141   :  { %v13224_v29 = vpop.f32.mrb[36].mxu0 }
 0x142   :  { %v14939_v30 = vadd.f32 %v13224_v29, %v14910_v50  ;;  %v582_v31 = vpop.f32.mrb[37].mxu0  ;;  %v15117_v29 = vld [vmem:[%s18094_s5 + $0xc4] ss:$16 sps:$4 sm:$0xff]  }
 0x143   :  { %v14942_v62 = vadd.f32 %v582_v31, %v14907_v42 }
 0x145   :  { %v13227_v18 = vpop.f32.mrb[38].mxu0 }
 0x146   :  { %v14945_v32 = vadd.f32 %v13227_v18, %v14916_v7  ;;  %v592_v10 = vpop.f32.mrb[39].mxu0  ;;  %v14955_v7 = vld [vmem:[%s18094_s5] ss:$16 sps:$4 sm:$0xff]   ;;  %v15138_v18 = vld [vmem:[%s18094_s5 + $0xc8] ss:$16 sps:$4 sm:$0xff]  }
 0x147   :  { %v14948_v33 = vadd.f32 %v592_v10, %v14913_v63  ;;  %v14960_v63 = vld [vmem:[%s18094_s5 + $0x8] ss:$16 sps:$4 sm:$0xff]   ;;  %v15150_v10 = vld [vmem:[%s18094_s5 + $0xec] ss:$16 sps:$4 sm:$0xff]  }
 0x149   :  { %v13230_v34 = vpop.f32.mrb[40].mxu0 }
 0x14a   :  { %v608_v36 = vadd.f32 %v13230_v34, %v463_v25  ;;  %v602_v37 = vpop.f32.mrb[41].mxu0  ;;  %v14966_v25 = vld [vmem:[%s18094_s5 + $0x24] ss:$16 sps:$4 sm:$0xff]   ;;  %v15161_v34 = vld [vmem:[%s18094_s5 + $0xe0] ss:$16 sps:$4 sm:$0xff]  }
 0x14b   :  { %v603_v26 = vadd.f32 %v602_v37, %v14919_v16  ;;  %v691_v37 = vlaneseq }
 0x14c   :  { %v642_v38 = vmax.f32 %v568_v19, %v608_v36  ;;  %v15166_v36 = vld [vmem:[%s18094_s5 + $0xe8] ss:$16 sps:$4 sm:$0xff]  }
 0x14d   :  { %v641_v50 = vmax.f32 %v563_v21, %v603_v26  ;;  %v13233_v39 = vpop.f32.mrb[42].mxu0  ;;  %v15082_v21 = vld [vmem:[%s18094_s5 + $0x88] ss:$16 sps:$4 sm:$0xff]   ;;  %v692_v26 = vshrl.u32 %v691_v37, 7 }
 0x14e   :  { %v618_v40 = vadd.f32 %v13233_v39, %v473_v44  ;;  %v612_v41 = vpop.f32.mrb[43].mxu0  ;;  %v650_v48 = vmax.f32 %v642_v38, 0.0  ;;  %v689_v39 = vld [vmem:[%s18093_s4] sm:$0xf]  ;;  %s11923_s4 = sshll.u32 %s14238_s7, 4  ;;  %s11924_s4 = int_to_ptr.vmem [resolvable:$true] %s11923_s4 }
 0x14f   :  { %v649_v42 = vmax.f32 %v641_v50, 0.0  ;;  %v613_v43 = vadd.f32 %v612_v41, %v14923_v35  ;;  %v14971_v35 = vld [vmem:[%s18094_s5 + $0x2c] ss:$16 sps:$4 sm:$0xff]   ;;  %v693_v38 = vsub.s32 0, %v692_v26  ;;  %v701_v50 = vsub.s32 2, %v692_v26  ;;  %s14210_s1 = scalar_lea.vmem %s11924_s4, 32  ;;  %p14215_p1 = scmp.lt.s32.totalorder %s11924_s4, %s11924_s4 }
 0x150   :  { %v644_v16 = vmax.f32 %v14935_v24, %v618_v40  ;;  %v697_v40 = vsub.s32 1, %v692_v26  ;;  %v705_v41 = vsub.s32 3, %v692_v26  ;;  %p14211_p0 = scmp.ne.s32.totalorder %s11924_s4, %s14210_s1  ;;  %p14216_p2 = scmp.lt.s32.totalorder %s14210_s1, %s14210_s1 }
 0x151   :  { %v643_v44 = vmax.f32 %v573_v28, %v613_v43  ;;  %v13236_v45 = vpop.f32.mrb[44].mxu0  ;;  %11932 = vmatmul.mubr.msk.f32.vlgmr.msra.gmra.mrb[32].mxu1 %vm711_vm0, %v649_v42  ;;  %11940 = vmatmul.mubr.msk.f32.vlgmr.msra.gmra.mrb[48].mxu0 %vm711_vm0, %v649_v42  ;;  %v15110_v28 = vld [vmem:[%s18094_s5 + $0xa8] ss:$16 sps:$4 sm:$0xff]   ;;  %v15218_v42 = vrot.slane %v689_v39, %v693_v38  ;;  %v15220_v43 = vrot.slane %v689_v39, %v701_v50 }
 0x152   :  { %v14975_v46 = vadd.f32 %v13236_v45, %v483_v3  ;;  %v622_v47 = vpop.f32.mrb[45].mxu0  ;;  %806 = vmatprep.mubr.f32.mxu1 %v14234_v57  ;;  %919 = vmatprep.mubr.f32.mxu0 %v14234_v57  ;;  %v652_v12 = vmax.f32 %v644_v16, 0.0  ;;  %v15222_v16 = vrot.slane %v689_v39, %v697_v40  ;;  %p14217_p3 = por %p14216_p2, %p14215_p1 }
 0x153   :  { %v623_v49 = vadd.f32 %v622_v47, %v478_v53  ;;  %1268 = vmatpush1.bf16.msra.mxu1 %v14955_v7  ;;  %1309 = vmatpush1.bf16.msra.mxu0 %v14960_v63  ;;  %v14998_v53 = vld [vmem:[%s18094_s5 + $0x44] ss:$16 sps:$4 sm:$0xff]   ;;  %v651_v2 = vmax.f32 %v643_v44, 0.0 }
 0x154   :  { %v646_v54 = vmax.f32 %v14939_v30, %v14975_v46  ;;  %1269 = vmatprep.subr.bf16.mxu1 %v14966_v25  ;;  %1310 = vmatprep.subr.bf16.mxu0 %v14971_v35  ;;  %v15122_v30 = vld [vmem:[%s18094_s5 + $0xcc] ss:$16 sps:$4 sm:$0xff]   ;;  %p14218_p4 = pnand %p14217_p3, %p14211_p0 }
 0x155   :  { %v645_v56 = vmax.f32 %v14942_v62, %v623_v49  ;;  %v13239_v61 = vpop.f32.mrb[46].mxu0  ;;  %11933 = vmatmul.mubr.msk.f32.gmra.mrb[34].mxu1 %vm711_vm0, %v650_v48  ;;  %11941 = vmatmul.mubr.msk.f32.gmra.mrb[50].mxu0 %vm711_vm0, %v650_v48  ;;  %v15133_v62 = vld [vmem:[%s18094_s5 + $0xc0] ss:$16 sps:$4 sm:$0xff]  }
 0x156   :  { %v15008_v0 = vadd.f32 %v13239_v61, %v493_v22  ;;  %v632_v1 = vpop.f32.mrb[47].mxu0  ;;  %812 = vmatprep.mubr.f32.mxu1 %v14234_v57  ;;  %925 = vmatprep.mubr.f32.mxu0 %v14234_v57  ;;  %v15089_v22 = vld [vmem:[%s18094_s5 + $0xa4] ss:$16 sps:$4 sm:$0xff]   ;;  %v654_v24 = vmax.f32 %v646_v54, 0.0 }
 0x157   :  { %v633_v3 = vadd.f32 %v632_v1, %v14929_v13  ;;  %1270 = vmatpush1.bf16.msra.mxu1 %v14984_v51  ;;  %1311 = vmatpush1.bf16.msra.mxu0 %v14989_v52  ;;  %v15049_v13 = vld [vmem:[%s18094_s5 + $0x60] ss:$16 sps:$4 sm:$0xff]   ;;  %v653_v19 = vmax.f32 %v645_v56, 0.0 }
 0x158   :  { %v648_v6 = vmax.f32 %v14945_v32, %v15008_v0  ;;  %1271 = vmatprep.subr.bf16.mxu1 %v14998_v53  ;;  %1312 = vmatprep.subr.bf16.mxu0 %v15003_v55  ;;  %v15145_v32 = vld [vmem:[%s18094_s5 + $0xe4] ss:$16 sps:$4 sm:$0xff]  }
 0x159   :  { %v647_v11 = vmax.f32 %v14948_v33, %v633_v3  ;;  %11934 = vmatmul.mubr.msk.f32.gmra.mrb[36].mxu1 %vm711_vm0, %v651_v2  ;;  %11942 = vmatmul.mubr.msk.f32.gmra.mrb[52].mxu0 %vm711_vm0, %v651_v2 }
 0x15a   :  { %818 = vmatprep.mubr.f32.mxu1 %v14234_v57  ;;  %931 = vmatprep.mubr.f32.mxu0 %v14234_v57  ;;  %v656_v33 = vmax.f32 %v648_v6, 0.0 }
 0x15b   :  { %1272 = vmatpush1.bf16.msra.mxu1 %v15018_v4  ;;  %1313 = vmatpush1.bf16.msra.mxu0 %v15023_v5  ;;  %v655_v31 = vmax.f32 %v647_v11, 0.0 }
 0x15c   :  { %1273 = vmatprep.subr.bf16.mxu1 %v15032_v8  ;;  %1314 = vmatprep.subr.bf16.mxu0 %v15037_v9 }
 0x15d   :  { %11935 = vmatmul.mubr.msk.f32.gmra.mrb[38].mxu1 %vm711_vm0, %v652_v12  ;;  %11943 = vmatmul.mubr.msk.f32.gmra.mrb[54].mxu0 %vm711_vm0, %v652_v12 }
 0x15e   :  { %824 = vmatprep.mubr.f32.mxu1 %v14234_v57  ;;  %937 = vmatprep.mubr.f32.mxu0 %v14234_v57 }
 0x15f   :  { %1274 = vmatpush1.bf16.msra.mxu1 %v15049_v13  ;;  %1315 = vmatpush1.bf16.msra.mxu0 %v15054_v14 }
 0x160   :  { %1275 = vmatprep.subr.bf16.mxu1 %v15061_v15  ;;  %1316 = vmatprep.subr.bf16.mxu0 %v15066_v17 }
 0x161   :  { %11936 = vmatmul.mubr.msk.f32.gmra.mrb[40].mxu1 %vm711_vm0, %v653_v19  ;;  %11944 = vmatmul.mubr.msk.f32.gmra.mrb[56].mxu0 %vm711_vm0, %v653_v19 }
 0x162   :  { %830 = vmatprep.mubr.f32.mxu1 %v14234_v57  ;;  %943 = vmatprep.mubr.f32.mxu0 %v14234_v57 }
 0x163   :  { %1276 = vmatpush1.bf16.msra.mxu1 %v15077_v20  ;;  %1317 = vmatpush1.bf16.msra.mxu0 %v15082_v21 }
 0x164   :  { %1277 = vmatprep.subr.bf16.mxu1 %v15089_v22  ;;  %1318 = vmatprep.subr.bf16.mxu0 %v15094_v23 }
 0x165   :  { %11937 = vmatmul.mubr.msk.f32.gmra.mrb[42].mxu1 %vm711_vm0, %v654_v24  ;;  %11945 = vmatmul.mubr.msk.f32.gmra.mrb[58].mxu0 %vm711_vm0, %v654_v24 }
 0x166   :  { %836 = vmatprep.mubr.f32.mxu1 %v14234_v57  ;;  %949 = vmatprep.mubr.f32.mxu0 %v14234_v57 }
 0x167   :  { %1278 = vmatpush1.bf16.msra.mxu1 %v15105_v27  ;;  %1319 = vmatpush1.bf16.msra.mxu0 %v15110_v28 }
 0x168   :  { %1279 = vmatprep.subr.bf16.mxu1 %v15117_v29  ;;  %1320 = vmatprep.subr.bf16.mxu0 %v15122_v30 }
 0x169   :  { %11938 = vmatmul.mubr.msk.f32.gmra.mrb[44].mxu1 %vm711_vm0, %v655_v31  ;;  %11946 = vmatmul.mubr.msk.f32.gmra.mrb[60].mxu0 %vm711_vm0, %v655_v31 }
 0x16a   :  { %842 = vmatprep.mubr.f32.mxu1 %v14234_v57  ;;  %955 = vmatprep.mubr.f32.mxu0 %v14234_v57 }
 0x16b   :  { %1280 = vmatpush1.bf16.msra.mxu1 %v15133_v62  ;;  %1321 = vmatpush1.bf16.msra.mxu0 %v15138_v18 }
 0x16c   :  { %1281 = vmatprep.subr.bf16.mxu1 %v15145_v32  ;;  %1322 = vmatprep.subr.bf16.mxu0 %v15150_v10 }
 0x16d   :  { %11939 = vmatmul.mubr.msk.f32.gmra.mrb[46].mxu1 %vm711_vm0, %v656_v33  ;;  %11947 = vmatmul.mubr.msk.f32.gmra.mrb[62].mxu0 %vm711_vm0, %v656_v33 }
 0x16e   :  { %1299 = vmatprep.mubr.bf16.mxu1 %v14235_v60  ;;  %1340 = vmatprep.mubr.bf16.mxu0 %v14235_v60 }
 0x16f   :  { %1282 = vmatpush1.bf16.msra.mxu1 %v15161_v34  ;;  %1323 = vmatpush1.bf16.msra.mxu0 %v15166_v36 }
 0x170   :  { %1604 = vmatprep.subr.bf16.mxu1 %v14878_v58  ;;  %1645 = vmatprep.subr.bf16.mxu0 %v14884_v59 }
 0x172   :  { %1300 = vmatmul.mubr.bf16.vlgmr.msra.gmra.mrb[48].mxu1 %v14235_v60  ;;  %1341 = vmatmul.mubr.bf16.vlgmr.msra.gmra.mrb[64].mxu0 %v14235_v60 }
 0x173   :  { %1605 = vmatpush1.bf16.msra.mxu1 %v14955_v7  ;;  %1646 = vmatpush1.bf16.msra.mxu0 %v14960_v63 }
 0x174   :  { %1606 = vmatprep.subr.bf16.mxu1 %v14966_v25  ;;  %1647 = vmatprep.subr.bf16.mxu0 %v14971_v35 }
 0x175   :  { %1636 = vmatprep.mubr.bf16.mxu1 %v14235_v60  ;;  %1677 = vmatprep.mubr.bf16.mxu0 %v14235_v60 }
 0x177   :  { %1607 = vmatpush1.bf16.msra.mxu1 %v14984_v51  ;;  %1648 = vmatpush1.bf16.msra.mxu0 %v14989_v52 }
 0x178   :  { %1608 = vmatprep.subr.bf16.mxu1 %v14998_v53  ;;  %1649 = vmatprep.subr.bf16.mxu0 %v15003_v55 }
 0x17b   :  { %1609 = vmatpush1.bf16.msra.mxu1 %v15018_v4  ;;  %1650 = vmatpush1.bf16.msra.mxu0 %v15023_v5 }
 0x17c   :  { %1610 = vmatprep.subr.bf16.mxu1 %v15032_v8  ;;  %1651 = vmatprep.subr.bf16.mxu0 %v15037_v9 }
 0x17f   :  { %1611 = vmatpush1.bf16.msra.mxu1 %v15049_v13  ;;  %1652 = vmatpush1.bf16.msra.mxu0 %v15054_v14 }
 0x180   :  { %1612 = vmatprep.subr.bf16.mxu1 %v15061_v15  ;;  %1653 = vmatprep.subr.bf16.mxu0 %v15066_v17 }
 0x183   :  { %1613 = vmatpush1.bf16.msra.mxu1 %v15077_v20  ;;  %1654 = vmatpush1.bf16.msra.mxu0 %v15082_v21 }
 0x184   :  { %1614 = vmatprep.subr.bf16.mxu1 %v15089_v22  ;;  %1655 = vmatprep.subr.bf16.mxu0 %v15094_v23 }
 0x187   :  { %1615 = vmatpush1.bf16.msra.mxu1 %v15105_v27  ;;  %1656 = vmatpush1.bf16.msra.mxu0 %v15110_v28 }
 0x188   :  { %1616 = vmatprep.subr.bf16.mxu1 %v15117_v29  ;;  %1657 = vmatprep.subr.bf16.mxu0 %v15122_v30 }
 0x18b   :  { %1617 = vmatpush1.bf16.msra.mxu1 %v15133_v62  ;;  %1658 = vmatpush1.bf16.msra.mxu0 %v15138_v18 }
 0x18c   :  { %1618 = vmatprep.subr.bf16.mxu1 %v15145_v32  ;;  %1659 = vmatprep.subr.bf16.mxu0 %v15150_v10 }
 0x18f   :  { %1619 = vmatpush1.bf16.msra.mxu1 %v15161_v34  ;;  %1660 = vmatpush1.bf16.msra.mxu0 %v15166_v36 }
 0x190   :  { %1937 = vmatprep.subr.bf16.mxu1 %v14878_v58  ;;  %1978 = vmatprep.subr.bf16.mxu0 %v14884_v59  ;;  %v15224_v58 = vrot.slane %v689_v39, %v705_v41 }
 0x224   :  { %v802_v59 = vpop.f32.mrb[32].mxu1  ;;  %v915_v44 = vpop.f32.mrb[48].mxu0 }
 0x225   :  { %v803_v45 = vadd.f32 %v802_v59, %v15218_v42  ;;  %v916_v46 = vadd.f32 %v915_v44, %v15220_v43  ;;  %v804_v47 = vpop.f32.mrb[33].mxu1  ;;  %v917_v48 = vpop.f32.mrb[49].mxu0 }
 0x226   :  { %v805_v49 = vadd.f32 %v804_v47, %v15222_v16  ;;  %v918_v54 = vadd.f32 %v917_v48, %v15224_v58 }
 0x227   :  { %962 = vst [vmem:[#allocation2] sm:$0xff] %v803_v45  ;;  %964 = vst [vmem:[#allocation2 + $0x10] sm:$0xff] %v916_v46 }
 0x228   :  { %963 = vst [vmem:[#allocation2 + $0x8] sm:$0xff] %v805_v49  ;;  %965 = vst [vmem:[#allocation2 + $0x18] sm:$0xff] %v918_v54  ;;  %v808_v56 = vpop.f32.mrb[34].mxu1  ;;  %v921_v61 = vpop.f32.mrb[50].mxu0 }
 0x229   :  { %v809_v0 = vadd.f32 %v808_v56, %v15218_v42  ;;  %v922_v1 = vadd.f32 %v921_v61, %v15220_v43  ;;  %v810_v2 = vpop.f32.mrb[35].mxu1  ;;  %v923_v3 = vpop.f32.mrb[51].mxu0 }
 0x22a   :  { %v811_v6 = vadd.f32 %v810_v2, %v15222_v16  ;;  %v924_v11 = vadd.f32 %v923_v3, %v15224_v58 }
 0x22b   :  { %966 = vst [vmem:[#allocation2 + $0x20] sm:$0xff] %v809_v0  ;;  %968 = vst [vmem:[#allocation2 + $0x30] sm:$0xff] %v922_v1 }
 0x22c   :  { %967 = vst [vmem:[#allocation2 + $0x28] sm:$0xff] %v811_v6  ;;  %969 = vst [vmem:[#allocation2 + $0x38] sm:$0xff] %v924_v11  ;;  %v814_v12 = vpop.f32.mrb[36].mxu1  ;;  %v927_v19 = vpop.f32.mrb[52].mxu0 }
 0x22d   :  { %v815_v24 = vadd.f32 %v814_v12, %v15218_v42  ;;  %v928_v31 = vadd.f32 %v927_v19, %v15220_v43  ;;  %v816_v33 = vpop.f32.mrb[37].mxu1  ;;  %v929_v26 = vpop.f32.mrb[53].mxu0 }
 0x22e   :  { %v817_v38 = vadd.f32 %v816_v33, %v15222_v16  ;;  %v930_v50 = vadd.f32 %v929_v26, %v15224_v58 }
 0x22f   :  { %970 = vst [vmem:[#allocation2 + $0x40] sm:$0xff] %v815_v24  ;;  %972 = vst [vmem:[#allocation2 + $0x50] sm:$0xff] %v928_v31 }
 0x230   :  { %971 = vst [vmem:[#allocation2 + $0x48] sm:$0xff] %v817_v38  ;;  %973 = vst [vmem:[#allocation2 + $0x58] sm:$0xff] %v930_v50  ;;  %v820_v39 = vpop.f32.mrb[38].mxu1  ;;  %v933_v40 = vpop.f32.mrb[54].mxu0 }
 0x231   :  { %v821_v41 = vadd.f32 %v820_v39, %v15218_v42  ;;  %v934_v59 = vadd.f32 %v933_v40, %v15220_v43  ;;  %v822_v44 = vpop.f32.mrb[39].mxu1  ;;  %v935_v45 = vpop.f32.mrb[55].mxu0 }
 0x232   :  { %v823_v46 = vadd.f32 %v822_v44, %v15222_v16  ;;  %v936_v47 = vadd.f32 %v935_v45, %v15224_v58 }
 0x233   :  { %974 = vst [vmem:[#allocation2 + $0x60] sm:$0xff] %v821_v41  ;;  %976 = vst [vmem:[#allocation2 + $0x70] sm:$0xff] %v934_v59 }
 0x234   :  { %975 = vst [vmem:[#allocation2 + $0x68] sm:$0xff] %v823_v46  ;;  %977 = vst [vmem:[#allocation2 + $0x78] sm:$0xff] %v936_v47  ;;  %v826_v48 = vpop.f32.mrb[40].mxu1  ;;  %v939_v49 = vpop.f32.mrb[56].mxu0  ;;  %v15255_v47 = vand.u32 127, %v691_v37 }
 0x235   :  { %v827_v54 = vadd.f32 %v826_v48, %v15218_v42  ;;  %v940_v56 = vadd.f32 %v939_v49, %v15220_v43  ;;  %v828_v61 = vpop.f32.mrb[41].mxu1  ;;  %v941_v0 = vpop.f32.mrb[57].mxu0 }
 0x236   :  { %v829_v1 = vadd.f32 %v828_v61, %v15222_v16  ;;  %v942_v2 = vadd.f32 %v941_v0, %v15224_v58  ;;  %v997_v37 = vadd.s32 256, %v15255_v47  ;;  %vm1047_vm1 = vcmp.lt.s32.totalorder %v15255_v47, 64 }
 0x237   :  { %978 = vst [vmem:[#allocation2 + $0x80] sm:$0xff] %v827_v54  ;;  %980 = vst [vmem:[#allocation2 + $0x90] sm:$0xff] %v940_v56 }
 0x238   :  { %979 = vst [vmem:[#allocation2 + $0x88] sm:$0xff] %v829_v1  ;;  %981 = vst [vmem:[#allocation2 + $0x98] sm:$0xff] %v942_v2  ;;  %v832_v3 = vpop.f32.mrb[42].mxu1  ;;  %v945_v6 = vpop.f32.mrb[58].mxu0  ;;  %v996_v1 = vadd.s32 128, %v15255_v47 }
 0x239   :  { %v833_v11 = vadd.f32 %v832_v3, %v15218_v42  ;;  %v946_v12 = vadd.f32 %v945_v6, %v15220_v43  ;;  %v834_v19 = vpop.f32.mrb[43].mxu1  ;;  %v947_v24 = vpop.f32.mrb[59].mxu0 }
 0x23a   :  { %v835_v31 = vadd.f32 %v834_v19, %v15222_v16  ;;  %v948_v33 = vadd.f32 %v947_v24, %v15224_v58  ;;  %v1010_v24 = vand.u32 127, %v996_v1 }
 0x23b   :  { %982 = vst [vmem:[#allocation2 + $0xa0] sm:$0xff] %v833_v11  ;;  %984 = vst [vmem:[#allocation2 + $0xb0] sm:$0xff] %v946_v12 }
 0x23c   :  { %983 = vst [vmem:[#allocation2 + $0xa8] sm:$0xff] %v835_v31  ;;  %985 = vst [vmem:[#allocation2 + $0xb8] sm:$0xff] %v948_v33  ;;  %v838_v26 = vpop.f32.mrb[44].mxu1  ;;  %v951_v38 = vpop.f32.mrb[60].mxu0  ;;  %vm15265_vm2 = vcmp.lt.s32.totalorder %v1010_v24, 64 }
 0x23d   :  { %v839_v50 = vadd.f32 %v838_v26, %v15218_v42  ;;  %v952_v39 = vadd.f32 %v951_v38, %v15220_v43  ;;  %v840_v40 = vpop.f32.mrb[45].mxu1  ;;  %v953_v41 = vpop.f32.mrb[61].mxu0 }
 0x23e   :  { %v841_v59 = vadd.f32 %v840_v40, %v15222_v16  ;;  %v954_v44 = vadd.f32 %v953_v41, %v15224_v58 }
 0x23f   :  { %986 = vst [vmem:[#allocation2 + $0xc0] sm:$0xff] %v839_v50  ;;  %988 = vst [vmem:[#allocation2 + $0xd0] sm:$0xff] %v952_v39  ;;  %v1083_v39 = vld [vmem:[#allocation2] sm:$0x3] }
 0x240   :  { %987 = vst [vmem:[#allocation2 + $0xc8] sm:$0xff] %v841_v59  ;;  %989 = vst [vmem:[#allocation2 + $0xd8] sm:$0xff] %v954_v44  ;;  %v844_v45 = vpop.f32.mrb[46].mxu1  ;;  %v957_v46 = vpop.f32.mrb[62].mxu0 }
 0x241   :  { %v845_v48 = vadd.f32 %v844_v45, %v15218_v42  ;;  %v958_v49 = vadd.f32 %v957_v46, %v15220_v43  ;;  %v846_v54 = vpop.f32.mrb[47].mxu1  ;;  %v959_v56 = vpop.f32.mrb[63].mxu0  ;;  %v1084_v45 = vld [vmem:[#allocation2 + $0x8] sm:$0x3] }
 0x242   :  { %v847_v61 = vadd.f32 %v846_v54, %v15222_v16  ;;  %v960_v0 = vadd.f32 %v959_v56, %v15224_v58  ;;  %v998_v16 = vadd.s32 384, %v15255_v47  ;;  %v1017_v58 = vand.u32 127, %v997_v37  ;;  %v1085_v56 = vld [vmem:[#allocation2 + $0x10] sm:$0x3] }
 0x243   :  { %990 = vst [vmem:[#allocation2 + $0xe0] sm:$0xff] %v845_v48  ;;  %992 = vst [vmem:[#allocation2 + $0xf0] sm:$0xff] %v958_v49 }
 0x244   :  { %991 = vst [vmem:[#allocation2 + $0xe8] sm:$0xff] %v847_v61  ;;  %993 = vst [vmem:[#allocation2 + $0xf8] sm:$0xff] %v960_v0  ;;  %v1024_v46 = vand.u32 127, %v998_v16  ;;  %vm15271_vm3 = vcmp.lt.s32.totalorder %v1017_v58, 64 }
 0x245   :  { %v1301_v2 = vpop.f32.mrb[48].mxu1  ;;  %v1342_v3 = vpop.f32.mrb[64].mxu0 }
 0x246   :  { %v1303_v6 = vpop.f32.mrb[49].mxu1  ;;  %v1344_v42 = vpop.f32.mrb[65].mxu0  ;;  %vm15279_vm4 = vcmp.lt.s32.totalorder %v1024_v46, 64 }
 0x247   :  { %v1305_v11 = vpop.f32.mrb[50].mxu1  ;;  %v1346_v43 = vpop.f32.mrb[66].mxu0 }
 0x248   :  { %v1306_v12 = vpop.f32.mrb[51].mxu1  ;;  %v1347_v19 = vpop.f32.mrb[67].mxu0 }
 0x249   :  { %v1086_v19 = vld [vmem:[#allocation2 + $0x18] sm:$0x3] }
 0x24a   :  { %v1087_v31 = vld [vmem:[#allocation2 + $0xe0] sm:$0xc0]  ;;  %v1089_v33 = vld [vmem:[#allocation2 + $0xf0] sm:$0xc0] }
 0x24b   :  { %v1095_v26 = vrot.slane %v1087_v31, 6  ;;  %v1088_v38 = vld [vmem:[#allocation2 + $0xe8] sm:$0xc0]  ;;  %v1097_v50 = vrot.slane %v1089_v33, 6  ;;  %v1090_v41 = vld [vmem:[#allocation2 + $0xf8] sm:$0xc0] }
 0x24c   :  { %v1096_v40 = vrot.slane %v1088_v38, 6  ;;  %v1098_v1 = vrot.slane %v1090_v41, 6 }
 0x24d   :  { %v1103_v44 = vsel %vm1047_vm1, %v1083_v39, %v1095_v26  ;;  %v1105_v0 = vsel %vm15271_vm3, %v1085_v56, %v1097_v50 }
 0x24e   :  { %v1302_v49 = vadd.f32 %v1301_v2, %v1103_v44  ;;  %v1104_v54 = vsel %vm15265_vm2, %v1084_v45, %v1096_v40  ;;  %v1343_v12 = vadd.f32 %v1342_v3, %v1105_v0  ;;  %v1106_v2 = vsel %vm15279_vm4, %v1086_v19, %v1098_v1 }
 0x24f   :  { %v1304_v61 = vadd.f32 %v1303_v6, %v1104_v54  ;;  %v1345_v24 = vadd.f32 %v1344_v42, %v1106_v2 }
 0x250   :  { %v1349_v37 = vmul.f32 0.5, %v1302_v49 }
 0x251   :  { %v1353_v11 = vmul.f32 0.5, %v1304_v61  ;;  %v1358_v6 = vmul.f32 0.5, %v1345_v24 }
 0x252   :  { %13866 = vtanh.f32 %v1349_v37 }
 0x253   :  { %13868 = vtanh.f32 %v1353_v11 }
 0x254   :  { %13870 = vtanh.f32 %v1343_v12 }
 0x255   :  { %13872 = vtanh.f32 %v1358_v6 }
 0x25c   :  { %v13867_v16 = vpop.eup %13866 }
 0x25d   :  { %v13869_v58 = vpop.eup %13868  ;;  %v1351_v31 = vmul.f32 0.5, %v13867_v16 }
 0x25e   :  { %v1355_v33 = vmul.f32 0.5, %v13869_v58  ;;  %v13871_v38 = vpop.eup %13870 }
 0x25f   :  { %v1352_v26 = vadd.f32 0.5, %v1351_v31  ;;  %v13873_v3 = vpop.eup %13872 }
 0x260   :  { %v1356_v50 = vadd.f32 0.5, %v1355_v33  ;;  %v1360_v44 = vmul.f32 0.5, %v13873_v3  ;;  %v15350_v3 = vld [vmem:[%s18094_s5 + $0xc] ss:$16 sps:$4 sm:$0xff]  }
 0x261   :  { %v1363_v39 = vmul.f32 %v13871_v38, %v1352_v26 }
 0x262   :  { %v1362_v40 = vmul.f32 0.0, %v1356_v50  ;;  %v1361_v45 = vadd.f32 0.5, %v1360_v44  ;;  %v15355_v44 = vld [vmem:[%s18094_s5] ss:$16 sps:$4 sm:$0xff]  }
 0x264   :  { %v15285_v41 = vadd.f32 %v1363_v39, %v1362_v40 }
 0x266   :  { %13874 = vtanh.f32 %v15285_v41 }
 0x270   :  { %v13875_v46 = vpop.eup %13874 }
 0x271   :  { %v1366_v42 = vmul.f32 %v13875_v46, %v1361_v45  ;;  %v15360_v45 = vld [vmem:[%s18094_s5 + $0x8] ss:$16 sps:$4 sm:$0xff]   ;;  %v15369_v46 = vld [vmem:[%s18094_s5 + $0x24] ss:$16 sps:$4 sm:$0xff]  }
 0x273   :  { %v1375_v49 = vpack.c.bf16 %v1366_v42, %v1366_v42  ;;  %1368 = vst.msk [vmem:[#allocation3] sm:$0x1] %vm1367_vm5, %v1366_v42 }
 0x274   :  { %1370 = vst.msk [vmem:[#allocation3 + $0x1f] sm:$0x1] %vm1369_vm6, %v1366_v42 }
 0x275   :  { %1372 = vst.msk [vmem:[#allocation3 + $0x1f] sm:$0x2] %vm1371_vm7, %v1366_v42  ;;  %1637 = vmatmul.mubr.bf16.vlgmr.msra.gmra.mrb[52].mxu1 %v1375_v49  ;;  %1678 = vmatmul.mubr.bf16.vlgmr.msra.gmra.mrb[68].mxu0 %v1375_v49  ;;  %v15379_v49 = vld [vmem:[%s18094_s5 + $0x20] ss:$16 sps:$4 sm:$0xff]  }
 0x276   :  { %1374 = vst.msk [vmem:[#allocation3 + $0x3e] sm:$0x2] %vm1373_vm8, %v1366_v42  ;;  %1938 = vmatpush1.bf16.msra.mxu1 %v14955_v7  ;;  %1979 = vmatpush1.bf16.msra.mxu0 %v14960_v63  ;;  %v1412_v7 = vld [vmem:[#allocation2 + $0xe0] sm:$0x30]  ;;  %v1413_v63 = vld [vmem:[#allocation2 + $0xe8] sm:$0x30] }
 0x277   :  { %1939 = vmatprep.subr.bf16.mxu1 %v14966_v25  ;;  %1980 = vmatprep.subr.bf16.mxu0 %v14971_v35  ;;  %v1420_v25 = vrot.slane %v1412_v7, 2  ;;  %v1414_v35 = vld [vmem:[#allocation2 + $0xf0] sm:$0x30]  ;;  %v15374_v42 = vld [vmem:[%s18094_s5 + $0x2c] ss:$16 sps:$4 sm:$0xff]  }
 0x278   :  { %1969 = vmatprep.mubr.bf16.mxu1 %v14235_v60  ;;  %2010 = vmatprep.mubr.bf16.mxu0 %v14235_v60  ;;  %v15384_v7 = vld [vmem:[%s18094_s5 + $0x28] ss:$16 sps:$4 sm:$0xff]  }
 0x27a   :  { %1940 = vmatpush1.bf16.msra.mxu1 %v14984_v51  ;;  %1981 = vmatpush1.bf16.msra.mxu0 %v14989_v52  ;;  %v1421_v51 = vrot.slane %v1413_v63, 2  ;;  %v1408_v52 = vld [vmem:[#allocation2] sm:$0xc]  ;;  %v15393_v63 = vld [vmem:[%s18094_s5 + $0x44] ss:$16 sps:$4 sm:$0xff]  }
 0x27b   :  { %1941 = vmatprep.subr.bf16.mxu1 %v14998_v53  ;;  %1982 = vmatprep.subr.bf16.mxu0 %v15003_v55  ;;  %v1428_v53 = vsel %vm1047_vm1, %v1408_v52, %v1420_v25  ;;  %v1422_v55 = vrot.slane %v1414_v35, 2  ;;  %v15398_v25 = vld [vmem:[%s18094_s5 + $0x4c] ss:$16 sps:$4 sm:$0xff]   ;;  %v15403_v35 = vld [vmem:[%s18094_s5 + $0x40] ss:$16 sps:$4 sm:$0xff]  }
 0x27c   :  { %v15417_v52 = vld [vmem:[%s18094_s5 + $0x64] ss:$16 sps:$4 sm:$0xff]  }
 0x27e   :  { %1942 = vmatpush1.bf16.msra.mxu1 %v15018_v4  ;;  %1983 = vmatpush1.bf16.msra.mxu0 %v15023_v5  ;;  %v1409_v4 = vld [vmem:[#allocation2 + $0x8] sm:$0xc] }
 0x27f   :  { %1943 = vmatprep.subr.bf16.mxu1 %v15032_v8  ;;  %1984 = vmatprep.subr.bf16.mxu0 %v15037_v9  ;;  %v1429_v5 = vsel %vm15265_vm2, %v1409_v4, %v1421_v51  ;;  %v1415_v8 = vld [vmem:[#allocation2 + $0xf8] sm:$0x30]  ;;  %v1596_v9 = vrot.slane %v1428_v53, 2  ;;  %v15408_v51 = vld [vmem:[%s18094_s5 + $0x48] ss:$16 sps:$4 sm:$0xff]  }
 0x280   :  { %v15422_v53 = vld [vmem:[%s18094_s5 + $0x6c] ss:$16 sps:$4 sm:$0xff]   ;;  %v15432_v4 = vld [vmem:[%s18094_s5 + $0x68] ss:$16 sps:$4 sm:$0xff]  }
 0x282   :  { %1944 = vmatpush1.bf16.msra.mxu1 %v15049_v13  ;;  %1985 = vmatpush1.bf16.msra.mxu0 %v15054_v14  ;;  %v1410_v13 = vld [vmem:[#allocation2 + $0x10] sm:$0xc] }
 0x283   :  { %1945 = vmatprep.subr.bf16.mxu1 %v15061_v15  ;;  %1986 = vmatprep.subr.bf16.mxu0 %v15066_v17  ;;  %v1430_v15 = vsel %vm15271_vm3, %v1410_v13, %v1422_v55  ;;  %v15427_v55 = vld [vmem:[%s18094_s5 + $0x60] ss:$16 sps:$4 sm:$0xff]   ;;  %v15456_v13 = vld [vmem:[%s18094_s5 + $0x88] ss:$16 sps:$4 sm:$0xff]  }
 0x286   :  { %1946 = vmatpush1.bf16.msra.mxu1 %v15077_v20  ;;  %1987 = vmatpush1.bf16.msra.mxu0 %v15082_v21  ;;  %v1597_v20 = vrot.slane %v1429_v5, 2  ;;  %v1423_v21 = vrot.slane %v1415_v8, 2  ;;  %v15441_v5 = vld [vmem:[%s18094_s5 + $0x84] ss:$16 sps:$4 sm:$0xff]   ;;  %v15446_v8 = vld [vmem:[%s18094_s5 + $0x8c] ss:$16 sps:$4 sm:$0xff]  }
 0x287   :  { %1947 = vmatprep.subr.bf16.mxu1 %v15089_v22  ;;  %1988 = vmatprep.subr.bf16.mxu0 %v15094_v23 }
 0x28a   :  { %1948 = vmatpush1.bf16.msra.mxu1 %v15105_v27  ;;  %1989 = vmatpush1.bf16.msra.mxu0 %v15110_v28 }
 0x28b   :  { %1949 = vmatprep.subr.bf16.mxu1 %v15117_v29  ;;  %1990 = vmatprep.subr.bf16.mxu0 %v15122_v30 }
 0x28e   :  { %1950 = vmatpush1.bf16.msra.mxu1 %v15133_v62  ;;  %1991 = vmatpush1.bf16.msra.mxu0 %v15138_v18  ;;  %v1598_v18 = vrot.slane %v1430_v15, 2  ;;  %v15470_v15 = vld [vmem:[%s18094_s5 + $0xac] ss:$16 sps:$4 sm:$0xff]  }
 0x28f   :  { %1951 = vmatprep.subr.bf16.mxu1 %v15145_v32  ;;  %1992 = vmatprep.subr.bf16.mxu0 %v15150_v10  ;;  %v1411_v32 = vld [vmem:[#allocation2 + $0x18] sm:$0xc] }
 0x290   :  { %v1431_v54 = vsel %vm15279_vm4, %v1411_v32, %v1423_v21  ;;  %v15489_v21 = vld [vmem:[%s18094_s5 + $0xc0] ss:$16 sps:$4 sm:$0xff]   ;;  %v1746_v32 = vld [vmem:[#allocation2 + $0xe8] sm:$0xc] }
 0x291   :  { %v1599_v61 = vrot.slane %v1431_v54, 2  ;;  %v1741_v54 = vld [vmem:[#allocation2] sm:$0x30] }
 0x292   :  { %1952 = vmatpush1.bf16.msra.mxu1 %v15161_v34  ;;  %1993 = vmatpush1.bf16.msra.mxu0 %v15166_v36 }
 0x293   :  { %2311 = vmatprep.subr.bf16.mxu0 %v15350_v3 }
 0x348   :  { %v1638_v14 = vpop.f32.mrb[52].mxu1  ;;  %v1679_v17 = vpop.f32.mrb[68].mxu0 }
 0x349   :  { %v1639_v22 = vadd.f32 %v1638_v14, %v1596_v9  ;;  %v1640_v23 = vpop.f32.mrb[53].mxu1  ;;  %v1681_v27 = vpop.f32.mrb[69].mxu0  ;;  %v1680_v56 = vadd.f32 %v1679_v17, %v1598_v18  ;;  %v15451_v9 = vld [vmem:[%s18094_s5 + $0x80] ss:$16 sps:$4 sm:$0xff]   ;;  %v15465_v14 = vld [vmem:[%s18094_s5 + $0xa4] ss:$16 sps:$4 sm:$0xff]  }
 0x34a   :  { %v1641_v28 = vadd.f32 %v1640_v23, %v1597_v20  ;;  %v1642_v29 = vpop.f32.mrb[54].mxu1  ;;  %v1683_v30 = vpop.f32.mrb[70].mxu0  ;;  %v1682_v0 = vadd.f32 %v1681_v27, %v1599_v61  ;;  %v15475_v17 = vld [vmem:[%s18094_s5 + $0xa0] ss:$16 sps:$4 sm:$0xff]   ;;  %v15480_v20 = vld [vmem:[%s18094_s5 + $0xa8] ss:$16 sps:$4 sm:$0xff]  }
 0x34b   :  { %v1686_v62 = vmul.f32 0.5, %v1639_v22  ;;  %v1643_v10 = vpop.f32.mrb[55].mxu1  ;;  %v1684_v34 = vpop.f32.mrb[71].mxu0  ;;  %v15494_v22 = vld [vmem:[%s18094_s5 + $0xc4] ss:$16 sps:$4 sm:$0xff]  }
 0x34c   :  { %v1690_v36 = vmul.f32 0.5, %v1641_v28  ;;  %v1695_v1 = vmul.f32 0.5, %v1682_v0  ;;  %v15499_v23 = vld [vmem:[%s18094_s5 + $0xc8] ss:$16 sps:$4 sm:$0xff]   ;;  %v15504_v27 = vld [vmem:[%s18094_s5 + $0xcc] ss:$16 sps:$4 sm:$0xff]  }
 0x34d   :  { %13876 = vtanh.f32 %v1686_v62  ;;  %v15509_v28 = vld [vmem:[%s18094_s5 + $0xe4] ss:$16 sps:$4 sm:$0xff]   ;;  %v15515_v29 = vld [vmem:[%s18094_s5 + $0xec] ss:$16 sps:$4 sm:$0xff]   ;;  %v15522_v30 = vld [vmem:[%s18094_s5 + $0xe0] ss:$16 sps:$4 sm:$0xff]  }
 0x34e   :  { %13878 = vtanh.f32 %v1690_v36  ;;  %v15529_v62 = vld [vmem:[%s18094_s5 + $0xe8] ss:$16 sps:$4 sm:$0xff]   ;;  %v1745_v18 = vld [vmem:[#allocation2 + $0xe0] sm:$0xc]  ;;  %v1747_v34 = vld [vmem:[#allocation2 + $0xf0] sm:$0xc] }
 0x34f   :  { %13880 = vtanh.f32 %v1680_v56  ;;  %v1753_v10 = vrot.slane %v1745_v18, 6  ;;  %v1754_v36 = vrot.slane %v1746_v32, 6  ;;  %v1755_v61 = vrot.slane %v1747_v34, 6  ;;  %v1742_v0 = vld [vmem:[#allocation2 + $0x8] sm:$0x30] }
 0x350   :  { %13882 = vtanh.f32 %v1695_v1  ;;  %v1744_v32 = vld [vmem:[#allocation2 + $0x18] sm:$0x30] }
 0x351   :  { %v1761_v56 = vsel %vm1047_vm1, %v1741_v54, %v1753_v10  ;;  %v1762_v1 = vsel %vm15265_vm2, %v1742_v0, %v1754_v36 }
 0x357   :  { %v13877_v37 = vpop.eup %13876 }
 0x358   :  { %v13879_v11 = vpop.eup %13878  ;;  %v1688_v12 = vmul.f32 0.5, %v13877_v37  ;;  %v1748_v37 = vld [vmem:[#allocation2 + $0xf8] sm:$0xc] }
 0x359   :  { %v1692_v19 = vmul.f32 0.5, %v13879_v11  ;;  %v13881_v24 = vpop.eup %13880  ;;  %v1929_v11 = vrot.slane %v1761_v56, 4 }
 0x35a   :  { %v1689_v2 = vadd.f32 0.5, %v1688_v12  ;;  %v13883_v33 = vpop.eup %13882  ;;  %v1743_v12 = vld [vmem:[#allocation2 + $0x10] sm:$0x30] }
 0x35b   :  { %v1693_v6 = vadd.f32 0.5, %v1692_v19  ;;  %v1697_v26 = vmul.f32 0.5, %v13883_v33 }
 0x35c   :  { %v1700_v16 = vmul.f32 %v13881_v24, %v1689_v2  ;;  %v1763_v2 = vsel %vm15271_vm3, %v1743_v12, %v1755_v61 }
 0x35d   :  { %v1699_v58 = vmul.f32 %v1693_v6, %v15285_v41  ;;  %v1698_v38 = vadd.f32 0.5, %v1697_v26  ;;  %v15345_v41 = vld [vmem:[%s18094_s5 + $0x4] ss:$16 sps:$4 sm:$0xff]   ;;  %v1930_v6 = vrot.slane %v1762_v1, 4  ;;  %v1931_v18 = vrot.slane %v1763_v2, 4 }
 0x35e   :  { %2270 = vmatprep.subr.bf16.mxu1 %v15345_v41 }
 0x35f   :  { %v15333_v31 = vadd.f32 %v1700_v16, %v1699_v58  ;;  %v1756_v16 = vrot.slane %v1748_v37, 6 }
 0x361   :  { %13884 = vtanh.f32 %v15333_v31  ;;  %v1764_v54 = vsel %vm15279_vm4, %v1744_v32, %v1756_v16  ;;  %v2079_v32 = vld [vmem:[#allocation2 + $0xe8] sm:$0x3] }
 0x362   :  { %v1932_v61 = vrot.slane %v1764_v54, 4  ;;  %v2074_v54 = vld [vmem:[#allocation2] sm:$0xc0] }
 0x36b   :  { %v13885_v50 = vpop.eup %13884 }
 0x36c   :  { %v1703_v39 = vmul.f32 %v13885_v50, %v1698_v38 }
 0x36e   :  { %1704 = vst.msk [vmem:[#allocation3 + $0x1] sm:$0x1] %vm1367_vm5, %v1703_v39  ;;  %v1708_v40 = vpack.c.bf16 %v1703_v39, %v1703_v39 }
 0x36f   :  { %1705 = vst.msk [vmem:[#allocation3 + $0x1e] sm:$0x1] %vm1369_vm6, %v1703_v39 }
 0x370   :  { %1706 = vst.msk [vmem:[#allocation3 + $0x20] sm:$0x2] %vm1371_vm7, %v1703_v39  ;;  %1970 = vmatmul.mubr.bf16.vlgmr.msra.gmra.mrb[56].mxu1 %v1708_v40  ;;  %2011 = vmatmul.mubr.bf16.vlgmr.msra.gmra.mrb[72].mxu0 %v1708_v40 }
 0x371   :  { %1707 = vst.msk [vmem:[#allocation3 + $0x3d] sm:$0x2] %vm1373_vm8, %v1703_v39  ;;  %2302 = vmatprep.mubr.bf16.mxu1 %v14235_v60  ;;  %2343 = vmatprep.mubr.bf16.mxu0 %v14235_v60 }
 0x372   :  { %2271 = vmatpush1.bf16.msra.mxu1 %v15355_v44  ;;  %2312 = vmatpush1.bf16.msra.mxu0 %v15360_v45 }
 0x373   :  { %2272 = vmatprep.subr.bf16.mxu1 %v15369_v46  ;;  %2313 = vmatprep.subr.bf16.mxu0 %v15374_v42 }
 0x376   :  { %2273 = vmatpush1.bf16.msra.mxu1 %v15379_v49  ;;  %2314 = vmatpush1.bf16.msra.mxu0 %v15384_v7 }
 0x377   :  { %2274 = vmatprep.subr.bf16.mxu1 %v15393_v63  ;;  %2315 = vmatprep.subr.bf16.mxu0 %v15398_v25 }
 0x37a   :  { %2275 = vmatpush1.bf16.msra.mxu1 %v15403_v35  ;;  %2316 = vmatpush1.bf16.msra.mxu0 %v15408_v51 }
 0x37b   :  { %2276 = vmatprep.subr.bf16.mxu1 %v15417_v52  ;;  %2317 = vmatprep.subr.bf16.mxu0 %v15422_v53 }
 0x37e   :  { %2277 = vmatpush1.bf16.msra.mxu1 %v15427_v55  ;;  %2318 = vmatpush1.bf16.msra.mxu0 %v15432_v4 }
 0x37f   :  { %2278 = vmatprep.subr.bf16.mxu1 %v15441_v5  ;;  %2319 = vmatprep.subr.bf16.mxu0 %v15446_v8 }
 0x382   :  { %2279 = vmatpush1.bf16.msra.mxu1 %v15451_v9  ;;  %2320 = vmatpush1.bf16.msra.mxu0 %v15456_v13 }
 0x383   :  { %2280 = vmatprep.subr.bf16.mxu1 %v15465_v14  ;;  %2321 = vmatprep.subr.bf16.mxu0 %v15470_v15 }
 0x386   :  { %2281 = vmatpush1.bf16.msra.mxu1 %v15475_v17  ;;  %2322 = vmatpush1.bf16.msra.mxu0 %v15480_v20 }
 0x387   :  { %2282 = vmatprep.subr.bf16.mxu1 %v15494_v22  ;;  %2323 = vmatprep.subr.bf16.mxu0 %v15504_v27 }
 0x38a   :  { %2283 = vmatpush1.bf16.msra.mxu1 %v15489_v21  ;;  %2324 = vmatpush1.bf16.msra.mxu0 %v15499_v23 }
 0x38b   :  { %2284 = vmatprep.subr.bf16.mxu1 %v15509_v28  ;;  %2325 = vmatprep.subr.bf16.mxu0 %v15515_v29 }
 0x38e   :  { %2285 = vmatpush1.bf16.msra.mxu1 %v15522_v30  ;;  %2326 = vmatpush1.bf16.msra.mxu0 %v15529_v62 }
 0x38f   :  { %2591 = vmatprep.subr.bf16.mxu1 %v15345_v41  ;;  %2632 = vmatprep.subr.bf16.mxu0 %v15350_v3 }
 0x443   :  { %v1971_v19 = vpop.f32.mrb[56].mxu1  ;;  %v2012_v24 = vpop.f32.mrb[72].mxu0 }
 0x444   :  { %v1972_v58 = vadd.f32 %v1971_v19, %v1929_v11  ;;  %v1973_v33 = vpop.f32.mrb[57].mxu1  ;;  %v2014_v26 = vpop.f32.mrb[73].mxu0  ;;  %v2013_v56 = vadd.f32 %v2012_v24, %v1931_v18 }
 0x445   :  { %v1974_v38 = vadd.f32 %v1973_v33, %v1930_v6  ;;  %v1975_v50 = vpop.f32.mrb[58].mxu1  ;;  %v2016_v39 = vpop.f32.mrb[74].mxu0  ;;  %v2015_v0 = vadd.f32 %v2014_v26, %v1932_v61 }
 0x446   :  { %v2019_v40 = vmul.f32 0.5, %v1972_v58  ;;  %v1976_v10 = vpop.f32.mrb[59].mxu1  ;;  %v2017_v34 = vpop.f32.mrb[75].mxu0 }
 0x447   :  { %v2023_v36 = vmul.f32 0.5, %v1974_v38  ;;  %v2028_v1 = vmul.f32 0.5, %v2015_v0  ;;  %v2080_v34 = vld [vmem:[#allocation2 + $0xf0] sm:$0x3]  ;;  %v2075_v0 = vld [vmem:[#allocation2 + $0x8] sm:$0xc0] }
 0x448   :  { %13886 = vtanh.f32 %v2019_v40  ;;  %v2088_v61 = vrot.slane %v2080_v34, 2 }
 0x449   :  { %13888 = vtanh.f32 %v2023_v36  ;;  %v2087_v36 = vrot.slane %v2079_v32, 2  ;;  %v2077_v32 = vld [vmem:[#allocation2 + $0x18] sm:$0xc0] }
 0x44a   :  { %13890 = vtanh.f32 %v2013_v56 }
 0x44b   :  { %13892 = vtanh.f32 %v2028_v1  ;;  %v2095_v1 = vsel %vm15265_vm2, %v2075_v0, %v2087_v36 }
 0x452   :  { %v13887_v37 = vpop.eup %13886 }
 0x453   :  { %v13889_v11 = vpop.eup %13888  ;;  %v2021_v12 = vmul.f32 0.5, %v13887_v37  ;;  %v2081_v37 = vld [vmem:[#allocation2 + $0xf8] sm:$0x3] }
 0x454   :  { %v2025_v19 = vmul.f32 0.5, %v13889_v11  ;;  %v13891_v6 = vpop.eup %13890 }
 0x455   :  { %v2022_v2 = vadd.f32 0.5, %v2021_v12  ;;  %v13893_v24 = vpop.eup %13892  ;;  %v2076_v12 = vld [vmem:[#allocation2 + $0x10] sm:$0xc0] }
 0x456   :  { %v2026_v58 = vadd.f32 0.5, %v2025_v19  ;;  %v2030_v16 = vmul.f32 0.5, %v13893_v24 }
 0x457   :  { %v2033_v33 = vmul.f32 %v13891_v6, %v2022_v2  ;;  %v2096_v2 = vsel %vm15271_vm3, %v2076_v12, %v2088_v61 }
 0x458   :  { %v2032_v38 = vmul.f32 %v2026_v58, %v15333_v31  ;;  %v2031_v39 = vadd.f32 0.5, %v2030_v16  ;;  %v2078_v31 = vld [vmem:[#allocation2 + $0xe0] sm:$0x3]  ;;  %v2263_v58 = vrot.slane %v2095_v1, 6 }
 0x459   :  { %v2086_v10 = vrot.slane %v2078_v31, 2  ;;  %v2264_v31 = vrot.slane %v2096_v2, 6 }
 0x45a   :  { %v15545_v50 = vadd.f32 %v2033_v33, %v2032_v38  ;;  %v2089_v33 = vrot.slane %v2081_v37, 2 }
 0x45b   :  { %v2094_v56 = vsel %vm1047_vm1, %v2074_v54, %v2086_v10 }
 0x45c   :  { %13894 = vtanh.f32 %v15545_v50  ;;  %v2262_v11 = vrot.slane %v2094_v56, 6  ;;  %v2097_v54 = vsel %vm15279_vm4, %v2077_v32, %v2089_v33  ;;  %v2412_v32 = vld [vmem:[#allocation2 + $0xc8] sm:$0xc0] }
 0x45d   :  { %v2265_v61 = vrot.slane %v2097_v54, 6  ;;  %v2407_v54 = vld [vmem:[#allocation2 + $0x20] sm:$0x3] }
 0x466   :  { %v13895_v26 = vpop.eup %13894 }
 0x467   :  { %v2036_v40 = vmul.f32 %v13895_v26, %v2031_v39 }
 0x469   :  { %2037 = vst.msk [vmem:[#allocation3 + $0x2] sm:$0x1] %vm1367_vm5, %v2036_v40  ;;  %v2041_v18 = vpack.c.bf16 %v2036_v40, %v2036_v40 }
 0x46a   :  { %2038 = vst.msk [vmem:[#allocation3 + $0x1d] sm:$0x1] %vm1369_vm6, %v2036_v40 }
 0x46b   :  { %2039 = vst.msk [vmem:[#allocation3 + $0x21] sm:$0x2] %vm1371_vm7, %v2036_v40  ;;  %2303 = vmatmul.mubr.bf16.vlgmr.msra.gmra.mrb[60].mxu1 %v2041_v18  ;;  %2344 = vmatmul.mubr.bf16.vlgmr.msra.gmra.mrb[76].mxu0 %v2041_v18 }
 0x46c   :  { %2040 = vst.msk [vmem:[#allocation3 + $0x3c] sm:$0x2] %vm1373_vm8, %v2036_v40  ;;  %2592 = vmatpush1.bf16.msra.mxu1 %v15355_v44  ;;  %2633 = vmatpush1.bf16.msra.mxu0 %v15360_v45 }
 0x46d   :  { %2593 = vmatprep.subr.bf16.mxu1 %v15369_v46  ;;  %2634 = vmatprep.subr.bf16.mxu0 %v15374_v42 }
 0x46e   :  { %2623 = vmatprep.mubr.bf16.mxu1 %v14235_v60  ;;  %2664 = vmatprep.mubr.bf16.mxu0 %v14235_v60 }
 0x470   :  { %2594 = vmatpush1.bf16.msra.mxu1 %v15379_v49  ;;  %2635 = vmatpush1.bf16.msra.mxu0 %v15384_v7 }
 0x471   :  { %2595 = vmatprep.subr.bf16.mxu1 %v15393_v63  ;;  %2636 = vmatprep.subr.bf16.mxu0 %v15398_v25 }
 0x474   :  { %2596 = vmatpush1.bf16.msra.mxu1 %v15403_v35  ;;  %2637 = vmatpush1.bf16.msra.mxu0 %v15408_v51 }
 0x475   :  { %2597 = vmatprep.subr.bf16.mxu1 %v15417_v52  ;;  %2638 = vmatprep.subr.bf16.mxu0 %v15422_v53 }
 0x478   :  { %2598 = vmatpush1.bf16.msra.mxu1 %v15427_v55  ;;  %2639 = vmatpush1.bf16.msra.mxu0 %v15432_v4 }
 0x479   :  { %2599 = vmatprep.subr.bf16.mxu1 %v15441_v5  ;;  %2640 = vmatprep.subr.bf16.mxu0 %v15446_v8 }
 0x47c   :  { %2600 = vmatpush1.bf16.msra.mxu1 %v15451_v9  ;;  %2641 = vmatpush1.bf16.msra.mxu0 %v15456_v13 }
 0x47d   :  { %2601 = vmatprep.subr.bf16.mxu1 %v15465_v14  ;;  %2642 = vmatprep.subr.bf16.mxu0 %v15470_v15 }
 0x480   :  { %2602 = vmatpush1.bf16.msra.mxu1 %v15475_v17  ;;  %2643 = vmatpush1.bf16.msra.mxu0 %v15480_v20 }
 0x481   :  { %2603 = vmatprep.subr.bf16.mxu1 %v15494_v22  ;;  %2644 = vmatprep.subr.bf16.mxu0 %v15504_v27 }
 0x484   :  { %2604 = vmatpush1.bf16.msra.mxu1 %v15489_v21  ;;  %2645 = vmatpush1.bf16.msra.mxu0 %v15499_v23 }
 0x485   :  { %2605 = vmatprep.subr.bf16.mxu1 %v15509_v28  ;;  %2646 = vmatprep.subr.bf16.mxu0 %v15515_v29 }
 0x488   :  { %2606 = vmatpush1.bf16.msra.mxu1 %v15522_v30  ;;  %2647 = vmatpush1.bf16.msra.mxu0 %v15529_v62 }
 0x489   :  { %2924 = vmatprep.subr.bf16.mxu1 %v15345_v41  ;;  %2965 = vmatprep.subr.bf16.mxu0 %v15350_v3 }
 0x53e   :  { %v2304_v19 = vpop.f32.mrb[60].mxu1  ;;  %v2345_v6 = vpop.f32.mrb[76].mxu0 }
 0x53f   :  { %v2305_v38 = vadd.f32 %v2304_v19, %v2262_v11  ;;  %v2306_v24 = vpop.f32.mrb[61].mxu1  ;;  %v2347_v16 = vpop.f32.mrb[77].mxu0  ;;  %v2346_v56 = vadd.f32 %v2345_v6, %v2264_v31 }
 0x540   :  { %v2307_v39 = vadd.f32 %v2306_v24, %v2263_v58  ;;  %v2308_v26 = vpop.f32.mrb[62].mxu1  ;;  %v2349_v40 = vpop.f32.mrb[78].mxu0  ;;  %v2348_v0 = vadd.f32 %v2347_v16, %v2265_v61 }
 0x541   :  { %v2352_v18 = vmul.f32 0.5, %v2305_v38  ;;  %v2309_v10 = vpop.f32.mrb[63].mxu1  ;;  %v2350_v34 = vpop.f32.mrb[79].mxu0 }
 0x542   :  { %v2356_v36 = vmul.f32 0.5, %v2307_v39  ;;  %v2361_v1 = vmul.f32 0.5, %v2348_v0  ;;  %v2413_v34 = vld [vmem:[#allocation2 + $0xd0] sm:$0xc0] }
 0x543   :  { %13896 = vtanh.f32 %v2352_v18  ;;  %v2421_v0 = vrot.slane %v2413_v34, 6 }
 0x544   :  { %13898 = vtanh.f32 %v2356_v36  ;;  %v2420_v36 = vrot.slane %v2412_v32, 6 }
 0x545   :  { %13900 = vtanh.f32 %v2346_v56 }
 0x546   :  { %13902 = vtanh.f32 %v2361_v1 }
 0x54d   :  { %v13897_v37 = vpop.eup %13896 }
 0x54e   :  { %v13899_v11 = vpop.eup %13898  ;;  %v2354_v12 = vmul.f32 0.5, %v13897_v37  ;;  %v2408_v37 = vld [vmem:[#allocation2 + $0x28] sm:$0x3] }
 0x54f   :  { %v2358_v19 = vmul.f32 0.5, %v13899_v11  ;;  %v13901_v58 = vpop.eup %13900 }
 0x550   :  { %v2355_v2 = vadd.f32 0.5, %v2354_v12  ;;  %v13903_v6 = vpop.eup %13902  ;;  %v2428_v12 = vsel %vm15265_vm2, %v2408_v37, %v2420_v36 }
 0x551   :  { %v2359_v38 = vadd.f32 0.5, %v2358_v19  ;;  %v2363_v33 = vmul.f32 0.5, %v13903_v6  ;;  %v2414_v19 = vld [vmem:[#allocation2 + $0xd8] sm:$0xc0] }
 0x552   :  { %v2366_v24 = vmul.f32 %v13901_v58, %v2355_v2 }
 0x553   :  { %v2365_v39 = vmul.f32 %v2359_v38, %v15545_v50  ;;  %v2364_v40 = vadd.f32 0.5, %v2363_v33  ;;  %v2411_v50 = vld [vmem:[#allocation2 + $0xc0] sm:$0xc0] }
 0x554   :  { %v2419_v10 = vrot.slane %v2411_v50, 6  ;;  %v2410_v50 = vld [vmem:[#allocation2 + $0x38] sm:$0x3] }
 0x555   :  { %v15595_v26 = vadd.f32 %v2366_v24, %v2365_v39  ;;  %v2409_v39 = vld [vmem:[#allocation2 + $0x30] sm:$0x3] }
 0x556   :  { %v2427_v56 = vsel %vm1047_vm1, %v2407_v54, %v2419_v10 }
 0x557   :  { %13904 = vtanh.f32 %v15595_v26 }
 0x561   :  { %v13905_v16 = vpop.eup %13904 }
 0x562   :  { %v2369_v18 = vmul.f32 %v13905_v16, %v2364_v40  ;;  %v2429_v40 = vsel %vm15271_vm3, %v2409_v39, %v2421_v0 }
 0x564   :  { %2370 = vst.msk [vmem:[#allocation3 + $0x3] sm:$0x1] %vm1367_vm5, %v2369_v18  ;;  %v2374_v31 = vpack.c.bf16 %v2369_v18, %v2369_v18 }
 0x565   :  { %2371 = vst.msk [vmem:[#allocation3 + $0x1c] sm:$0x1] %vm1369_vm6, %v2369_v18 }
 0x566   :  { %2372 = vst.msk [vmem:[#allocation3 + $0x22] sm:$0x2] %vm1371_vm7, %v2369_v18  ;;  %2624 = vmatmul.mubr.bf16.vlgmr.msra.gmra.mrb[64].mxu1 %v2374_v31  ;;  %2665 = vmatmul.mubr.bf16.vlgmr.msra.gmra.mrb[80].mxu0 %v2374_v31 }
 0x567   :  { %2373 = vst.msk [vmem:[#allocation3 + $0x3b] sm:$0x2] %vm1373_vm8, %v2369_v18  ;;  %2925 = vmatpush1.bf16.msra.mxu1 %v15355_v44  ;;  %2966 = vmatpush1.bf16.msra.mxu0 %v15360_v45  ;;  %v2422_v18 = vrot.slane %v2414_v19, 6 }
 0x568   :  { %2926 = vmatprep.subr.bf16.mxu1 %v15369_v46  ;;  %2967 = vmatprep.subr.bf16.mxu0 %v15374_v42 }
 0x569   :  { %2956 = vmatprep.mubr.bf16.mxu1 %v14235_v60  ;;  %2997 = vmatprep.mubr.bf16.mxu0 %v14235_v60  ;;  %v2430_v32 = vsel %vm15279_vm4, %v2410_v50, %v2422_v18 }
 0x56b   :  { %2927 = vmatpush1.bf16.msra.mxu1 %v15379_v49  ;;  %2968 = vmatpush1.bf16.msra.mxu0 %v15384_v7 }
 0x56c   :  { %2928 = vmatprep.subr.bf16.mxu1 %v15393_v63  ;;  %2969 = vmatprep.subr.bf16.mxu0 %v15398_v25 }
 0x56f   :  { %2929 = vmatpush1.bf16.msra.mxu1 %v15403_v35  ;;  %2970 = vmatpush1.bf16.msra.mxu0 %v15408_v51 }
 0x570   :  { %2930 = vmatprep.subr.bf16.mxu1 %v15417_v52  ;;  %2971 = vmatprep.subr.bf16.mxu0 %v15422_v53 }
 0x573   :  { %2931 = vmatpush1.bf16.msra.mxu1 %v15427_v55  ;;  %2972 = vmatpush1.bf16.msra.mxu0 %v15432_v4 }
 0x574   :  { %2932 = vmatprep.subr.bf16.mxu1 %v15441_v5  ;;  %2973 = vmatprep.subr.bf16.mxu0 %v15446_v8 }
 0x577   :  { %2933 = vmatpush1.bf16.msra.mxu1 %v15451_v9  ;;  %2974 = vmatpush1.bf16.msra.mxu0 %v15456_v13 }
 0x578   :  { %2934 = vmatprep.subr.bf16.mxu1 %v15465_v14  ;;  %2975 = vmatprep.subr.bf16.mxu0 %v15470_v15 }
 0x57b   :  { %2935 = vmatpush1.bf16.msra.mxu1 %v15475_v17  ;;  %2976 = vmatpush1.bf16.msra.mxu0 %v15480_v20 }
 0x57c   :  { %2936 = vmatprep.subr.bf16.mxu1 %v15494_v22  ;;  %2977 = vmatprep.subr.bf16.mxu0 %v15504_v27 }
 0x57f   :  { %2937 = vmatpush1.bf16.msra.mxu1 %v15489_v21  ;;  %2978 = vmatpush1.bf16.msra.mxu0 %v15499_v23 }
 0x580   :  { %2938 = vmatprep.subr.bf16.mxu1 %v15509_v28  ;;  %2979 = vmatprep.subr.bf16.mxu0 %v15515_v29 }
 0x583   :  { %2939 = vmatpush1.bf16.msra.mxu1 %v15522_v30  ;;  %2980 = vmatpush1.bf16.msra.mxu0 %v15529_v62 }
 0x584   :  { %3257 = vmatprep.subr.bf16.mxu1 %v15345_v41  ;;  %3298 = vmatprep.subr.bf16.mxu0 %v15350_v3 }
 0x639   :  { %v2625_v61 = vpop.f32.mrb[64].mxu1  ;;  %v2666_v1 = vpop.f32.mrb[80].mxu0 }
 0x63a   :  { %v2626_v11 = vadd.f32 %v2625_v61, %v2427_v56  ;;  %v2627_v41 = vpop.f32.mrb[65].mxu1  ;;  %v2668_v3 = vpop.f32.mrb[81].mxu0  ;;  %v2667_v31 = vadd.f32 %v2666_v1, %v2429_v40 }
 0x63b   :  { %v2628_v2 = vadd.f32 %v2627_v41, %v2428_v12  ;;  %v2629_v58 = vpop.f32.mrb[66].mxu1  ;;  %v2670_v38 = vpop.f32.mrb[82].mxu0  ;;  %v2669_v10 = vadd.f32 %v2668_v3, %v2430_v32 }
 0x63c   :  { %v2673_v24 = vmul.f32 0.5, %v2626_v11  ;;  %v2630_v6 = vpop.f32.mrb[67].mxu1  ;;  %v2671_v33 = vpop.f32.mrb[83].mxu0 }
 0x63d   :  { %v2677_v16 = vmul.f32 0.5, %v2628_v2  ;;  %v2682_v34 = vmul.f32 0.5, %v2669_v10 }
 0x63e   :  { %13906 = vtanh.f32 %v2673_v24 }
 0x63f   :  { %13908 = vtanh.f32 %v2677_v16 }
 0x640   :  { %13910 = vtanh.f32 %v2667_v31 }
 0x641   :  { %13912 = vtanh.f32 %v2682_v34 }
 0x648   :  { %v13907_v36 = vpop.eup %13906 }
 0x649   :  { %v13909_v54 = vpop.eup %13908  ;;  %v2675_v56 = vmul.f32 0.5, %v13907_v36 }
 0x64a   :  { %v2679_v61 = vmul.f32 0.5, %v13909_v54  ;;  %v13911_v11 = vpop.eup %13910 }
 0x64b   :  { %v2676_v37 = vadd.f32 0.5, %v2675_v56  ;;  %v13913_v19 = vpop.eup %13912 }
 0x64c   :  { %v2680_v0 = vadd.f32 0.5, %v2679_v61  ;;  %v2684_v2 = vmul.f32 0.5, %v13913_v19  ;;  %v15710_v19 = vld [vmem:[%s18094_s5 + $0xc] ss:$16 sps:$4 sm:$0xff]  }
 0x64d   :  { %v2687_v12 = vmul.f32 %v13911_v11, %v2676_v37 }
 0x64e   :  { %v2686_v41 = vmul.f32 %v2680_v0, %v15595_v26  ;;  %v2685_v58 = vadd.f32 0.5, %v2684_v2  ;;  %v15715_v2 = vld [vmem:[%s18094_s5] ss:$16 sps:$4 sm:$0xff]  }
 0x650   :  { %v15645_v1 = vadd.f32 %v2687_v12, %v2686_v41 }
 0x652   :  { %13914 = vtanh.f32 %v15645_v1 }
 0x65c   :  { %v13915_v3 = vpop.eup %13914 }
 0x65d   :  { %v2690_v38 = vmul.f32 %v13915_v3, %v2685_v58  ;;  %v15720_v58 = vld [vmem:[%s18094_s5 + $0x8] ss:$16 sps:$4 sm:$0xff]   ;;  %v15729_v3 = vld [vmem:[%s18094_s5 + $0x24] ss:$16 sps:$4 sm:$0xff]  }
 0x65f   :  { %2691 = vst.msk [vmem:[#allocation3 + $0x4] sm:$0x1] %vm1367_vm5, %v2690_v38  ;;  %v2695_v24 = vpack.c.bf16 %v2690_v38, %v2690_v38 }
 0x660   :  { %2692 = vst.msk [vmem:[#allocation3 + $0x1b] sm:$0x1] %vm1369_vm6, %v2690_v38 }
 0x661   :  { %2693 = vst.msk [vmem:[#allocation3 + $0x23] sm:$0x2] %vm1371_vm7, %v2690_v38  ;;  %2957 = vmatmul.mubr.bf16.vlgmr.msra.gmra.mrb[68].mxu1 %v2695_v24  ;;  %2998 = vmatmul.mubr.bf16.vlgmr.msra.gmra.mrb[84].mxu0 %v2695_v24  ;;  %v15739_v24 = vld [vmem:[%s18094_s5 + $0x20] ss:$16 sps:$4 sm:$0xff]  }
 0x662   :  { %2694 = vst.msk [vmem:[#allocation3 + $0x3a] sm:$0x2] %vm1373_vm8, %v2690_v38  ;;  %3258 = vmatpush1.bf16.msra.mxu1 %v15355_v44  ;;  %3299 = vmatpush1.bf16.msra.mxu0 %v15360_v45  ;;  %v2732_v44 = vld [vmem:[#allocation2 + $0xc0] sm:$0x30]  ;;  %v2733_v45 = vld [vmem:[#allocation2 + $0xc8] sm:$0x30] }
 0x663   :  { %3259 = vmatprep.subr.bf16.mxu1 %v15369_v46  ;;  %3300 = vmatprep.subr.bf16.mxu0 %v15374_v42  ;;  %v2740_v46 = vrot.slane %v2732_v44, 2  ;;  %v2734_v42 = vld [vmem:[#allocation2 + $0xd0] sm:$0x30]  ;;  %v15734_v38 = vld [vmem:[%s18094_s5 + $0x2c] ss:$16 sps:$4 sm:$0xff]  }
 0x664   :  { %3289 = vmatprep.mubr.bf16.mxu1 %v14235_v60  ;;  %3330 = vmatprep.mubr.bf16.mxu0 %v14235_v60  ;;  %v15744_v44 = vld [vmem:[%s18094_s5 + $0x28] ss:$16 sps:$4 sm:$0xff]  }
 0x666   :  { %3260 = vmatpush1.bf16.msra.mxu1 %v15379_v49  ;;  %3301 = vmatpush1.bf16.msra.mxu0 %v15384_v7  ;;  %v2741_v49 = vrot.slane %v2733_v45, 2  ;;  %v2728_v7 = vld [vmem:[#allocation2 + $0x20] sm:$0xc]  ;;  %v15753_v45 = vld [vmem:[%s18094_s5 + $0x44] ss:$16 sps:$4 sm:$0xff]  }
 0x667   :  { %3261 = vmatprep.subr.bf16.mxu1 %v15393_v63  ;;  %3302 = vmatprep.subr.bf16.mxu0 %v15398_v25  ;;  %v2748_v63 = vsel %vm1047_vm1, %v2728_v7, %v2740_v46  ;;  %v2742_v25 = vrot.slane %v2734_v42, 2  ;;  %v15758_v46 = vld [vmem:[%s18094_s5 + $0x4c] ss:$16 sps:$4 sm:$0xff]   ;;  %v15763_v42 = vld [vmem:[%s18094_s5 + $0x40] ss:$16 sps:$4 sm:$0xff]  }
 0x668   :  { %v15777_v7 = vld [vmem:[%s18094_s5 + $0x60] ss:$16 sps:$4 sm:$0xff]  }
 0x66a   :  { %3262 = vmatpush1.bf16.msra.mxu1 %v15403_v35  ;;  %3303 = vmatpush1.bf16.msra.mxu0 %v15408_v51  ;;  %v2729_v35 = vld [vmem:[#allocation2 + $0x28] sm:$0xc] }
 0x66b   :  { %3263 = vmatprep.subr.bf16.mxu1 %v15417_v52  ;;  %3304 = vmatprep.subr.bf16.mxu0 %v15422_v53  ;;  %v2749_v51 = vsel %vm15265_vm2, %v2729_v35, %v2741_v49  ;;  %v2735_v52 = vld [vmem:[#allocation2 + $0xd8] sm:$0x30]  ;;  %v2916_v53 = vrot.slane %v2748_v63, 2  ;;  %v15768_v49 = vld [vmem:[%s18094_s5 + $0x48] ss:$16 sps:$4 sm:$0xff]  }
 0x66c   :  { %v15782_v63 = vld [vmem:[%s18094_s5 + $0x64] ss:$16 sps:$4 sm:$0xff]   ;;  %v15792_v35 = vld [vmem:[%s18094_s5 + $0x6c] ss:$16 sps:$4 sm:$0xff]  }
 0x66e   :  { %3264 = vmatpush1.bf16.msra.mxu1 %v15427_v55  ;;  %3305 = vmatpush1.bf16.msra.mxu0 %v15432_v4  ;;  %v2730_v55 = vld [vmem:[#allocation2 + $0x30] sm:$0xc] }
 0x66f   :  { %3265 = vmatprep.subr.bf16.mxu1 %v15441_v5  ;;  %3306 = vmatprep.subr.bf16.mxu0 %v15446_v8  ;;  %v2750_v5 = vsel %vm15271_vm3, %v2730_v55, %v2742_v25  ;;  %v15787_v25 = vld [vmem:[%s18094_s5 + $0x68] ss:$16 sps:$4 sm:$0xff]  }
 0x670   :  { %v15816_v55 = vld [vmem:[%s18094_s5 + $0x88] ss:$16 sps:$4 sm:$0xff]  }
 0x672   :  { %3266 = vmatpush1.bf16.msra.mxu1 %v15451_v9  ;;  %3307 = vmatpush1.bf16.msra.mxu0 %v15456_v13  ;;  %v2917_v9 = vrot.slane %v2749_v51, 2  ;;  %v2743_v13 = vrot.slane %v2735_v52, 2  ;;  %v15797_v51 = vld [vmem:[%s18094_s5 + $0x84] ss:$16 sps:$4 sm:$0xff]   ;;  %v15803_v52 = vld [vmem:[%s18094_s5 + $0x8c] ss:$16 sps:$4 sm:$0xff]  }
 0x673   :  { %3267 = vmatprep.subr.bf16.mxu1 %v15465_v14  ;;  %3308 = vmatprep.subr.bf16.mxu0 %v15470_v15 }
 0x676   :  { %3268 = vmatpush1.bf16.msra.mxu1 %v15475_v17  ;;  %3309 = vmatpush1.bf16.msra.mxu0 %v15480_v20 }
 0x677   :  { %3269 = vmatprep.subr.bf16.mxu1 %v15494_v22  ;;  %3310 = vmatprep.subr.bf16.mxu0 %v15504_v27  ;;  %v2918_v27 = vrot.slane %v2750_v5, 2  ;;  %v15828_v5 = vld [vmem:[%s18094_s5 + $0xac] ss:$16 sps:$4 sm:$0xff]  }
 0x67a   :  { %3270 = vmatpush1.bf16.msra.mxu1 %v15489_v21  ;;  %3311 = vmatpush1.bf16.msra.mxu0 %v15499_v23 }
 0x67b   :  { %3271 = vmatprep.subr.bf16.mxu1 %v15509_v28  ;;  %3312 = vmatprep.subr.bf16.mxu0 %v15515_v29  ;;  %v2731_v28 = vld [vmem:[#allocation2 + $0x38] sm:$0xc] }
 0x67c   :  { %v2751_v26 = vsel %vm15279_vm4, %v2731_v28, %v2743_v13  ;;  %v15847_v13 = vld [vmem:[%s18094_s5 + $0xc4] ss:$16 sps:$4 sm:$0xff]   ;;  %v3066_v28 = vld [vmem:[#allocation2 + $0xc8] sm:$0xc] }
 0x67d   :  { %v2919_v6 = vrot.slane %v2751_v26, 2  ;;  %v3061_v26 = vld [vmem:[#allocation2 + $0x20] sm:$0x30] }
 0x67e   :  { %3272 = vmatpush1.bf16.msra.mxu1 %v15522_v30  ;;  %3313 = vmatpush1.bf16.msra.mxu0 %v15529_v62 }
 0x67f   :  { %3631 = vmatprep.subr.bf16.mxu0 %v15710_v19 }
 0x734   :  { %v2958_v4 = vpop.f32.mrb[68].mxu1  ;;  %v2999_v8 = vpop.f32.mrb[84].mxu0 }
 0x735   :  { %v2959_v14 = vadd.f32 %v2958_v4, %v2916_v53  ;;  %v2960_v15 = vpop.f32.mrb[69].mxu1  ;;  %v3001_v17 = vpop.f32.mrb[85].mxu0  ;;  %v3000_v39 = vadd.f32 %v2999_v8, %v2918_v27  ;;  %v15811_v53 = vld [vmem:[%s18094_s5 + $0x80] ss:$16 sps:$4 sm:$0xff]   ;;  %v15823_v4 = vld [vmem:[%s18094_s5 + $0xa4] ss:$16 sps:$4 sm:$0xff]  }
 0x736   :  { %v2961_v20 = vadd.f32 %v2960_v15, %v2917_v9  ;;  %v2962_v21 = vpop.f32.mrb[70].mxu1  ;;  %v3003_v22 = vpop.f32.mrb[86].mxu0  ;;  %v3002_v33 = vadd.f32 %v3001_v17, %v2919_v6  ;;  %v15835_v8 = vld [vmem:[%s18094_s5 + $0xa0] ss:$16 sps:$4 sm:$0xff]   ;;  %v15840_v9 = vld [vmem:[%s18094_s5 + $0xa8] ss:$16 sps:$4 sm:$0xff]  }
 0x737   :  { %v3006_v23 = vmul.f32 0.5, %v2959_v14  ;;  %v2963_v29 = vpop.f32.mrb[71].mxu1  ;;  %v3004_v30 = vpop.f32.mrb[87].mxu0  ;;  %v15852_v14 = vld [vmem:[%s18094_s5 + $0xcc] ss:$16 sps:$4 sm:$0xff]  }
 0x738   :  { %v3010_v62 = vmul.f32 0.5, %v2961_v20  ;;  %v3015_v40 = vmul.f32 0.5, %v3002_v33  ;;  %v15859_v15 = vld [vmem:[%s18094_s5 + $0xc0] ss:$16 sps:$4 sm:$0xff]   ;;  %v15864_v17 = vld [vmem:[%s18094_s5 + $0xc8] ss:$16 sps:$4 sm:$0xff]  }
 0x739   :  { %13916 = vtanh.f32 %v3006_v23  ;;  %v15871_v20 = vld [vmem:[%s18094_s5 + $0xe4] ss:$16 sps:$4 sm:$0xff]   ;;  %v15876_v21 = vld [vmem:[%s18094_s5 + $0xec] ss:$16 sps:$4 sm:$0xff]   ;;  %v15883_v22 = vld [vmem:[%s18094_s5 + $0xe0] ss:$16 sps:$4 sm:$0xff]  }
 0x73a   :  { %13918 = vtanh.f32 %v3010_v62  ;;  %v15888_v23 = vld [vmem:[%s18094_s5 + $0xe8] ss:$16 sps:$4 sm:$0xff]   ;;  %v3065_v27 = vld [vmem:[#allocation2 + $0xc0] sm:$0xc]  ;;  %v3067_v30 = vld [vmem:[#allocation2 + $0xd0] sm:$0xc] }
 0x73b   :  { %13920 = vtanh.f32 %v3000_v39  ;;  %v3073_v29 = vrot.slane %v3065_v27, 6  ;;  %v3074_v62 = vrot.slane %v3066_v28, 6  ;;  %v3075_v6 = vrot.slane %v3067_v30, 6  ;;  %v3062_v33 = vld [vmem:[#allocation2 + $0x28] sm:$0x30] }
 0x73c   :  { %13922 = vtanh.f32 %v3015_v40  ;;  %v3064_v28 = vld [vmem:[#allocation2 + $0x38] sm:$0x30] }
 0x73d   :  { %v3081_v39 = vsel %vm1047_vm1, %v3061_v26, %v3073_v29  ;;  %v3082_v40 = vsel %vm15265_vm2, %v3062_v33, %v3074_v62 }
 0x743   :  { %v13917_v16 = vpop.eup %13916 }
 0x744   :  { %v13919_v18 = vpop.eup %13918  ;;  %v3008_v31 = vmul.f32 0.5, %v13917_v16  ;;  %v3068_v16 = vld [vmem:[#allocation2 + $0xd8] sm:$0xc] }
 0x745   :  { %v3012_v50 = vmul.f32 0.5, %v13919_v18  ;;  %v13921_v10 = vpop.eup %13920  ;;  %v3249_v18 = vrot.slane %v3081_v39, 4 }
 0x746   :  { %v3009_v32 = vadd.f32 0.5, %v3008_v31  ;;  %v13923_v61 = vpop.eup %13922  ;;  %v3063_v31 = vld [vmem:[#allocation2 + $0x30] sm:$0x30] }
 0x747   :  { %v3013_v34 = vadd.f32 0.5, %v3012_v50  ;;  %v3017_v37 = vmul.f32 0.5, %v13923_v61 }
 0x748   :  { %v3020_v36 = vmul.f32 %v13921_v10, %v3009_v32  ;;  %v3083_v32 = vsel %vm15271_vm3, %v3063_v31, %v3075_v6 }
 0x749   :  { %v3019_v54 = vmul.f32 %v3013_v34, %v15645_v1  ;;  %v3018_v11 = vadd.f32 0.5, %v3017_v37  ;;  %v15705_v1 = vld [vmem:[%s18094_s5 + $0x4] ss:$16 sps:$4 sm:$0xff]   ;;  %v3250_v34 = vrot.slane %v3082_v40, 4  ;;  %v3251_v27 = vrot.slane %v3083_v32, 4 }
 0x74a   :  { %3590 = vmatprep.subr.bf16.mxu1 %v15705_v1 }
 0x74b   :  { %v15693_v56 = vadd.f32 %v3020_v36, %v3019_v54  ;;  %v3076_v36 = vrot.slane %v3068_v16, 6 }
 0x74d   :  { %13924 = vtanh.f32 %v15693_v56  ;;  %v3084_v26 = vsel %vm15279_vm4, %v3064_v28, %v3076_v36  ;;  %v3399_v28 = vld [vmem:[#allocation2 + $0xc8] sm:$0x3] }
 0x74e   :  { %v3252_v6 = vrot.slane %v3084_v26, 4  ;;  %v3394_v26 = vld [vmem:[#allocation2 + $0x20] sm:$0xc0] }
 0x757   :  { %v13925_v0 = vpop.eup %13924 }
 0x758   :  { %v3023_v12 = vmul.f32 %v13925_v0, %v3018_v11 }
 0x75a   :  { %3024 = vst.msk [vmem:[#allocation3 + $0x5] sm:$0x1] %vm1367_vm5, %v3023_v12  ;;  %v3028_v41 = vpack.c.bf16 %v3023_v12, %v3023_v12 }
 0x75b   :  { %3025 = vst.msk [vmem:[#allocation3 + $0x1a] sm:$0x1] %vm1369_vm6, %v3023_v12 }
 0x75c   :  { %3026 = vst.msk [vmem:[#allocation3 + $0x24] sm:$0x2] %vm1371_vm7, %v3023_v12  ;;  %3290 = vmatmul.mubr.bf16.vlgmr.msra.gmra.mrb[72].mxu1 %v3028_v41  ;;  %3331 = vmatmul.mubr.bf16.vlgmr.msra.gmra.mrb[88].mxu0 %v3028_v41 }
 0x75d   :  { %3027 = vst.msk [vmem:[#allocation3 + $0x39] sm:$0x2] %vm1373_vm8, %v3023_v12  ;;  %3622 = vmatprep.mubr.bf16.mxu1 %v14235_v60  ;;  %3663 = vmatprep.mubr.bf16.mxu0 %v14235_v60 }
 0x75e   :  { %3591 = vmatpush1.bf16.msra.mxu1 %v15715_v2  ;;  %3632 = vmatpush1.bf16.msra.mxu0 %v15720_v58 }
 0x75f   :  { %3592 = vmatprep.subr.bf16.mxu1 %v15729_v3  ;;  %3633 = vmatprep.subr.bf16.mxu0 %v15734_v38 }
 0x762   :  { %3593 = vmatpush1.bf16.msra.mxu1 %v15739_v24  ;;  %3634 = vmatpush1.bf16.msra.mxu0 %v15744_v44 }
 0x763   :  { %3594 = vmatprep.subr.bf16.mxu1 %v15753_v45  ;;  %3635 = vmatprep.subr.bf16.mxu0 %v15758_v46 }
 0x766   :  { %3595 = vmatpush1.bf16.msra.mxu1 %v15763_v42  ;;  %3636 = vmatpush1.bf16.msra.mxu0 %v15768_v49 }
 0x767   :  { %3596 = vmatprep.subr.bf16.mxu1 %v15782_v63  ;;  %3637 = vmatprep.subr.bf16.mxu0 %v15792_v35 }
 0x76a   :  { %3597 = vmatpush1.bf16.msra.mxu1 %v15777_v7  ;;  %3638 = vmatpush1.bf16.msra.mxu0 %v15787_v25 }
 0x76b   :  { %3598 = vmatprep.subr.bf16.mxu1 %v15797_v51  ;;  %3639 = vmatprep.subr.bf16.mxu0 %v15803_v52 }
 0x76e   :  { %3599 = vmatpush1.bf16.msra.mxu1 %v15811_v53  ;;  %3640 = vmatpush1.bf16.msra.mxu0 %v15816_v55 }
 0x76f   :  { %3600 = vmatprep.subr.bf16.mxu1 %v15823_v4  ;;  %3641 = vmatprep.subr.bf16.mxu0 %v15828_v5 }
 0x772   :  { %3601 = vmatpush1.bf16.msra.mxu1 %v15835_v8  ;;  %3642 = vmatpush1.bf16.msra.mxu0 %v15840_v9 }
 0x773   :  { %3602 = vmatprep.subr.bf16.mxu1 %v15847_v13  ;;  %3643 = vmatprep.subr.bf16.mxu0 %v15852_v14 }
 0x776   :  { %3603 = vmatpush1.bf16.msra.mxu1 %v15859_v15  ;;  %3644 = vmatpush1.bf16.msra.mxu0 %v15864_v17 }
 0x777   :  { %3604 = vmatprep.subr.bf16.mxu1 %v15871_v20  ;;  %3645 = vmatprep.subr.bf16.mxu0 %v15876_v21 }
 0x77a   :  { %3605 = vmatpush1.bf16.msra.mxu1 %v15883_v22  ;;  %3646 = vmatpush1.bf16.msra.mxu0 %v15888_v23 }
 0x77b   :  { %3911 = vmatprep.subr.bf16.mxu1 %v15705_v1  ;;  %3952 = vmatprep.subr.bf16.mxu0 %v15710_v19 }
 0x82f   :  { %v3291_v50 = vpop.f32.mrb[72].mxu1  ;;  %v3332_v10 = vpop.f32.mrb[88].mxu0 }
 0x830   :  { %v3292_v54 = vadd.f32 %v3291_v50, %v3249_v18  ;;  %v3293_v61 = vpop.f32.mrb[73].mxu1  ;;  %v3334_v37 = vpop.f32.mrb[89].mxu0  ;;  %v3333_v39 = vadd.f32 %v3332_v10, %v3251_v27 }
 0x831   :  { %v3294_v11 = vadd.f32 %v3293_v61, %v3250_v34  ;;  %v3295_v0 = vpop.f32.mrb[74].mxu1  ;;  %v3336_v12 = vpop.f32.mrb[90].mxu0  ;;  %v3335_v33 = vadd.f32 %v3334_v37, %v3252_v6 }
 0x832   :  { %v3339_v41 = vmul.f32 0.5, %v3292_v54  ;;  %v3296_v29 = vpop.f32.mrb[75].mxu1  ;;  %v3337_v30 = vpop.f32.mrb[91].mxu0 }
 0x833   :  { %v3343_v62 = vmul.f32 0.5, %v3294_v11  ;;  %v3348_v40 = vmul.f32 0.5, %v3335_v33  ;;  %v3400_v30 = vld [vmem:[#allocation2 + $0xd0] sm:$0x3]  ;;  %v3395_v33 = vld [vmem:[#allocation2 + $0x28] sm:$0xc0] }
 0x834   :  { %13926 = vtanh.f32 %v3339_v41  ;;  %v3408_v6 = vrot.slane %v3400_v30, 2 }
 0x835   :  { %13928 = vtanh.f32 %v3343_v62  ;;  %v3407_v62 = vrot.slane %v3399_v28, 2  ;;  %v3397_v28 = vld [vmem:[#allocation2 + $0x38] sm:$0xc0] }
 0x836   :  { %13930 = vtanh.f32 %v3333_v39 }
 0x837   :  { %13932 = vtanh.f32 %v3348_v40  ;;  %v3415_v40 = vsel %vm15265_vm2, %v3395_v33, %v3407_v62 }
 0x83e   :  { %v13927_v16 = vpop.eup %13926 }
 0x83f   :  { %v13929_v18 = vpop.eup %13928  ;;  %v3341_v31 = vmul.f32 0.5, %v13927_v16  ;;  %v3401_v16 = vld [vmem:[#allocation2 + $0xd8] sm:$0x3] }
 0x840   :  { %v3345_v50 = vmul.f32 0.5, %v13929_v18  ;;  %v13931_v34 = vpop.eup %13930 }
 0x841   :  { %v3342_v32 = vadd.f32 0.5, %v3341_v31  ;;  %v13933_v10 = vpop.eup %13932  ;;  %v3396_v31 = vld [vmem:[#allocation2 + $0x30] sm:$0xc0] }
 0x842   :  { %v3346_v54 = vadd.f32 0.5, %v3345_v50  ;;  %v3350_v36 = vmul.f32 0.5, %v13933_v10 }
 0x843   :  { %v3353_v61 = vmul.f32 %v13931_v34, %v3342_v32  ;;  %v3416_v32 = vsel %vm15271_vm3, %v3396_v31, %v3408_v6 }
 0x844   :  { %v3352_v11 = vmul.f32 %v3346_v54, %v15693_v56  ;;  %v3351_v12 = vadd.f32 0.5, %v3350_v36  ;;  %v3398_v56 = vld [vmem:[#allocation2 + $0xc0] sm:$0x3]  ;;  %v3583_v54 = vrot.slane %v3415_v40, 6 }
 0x845   :  { %v3406_v29 = vrot.slane %v3398_v56, 2  ;;  %v3584_v56 = vrot.slane %v3416_v32, 6 }
 0x846   :  { %v15905_v0 = vadd.f32 %v3353_v61, %v3352_v11  ;;  %v3409_v61 = vrot.slane %v3401_v16, 2 }
 0x847   :  { %v3414_v39 = vsel %vm1047_vm1, %v3394_v26, %v3406_v29 }
 0x848   :  { %13934 = vtanh.f32 %v15905_v0  ;;  %v3582_v18 = vrot.slane %v3414_v39, 6  ;;  %v3417_v26 = vsel %vm15279_vm4, %v3397_v28, %v3409_v61  ;;  %v3732_v28 = vld [vmem:[#allocation2 + $0xa8] sm:$0xc0] }
 0x849   :  { %v3585_v6 = vrot.slane %v3417_v26, 6  ;;  %v3727_v26 = vld [vmem:[#allocation2 + $0x40] sm:$0x3] }
 0x852   :  { %v13935_v37 = vpop.eup %13934 }
 0x853   :  { %v3356_v41 = vmul.f32 %v13935_v37, %v3351_v12 }
 0x855   :  { %3357 = vst.msk [vmem:[#allocation3 + $0x6] sm:$0x1] %vm1367_vm5, %v3356_v41  ;;  %v3361_v27 = vpack.c.bf16 %v3356_v41, %v3356_v41 }
 0x856   :  { %3358 = vst.msk [vmem:[#allocation3 + $0x19] sm:$0x1] %vm1369_vm6, %v3356_v41 }
 0x857   :  { %3359 = vst.msk [vmem:[#allocation3 + $0x25] sm:$0x2] %vm1371_vm7, %v3356_v41  ;;  %3623 = vmatmul.mubr.bf16.vlgmr.msra.gmra.mrb[76].mxu1 %v3361_v27  ;;  %3664 = vmatmul.mubr.bf16.vlgmr.msra.gmra.mrb[92].mxu0 %v3361_v27 }
 0x858   :  { %3360 = vst.msk [vmem:[#allocation3 + $0x38] sm:$0x2] %vm1373_vm8, %v3356_v41  ;;  %3912 = vmatpush1.bf16.msra.mxu1 %v15715_v2  ;;  %3953 = vmatpush1.bf16.msra.mxu0 %v15720_v58 }
 0x859   :  { %3913 = vmatprep.subr.bf16.mxu1 %v15729_v3  ;;  %3954 = vmatprep.subr.bf16.mxu0 %v15734_v38 }
 0x85a   :  { %3943 = vmatprep.mubr.bf16.mxu1 %v14235_v60  ;;  %3984 = vmatprep.mubr.bf16.mxu0 %v14235_v60 }
 0x85c   :  { %3914 = vmatpush1.bf16.msra.mxu1 %v15739_v24  ;;  %3955 = vmatpush1.bf16.msra.mxu0 %v15744_v44 }
 0x85d   :  { %3915 = vmatprep.subr.bf16.mxu1 %v15753_v45  ;;  %3956 = vmatprep.subr.bf16.mxu0 %v15758_v46 }
 0x860   :  { %3916 = vmatpush1.bf16.msra.mxu1 %v15763_v42  ;;  %3957 = vmatpush1.bf16.msra.mxu0 %v15768_v49 }
 0x861   :  { %3917 = vmatprep.subr.bf16.mxu1 %v15782_v63  ;;  %3958 = vmatprep.subr.bf16.mxu0 %v15792_v35 }
 0x864   :  { %3918 = vmatpush1.bf16.msra.mxu1 %v15777_v7  ;;  %3959 = vmatpush1.bf16.msra.mxu0 %v15787_v25 }
 0x865   :  { %3919 = vmatprep.subr.bf16.mxu1 %v15797_v51  ;;  %3960 = vmatprep.subr.bf16.mxu0 %v15803_v52 }
 0x868   :  { %3920 = vmatpush1.bf16.msra.mxu1 %v15811_v53  ;;  %3961 = vmatpush1.bf16.msra.mxu0 %v15816_v55 }
 0x869   :  { %3921 = vmatprep.subr.bf16.mxu1 %v15823_v4  ;;  %3962 = vmatprep.subr.bf16.mxu0 %v15828_v5 }
 0x86c   :  { %3922 = vmatpush1.bf16.msra.mxu1 %v15835_v8  ;;  %3963 = vmatpush1.bf16.msra.mxu0 %v15840_v9 }
 0x86d   :  { %3923 = vmatprep.subr.bf16.mxu1 %v15847_v13  ;;  %3964 = vmatprep.subr.bf16.mxu0 %v15852_v14 }
 0x870   :  { %3924 = vmatpush1.bf16.msra.mxu1 %v15859_v15  ;;  %3965 = vmatpush1.bf16.msra.mxu0 %v15864_v17 }
 0x871   :  { %3925 = vmatprep.subr.bf16.mxu1 %v15871_v20  ;;  %3966 = vmatprep.subr.bf16.mxu0 %v15876_v21 }
 0x874   :  { %3926 = vmatpush1.bf16.msra.mxu1 %v15883_v22  ;;  %3967 = vmatpush1.bf16.msra.mxu0 %v15888_v23 }
 0x875   :  { %4244 = vmatprep.subr.bf16.mxu1 %v15705_v1  ;;  %4285 = vmatprep.subr.bf16.mxu0 %v15710_v19 }
 0x92a   :  { %v3624_v50 = vpop.f32.mrb[76].mxu1  ;;  %v3665_v34 = vpop.f32.mrb[92].mxu0 }
 0x92b   :  { %v3625_v11 = vadd.f32 %v3624_v50, %v3582_v18  ;;  %v3626_v10 = vpop.f32.mrb[77].mxu1  ;;  %v3667_v36 = vpop.f32.mrb[93].mxu0  ;;  %v3666_v39 = vadd.f32 %v3665_v34, %v3584_v56 }
 0x92c   :  { %v3627_v12 = vadd.f32 %v3626_v10, %v3583_v54  ;;  %v3628_v37 = vpop.f32.mrb[78].mxu1  ;;  %v3669_v41 = vpop.f32.mrb[94].mxu0  ;;  %v3668_v33 = vadd.f32 %v3667_v36, %v3585_v6 }
 0x92d   :  { %v3672_v27 = vmul.f32 0.5, %v3625_v11  ;;  %v3629_v29 = vpop.f32.mrb[79].mxu1  ;;  %v3670_v30 = vpop.f32.mrb[95].mxu0 }
 0x92e   :  { %v3676_v62 = vmul.f32 0.5, %v3627_v12  ;;  %v3681_v40 = vmul.f32 0.5, %v3668_v33  ;;  %v3733_v30 = vld [vmem:[#allocation2 + $0xb0] sm:$0xc0] }
 0x92f   :  { %13936 = vtanh.f32 %v3672_v27  ;;  %v3741_v33 = vrot.slane %v3733_v30, 6 }
 0x930   :  { %13938 = vtanh.f32 %v3676_v62  ;;  %v3740_v62 = vrot.slane %v3732_v28, 6 }
 0x931   :  { %13940 = vtanh.f32 %v3666_v39 }
 0x932   :  { %13942 = vtanh.f32 %v3681_v40 }
 0x939   :  { %v13937_v16 = vpop.eup %13936 }
 0x93a   :  { %v13939_v18 = vpop.eup %13938  ;;  %v3674_v31 = vmul.f32 0.5, %v13937_v16  ;;  %v3728_v16 = vld [vmem:[#allocation2 + $0x48] sm:$0x3] }
 0x93b   :  { %v3678_v50 = vmul.f32 0.5, %v13939_v18  ;;  %v13941_v54 = vpop.eup %13940 }
 0x93c   :  { %v3675_v32 = vadd.f32 0.5, %v3674_v31  ;;  %v13943_v34 = vpop.eup %13942  ;;  %v3748_v31 = vsel %vm15265_vm2, %v3728_v16, %v3740_v62 }
 0x93d   :  { %v3679_v11 = vadd.f32 0.5, %v3678_v50  ;;  %v3683_v61 = vmul.f32 0.5, %v13943_v34  ;;  %v3734_v50 = vld [vmem:[#allocation2 + $0xb8] sm:$0xc0] }
 0x93e   :  { %v3686_v10 = vmul.f32 %v13941_v54, %v3675_v32 }
 0x93f   :  { %v3685_v12 = vmul.f32 %v3679_v11, %v15905_v0  ;;  %v3684_v41 = vadd.f32 0.5, %v3683_v61  ;;  %v3731_v0 = vld [vmem:[#allocation2 + $0xa0] sm:$0xc0] }
 0x940   :  { %v3739_v29 = vrot.slane %v3731_v0, 6  ;;  %v3730_v0 = vld [vmem:[#allocation2 + $0x58] sm:$0x3] }
 0x941   :  { %v15955_v37 = vadd.f32 %v3686_v10, %v3685_v12  ;;  %v3729_v12 = vld [vmem:[#allocation2 + $0x50] sm:$0x3] }
 0x942   :  { %v3747_v39 = vsel %vm1047_vm1, %v3727_v26, %v3739_v29 }
 0x943   :  { %13944 = vtanh.f32 %v15955_v37 }
 0x94d   :  { %v13945_v36 = vpop.eup %13944 }
 0x94e   :  { %v3689_v27 = vmul.f32 %v13945_v36, %v3684_v41  ;;  %v3749_v41 = vsel %vm15271_vm3, %v3729_v12, %v3741_v33 }
 0x950   :  { %3690 = vst.msk [vmem:[#allocation3 + $0x7] sm:$0x1] %vm1367_vm5, %v3689_v27  ;;  %v3694_v56 = vpack.c.bf16 %v3689_v27, %v3689_v27 }
 0x951   :  { %3691 = vst.msk [vmem:[#allocation3 + $0x18] sm:$0x1] %vm1369_vm6, %v3689_v27 }
 0x952   :  { %3692 = vst.msk [vmem:[#allocation3 + $0x26] sm:$0x2] %vm1371_vm7, %v3689_v27  ;;  %3944 = vmatmul.mubr.bf16.vlgmr.msra.gmra.mrb[80].mxu1 %v3694_v56  ;;  %3985 = vmatmul.mubr.bf16.vlgmr.msra.gmra.mrb[96].mxu0 %v3694_v56 }
 0x953   :  { %3693 = vst.msk [vmem:[#allocation3 + $0x37] sm:$0x2] %vm1373_vm8, %v3689_v27  ;;  %4245 = vmatpush1.bf16.msra.mxu1 %v15715_v2  ;;  %4286 = vmatpush1.bf16.msra.mxu0 %v15720_v58  ;;  %v3742_v27 = vrot.slane %v3734_v50, 6 }
 0x954   :  { %4246 = vmatprep.subr.bf16.mxu1 %v15729_v3  ;;  %4287 = vmatprep.subr.bf16.mxu0 %v15734_v38 }
 0x955   :  { %4276 = vmatprep.mubr.bf16.mxu1 %v14235_v60  ;;  %4317 = vmatprep.mubr.bf16.mxu0 %v14235_v60  ;;  %v3750_v28 = vsel %vm15279_vm4, %v3730_v0, %v3742_v27 }
 0x957   :  { %4247 = vmatpush1.bf16.msra.mxu1 %v15739_v24  ;;  %4288 = vmatpush1.bf16.msra.mxu0 %v15744_v44 }
 0x958   :  { %4248 = vmatprep.subr.bf16.mxu1 %v15753_v45  ;;  %4289 = vmatprep.subr.bf16.mxu0 %v15758_v46 }
 0x95b   :  { %4249 = vmatpush1.bf16.msra.mxu1 %v15763_v42  ;;  %4290 = vmatpush1.bf16.msra.mxu0 %v15768_v49 }
 0x95c   :  { %4250 = vmatprep.subr.bf16.mxu1 %v15782_v63  ;;  %4291 = vmatprep.subr.bf16.mxu0 %v15792_v35 }
 0x95f   :  { %4251 = vmatpush1.bf16.msra.mxu1 %v15777_v7  ;;  %4292 = vmatpush1.bf16.msra.mxu0 %v15787_v25 }
 0x960   :  { %4252 = vmatprep.subr.bf16.mxu1 %v15797_v51  ;;  %4293 = vmatprep.subr.bf16.mxu0 %v15803_v52 }
 0x963   :  { %4253 = vmatpush1.bf16.msra.mxu1 %v15811_v53  ;;  %4294 = vmatpush1.bf16.msra.mxu0 %v15816_v55 }
 0x964   :  { %4254 = vmatprep.subr.bf16.mxu1 %v15823_v4  ;;  %4295 = vmatprep.subr.bf16.mxu0 %v15828_v5 }
 0x967   :  { %4255 = vmatpush1.bf16.msra.mxu1 %v15835_v8  ;;  %4296 = vmatpush1.bf16.msra.mxu0 %v15840_v9 }
 0x968   :  { %4256 = vmatprep.subr.bf16.mxu1 %v15847_v13  ;;  %4297 = vmatprep.subr.bf16.mxu0 %v15852_v14 }
 0x96b   :  { %4257 = vmatpush1.bf16.msra.mxu1 %v15859_v15  ;;  %4298 = vmatpush1.bf16.msra.mxu0 %v15864_v17 }
 0x96c   :  { %4258 = vmatprep.subr.bf16.mxu1 %v15871_v20  ;;  %4299 = vmatprep.subr.bf16.mxu0 %v15876_v21 }
 0x96f   :  { %4259 = vmatpush1.bf16.msra.mxu1 %v15883_v22  ;;  %4300 = vmatpush1.bf16.msra.mxu0 %v15888_v23 }
 0x970   :  { %4577 = vmatprep.subr.bf16.mxu1 %v15705_v1  ;;  %4618 = vmatprep.subr.bf16.mxu0 %v15710_v19 }
 0xa25   :  { %v3945_v6 = vpop.f32.mrb[80].mxu1  ;;  %v3986_v40 = vpop.f32.mrb[96].mxu0 }
 0xa26   :  { %v3946_v18 = vadd.f32 %v3945_v6, %v3747_v39  ;;  %v3947_v1 = vpop.f32.mrb[81].mxu1  ;;  %v3988_v19 = vpop.f32.mrb[97].mxu0  ;;  %v3987_v56 = vadd.f32 %v3986_v40, %v3749_v41 }
 0xa27   :  { %v3948_v32 = vadd.f32 %v3947_v1, %v3748_v31  ;;  %v3949_v54 = vpop.f32.mrb[82].mxu1  ;;  %v3990_v11 = vpop.f32.mrb[98].mxu0  ;;  %v3989_v29 = vadd.f32 %v3988_v19, %v3750_v28 }
 0xa28   :  { %v3993_v10 = vmul.f32 0.5, %v3946_v18  ;;  %v3950_v34 = vpop.f32.mrb[83].mxu1  ;;  %v3991_v61 = vpop.f32.mrb[99].mxu0 }
 0xa29   :  { %v3997_v36 = vmul.f32 0.5, %v3948_v32  ;;  %v4002_v30 = vmul.f32 0.5, %v3989_v29 }
 0xa2a   :  { %13946 = vtanh.f32 %v3993_v10 }
 0xa2b   :  { %13948 = vtanh.f32 %v3997_v36 }
 0xa2c   :  { %13950 = vtanh.f32 %v3987_v56 }
 0xa2d   :  { %13952 = vtanh.f32 %v4002_v30 }
 0xa34   :  { %v13947_v62 = vpop.eup %13946 }
 0xa35   :  { %v13949_v26 = vpop.eup %13948  ;;  %v3995_v39 = vmul.f32 0.5, %v13947_v62 }
 0xa36   :  { %v3999_v6 = vmul.f32 0.5, %v13949_v26  ;;  %v13951_v18 = vpop.eup %13950 }
 0xa37   :  { %v3996_v16 = vadd.f32 0.5, %v3995_v39  ;;  %v13953_v50 = vpop.eup %13952 }
 0xa38   :  { %v4000_v33 = vadd.f32 0.5, %v3999_v6  ;;  %v4004_v32 = vmul.f32 0.5, %v13953_v50  ;;  %v16070_v50 = vld [vmem:[%s18094_s5 + $0x4] ss:$16 sps:$4 sm:$0xff]  }
 0xa39   :  { %v4007_v31 = vmul.f32 %v13951_v18, %v3996_v16 }
 0xa3a   :  { %v4006_v1 = vmul.f32 %v4000_v33, %v15955_v37  ;;  %v4005_v54 = vadd.f32 0.5, %v4004_v32  ;;  %v16075_v32 = vld [vmem:[%s18094_s5 + $0x8] ss:$16 sps:$4 sm:$0xff]  }
 0xa3c   :  { %v16005_v40 = vadd.f32 %v4007_v31, %v4006_v1 }
 0xa3e   :  { %13954 = vtanh.f32 %v16005_v40 }
 0xa48   :  { %v13955_v19 = vpop.eup %13954 }
 0xa49   :  { %v4010_v11 = vmul.f32 %v13955_v19, %v4005_v54  ;;  %v16080_v54 = vld [vmem:[%s18094_s5 + $0xc] ss:$16 sps:$4 sm:$0xff]   ;;  %v16085_v19 = vld [vmem:[%s18094_s5 + $0x24] ss:$16 sps:$4 sm:$0xff]  }
 0xa4b   :  { %4011 = vst.msk [vmem:[#allocation3 + $0x8] sm:$0x1] %vm1367_vm5, %v4010_v11  ;;  %v4015_v10 = vpack.c.bf16 %v4010_v11, %v4010_v11 }
 0xa4c   :  { %4012 = vst.msk [vmem:[#allocation3 + $0x17] sm:$0x1] %vm1369_vm6, %v4010_v11 }
 0xa4d   :  { %4013 = vst.msk [vmem:[#allocation3 + $0x27] sm:$0x2] %vm1371_vm7, %v4010_v11  ;;  %4277 = vmatmul.mubr.bf16.vlgmr.msra.gmra.mrb[84].mxu1 %v4015_v10  ;;  %4318 = vmatmul.mubr.bf16.vlgmr.msra.gmra.mrb[100].mxu0 %v4015_v10  ;;  %v16098_v10 = vld [vmem:[%s18094_s5 + $0x20] ss:$16 sps:$4 sm:$0xff]  }
 0xa4e   :  { %4014 = vst.msk [vmem:[#allocation3 + $0x36] sm:$0x2] %vm1373_vm8, %v4010_v11  ;;  %4578 = vmatpush1.bf16.msra.mxu1 %v15715_v2  ;;  %4619 = vmatpush1.bf16.msra.mxu0 %v15720_v58  ;;  %v4052_v2 = vld [vmem:[#allocation2 + $0xa0] sm:$0x30]  ;;  %v4053_v58 = vld [vmem:[#allocation2 + $0xa8] sm:$0x30] }
 0xa4f   :  { %4579 = vmatprep.subr.bf16.mxu1 %v15729_v3  ;;  %4620 = vmatprep.subr.bf16.mxu0 %v15734_v38  ;;  %v4060_v3 = vrot.slane %v4052_v2, 2  ;;  %v4054_v38 = vld [vmem:[#allocation2 + $0xb0] sm:$0x30]  ;;  %v16091_v11 = vld [vmem:[%s18094_s5 + $0x2c] ss:$16 sps:$4 sm:$0xff]  }
 0xa50   :  { %4609 = vmatprep.mubr.bf16.mxu1 %v14235_v60  ;;  %4650 = vmatprep.mubr.bf16.mxu0 %v14235_v60  ;;  %v16105_v2 = vld [vmem:[%s18094_s5 + $0x28] ss:$16 sps:$4 sm:$0xff]  }
 0xa52   :  { %4580 = vmatpush1.bf16.msra.mxu1 %v15739_v24  ;;  %4621 = vmatpush1.bf16.msra.mxu0 %v15744_v44  ;;  %v4061_v24 = vrot.slane %v4053_v58, 2  ;;  %v4048_v44 = vld [vmem:[#allocation2 + $0x40] sm:$0xc]  ;;  %v16110_v58 = vld [vmem:[%s18094_s5 + $0x44] ss:$16 sps:$4 sm:$0xff]  }
 0xa53   :  { %4581 = vmatprep.subr.bf16.mxu1 %v15753_v45  ;;  %4622 = vmatprep.subr.bf16.mxu0 %v15758_v46  ;;  %v4068_v45 = vsel %vm1047_vm1, %v4048_v44, %v4060_v3  ;;  %v4062_v46 = vrot.slane %v4054_v38, 2  ;;  %v16116_v3 = vld [vmem:[%s18094_s5 + $0x4c] ss:$16 sps:$4 sm:$0xff]   ;;  %v16122_v38 = vld [vmem:[%s18094_s5 + $0x40] ss:$16 sps:$4 sm:$0xff]  }
 0xa54   :  { %v16134_v44 = vld [vmem:[%s18094_s5 + $0x64] ss:$16 sps:$4 sm:$0xff]  }
 0xa56   :  { %4582 = vmatpush1.bf16.msra.mxu1 %v15763_v42  ;;  %4623 = vmatpush1.bf16.msra.mxu0 %v15768_v49  ;;  %v4049_v42 = vld [vmem:[#allocation2 + $0x48] sm:$0xc] }
 0xa57   :  { %4583 = vmatprep.subr.bf16.mxu1 %v15782_v63  ;;  %4624 = vmatprep.subr.bf16.mxu0 %v15792_v35  ;;  %v4069_v49 = vsel %vm15265_vm2, %v4049_v42, %v4061_v24  ;;  %v4236_v63 = vrot.slane %v4068_v45, 2  ;;  %v16129_v24 = vld [vmem:[%s18094_s5 + $0x48] ss:$16 sps:$4 sm:$0xff]   ;;  %v16140_v45 = vld [vmem:[%s18094_s5 + $0x6c] ss:$16 sps:$4 sm:$0xff]  }
 0xa58   :  { %v16153_v42 = vld [vmem:[%s18094_s5 + $0x68] ss:$16 sps:$4 sm:$0xff]  }
 0xa5a   :  { %4584 = vmatpush1.bf16.msra.mxu1 %v15777_v7  ;;  %4625 = vmatpush1.bf16.msra.mxu0 %v15787_v25  ;;  %v4055_v7 = vld [vmem:[#allocation2 + $0xb8] sm:$0x30]  ;;  %v4050_v25 = vld [vmem:[#allocation2 + $0x50] sm:$0xc] }
 0xa5b   :  { %4585 = vmatprep.subr.bf16.mxu1 %v15797_v51  ;;  %4626 = vmatprep.subr.bf16.mxu0 %v15803_v52  ;;  %v4070_v51 = vsel %vm15271_vm3, %v4050_v25, %v4062_v46  ;;  %v16146_v46 = vld [vmem:[%s18094_s5 + $0x60] ss:$16 sps:$4 sm:$0xff]   ;;  %v16177_v25 = vld [vmem:[%s18094_s5 + $0x88] ss:$16 sps:$4 sm:$0xff]  }
 0xa5e   :  { %4586 = vmatpush1.bf16.msra.mxu1 %v15811_v53  ;;  %4627 = vmatpush1.bf16.msra.mxu0 %v15816_v55  ;;  %v4237_v53 = vrot.slane %v4069_v49, 2  ;;  %v4063_v55 = vrot.slane %v4055_v7, 2  ;;  %v16158_v49 = vld [vmem:[%s18094_s5 + $0x84] ss:$16 sps:$4 sm:$0xff]   ;;  %v16164_v7 = vld [vmem:[%s18094_s5 + $0x8c] ss:$16 sps:$4 sm:$0xff]  }
 0xa5f   :  { %4587 = vmatprep.subr.bf16.mxu1 %v15823_v4  ;;  %4628 = vmatprep.subr.bf16.mxu0 %v15828_v5 }
 0xa62   :  { %4588 = vmatpush1.bf16.msra.mxu1 %v15835_v8  ;;  %4629 = vmatpush1.bf16.msra.mxu0 %v15840_v9 }
 0xa63   :  { %4589 = vmatprep.subr.bf16.mxu1 %v15847_v13  ;;  %4630 = vmatprep.subr.bf16.mxu0 %v15852_v14 }
 0xa66   :  { %4590 = vmatpush1.bf16.msra.mxu1 %v15859_v15  ;;  %4631 = vmatpush1.bf16.msra.mxu0 %v15864_v17  ;;  %v4238_v17 = vrot.slane %v4070_v51, 2  ;;  %v16188_v51 = vld [vmem:[%s18094_s5 + $0xac] ss:$16 sps:$4 sm:$0xff]  }
 0xa67   :  { %4591 = vmatprep.subr.bf16.mxu1 %v15871_v20  ;;  %4632 = vmatprep.subr.bf16.mxu0 %v15876_v21  ;;  %v4051_v20 = vld [vmem:[#allocation2 + $0x58] sm:$0xc] }
 0xa68   :  { %v4071_v37 = vsel %vm15279_vm4, %v4051_v20, %v4063_v55  ;;  %v16206_v55 = vld [vmem:[%s18094_s5 + $0xc4] ss:$16 sps:$4 sm:$0xff]   ;;  %v4386_v20 = vld [vmem:[#allocation2 + $0xa8] sm:$0xc] }
 0xa69   :  { %v4239_v34 = vrot.slane %v4071_v37, 2  ;;  %v4381_v37 = vld [vmem:[#allocation2 + $0x40] sm:$0x30] }
 0xa6a   :  { %4592 = vmatpush1.bf16.msra.mxu1 %v15883_v22  ;;  %4633 = vmatpush1.bf16.msra.mxu0 %v15888_v23 }
 0xa6b   :  { %4910 = vmatprep.subr.bf16.mxu1 %v16070_v50  ;;  %4951 = vmatprep.subr.bf16.mxu0 %v16080_v54 }
 0xb20   :  { %v4278_v35 = vpop.f32.mrb[84].mxu1  ;;  %v4319_v52 = vpop.f32.mrb[100].mxu0 }
 0xb21   :  { %v4279_v4 = vadd.f32 %v4278_v35, %v4236_v63  ;;  %v4280_v5 = vpop.f32.mrb[85].mxu1  ;;  %v4321_v8 = vpop.f32.mrb[101].mxu0  ;;  %v4320_v12 = vadd.f32 %v4319_v52, %v4238_v17  ;;  %v16170_v63 = vld [vmem:[%s18094_s5 + $0x80] ss:$16 sps:$4 sm:$0xff]   ;;  %v16182_v35 = vld [vmem:[%s18094_s5 + $0xa4] ss:$16 sps:$4 sm:$0xff]  }
 0xb22   :  { %v4281_v9 = vadd.f32 %v4280_v5, %v4237_v53  ;;  %v4282_v13 = vpop.f32.mrb[86].mxu1  ;;  %v4323_v14 = vpop.f32.mrb[102].mxu0  ;;  %v4322_v61 = vadd.f32 %v4321_v8, %v4239_v34  ;;  %v16194_v52 = vld [vmem:[%s18094_s5 + $0xa0] ss:$16 sps:$4 sm:$0xff]   ;;  %v16201_v53 = vld [vmem:[%s18094_s5 + $0xa8] ss:$16 sps:$4 sm:$0xff]  }
 0xb23   :  { %v4326_v15 = vmul.f32 0.5, %v4279_v4  ;;  %v4283_v21 = vpop.f32.mrb[87].mxu1  ;;  %v4324_v22 = vpop.f32.mrb[103].mxu0  ;;  %v16212_v4 = vld [vmem:[%s18094_s5 + $0xcc] ss:$16 sps:$4 sm:$0xff]  }
 0xb24   :  { %v4330_v23 = vmul.f32 0.5, %v4281_v9  ;;  %v4335_v41 = vmul.f32 0.5, %v4322_v61  ;;  %v16218_v5 = vld [vmem:[%s18094_s5 + $0xc0] ss:$16 sps:$4 sm:$0xff]   ;;  %v16225_v8 = vld [vmem:[%s18094_s5 + $0xc8] ss:$16 sps:$4 sm:$0xff]  }
 0xb25   :  { %13956 = vtanh.f32 %v4326_v15  ;;  %v16230_v9 = vld [vmem:[%s18094_s5 + $0xe4] ss:$16 sps:$4 sm:$0xff]   ;;  %v16236_v13 = vld [vmem:[%s18094_s5 + $0xec] ss:$16 sps:$4 sm:$0xff]   ;;  %v16242_v14 = vld [vmem:[%s18094_s5 + $0xe0] ss:$16 sps:$4 sm:$0xff]  }
 0xb26   :  { %13958 = vtanh.f32 %v4330_v23  ;;  %v16249_v15 = vld [vmem:[%s18094_s5 + $0xe8] ss:$16 sps:$4 sm:$0xff]   ;;  %v4385_v17 = vld [vmem:[#allocation2 + $0xa0] sm:$0xc]  ;;  %v4387_v22 = vld [vmem:[#allocation2 + $0xb0] sm:$0xc] }
 0xb27   :  { %13960 = vtanh.f32 %v4320_v12  ;;  %v4393_v21 = vrot.slane %v4385_v17, 6  ;;  %v4394_v23 = vrot.slane %v4386_v20, 6  ;;  %v4395_v34 = vrot.slane %v4387_v22, 6  ;;  %v4382_v61 = vld [vmem:[#allocation2 + $0x48] sm:$0x30] }
 0xb28   :  { %13962 = vtanh.f32 %v4335_v41  ;;  %v4384_v20 = vld [vmem:[#allocation2 + $0x58] sm:$0x30] }
 0xb29   :  { %v4401_v12 = vsel %vm1047_vm1, %v4381_v37, %v4393_v21  ;;  %v4402_v41 = vsel %vm15265_vm2, %v4382_v61, %v4394_v23 }
 0xb2f   :  { %v13957_v36 = vpop.eup %13956 }
 0xb30   :  { %v13959_v27 = vpop.eup %13958  ;;  %v4328_v56 = vmul.f32 0.5, %v13957_v36  ;;  %v4388_v36 = vld [vmem:[#allocation2 + $0xb8] sm:$0xc] }
 0xb31   :  { %v4332_v0 = vmul.f32 0.5, %v13959_v27  ;;  %v13961_v29 = vpop.eup %13960  ;;  %v4569_v27 = vrot.slane %v4401_v12, 4 }
 0xb32   :  { %v4329_v28 = vadd.f32 0.5, %v4328_v56  ;;  %v13963_v6 = vpop.eup %13962  ;;  %v4383_v56 = vld [vmem:[#allocation2 + $0x50] sm:$0x30] }
 0xb33   :  { %v4333_v30 = vadd.f32 0.5, %v4332_v0  ;;  %v4337_v16 = vmul.f32 0.5, %v13963_v6 }
 0xb34   :  { %v4340_v62 = vmul.f32 %v13961_v29, %v4329_v28  ;;  %v4403_v28 = vsel %vm15271_vm3, %v4383_v56, %v4395_v34 }
 0xb35   :  { %v4339_v26 = vmul.f32 %v4333_v30, %v16005_v40  ;;  %v4338_v18 = vadd.f32 0.5, %v4337_v16  ;;  %v16065_v40 = vld [vmem:[%s18094_s5] ss:$16 sps:$4 sm:$0xff]   ;;  %v4570_v30 = vrot.slane %v4402_v41, 4  ;;  %v4571_v17 = vrot.slane %v4403_v28, 4 }
 0xb37   :  { %v16053_v39 = vadd.f32 %v4340_v62, %v4339_v26  ;;  %v4396_v62 = vrot.slane %v4388_v36, 6 }
 0xb39   :  { %13964 = vtanh.f32 %v16053_v39  ;;  %v4404_v37 = vsel %vm15279_vm4, %v4384_v20, %v4396_v62  ;;  %v4719_v20 = vld [vmem:[#allocation2 + $0xa8] sm:$0x3] }
 0xb3a   :  { %v4572_v34 = vrot.slane %v4404_v37, 4  ;;  %v4714_v37 = vld [vmem:[#allocation2 + $0x40] sm:$0xc0] }
 0xb43   :  { %v13965_v33 = vpop.eup %13964 }
 0xb44   :  { %v4343_v31 = vmul.f32 %v13965_v33, %v4338_v18 }
 0xb46   :  { %4344 = vst.msk [vmem:[#allocation3 + $0x9] sm:$0x1] %vm1367_vm5, %v4343_v31  ;;  %v4348_v1 = vpack.c.bf16 %v4343_v31, %v4343_v31 }
 0xb47   :  { %4345 = vst.msk [vmem:[#allocation3 + $0x16] sm:$0x1] %vm1369_vm6, %v4343_v31 }
 0xb48   :  { %4346 = vst.msk [vmem:[#allocation3 + $0x28] sm:$0x2] %vm1371_vm7, %v4343_v31  ;;  %4610 = vmatmul.mubr.bf16.vlgmr.msra.gmra.mrb[88].mxu1 %v4348_v1  ;;  %4651 = vmatmul.mubr.bf16.vlgmr.msra.gmra.mrb[104].mxu0 %v4348_v1 }
 0xb49   :  { %4347 = vst.msk [vmem:[#allocation3 + $0x35] sm:$0x2] %vm1373_vm8, %v4343_v31  ;;  %4942 = vmatprep.mubr.bf16.mxu1 %v14235_v60  ;;  %4983 = vmatprep.mubr.bf16.mxu0 %v14235_v60 }
 0xb4a   :  { %4911 = vmatpush1.bf16.msra.mxu1 %v16065_v40  ;;  %4952 = vmatpush1.bf16.msra.mxu0 %v16075_v32 }
 0xb4b   :  { %4912 = vmatprep.subr.bf16.mxu1 %v16085_v19  ;;  %4953 = vmatprep.subr.bf16.mxu0 %v16091_v11 }
 0xb4e   :  { %4913 = vmatpush1.bf16.msra.mxu1 %v16098_v10  ;;  %4954 = vmatpush1.bf16.msra.mxu0 %v16105_v2 }
 0xb4f   :  { %4914 = vmatprep.subr.bf16.mxu1 %v16110_v58  ;;  %4955 = vmatprep.subr.bf16.mxu0 %v16116_v3 }
 0xb52   :  { %4915 = vmatpush1.bf16.msra.mxu1 %v16122_v38  ;;  %4956 = vmatpush1.bf16.msra.mxu0 %v16129_v24 }
 0xb53   :  { %4916 = vmatprep.subr.bf16.mxu1 %v16134_v44  ;;  %4957 = vmatprep.subr.bf16.mxu0 %v16140_v45 }
 0xb56   :  { %4917 = vmatpush1.bf16.msra.mxu1 %v16146_v46  ;;  %4958 = vmatpush1.bf16.msra.mxu0 %v16153_v42 }
 0xb57   :  { %4918 = vmatprep.subr.bf16.mxu1 %v16158_v49  ;;  %4959 = vmatprep.subr.bf16.mxu0 %v16164_v7 }
 0xb5a   :  { %4919 = vmatpush1.bf16.msra.mxu1 %v16170_v63  ;;  %4960 = vmatpush1.bf16.msra.mxu0 %v16177_v25 }
 0xb5b   :  { %4920 = vmatprep.subr.bf16.mxu1 %v16182_v35  ;;  %4961 = vmatprep.subr.bf16.mxu0 %v16188_v51 }
 0xb5e   :  { %4921 = vmatpush1.bf16.msra.mxu1 %v16194_v52  ;;  %4962 = vmatpush1.bf16.msra.mxu0 %v16201_v53 }
 0xb5f   :  { %4922 = vmatprep.subr.bf16.mxu1 %v16206_v55  ;;  %4963 = vmatprep.subr.bf16.mxu0 %v16212_v4 }
 0xb62   :  { %4923 = vmatpush1.bf16.msra.mxu1 %v16218_v5  ;;  %4964 = vmatpush1.bf16.msra.mxu0 %v16225_v8 }
 0xb63   :  { %4924 = vmatprep.subr.bf16.mxu1 %v16230_v9  ;;  %4965 = vmatprep.subr.bf16.mxu0 %v16236_v13 }
 0xb66   :  { %4925 = vmatpush1.bf16.msra.mxu1 %v16242_v14  ;;  %4966 = vmatpush1.bf16.msra.mxu0 %v16249_v15 }
 0xb67   :  { %5231 = vmatprep.subr.bf16.mxu1 %v16070_v50  ;;  %5272 = vmatprep.subr.bf16.mxu0 %v16080_v54 }
 0xc1b   :  { %v4611_v0 = vpop.f32.mrb[88].mxu1  ;;  %v4652_v29 = vpop.f32.mrb[104].mxu0 }
 0xc1c   :  { %v4612_v26 = vadd.f32 %v4611_v0, %v4569_v27  ;;  %v4613_v6 = vpop.f32.mrb[89].mxu1  ;;  %v4654_v16 = vpop.f32.mrb[105].mxu0  ;;  %v4653_v12 = vadd.f32 %v4652_v29, %v4571_v17 }
 0xc1d   :  { %v4614_v18 = vadd.f32 %v4613_v6, %v4570_v30  ;;  %v4615_v33 = vpop.f32.mrb[90].mxu1  ;;  %v4656_v31 = vpop.f32.mrb[106].mxu0  ;;  %v4655_v61 = vadd.f32 %v4654_v16, %v4572_v34 }
 0xc1e   :  { %v4659_v1 = vmul.f32 0.5, %v4612_v26  ;;  %v4616_v21 = vpop.f32.mrb[91].mxu1  ;;  %v4657_v22 = vpop.f32.mrb[107].mxu0 }
 0xc1f   :  { %v4663_v23 = vmul.f32 0.5, %v4614_v18  ;;  %v4668_v41 = vmul.f32 0.5, %v4655_v61  ;;  %v4720_v22 = vld [vmem:[#allocation2 + $0xb0] sm:$0x3]  ;;  %v4715_v61 = vld [vmem:[#allocation2 + $0x48] sm:$0xc0] }
 0xc20   :  { %13966 = vtanh.f32 %v4659_v1  ;;  %v4728_v34 = vrot.slane %v4720_v22, 2 }
 0xc21   :  { %13968 = vtanh.f32 %v4663_v23  ;;  %v4727_v23 = vrot.slane %v4719_v20, 2  ;;  %v4717_v20 = vld [vmem:[#allocation2 + $0x58] sm:$0xc0] }
 0xc22   :  { %13970 = vtanh.f32 %v4653_v12 }
 0xc23   :  { %13972 = vtanh.f32 %v4668_v41  ;;  %v4735_v41 = vsel %vm15265_vm2, %v4715_v61, %v4727_v23 }
 0xc2a   :  { %v13967_v36 = vpop.eup %13966 }
 0xc2b   :  { %v13969_v27 = vpop.eup %13968  ;;  %v4661_v56 = vmul.f32 0.5, %v13967_v36  ;;  %v4721_v36 = vld [vmem:[#allocation2 + $0xb8] sm:$0x3] }
 0xc2c   :  { %v4665_v0 = vmul.f32 0.5, %v13969_v27  ;;  %v13971_v30 = vpop.eup %13970 }
 0xc2d   :  { %v4662_v28 = vadd.f32 0.5, %v4661_v56  ;;  %v13973_v29 = vpop.eup %13972  ;;  %v4716_v56 = vld [vmem:[#allocation2 + $0x50] sm:$0xc0] }
 0xc2e   :  { %v4666_v26 = vadd.f32 0.5, %v4665_v0  ;;  %v4670_v62 = vmul.f32 0.5, %v13973_v29 }
 0xc2f   :  { %v4673_v6 = vmul.f32 %v13971_v30, %v4662_v28  ;;  %v4736_v28 = vsel %vm15271_vm3, %v4716_v56, %v4728_v34 }
 0xc30   :  { %v4672_v18 = vmul.f32 %v4666_v26, %v16053_v39  ;;  %v4671_v31 = vadd.f32 0.5, %v4670_v62  ;;  %v4718_v39 = vld [vmem:[#allocation2 + $0xa0] sm:$0x3]  ;;  %v4903_v26 = vrot.slane %v4735_v41, 6 }
 0xc31   :  { %v4726_v21 = vrot.slane %v4718_v39, 2  ;;  %v4904_v39 = vrot.slane %v4736_v28, 6 }
 0xc32   :  { %v16265_v33 = vadd.f32 %v4673_v6, %v4672_v18  ;;  %v4729_v6 = vrot.slane %v4721_v36, 2 }
 0xc33   :  { %v4734_v12 = vsel %vm1047_vm1, %v4714_v37, %v4726_v21 }
 0xc34   :  { %13974 = vtanh.f32 %v16265_v33  ;;  %v4902_v27 = vrot.slane %v4734_v12, 6  ;;  %v4737_v37 = vsel %vm15279_vm4, %v4717_v20, %v4729_v6  ;;  %v5052_v20 = vld [vmem:[#allocation2 + $0x88] sm:$0xc0] }
 0xc35   :  { %v4905_v34 = vrot.slane %v4737_v37, 6  ;;  %v5047_v37 = vld [vmem:[#allocation2 + $0x60] sm:$0x3] }
 0xc3e   :  { %v13975_v16 = vpop.eup %13974 }
 0xc3f   :  { %v4676_v1 = vmul.f32 %v13975_v16, %v4671_v31 }
 0xc41   :  { %4677 = vst.msk [vmem:[#allocation3 + $0xa] sm:$0x1] %vm1367_vm5, %v4676_v1  ;;  %v4681_v17 = vpack.c.bf16 %v4676_v1, %v4676_v1 }
 0xc42   :  { %4678 = vst.msk [vmem:[#allocation3 + $0x15] sm:$0x1] %vm1369_vm6, %v4676_v1 }
 0xc43   :  { %4679 = vst.msk [vmem:[#allocation3 + $0x29] sm:$0x2] %vm1371_vm7, %v4676_v1  ;;  %4943 = vmatmul.mubr.bf16.vlgmr.msra.gmra.mrb[92].mxu1 %v4681_v17  ;;  %4984 = vmatmul.mubr.bf16.vlgmr.msra.gmra.mrb[108].mxu0 %v4681_v17 }
 0xc44   :  { %4680 = vst.msk [vmem:[#allocation3 + $0x34] sm:$0x2] %vm1373_vm8, %v4676_v1  ;;  %5232 = vmatpush1.bf16.msra.mxu1 %v16065_v40  ;;  %5273 = vmatpush1.bf16.msra.mxu0 %v16075_v32 }
 0xc45   :  { %5233 = vmatprep.subr.bf16.mxu1 %v16085_v19  ;;  %5274 = vmatprep.subr.bf16.mxu0 %v16091_v11 }
 0xc46   :  { %5263 = vmatprep.mubr.bf16.mxu1 %v14235_v60  ;;  %5304 = vmatprep.mubr.bf16.mxu0 %v14235_v60 }
 0xc48   :  { %5234 = vmatpush1.bf16.msra.mxu1 %v16098_v10  ;;  %5275 = vmatpush1.bf16.msra.mxu0 %v16105_v2 }
 0xc49   :  { %5235 = vmatprep.subr.bf16.mxu1 %v16110_v58  ;;  %5276 = vmatprep.subr.bf16.mxu0 %v16116_v3 }
 0xc4c   :  { %5236 = vmatpush1.bf16.msra.mxu1 %v16122_v38  ;;  %5277 = vmatpush1.bf16.msra.mxu0 %v16129_v24 }
 0xc4d   :  { %5237 = vmatprep.subr.bf16.mxu1 %v16134_v44  ;;  %5278 = vmatprep.subr.bf16.mxu0 %v16140_v45 }
 0xc50   :  { %5238 = vmatpush1.bf16.msra.mxu1 %v16146_v46  ;;  %5279 = vmatpush1.bf16.msra.mxu0 %v16153_v42 }
 0xc51   :  { %5239 = vmatprep.subr.bf16.mxu1 %v16158_v49  ;;  %5280 = vmatprep.subr.bf16.mxu0 %v16164_v7 }
 0xc54   :  { %5240 = vmatpush1.bf16.msra.mxu1 %v16170_v63  ;;  %5281 = vmatpush1.bf16.msra.mxu0 %v16177_v25 }
 0xc55   :  { %5241 = vmatprep.subr.bf16.mxu1 %v16182_v35  ;;  %5282 = vmatprep.subr.bf16.mxu0 %v16188_v51 }
 0xc58   :  { %5242 = vmatpush1.bf16.msra.mxu1 %v16194_v52  ;;  %5283 = vmatpush1.bf16.msra.mxu0 %v16201_v53 }
 0xc59   :  { %5243 = vmatprep.subr.bf16.mxu1 %v16206_v55  ;;  %5284 = vmatprep.subr.bf16.mxu0 %v16212_v4 }
 0xc5c   :  { %5244 = vmatpush1.bf16.msra.mxu1 %v16218_v5  ;;  %5285 = vmatpush1.bf16.msra.mxu0 %v16225_v8 }
 0xc5d   :  { %5245 = vmatprep.subr.bf16.mxu1 %v16230_v9  ;;  %5286 = vmatprep.subr.bf16.mxu0 %v16236_v13 }
 0xc60   :  { %5246 = vmatpush1.bf16.msra.mxu1 %v16242_v14  ;;  %5287 = vmatpush1.bf16.msra.mxu0 %v16249_v15 }
 0xc61   :  { %5564 = vmatprep.subr.bf16.mxu1 %v16070_v50  ;;  %5605 = vmatprep.subr.bf16.mxu0 %v16080_v54 }
 0xd16   :  { %v4944_v0 = vpop.f32.mrb[92].mxu1  ;;  %v4985_v30 = vpop.f32.mrb[108].mxu0 }
 0xd17   :  { %v4945_v18 = vadd.f32 %v4944_v0, %v4902_v27  ;;  %v4946_v29 = vpop.f32.mrb[93].mxu1  ;;  %v4987_v62 = vpop.f32.mrb[109].mxu0  ;;  %v4986_v12 = vadd.f32 %v4985_v30, %v4904_v39 }
 0xd18   :  { %v4947_v31 = vadd.f32 %v4946_v29, %v4903_v26  ;;  %v4948_v16 = vpop.f32.mrb[94].mxu1  ;;  %v4989_v1 = vpop.f32.mrb[110].mxu0  ;;  %v4988_v61 = vadd.f32 %v4987_v62, %v4905_v34 }
 0xd19   :  { %v4992_v17 = vmul.f32 0.5, %v4945_v18  ;;  %v4949_v21 = vpop.f32.mrb[95].mxu1  ;;  %v4990_v22 = vpop.f32.mrb[111].mxu0 }
 0xd1a   :  { %v4996_v23 = vmul.f32 0.5, %v4947_v31  ;;  %v5001_v41 = vmul.f32 0.5, %v4988_v61  ;;  %v5053_v22 = vld [vmem:[#allocation2 + $0x90] sm:$0xc0] }
 0xd1b   :  { %13976 = vtanh.f32 %v4992_v17  ;;  %v5061_v61 = vrot.slane %v5053_v22, 6 }
 0xd1c   :  { %13978 = vtanh.f32 %v4996_v23  ;;  %v5060_v23 = vrot.slane %v5052_v20, 6 }
 0xd1d   :  { %13980 = vtanh.f32 %v4986_v12 }
 0xd1e   :  { %13982 = vtanh.f32 %v5001_v41 }
 0xd25   :  { %v13977_v36 = vpop.eup %13976 }
 0xd26   :  { %v13979_v27 = vpop.eup %13978  ;;  %v4994_v56 = vmul.f32 0.5, %v13977_v36  ;;  %v5048_v36 = vld [vmem:[#allocation2 + $0x68] sm:$0x3] }
 0xd27   :  { %v4998_v0 = vmul.f32 0.5, %v13979_v27  ;;  %v13981_v26 = vpop.eup %13980 }
 0xd28   :  { %v4995_v28 = vadd.f32 0.5, %v4994_v56  ;;  %v13983_v30 = vpop.eup %13982  ;;  %v5068_v56 = vsel %vm15265_vm2, %v5048_v36, %v5060_v23 }
 0xd29   :  { %v4999_v18 = vadd.f32 0.5, %v4998_v0  ;;  %v5003_v6 = vmul.f32 0.5, %v13983_v30  ;;  %v5054_v0 = vld [vmem:[#allocation2 + $0x98] sm:$0xc0] }
 0xd2a   :  { %v5006_v29 = vmul.f32 %v13981_v26, %v4995_v28 }
 0xd2b   :  { %v5005_v31 = vmul.f32 %v4999_v18, %v16265_v33  ;;  %v5004_v1 = vadd.f32 0.5, %v5003_v6  ;;  %v5051_v33 = vld [vmem:[#allocation2 + $0x80] sm:$0xc0] }
 0xd2c   :  { %v5059_v21 = vrot.slane %v5051_v33, 6  ;;  %v5050_v33 = vld [vmem:[#allocation2 + $0x78] sm:$0x3] }
 0xd2d   :  { %v16315_v16 = vadd.f32 %v5006_v29, %v5005_v31  ;;  %v5049_v31 = vld [vmem:[#allocation2 + $0x70] sm:$0x3] }
 0xd2e   :  { %v5067_v12 = vsel %vm1047_vm1, %v5047_v37, %v5059_v21 }
 0xd2f   :  { %13984 = vtanh.f32 %v16315_v16 }
 0xd39   :  { %v13985_v62 = vpop.eup %13984 }
 0xd3a   :  { %v5009_v17 = vmul.f32 %v13985_v62, %v5004_v1  ;;  %v5069_v1 = vsel %vm15271_vm3, %v5049_v31, %v5061_v61 }
 0xd3c   :  { %5010 = vst.msk [vmem:[#allocation3 + $0xb] sm:$0x1] %vm1367_vm5, %v5009_v17  ;;  %v5014_v39 = vpack.c.bf16 %v5009_v17, %v5009_v17 }
 0xd3d   :  { %5011 = vst.msk [vmem:[#allocation3 + $0x14] sm:$0x1] %vm1369_vm6, %v5009_v17 }
 0xd3e   :  { %5012 = vst.msk [vmem:[#allocation3 + $0x2a] sm:$0x2] %vm1371_vm7, %v5009_v17  ;;  %5264 = vmatmul.mubr.bf16.vlgmr.msra.gmra.mrb[96].mxu1 %v5014_v39  ;;  %5305 = vmatmul.mubr.bf16.vlgmr.msra.gmra.mrb[112].mxu0 %v5014_v39 }
 0xd3f   :  { %5013 = vst.msk [vmem:[#allocation3 + $0x33] sm:$0x2] %vm1373_vm8, %v5009_v17  ;;  %5565 = vmatpush1.bf16.msra.mxu1 %v16065_v40  ;;  %5606 = vmatpush1.bf16.msra.mxu0 %v16075_v32  ;;  %v5062_v17 = vrot.slane %v5054_v0, 6 }
 0xd40   :  { %5566 = vmatprep.subr.bf16.mxu1 %v16085_v19  ;;  %5607 = vmatprep.subr.bf16.mxu0 %v16091_v11 }
 0xd41   :  { %5596 = vmatprep.mubr.bf16.mxu1 %v14235_v60  ;;  %5637 = vmatprep.mubr.bf16.mxu0 %v14235_v60  ;;  %v5070_v20 = vsel %vm15279_vm4, %v5050_v33, %v5062_v17 }
 0xd43   :  { %5567 = vmatpush1.bf16.msra.mxu1 %v16098_v10  ;;  %5608 = vmatpush1.bf16.msra.mxu0 %v16105_v2 }
 0xd44   :  { %5568 = vmatprep.subr.bf16.mxu1 %v16110_v58  ;;  %5609 = vmatprep.subr.bf16.mxu0 %v16116_v3 }
 0xd47   :  { %5569 = vmatpush1.bf16.msra.mxu1 %v16122_v38  ;;  %5610 = vmatpush1.bf16.msra.mxu0 %v16129_v24 }
 0xd48   :  { %5570 = vmatprep.subr.bf16.mxu1 %v16134_v44  ;;  %5611 = vmatprep.subr.bf16.mxu0 %v16140_v45 }
 0xd4b   :  { %5571 = vmatpush1.bf16.msra.mxu1 %v16146_v46  ;;  %5612 = vmatpush1.bf16.msra.mxu0 %v16153_v42 }
 0xd4c   :  { %5572 = vmatprep.subr.bf16.mxu1 %v16158_v49  ;;  %5613 = vmatprep.subr.bf16.mxu0 %v16164_v7 }
 0xd4f   :  { %5573 = vmatpush1.bf16.msra.mxu1 %v16170_v63  ;;  %5614 = vmatpush1.bf16.msra.mxu0 %v16177_v25 }
 0xd50   :  { %5574 = vmatprep.subr.bf16.mxu1 %v16182_v35  ;;  %5615 = vmatprep.subr.bf16.mxu0 %v16188_v51 }
 0xd53   :  { %5575 = vmatpush1.bf16.msra.mxu1 %v16194_v52  ;;  %5616 = vmatpush1.bf16.msra.mxu0 %v16201_v53 }
 0xd54   :  { %5576 = vmatprep.subr.bf16.mxu1 %v16206_v55  ;;  %5617 = vmatprep.subr.bf16.mxu0 %v16212_v4 }
 0xd57   :  { %5577 = vmatpush1.bf16.msra.mxu1 %v16218_v5  ;;  %5618 = vmatpush1.bf16.msra.mxu0 %v16225_v8 }
 0xd58   :  { %5578 = vmatprep.subr.bf16.mxu1 %v16230_v9  ;;  %5619 = vmatprep.subr.bf16.mxu0 %v16236_v13 }
 0xd5b   :  { %5579 = vmatpush1.bf16.msra.mxu1 %v16242_v14  ;;  %5620 = vmatpush1.bf16.msra.mxu0 %v16249_v15 }
 0xd5c   :  { %5897 = vmatprep.subr.bf16.mxu1 %v16070_v50  ;;  %5938 = vmatprep.subr.bf16.mxu0 %v16080_v54 }
 0xe11   :  { %v5265_v34 = vpop.f32.mrb[96].mxu1  ;;  %v5306_v41 = vpop.f32.mrb[112].mxu0 }
 0xe12   :  { %v5266_v27 = vadd.f32 %v5265_v34, %v5067_v12  ;;  %v5267_v50 = vpop.f32.mrb[97].mxu1  ;;  %v5308_v54 = vpop.f32.mrb[113].mxu0  ;;  %v5307_v39 = vadd.f32 %v5306_v41, %v5069_v1 }
 0xe13   :  { %v5268_v28 = vadd.f32 %v5267_v50, %v5068_v56  ;;  %v5269_v26 = vpop.f32.mrb[98].mxu1  ;;  %v5310_v18 = vpop.f32.mrb[114].mxu0  ;;  %v5309_v21 = vadd.f32 %v5308_v54, %v5070_v20 }
 0xe14   :  { %v5313_v29 = vmul.f32 0.5, %v5266_v27  ;;  %v5270_v30 = vpop.f32.mrb[99].mxu1  ;;  %v5311_v6 = vpop.f32.mrb[115].mxu0 }
 0xe15   :  { %v5317_v62 = vmul.f32 0.5, %v5268_v28  ;;  %v5322_v22 = vmul.f32 0.5, %v5309_v21 }
 0xe16   :  { %13986 = vtanh.f32 %v5313_v29 }
 0xe17   :  { %13988 = vtanh.f32 %v5317_v62 }
 0xe18   :  { %13990 = vtanh.f32 %v5307_v39 }
 0xe19   :  { %13992 = vtanh.f32 %v5322_v22 }
 0xe20   :  { %v13987_v23 = vpop.eup %13986 }
 0xe21   :  { %v13989_v37 = vpop.eup %13988  ;;  %v5315_v12 = vmul.f32 0.5, %v13987_v23 }
 0xe22   :  { %v5319_v34 = vmul.f32 0.5, %v13989_v37  ;;  %v13991_v27 = vpop.eup %13990 }
 0xe23   :  { %v5316_v36 = vadd.f32 0.5, %v5315_v12  ;;  %v13993_v0 = vpop.eup %13992 }
 0xe24   :  { %v5320_v61 = vadd.f32 0.5, %v5319_v34  ;;  %v5324_v28 = vmul.f32 0.5, %v13993_v0  ;;  %v16430_v0 = vld [vmem:[%s18094_s5 + $0x4] ss:$16 sps:$4 sm:$0xff]  }
 0xe25   :  { %v5327_v56 = vmul.f32 %v13991_v27, %v5316_v36 }
 0xe26   :  { %v5326_v50 = vmul.f32 %v5320_v61, %v16315_v16  ;;  %v5325_v26 = vadd.f32 0.5, %v5324_v28  ;;  %v16435_v28 = vld [vmem:[%s18094_s5 + $0x8] ss:$16 sps:$4 sm:$0xff]  }
 0xe28   :  { %v16365_v41 = vadd.f32 %v5327_v56, %v5326_v50 }
 0xe2a   :  { %13994 = vtanh.f32 %v16365_v41 }
 0xe34   :  { %v13995_v54 = vpop.eup %13994 }
 0xe35   :  { %v5330_v18 = vmul.f32 %v13995_v54, %v5325_v26  ;;  %v16440_v26 = vld [vmem:[%s18094_s5 + $0xc] ss:$16 sps:$4 sm:$0xff]   ;;  %v16445_v54 = vld [vmem:[%s18094_s5 + $0x24] ss:$16 sps:$4 sm:$0xff]  }
 0xe37   :  { %5331 = vst.msk [vmem:[#allocation3 + $0xc] sm:$0x1] %vm1367_vm5, %v5330_v18  ;;  %v5335_v29 = vpack.c.bf16 %v5330_v18, %v5330_v18 }
 0xe38   :  { %5332 = vst.msk [vmem:[#allocation3 + $0x13] sm:$0x1] %vm1369_vm6, %v5330_v18 }
 0xe39   :  { %5333 = vst.msk [vmem:[#allocation3 + $0x2b] sm:$0x2] %vm1371_vm7, %v5330_v18  ;;  %5597 = vmatmul.mubr.bf16.vlgmr.msra.gmra.mrb[100].mxu1 %v5335_v29  ;;  %5638 = vmatmul.mubr.bf16.vlgmr.msra.gmra.mrb[116].mxu0 %v5335_v29  ;;  %v16458_v29 = vld [vmem:[%s18094_s5 + $0x20] ss:$16 sps:$4 sm:$0xff]  }
 0xe3a   :  { %5334 = vst.msk [vmem:[#allocation3 + $0x32] sm:$0x2] %vm1373_vm8, %v5330_v18  ;;  %5898 = vmatpush1.bf16.msra.mxu1 %v16065_v40  ;;  %5939 = vmatpush1.bf16.msra.mxu0 %v16075_v32  ;;  %v5372_v40 = vld [vmem:[#allocation2 + $0x80] sm:$0x30]  ;;  %v5373_v32 = vld [vmem:[#allocation2 + $0x88] sm:$0x30] }
 0xe3b   :  { %5899 = vmatprep.subr.bf16.mxu1 %v16085_v19  ;;  %5940 = vmatprep.subr.bf16.mxu0 %v16091_v11  ;;  %v5380_v19 = vrot.slane %v5372_v40, 2  ;;  %v5374_v11 = vld [vmem:[#allocation2 + $0x90] sm:$0x30]  ;;  %v16451_v18 = vld [vmem:[%s18094_s5 + $0x2c] ss:$16 sps:$4 sm:$0xff]  }
 0xe3c   :  { %5929 = vmatprep.mubr.bf16.mxu1 %v14235_v60  ;;  %5970 = vmatprep.mubr.bf16.mxu0 %v14235_v60  ;;  %v16465_v40 = vld [vmem:[%s18094_s5 + $0x28] ss:$16 sps:$4 sm:$0xff]  }
 0xe3e   :  { %5900 = vmatpush1.bf16.msra.mxu1 %v16098_v10  ;;  %5941 = vmatpush1.bf16.msra.mxu0 %v16105_v2  ;;  %v5381_v10 = vrot.slane %v5373_v32, 2  ;;  %v5368_v2 = vld [vmem:[#allocation2 + $0x60] sm:$0xc]  ;;  %v16470_v32 = vld [vmem:[%s18094_s5 + $0x44] ss:$16 sps:$4 sm:$0xff]  }
 0xe3f   :  { %5901 = vmatprep.subr.bf16.mxu1 %v16110_v58  ;;  %5942 = vmatprep.subr.bf16.mxu0 %v16116_v3  ;;  %v5388_v58 = vsel %vm1047_vm1, %v5368_v2, %v5380_v19  ;;  %v5382_v3 = vrot.slane %v5374_v11, 2  ;;  %v16476_v19 = vld [vmem:[%s18094_s5 + $0x4c] ss:$16 sps:$4 sm:$0xff]   ;;  %v16482_v11 = vld [vmem:[%s18094_s5 + $0x40] ss:$16 sps:$4 sm:$0xff]  }
 0xe40   :  { %v16494_v2 = vld [vmem:[%s18094_s5 + $0x64] ss:$16 sps:$4 sm:$0xff]  }
 0xe42   :  { %5902 = vmatpush1.bf16.msra.mxu1 %v16122_v38  ;;  %5943 = vmatpush1.bf16.msra.mxu0 %v16129_v24  ;;  %v5369_v38 = vld [vmem:[#allocation2 + $0x68] sm:$0xc] }
 0xe43   :  { %5903 = vmatprep.subr.bf16.mxu1 %v16134_v44  ;;  %5944 = vmatprep.subr.bf16.mxu0 %v16140_v45  ;;  %v5389_v24 = vsel %vm15265_vm2, %v5369_v38, %v5381_v10  ;;  %v5375_v44 = vld [vmem:[#allocation2 + $0x98] sm:$0x30]  ;;  %v5556_v45 = vrot.slane %v5388_v58, 2  ;;  %v16489_v10 = vld [vmem:[%s18094_s5 + $0x48] ss:$16 sps:$4 sm:$0xff]  }
 0xe44   :  { %v16500_v58 = vld [vmem:[%s18094_s5 + $0x6c] ss:$16 sps:$4 sm:$0xff]   ;;  %v16513_v38 = vld [vmem:[%s18094_s5 + $0x68] ss:$16 sps:$4 sm:$0xff]  }
 0xe46   :  { %5904 = vmatpush1.bf16.msra.mxu1 %v16146_v46  ;;  %5945 = vmatpush1.bf16.msra.mxu0 %v16153_v42  ;;  %v5370_v46 = vld [vmem:[#allocation2 + $0x70] sm:$0xc] }
 0xe47   :  { %5905 = vmatprep.subr.bf16.mxu1 %v16158_v49  ;;  %5946 = vmatprep.subr.bf16.mxu0 %v16164_v7  ;;  %v5390_v49 = vsel %vm15271_vm3, %v5370_v46, %v5382_v3  ;;  %v16506_v3 = vld [vmem:[%s18094_s5 + $0x60] ss:$16 sps:$4 sm:$0xff]   ;;  %v16537_v46 = vld [vmem:[%s18094_s5 + $0x88] ss:$16 sps:$4 sm:$0xff]  }
 0xe4a   :  { %5906 = vmatpush1.bf16.msra.mxu1 %v16170_v63  ;;  %5947 = vmatpush1.bf16.msra.mxu0 %v16177_v25  ;;  %v5557_v63 = vrot.slane %v5389_v24, 2  ;;  %v5383_v25 = vrot.slane %v5375_v44, 2  ;;  %v16518_v24 = vld [vmem:[%s18094_s5 + $0x84] ss:$16 sps:$4 sm:$0xff]   ;;  %v16524_v44 = vld [vmem:[%s18094_s5 + $0x8c] ss:$16 sps:$4 sm:$0xff]  }
 0xe4b   :  { %5907 = vmatprep.subr.bf16.mxu1 %v16182_v35  ;;  %5948 = vmatprep.subr.bf16.mxu0 %v16188_v51 }
 0xe4e   :  { %5908 = vmatpush1.bf16.msra.mxu1 %v16194_v52  ;;  %5949 = vmatpush1.bf16.msra.mxu0 %v16201_v53 }
 0xe4f   :  { %5909 = vmatprep.subr.bf16.mxu1 %v16206_v55  ;;  %5950 = vmatprep.subr.bf16.mxu0 %v16212_v4 }
 0xe52   :  { %5910 = vmatpush1.bf16.msra.mxu1 %v16218_v5  ;;  %5951 = vmatpush1.bf16.msra.mxu0 %v16225_v8  ;;  %v5558_v8 = vrot.slane %v5390_v49, 2  ;;  %v16548_v49 = vld [vmem:[%s18094_s5 + $0xac] ss:$16 sps:$4 sm:$0xff]  }
 0xe53   :  { %5911 = vmatprep.subr.bf16.mxu1 %v16230_v9  ;;  %5952 = vmatprep.subr.bf16.mxu0 %v16236_v13  ;;  %v5371_v9 = vld [vmem:[#allocation2 + $0x78] sm:$0xc] }
 0xe54   :  { %v5391_v16 = vsel %vm15279_vm4, %v5371_v9, %v5383_v25  ;;  %v16566_v25 = vld [vmem:[%s18094_s5 + $0xc4] ss:$16 sps:$4 sm:$0xff]   ;;  %v5706_v9 = vld [vmem:[#allocation2 + $0x88] sm:$0xc] }
 0xe55   :  { %v5559_v30 = vrot.slane %v5391_v16, 2  ;;  %v5701_v16 = vld [vmem:[#allocation2 + $0x60] sm:$0x30] }
 0xe56   :  { %5912 = vmatpush1.bf16.msra.mxu1 %v16242_v14  ;;  %5953 = vmatpush1.bf16.msra.mxu0 %v16249_v15 }
 0xe57   :  { %6230 = vmatprep.subr.bf16.mxu1 %v16430_v0  ;;  %6271 = vmatprep.subr.bf16.mxu0 %v16440_v26 }
 0xf0c   :  { %v5598_v42 = vpop.f32.mrb[100].mxu1  ;;  %v5639_v7 = vpop.f32.mrb[116].mxu0 }
 0xf0d   :  { %v5599_v35 = vadd.f32 %v5598_v42, %v5556_v45  ;;  %v5600_v51 = vpop.f32.mrb[101].mxu1  ;;  %v5641_v52 = vpop.f32.mrb[117].mxu0  ;;  %v5640_v31 = vadd.f32 %v5639_v7, %v5558_v8  ;;  %v16530_v45 = vld [vmem:[%s18094_s5 + $0x80] ss:$16 sps:$4 sm:$0xff]   ;;  %v16542_v42 = vld [vmem:[%s18094_s5 + $0xa4] ss:$16 sps:$4 sm:$0xff]  }
 0xf0e   :  { %v5601_v53 = vadd.f32 %v5600_v51, %v5557_v63  ;;  %v5602_v55 = vpop.f32.mrb[102].mxu1  ;;  %v5643_v4 = vpop.f32.mrb[118].mxu0  ;;  %v5642_v6 = vadd.f32 %v5641_v52, %v5559_v30  ;;  %v16554_v7 = vld [vmem:[%s18094_s5 + $0xa0] ss:$16 sps:$4 sm:$0xff]   ;;  %v16561_v63 = vld [vmem:[%s18094_s5 + $0xa8] ss:$16 sps:$4 sm:$0xff]  }
 0xf0f   :  { %v5646_v5 = vmul.f32 0.5, %v5599_v35  ;;  %v5603_v13 = vpop.f32.mrb[103].mxu1  ;;  %v5644_v14 = vpop.f32.mrb[119].mxu0  ;;  %v16572_v35 = vld [vmem:[%s18094_s5 + $0xcc] ss:$16 sps:$4 sm:$0xff]  }
 0xf10   :  { %v5650_v15 = vmul.f32 0.5, %v5601_v53  ;;  %v5655_v1 = vmul.f32 0.5, %v5642_v6  ;;  %v16578_v51 = vld [vmem:[%s18094_s5 + $0xc0] ss:$16 sps:$4 sm:$0xff]   ;;  %v16585_v52 = vld [vmem:[%s18094_s5 + $0xc8] ss:$16 sps:$4 sm:$0xff]  }
 0xf11   :  { %13996 = vtanh.f32 %v5646_v5  ;;  %v16590_v53 = vld [vmem:[%s18094_s5 + $0xe4] ss:$16 sps:$4 sm:$0xff]   ;;  %v16596_v55 = vld [vmem:[%s18094_s5 + $0xec] ss:$16 sps:$4 sm:$0xff]   ;;  %v16602_v4 = vld [vmem:[%s18094_s5 + $0xe0] ss:$16 sps:$4 sm:$0xff]  }
 0xf12   :  { %13998 = vtanh.f32 %v5650_v15  ;;  %v16609_v5 = vld [vmem:[%s18094_s5 + $0xe8] ss:$16 sps:$4 sm:$0xff]   ;;  %v5705_v8 = vld [vmem:[#allocation2 + $0x80] sm:$0xc]  ;;  %v5707_v14 = vld [vmem:[#allocation2 + $0x90] sm:$0xc] }
 0xf13   :  { %14000 = vtanh.f32 %v5640_v31  ;;  %v5713_v13 = vrot.slane %v5705_v8, 6  ;;  %v5714_v15 = vrot.slane %v5706_v9, 6  ;;  %v5715_v30 = vrot.slane %v5707_v14, 6  ;;  %v5702_v6 = vld [vmem:[#allocation2 + $0x68] sm:$0x30] }
 0xf14   :  { %14002 = vtanh.f32 %v5655_v1  ;;  %v5704_v9 = vld [vmem:[#allocation2 + $0x78] sm:$0x30] }
 0xf15   :  { %v5721_v31 = vsel %vm1047_vm1, %v5701_v16, %v5713_v13  ;;  %v5722_v1 = vsel %vm15265_vm2, %v5702_v6, %v5714_v15 }
 0xf1b   :  { %v13997_v62 = vpop.eup %13996 }
 0xf1c   :  { %v13999_v17 = vpop.eup %13998  ;;  %v5648_v39 = vmul.f32 0.5, %v13997_v62  ;;  %v5708_v62 = vld [vmem:[#allocation2 + $0x98] sm:$0xc] }
 0xf1d   :  { %v5652_v33 = vmul.f32 0.5, %v13999_v17  ;;  %v14001_v21 = vpop.eup %14000  ;;  %v5889_v17 = vrot.slane %v5721_v31, 4 }
 0xf1e   :  { %v5649_v20 = vadd.f32 0.5, %v5648_v39  ;;  %v14003_v34 = vpop.eup %14002  ;;  %v5703_v39 = vld [vmem:[#allocation2 + $0x70] sm:$0x30] }
 0xf1f   :  { %v5653_v22 = vadd.f32 0.5, %v5652_v33  ;;  %v5657_v36 = vmul.f32 0.5, %v14003_v34 }
 0xf20   :  { %v5660_v23 = vmul.f32 %v14001_v21, %v5649_v20  ;;  %v5723_v20 = vsel %vm15271_vm3, %v5703_v39, %v5715_v30 }
 0xf21   :  { %v5659_v37 = vmul.f32 %v5653_v22, %v16365_v41  ;;  %v5658_v27 = vadd.f32 0.5, %v5657_v36  ;;  %v16425_v41 = vld [vmem:[%s18094_s5] ss:$16 sps:$4 sm:$0xff]   ;;  %v5890_v22 = vrot.slane %v5722_v1, 4  ;;  %v5891_v8 = vrot.slane %v5723_v20, 4 }
 0xf23   :  { %v16413_v12 = vadd.f32 %v5660_v23, %v5659_v37  ;;  %v5716_v23 = vrot.slane %v5708_v62, 6 }
 0xf25   :  { %14004 = vtanh.f32 %v16413_v12  ;;  %v5724_v16 = vsel %vm15279_vm4, %v5704_v9, %v5716_v23  ;;  %v6039_v9 = vld [vmem:[#allocation2 + $0x88] sm:$0x3] }
 0xf26   :  { %v5892_v30 = vrot.slane %v5724_v16, 4  ;;  %v6034_v16 = vld [vmem:[#allocation2 + $0x60] sm:$0xc0] }
 0xf2f   :  { %v14005_v61 = vpop.eup %14004 }
 0xf30   :  { %v5663_v56 = vmul.f32 %v14005_v61, %v5658_v27 }
 0xf32   :  { %5664 = vst.msk [vmem:[#allocation3 + $0xd] sm:$0x1] %vm1367_vm5, %v5663_v56  ;;  %v5668_v50 = vpack.c.bf16 %v5663_v56, %v5663_v56 }
 0xf33   :  { %5665 = vst.msk [vmem:[#allocation3 + $0x12] sm:$0x1] %vm1369_vm6, %v5663_v56 }
 0xf34   :  { %5666 = vst.msk [vmem:[#allocation3 + $0x2c] sm:$0x2] %vm1371_vm7, %v5663_v56  ;;  %5930 = vmatmul.mubr.bf16.vlgmr.msra.gmra.mrb[104].mxu1 %v5668_v50  ;;  %5971 = vmatmul.mubr.bf16.vlgmr.msra.gmra.mrb[120].mxu0 %v5668_v50 }
 0xf35   :  { %5667 = vst.msk [vmem:[#allocation3 + $0x31] sm:$0x2] %vm1373_vm8, %v5663_v56  ;;  %6262 = vmatprep.mubr.bf16.mxu1 %v14235_v60  ;;  %6303 = vmatprep.mubr.bf16.mxu0 %v14235_v60 }
 0xf36   :  { %6231 = vmatpush1.bf16.msra.mxu1 %v16425_v41  ;;  %6272 = vmatpush1.bf16.msra.mxu0 %v16435_v28 }
 0xf37   :  { %6232 = vmatprep.subr.bf16.mxu1 %v16445_v54  ;;  %6273 = vmatprep.subr.bf16.mxu0 %v16451_v18 }
 0xf3a   :  { %6233 = vmatpush1.bf16.msra.mxu1 %v16458_v29  ;;  %6274 = vmatpush1.bf16.msra.mxu0 %v16465_v40 }
 0xf3b   :  { %6234 = vmatprep.subr.bf16.mxu1 %v16470_v32  ;;  %6275 = vmatprep.subr.bf16.mxu0 %v16476_v19 }
 0xf3e   :  { %6235 = vmatpush1.bf16.msra.mxu1 %v16482_v11  ;;  %6276 = vmatpush1.bf16.msra.mxu0 %v16489_v10 }
 0xf3f   :  { %6236 = vmatprep.subr.bf16.mxu1 %v16494_v2  ;;  %6277 = vmatprep.subr.bf16.mxu0 %v16500_v58 }
 0xf42   :  { %6237 = vmatpush1.bf16.msra.mxu1 %v16506_v3  ;;  %6278 = vmatpush1.bf16.msra.mxu0 %v16513_v38 }
 0xf43   :  { %6238 = vmatprep.subr.bf16.mxu1 %v16518_v24  ;;  %6279 = vmatprep.subr.bf16.mxu0 %v16524_v44 }
 0xf46   :  { %6239 = vmatpush1.bf16.msra.mxu1 %v16530_v45  ;;  %6280 = vmatpush1.bf16.msra.mxu0 %v16537_v46 }
 0xf47   :  { %6240 = vmatprep.subr.bf16.mxu1 %v16542_v42  ;;  %6281 = vmatprep.subr.bf16.mxu0 %v16548_v49 }
 0xf4a   :  { %6241 = vmatpush1.bf16.msra.mxu1 %v16554_v7  ;;  %6282 = vmatpush1.bf16.msra.mxu0 %v16561_v63 }
 0xf4b   :  { %6242 = vmatprep.subr.bf16.mxu1 %v16566_v25  ;;  %6283 = vmatprep.subr.bf16.mxu0 %v16572_v35 }
 0xf4e   :  { %6243 = vmatpush1.bf16.msra.mxu1 %v16578_v51  ;;  %6284 = vmatpush1.bf16.msra.mxu0 %v16585_v52 }
 0xf4f   :  { %6244 = vmatprep.subr.bf16.mxu1 %v16590_v53  ;;  %6285 = vmatprep.subr.bf16.mxu0 %v16596_v55 }
 0xf52   :  { %6245 = vmatpush1.bf16.msra.mxu1 %v16602_v4  ;;  %6286 = vmatpush1.bf16.msra.mxu0 %v16609_v5 }
 0xf53   :  { %6551 = vmatprep.subr.bf16.mxu1 %v16430_v0  ;;  %6592 = vmatprep.subr.bf16.mxu0 %v16440_v26 }
0x1007   :  { %v5931_v33 = vpop.f32.mrb[104].mxu1  ;;  %v5972_v21 = vpop.f32.mrb[120].mxu0 }
0x1008   :  { %v5932_v37 = vadd.f32 %v5931_v33, %v5889_v17  ;;  %v5933_v34 = vpop.f32.mrb[105].mxu1  ;;  %v5974_v36 = vpop.f32.mrb[121].mxu0  ;;  %v5973_v31 = vadd.f32 %v5972_v21, %v5891_v8 }
0x1009   :  { %v5934_v27 = vadd.f32 %v5933_v34, %v5890_v22  ;;  %v5935_v61 = vpop.f32.mrb[106].mxu1  ;;  %v5976_v56 = vpop.f32.mrb[122].mxu0  ;;  %v5975_v6 = vadd.f32 %v5974_v36, %v5892_v30 }
0x100a   :  { %v5979_v50 = vmul.f32 0.5, %v5932_v37  ;;  %v5936_v13 = vpop.f32.mrb[107].mxu1  ;;  %v5977_v14 = vpop.f32.mrb[123].mxu0 }
0x100b   :  { %v5983_v15 = vmul.f32 0.5, %v5934_v27  ;;  %v5988_v1 = vmul.f32 0.5, %v5975_v6  ;;  %v6040_v14 = vld [vmem:[#allocation2 + $0x90] sm:$0x3]  ;;  %v6035_v6 = vld [vmem:[#allocation2 + $0x68] sm:$0xc0] }
0x100c   :  { %14006 = vtanh.f32 %v5979_v50  ;;  %v6048_v30 = vrot.slane %v6040_v14, 2 }
0x100d   :  { %14008 = vtanh.f32 %v5983_v15  ;;  %v6047_v15 = vrot.slane %v6039_v9, 2  ;;  %v6037_v9 = vld [vmem:[#allocation2 + $0x78] sm:$0xc0] }
0x100e   :  { %14010 = vtanh.f32 %v5973_v31 }
0x100f   :  { %14012 = vtanh.f32 %v5988_v1  ;;  %v6055_v1 = vsel %vm15265_vm2, %v6035_v6, %v6047_v15 }
0x1016   :  { %v14007_v62 = vpop.eup %14006 }
0x1017   :  { %v14009_v17 = vpop.eup %14008  ;;  %v5981_v39 = vmul.f32 0.5, %v14007_v62  ;;  %v6041_v62 = vld [vmem:[#allocation2 + $0x98] sm:$0x3] }
0x1018   :  { %v5985_v33 = vmul.f32 0.5, %v14009_v17  ;;  %v14011_v22 = vpop.eup %14010 }
0x1019   :  { %v5982_v20 = vadd.f32 0.5, %v5981_v39  ;;  %v14013_v21 = vpop.eup %14012  ;;  %v6036_v39 = vld [vmem:[#allocation2 + $0x70] sm:$0xc0] }
0x101a   :  { %v5986_v37 = vadd.f32 0.5, %v5985_v33  ;;  %v5990_v23 = vmul.f32 0.5, %v14013_v21 }
0x101b   :  { %v5993_v34 = vmul.f32 %v14011_v22, %v5982_v20  ;;  %v6056_v20 = vsel %vm15271_vm3, %v6036_v39, %v6048_v30 }
0x101c   :  { %v5992_v27 = vmul.f32 %v5986_v37, %v16413_v12  ;;  %v5991_v56 = vadd.f32 0.5, %v5990_v23  ;;  %v6038_v12 = vld [vmem:[#allocation2 + $0x80] sm:$0x3]  ;;  %v6223_v37 = vrot.slane %v6055_v1, 6 }
0x101d   :  { %v6046_v13 = vrot.slane %v6038_v12, 2  ;;  %v6224_v12 = vrot.slane %v6056_v20, 6 }
0x101e   :  { %v16625_v61 = vadd.f32 %v5993_v34, %v5992_v27  ;;  %v6049_v34 = vrot.slane %v6041_v62, 2 }
0x101f   :  { %v6054_v31 = vsel %vm1047_vm1, %v6034_v16, %v6046_v13 }
0x1020   :  { %14014 = vtanh.f32 %v16625_v61  ;;  %v6222_v17 = vrot.slane %v6054_v31, 6  ;;  %v6057_v16 = vsel %vm15279_vm4, %v6037_v9, %v6049_v34  ;;  %v6372_v9 = vld [vmem:[#allocation2 + $0x68] sm:$0xc0] }
0x1021   :  { %v6225_v30 = vrot.slane %v6057_v16, 6  ;;  %v6373_v16 = vld [vmem:[#allocation2 + $0x70] sm:$0xc0] }
0x102a   :  { %v14015_v36 = vpop.eup %14014 }
0x102b   :  { %v5996_v50 = vmul.f32 %v14015_v36, %v5991_v56 }
0x102d   :  { %5997 = vst.msk [vmem:[#allocation3 + $0xe] sm:$0x1] %vm1367_vm5, %v5996_v50  ;;  %v6001_v8 = vpack.c.bf16 %v5996_v50, %v5996_v50 }
0x102e   :  { %5998 = vst.msk [vmem:[#allocation3 + $0x11] sm:$0x1] %vm1369_vm6, %v5996_v50 }
0x102f   :  { %5999 = vst.msk [vmem:[#allocation3 + $0x2d] sm:$0x2] %vm1371_vm7, %v5996_v50  ;;  %6263 = vmatmul.mubr.bf16.vlgmr.msra.gmra.mrb[108].mxu1 %v6001_v8  ;;  %6304 = vmatmul.mubr.bf16.vlgmr.msra.gmra.mrb[124].mxu0 %v6001_v8 }
0x1030   :  { %6000 = vst.msk [vmem:[#allocation3 + $0x30] sm:$0x2] %vm1373_vm8, %v5996_v50  ;;  %6552 = vmatpush1.bf16.msra.mxu1 %v16425_v41  ;;  %6593 = vmatpush1.bf16.msra.mxu0 %v16435_v28 }
0x1031   :  { %6553 = vmatprep.subr.bf16.mxu1 %v16445_v54  ;;  %6594 = vmatprep.subr.bf16.mxu0 %v16451_v18 }
0x1032   :  { %6583 = vmatprep.mubr.bf16.mxu1 %v14235_v60  ;;  %6624 = vmatprep.mubr.bf16.mxu0 %v14235_v60 }
0x1034   :  { %6554 = vmatpush1.bf16.msra.mxu1 %v16458_v29  ;;  %6595 = vmatpush1.bf16.msra.mxu0 %v16465_v40 }
0x1035   :  { %6555 = vmatprep.subr.bf16.mxu1 %v16470_v32  ;;  %6596 = vmatprep.subr.bf16.mxu0 %v16476_v19 }
0x1038   :  { %6556 = vmatpush1.bf16.msra.mxu1 %v16482_v11  ;;  %6597 = vmatpush1.bf16.msra.mxu0 %v16489_v10 }
0x1039   :  { %6557 = vmatprep.subr.bf16.mxu1 %v16494_v2  ;;  %6598 = vmatprep.subr.bf16.mxu0 %v16500_v58 }
0x103c   :  { %6558 = vmatpush1.bf16.msra.mxu1 %v16506_v3  ;;  %6599 = vmatpush1.bf16.msra.mxu0 %v16513_v38 }
0x103d   :  { %6559 = vmatprep.subr.bf16.mxu1 %v16518_v24  ;;  %6600 = vmatprep.subr.bf16.mxu0 %v16524_v44 }
0x1040   :  { %6560 = vmatpush1.bf16.msra.mxu1 %v16530_v45  ;;  %6601 = vmatpush1.bf16.msra.mxu0 %v16537_v46 }
0x1041   :  { %6561 = vmatprep.subr.bf16.mxu1 %v16542_v42  ;;  %6602 = vmatprep.subr.bf16.mxu0 %v16548_v49 }
0x1044   :  { %6562 = vmatpush1.bf16.msra.mxu1 %v16554_v7  ;;  %6603 = vmatpush1.bf16.msra.mxu0 %v16561_v63 }
0x1045   :  { %6563 = vmatprep.subr.bf16.mxu1 %v16566_v25  ;;  %6604 = vmatprep.subr.bf16.mxu0 %v16572_v35 }
0x1048   :  { %6564 = vmatpush1.bf16.msra.mxu1 %v16578_v51  ;;  %6605 = vmatpush1.bf16.msra.mxu0 %v16585_v52 }
0x1049   :  { %6565 = vmatprep.subr.bf16.mxu1 %v16590_v53  ;;  %6606 = vmatprep.subr.bf16.mxu0 %v16596_v55 }
0x104c   :  { %6566 = vmatpush1.bf16.msra.mxu1 %v16602_v4  ;;  %6607 = vmatpush1.bf16.msra.mxu0 %v16609_v5 }
0x104d   :  { %6884 = vmatprep.subr.bf16.mxu1 %v16430_v0  ;;  %6925 = vmatprep.subr.bf16.mxu0 %v16440_v26 }
0x1102   :  { %v6264_v33 = vpop.f32.mrb[108].mxu1  ;;  %v6305_v22 = vpop.f32.mrb[124].mxu0 }
0x1103   :  { %v6265_v27 = vadd.f32 %v6264_v33, %v6222_v17  ;;  %v6266_v21 = vpop.f32.mrb[109].mxu1  ;;  %v6307_v23 = vpop.f32.mrb[125].mxu0  ;;  %v6306_v31 = vadd.f32 %v6305_v22, %v6224_v12 }
0x1104   :  { %v6267_v56 = vadd.f32 %v6266_v21, %v6223_v37  ;;  %v6268_v36 = vpop.f32.mrb[110].mxu1  ;;  %v6309_v50 = vpop.f32.mrb[126].mxu0  ;;  %v6308_v6 = vadd.f32 %v6307_v23, %v6225_v30 }
0x1105   :  { %v6312_v8 = vmul.f32 0.5, %v6265_v27  ;;  %v6269_v13 = vpop.f32.mrb[111].mxu1  ;;  %v6310_v14 = vpop.f32.mrb[127].mxu0 }
0x1106   :  { %v6316_v15 = vmul.f32 0.5, %v6267_v56  ;;  %v6321_v1 = vmul.f32 0.5, %v6308_v6  ;;  %v6367_v13 = vld [vmem:[#allocation2 + $0x80] sm:$0x3] }
0x1107   :  { %14016 = vtanh.f32 %v6312_v8 }
0x1108   :  { %14018 = vtanh.f32 %v6316_v15  ;;  %v6368_v15 = vld [vmem:[#allocation2 + $0x88] sm:$0x3] }
0x1109   :  { %14020 = vtanh.f32 %v6306_v31  ;;  %v6380_v31 = vrot.slane %v6372_v9, 6 }
0x110a   :  { %14022 = vtanh.f32 %v6321_v1 }
0x1111   :  { %v14017_v62 = vpop.eup %14016 }
0x1112   :  { %v14019_v17 = vpop.eup %14018  ;;  %v6314_v39 = vmul.f32 0.5, %v14017_v62 }
0x1113   :  { %v6318_v33 = vmul.f32 0.5, %v14019_v17  ;;  %v14021_v37 = vpop.eup %14020  ;;  %v6369_v17 = vld [vmem:[#allocation2 + $0x90] sm:$0x3] }
0x1114   :  { %v6315_v20 = vadd.f32 0.5, %v6314_v39  ;;  %v14023_v22 = vpop.eup %14022  ;;  %v6388_v39 = vsel %vm15265_vm2, %v6368_v15, %v6380_v31 }
0x1115   :  { %v6319_v27 = vadd.f32 0.5, %v6318_v33  ;;  %v6323_v34 = vmul.f32 0.5, %v14023_v22 }
0x1116   :  { %v6326_v21 = vmul.f32 %v14021_v37, %v6315_v20 }
0x1117   :  { %v6325_v56 = vmul.f32 %v6319_v27, %v16625_v61  ;;  %v6324_v50 = vadd.f32 0.5, %v6323_v34  ;;  %v6371_v61 = vld [vmem:[#allocation2 + $0x60] sm:$0xc0] }
0x1118   :  { %v6379_v14 = vrot.slane %v6371_v61, 6 }
0x1119   :  { %v16675_v36 = vadd.f32 %v6326_v21, %v6325_v56  ;;  %v6374_v56 = vld [vmem:[#allocation2 + $0x78] sm:$0xc0] }
0x111a   :  { %v6387_v30 = vsel %vm1047_vm1, %v6367_v13, %v6379_v14  ;;  %v6382_v61 = vrot.slane %v6374_v56, 6 }
0x111b   :  { %14024 = vtanh.f32 %v16675_v36 }
0x1125   :  { %v14025_v23 = vpop.eup %14024 }
0x1126   :  { %v6329_v8 = vmul.f32 %v14025_v23, %v6324_v50 }
0x1128   :  { %6330 = vst.msk [vmem:[#allocation3 + $0xf] sm:$0x1] %vm1367_vm5, %v6329_v8  ;;  %v6334_v12 = vpack.c.bf16 %v6329_v8, %v6329_v8 }
0x1129   :  { %6331 = vst.msk [vmem:[#allocation3 + $0x10] sm:$0x1] %vm1369_vm6, %v6329_v8 }
0x112a   :  { %6332 = vst.msk [vmem:[#allocation3 + $0x2e] sm:$0x2] %vm1371_vm7, %v6329_v8  ;;  %6584 = vmatmul.mubr.bf16.vlgmr.msra.gmra.mrb[112].mxu1 %v6334_v12  ;;  %6625 = vmatmul.mubr.bf16.vlgmr.msra.gmra.mrb[128].mxu0 %v6334_v12  ;;  %v6370_v12 = vld [vmem:[#allocation2 + $0x98] sm:$0x3] }
0x112b   :  { %6333 = vst.msk [vmem:[#allocation3 + $0x2f] sm:$0x2] %vm1373_vm8, %v6329_v8  ;;  %6885 = vmatpush1.bf16.msra.mxu1 %v16425_v41  ;;  %6926 = vmatpush1.bf16.msra.mxu0 %v16435_v28  ;;  %v6390_v9 = vsel %vm15279_vm4, %v6370_v12, %v6382_v61 }
0x112c   :  { %6886 = vmatprep.subr.bf16.mxu1 %v16445_v54  ;;  %6927 = vmatprep.subr.bf16.mxu0 %v16451_v18 }
0x112d   :  { %6916 = vmatprep.mubr.bf16.mxu1 %v14235_v60  ;;  %6957 = vmatprep.mubr.bf16.mxu0 %v14235_v60 }
0x112f   :  { %6887 = vmatpush1.bf16.msra.mxu1 %v16458_v29  ;;  %6928 = vmatpush1.bf16.msra.mxu0 %v16465_v40 }
0x1130   :  { %6888 = vmatprep.subr.bf16.mxu1 %v16470_v32  ;;  %6929 = vmatprep.subr.bf16.mxu0 %v16476_v19 }
0x1133   :  { %6889 = vmatpush1.bf16.msra.mxu1 %v16482_v11  ;;  %6930 = vmatpush1.bf16.msra.mxu0 %v16489_v10 }
0x1134   :  { %6890 = vmatprep.subr.bf16.mxu1 %v16494_v2  ;;  %6931 = vmatprep.subr.bf16.mxu0 %v16500_v58 }
0x1137   :  { %6891 = vmatpush1.bf16.msra.mxu1 %v16506_v3  ;;  %6932 = vmatpush1.bf16.msra.mxu0 %v16513_v38 }
0x1138   :  { %6892 = vmatprep.subr.bf16.mxu1 %v16518_v24  ;;  %6933 = vmatprep.subr.bf16.mxu0 %v16524_v44 }
0x113b   :  { %6893 = vmatpush1.bf16.msra.mxu1 %v16530_v45  ;;  %6934 = vmatpush1.bf16.msra.mxu0 %v16537_v46 }
0x113c   :  { %6894 = vmatprep.subr.bf16.mxu1 %v16542_v42  ;;  %6935 = vmatprep.subr.bf16.mxu0 %v16548_v49 }
0x113f   :  { %6895 = vmatpush1.bf16.msra.mxu1 %v16554_v7  ;;  %6936 = vmatpush1.bf16.msra.mxu0 %v16561_v63 }
0x1140   :  { %6896 = vmatprep.subr.bf16.mxu1 %v16566_v25  ;;  %6937 = vmatprep.subr.bf16.mxu0 %v16572_v35 }
0x1143   :  { %6897 = vmatpush1.bf16.msra.mxu1 %v16578_v51  ;;  %6938 = vmatpush1.bf16.msra.mxu0 %v16585_v52 }
0x1144   :  { %6898 = vmatprep.subr.bf16.mxu1 %v16590_v53  ;;  %6939 = vmatprep.subr.bf16.mxu0 %v16596_v55 }
0x1147   :  { %6899 = vmatpush1.bf16.msra.mxu1 %v16602_v4  ;;  %6940 = vmatpush1.bf16.msra.mxu0 %v16609_v5 }
0x1148   :  { %7217 = vmatprep.subr.bf16.mxu1 %v16430_v0  ;;  %7258 = vmatprep.subr.bf16.mxu0 %v16440_v26  ;;  %v6381_v26 = vrot.slane %v6373_v16, 6 }
0x114a   :  { %v6389_v50 = vsel %vm15271_vm3, %v6369_v17, %v6381_v26 }
0x11fd   :  { %v6585_v6 = vpop.f32.mrb[112].mxu1  ;;  %v6626_v1 = vpop.f32.mrb[128].mxu0 }
0x11fe   :  { %v6586_v62 = vadd.f32 %v6585_v6, %v6387_v30  ;;  %v6587_v0 = vpop.f32.mrb[113].mxu1  ;;  %v6628_v33 = vpop.f32.mrb[129].mxu0  ;;  %v6627_v8 = vadd.f32 %v6626_v1, %v6389_v50 }
0x11ff   :  { %v6588_v20 = vadd.f32 %v6587_v0, %v6388_v39  ;;  %v6589_v37 = vpop.f32.mrb[114].mxu1  ;;  %v6630_v27 = vpop.f32.mrb[130].mxu0  ;;  %v6629_v13 = vadd.f32 %v6628_v33, %v6390_v9 }
0x1200   :  { %v6633_v21 = vmul.f32 0.5, %v6586_v62  ;;  %v6590_v22 = vpop.f32.mrb[115].mxu1  ;;  %v6631_v34 = vpop.f32.mrb[131].mxu0 }
0x1201   :  { %v6637_v23 = vmul.f32 0.5, %v6588_v20  ;;  %v6642_v14 = vmul.f32 0.5, %v6629_v13 }
0x1202   :  { %14026 = vtanh.f32 %v6633_v21 }
0x1203   :  { %14028 = vtanh.f32 %v6637_v23 }
0x1204   :  { %14030 = vtanh.f32 %v6627_v8 }
0x1205   :  { %14032 = vtanh.f32 %v6642_v14 }
0x120c   :  { %v14027_v15 = vpop.eup %14026 }
0x120d   :  { %v14029_v16 = vpop.eup %14028  ;;  %v6635_v31 = vmul.f32 0.5, %v14027_v15 }
0x120e   :  { %v6639_v30 = vmul.f32 0.5, %v14029_v16  ;;  %v14031_v62 = vpop.eup %14030 }
0x120f   :  { %v6636_v6 = vadd.f32 0.5, %v6635_v31  ;;  %v14033_v26 = vpop.eup %14032 }
0x1210   :  { %v6640_v17 = vadd.f32 0.5, %v6639_v30  ;;  %v6644_v20 = vmul.f32 0.5, %v14033_v26  ;;  %v16790_v26 = vld [vmem:[%s18094_s5 + $0x4] ss:$16 sps:$4 sm:$0xff]  }
0x1211   :  { %v6647_v39 = vmul.f32 %v14031_v62, %v6636_v6 }
0x1212   :  { %v6646_v1 = vmul.f32 %v6640_v17, %v16675_v36  ;;  %v6645_v37 = vadd.f32 0.5, %v6644_v20  ;;  %v16795_v20 = vld [vmem:[%s18094_s5 + $0x8] ss:$16 sps:$4 sm:$0xff]  }
0x1214   :  { %v16725_v0 = vadd.f32 %v6647_v39, %v6646_v1 }
0x1216   :  { %14034 = vtanh.f32 %v16725_v0 }
0x1220   :  { %v14035_v33 = vpop.eup %14034 }
0x1221   :  { %v6650_v27 = vmul.f32 %v14035_v33, %v6645_v37  ;;  %v16800_v37 = vld [vmem:[%s18094_s5 + $0xc] ss:$16 sps:$4 sm:$0xff]   ;;  %v16805_v33 = vld [vmem:[%s18094_s5 + $0x24] ss:$16 sps:$4 sm:$0xff]  }
0x1223   :  { %6651 = vst.msk [vmem:[#allocation3 + $0x10] sm:$0x1] %vm1367_vm5, %v6650_v27  ;;  %v6655_v21 = vpack.c.bf16 %v6650_v27, %v6650_v27 }
0x1224   :  { %6652 = vst.msk [vmem:[#allocation3 + $0xf] sm:$0x1] %vm1369_vm6, %v6650_v27 }
0x1225   :  { %6653 = vst.msk [vmem:[#allocation3 + $0x2f] sm:$0x2] %vm1371_vm7, %v6650_v27  ;;  %6917 = vmatmul.mubr.bf16.vlgmr.msra.gmra.mrb[116].mxu1 %v6655_v21  ;;  %6958 = vmatmul.mubr.bf16.vlgmr.msra.gmra.mrb[132].mxu0 %v6655_v21  ;;  %v16818_v21 = vld [vmem:[%s18094_s5 + $0x20] ss:$16 sps:$4 sm:$0xff]  }
0x1226   :  { %6654 = vst.msk [vmem:[#allocation3 + $0x2e] sm:$0x2] %vm1373_vm8, %v6650_v27  ;;  %7218 = vmatpush1.bf16.msra.mxu1 %v16425_v41  ;;  %7259 = vmatpush1.bf16.msra.mxu0 %v16435_v28  ;;  %v6692_v41 = vld [vmem:[#allocation2 + $0x60] sm:$0x30]  ;;  %v6693_v28 = vld [vmem:[#allocation2 + $0x68] sm:$0x30] }
0x1227   :  { %7219 = vmatprep.subr.bf16.mxu1 %v16445_v54  ;;  %7260 = vmatprep.subr.bf16.mxu0 %v16451_v18  ;;  %v6688_v54 = vld [vmem:[#allocation2 + $0x80] sm:$0xc]  ;;  %v6700_v18 = vrot.slane %v6692_v41, 2  ;;  %v16811_v27 = vld [vmem:[%s18094_s5 + $0x2c] ss:$16 sps:$4 sm:$0xff]  }
0x1228   :  { %7249 = vmatprep.mubr.bf16.mxu1 %v14235_v60  ;;  %7290 = vmatprep.mubr.bf16.mxu0 %v14235_v60  ;;  %v16825_v41 = vld [vmem:[%s18094_s5 + $0x28] ss:$16 sps:$4 sm:$0xff]  }
0x122a   :  { %7220 = vmatpush1.bf16.msra.mxu1 %v16458_v29  ;;  %7261 = vmatpush1.bf16.msra.mxu0 %v16465_v40  ;;  %v6689_v29 = vld [vmem:[#allocation2 + $0x88] sm:$0xc]  ;;  %v6694_v40 = vld [vmem:[#allocation2 + $0x70] sm:$0x30] }
0x122b   :  { %7221 = vmatprep.subr.bf16.mxu1 %v16470_v32  ;;  %7262 = vmatprep.subr.bf16.mxu0 %v16476_v19  ;;  %v6701_v32 = vrot.slane %v6693_v28, 2  ;;  %v6708_v19 = vsel %vm1047_vm1, %v6688_v54, %v6700_v18  ;;  %v16830_v28 = vld [vmem:[%s18094_s5 + $0x44] ss:$16 sps:$4 sm:$0xff]   ;;  %v16836_v54 = vld [vmem:[%s18094_s5 + $0x4c] ss:$16 sps:$4 sm:$0xff]  }
0x122c   :  { %v16842_v18 = vld [vmem:[%s18094_s5 + $0x40] ss:$16 sps:$4 sm:$0xff]  }
0x122e   :  { %7222 = vmatpush1.bf16.msra.mxu1 %v16482_v11  ;;  %7263 = vmatpush1.bf16.msra.mxu0 %v16489_v10  ;;  %v6690_v11 = vld [vmem:[#allocation2 + $0x90] sm:$0xc]  ;;  %v6709_v10 = vsel %vm15265_vm2, %v6689_v29, %v6701_v32  ;;  %v16849_v29 = vld [vmem:[%s18094_s5 + $0x48] ss:$16 sps:$4 sm:$0xff]   ;;  %v16860_v32 = vld [vmem:[%s18094_s5 + $0x6c] ss:$16 sps:$4 sm:$0xff]  }
0x122f   :  { %7223 = vmatprep.subr.bf16.mxu1 %v16494_v2  ;;  %7264 = vmatprep.subr.bf16.mxu0 %v16500_v58  ;;  %v6702_v2 = vrot.slane %v6694_v40, 2  ;;  %v6876_v58 = vrot.slane %v6708_v19, 2  ;;  %v16854_v40 = vld [vmem:[%s18094_s5 + $0x64] ss:$16 sps:$4 sm:$0xff]   ;;  %v16866_v19 = vld [vmem:[%s18094_s5 + $0x60] ss:$16 sps:$4 sm:$0xff]  }
0x1232   :  { %7224 = vmatpush1.bf16.msra.mxu1 %v16506_v3  ;;  %7265 = vmatpush1.bf16.msra.mxu0 %v16513_v38  ;;  %v6695_v3 = vld [vmem:[#allocation2 + $0x78] sm:$0x30] }
0x1233   :  { %7225 = vmatprep.subr.bf16.mxu1 %v16518_v24  ;;  %7266 = vmatprep.subr.bf16.mxu0 %v16524_v44  ;;  %v6710_v24 = vsel %vm15271_vm3, %v6690_v11, %v6702_v2  ;;  %v16873_v11 = vld [vmem:[%s18094_s5 + $0x68] ss:$16 sps:$4 sm:$0xff]   ;;  %v16884_v2 = vld [vmem:[%s18094_s5 + $0x8c] ss:$16 sps:$4 sm:$0xff]  }
0x1236   :  { %7226 = vmatpush1.bf16.msra.mxu1 %v16530_v45  ;;  %7267 = vmatpush1.bf16.msra.mxu0 %v16537_v46  ;;  %v6877_v45 = vrot.slane %v6709_v10, 2  ;;  %v16878_v10 = vld [vmem:[%s18094_s5 + $0x84] ss:$16 sps:$4 sm:$0xff]  }
0x1237   :  { %7227 = vmatprep.subr.bf16.mxu1 %v16542_v42  ;;  %7268 = vmatprep.subr.bf16.mxu0 %v16548_v49  ;;  %v6691_v49 = vld [vmem:[#allocation2 + $0x98] sm:$0xc] }
0x123a   :  { %7228 = vmatpush1.bf16.msra.mxu1 %v16554_v7  ;;  %7269 = vmatpush1.bf16.msra.mxu0 %v16561_v63 }
0x123b   :  { %7229 = vmatprep.subr.bf16.mxu1 %v16566_v25  ;;  %7270 = vmatprep.subr.bf16.mxu0 %v16572_v35  ;;  %v6703_v25 = vrot.slane %v6695_v3, 2  ;;  %v16897_v3 = vld [vmem:[%s18094_s5 + $0x88] ss:$16 sps:$4 sm:$0xff]  }
0x123d   :  { %v6711_v36 = vsel %vm15279_vm4, %v6691_v49, %v6703_v25  ;;  %v16938_v49 = vld [vmem:[%s18094_s5 + $0xc0] ss:$16 sps:$4 sm:$0xff]   ;;  %v16956_v25 = vld [vmem:[%s18094_s5 + $0xec] ss:$16 sps:$4 sm:$0xff]  }
0x123e   :  { %7230 = vmatpush1.bf16.msra.mxu1 %v16578_v51  ;;  %7271 = vmatpush1.bf16.msra.mxu0 %v16585_v52  ;;  %v6879_v22 = vrot.slane %v6711_v36, 2  ;;  %v7027_v36 = vld [vmem:[#allocation2 + $0x70] sm:$0xc] }
0x123f   :  { %7231 = vmatprep.subr.bf16.mxu1 %v16590_v53  ;;  %7272 = vmatprep.subr.bf16.mxu0 %v16596_v55  ;;  %v6878_v53 = vrot.slane %v6710_v24, 2  ;;  %v16908_v24 = vld [vmem:[%s18094_s5 + $0xac] ss:$16 sps:$4 sm:$0xff]  }
0x1242   :  { %7232 = vmatpush1.bf16.msra.mxu1 %v16602_v4  ;;  %7273 = vmatpush1.bf16.msra.mxu0 %v16609_v5 }
0x1243   :  { %7550 = vmatprep.subr.bf16.mxu1 %v16790_v26  ;;  %7591 = vmatprep.subr.bf16.mxu0 %v16800_v37 }
0x12f8   :  { %v6918_v38 = vpop.f32.mrb[116].mxu1  ;;  %v6959_v44 = vpop.f32.mrb[132].mxu0 }
0x12f9   :  { %v6919_v46 = vadd.f32 %v6918_v38, %v6876_v58  ;;  %v6920_v42 = vpop.f32.mrb[117].mxu1  ;;  %v6961_v7 = vpop.f32.mrb[133].mxu0  ;;  %v6960_v56 = vadd.f32 %v6959_v44, %v6878_v53  ;;  %v16890_v58 = vld [vmem:[%s18094_s5 + $0x80] ss:$16 sps:$4 sm:$0xff]   ;;  %v16902_v38 = vld [vmem:[%s18094_s5 + $0xa4] ss:$16 sps:$4 sm:$0xff]  }
0x12fa   :  { %v6921_v63 = vadd.f32 %v6920_v42, %v6877_v45  ;;  %v6922_v35 = vpop.f32.mrb[118].mxu1  ;;  %v6963_v51 = vpop.f32.mrb[134].mxu0  ;;  %v6962_v34 = vadd.f32 %v6961_v7, %v6879_v22  ;;  %v16914_v44 = vld [vmem:[%s18094_s5 + $0xa0] ss:$16 sps:$4 sm:$0xff]   ;;  %v16921_v45 = vld [vmem:[%s18094_s5 + $0xa8] ss:$16 sps:$4 sm:$0xff]  }
0x12fb   :  { %v6966_v52 = vmul.f32 0.5, %v6919_v46  ;;  %v6923_v55 = vpop.f32.mrb[119].mxu1  ;;  %v6964_v4 = vpop.f32.mrb[135].mxu0  ;;  %v16926_v46 = vld [vmem:[%s18094_s5 + $0xc4] ss:$16 sps:$4 sm:$0xff]  }
0x12fc   :  { %v6970_v5 = vmul.f32 0.5, %v6921_v63  ;;  %v6975_v50 = vmul.f32 0.5, %v6962_v34  ;;  %v16932_v42 = vld [vmem:[%s18094_s5 + $0xcc] ss:$16 sps:$4 sm:$0xff]   ;;  %v16945_v7 = vld [vmem:[%s18094_s5 + $0xc8] ss:$16 sps:$4 sm:$0xff]  }
0x12fd   :  { %14036 = vtanh.f32 %v6966_v52  ;;  %v16950_v63 = vld [vmem:[%s18094_s5 + $0xe4] ss:$16 sps:$4 sm:$0xff]   ;;  %v16962_v35 = vld [vmem:[%s18094_s5 + $0xe0] ss:$16 sps:$4 sm:$0xff]   ;;  %v16969_v51 = vld [vmem:[%s18094_s5 + $0xe8] ss:$16 sps:$4 sm:$0xff]  }
0x12fe   :  { %14038 = vtanh.f32 %v6970_v5  ;;  %v7025_v52 = vld [vmem:[#allocation2 + $0x60] sm:$0xc]  ;;  %v7026_v53 = vld [vmem:[#allocation2 + $0x68] sm:$0xc]  ;;  %v7021_v55 = vld [vmem:[#allocation2 + $0x80] sm:$0x30] }
0x12ff   :  { %14040 = vtanh.f32 %v6960_v56  ;;  %v7033_v4 = vrot.slane %v7025_v52, 6  ;;  %v7022_v5 = vld [vmem:[#allocation2 + $0x88] sm:$0x30]  ;;  %v7034_v56 = vrot.slane %v7026_v53, 6  ;;  %v7023_v34 = vld [vmem:[#allocation2 + $0x90] sm:$0x30] }
0x1300   :  { %14042 = vtanh.f32 %v6975_v50 }
0x1301   :  { %v7041_v22 = vsel %vm1047_vm1, %v7021_v55, %v7033_v4  ;;  %v7042_v50 = vsel %vm15265_vm2, %v7022_v5, %v7034_v56 }
0x1307   :  { %v14037_v23 = vpop.eup %14036 }
0x1308   :  { %v14039_v8 = vpop.eup %14038  ;;  %v6968_v12 = vmul.f32 0.5, %v14037_v23  ;;  %v7035_v23 = vrot.slane %v7027_v36, 6 }
0x1309   :  { %v6972_v61 = vmul.f32 0.5, %v14039_v8  ;;  %v14041_v13 = vpop.eup %14040  ;;  %v7209_v8 = vrot.slane %v7041_v22, 4 }
0x130a   :  { %v6969_v9 = vadd.f32 0.5, %v6968_v12  ;;  %v14043_v30 = vpop.eup %14042  ;;  %v7028_v12 = vld [vmem:[#allocation2 + $0x78] sm:$0xc] }
0x130b   :  { %v6973_v14 = vadd.f32 0.5, %v6972_v61  ;;  %v6977_v6 = vmul.f32 0.5, %v14043_v30  ;;  %v7024_v30 = vld [vmem:[#allocation2 + $0x98] sm:$0x30] }
0x130c   :  { %v6980_v15 = vmul.f32 %v14041_v13, %v6969_v9  ;;  %v7043_v9 = vsel %vm15271_vm3, %v7023_v34, %v7035_v23 }
0x130d   :  { %v6979_v16 = vmul.f32 %v6973_v14, %v16725_v0  ;;  %v6978_v62 = vadd.f32 0.5, %v6977_v6  ;;  %v16785_v0 = vld [vmem:[%s18094_s5] ss:$16 sps:$4 sm:$0xff]   ;;  %v7210_v14 = vrot.slane %v7042_v50, 4  ;;  %v7211_v53 = vrot.slane %v7043_v9, 4 }
0x130f   :  { %v16773_v31 = vadd.f32 %v6980_v15, %v6979_v16 }
0x1311   :  { %14044 = vtanh.f32 %v16773_v31 }
0x131b   :  { %v14045_v17 = vpop.eup %14044 }
0x131c   :  { %v6983_v39 = vmul.f32 %v14045_v17, %v6978_v62  ;;  %v7036_v17 = vrot.slane %v7028_v12, 6 }
0x131e   :  { %6984 = vst.msk [vmem:[#allocation3 + $0x11] sm:$0x1] %vm1367_vm5, %v6983_v39  ;;  %v6988_v1 = vpack.c.bf16 %v6983_v39, %v6983_v39  ;;  %v7044_v36 = vsel %vm15279_vm4, %v7024_v30, %v7036_v17 }
0x131f   :  { %6985 = vst.msk [vmem:[#allocation3 + $0xe] sm:$0x1] %vm1369_vm6, %v6983_v39  ;;  %v7212_v22 = vrot.slane %v7044_v36, 4  ;;  %v7360_v36 = vld [vmem:[#allocation2 + $0x70] sm:$0x3] }
0x1320   :  { %6986 = vst.msk [vmem:[#allocation3 + $0x30] sm:$0x2] %vm1371_vm7, %v6983_v39  ;;  %7250 = vmatmul.mubr.bf16.vlgmr.msra.gmra.mrb[120].mxu1 %v6988_v1  ;;  %7291 = vmatmul.mubr.bf16.vlgmr.msra.gmra.mrb[136].mxu0 %v6988_v1 }
0x1321   :  { %6987 = vst.msk [vmem:[#allocation3 + $0x2d] sm:$0x2] %vm1373_vm8, %v6983_v39  ;;  %7582 = vmatprep.mubr.bf16.mxu1 %v14235_v60  ;;  %7623 = vmatprep.mubr.bf16.mxu0 %v14235_v60 }
0x1322   :  { %7551 = vmatpush1.bf16.msra.mxu1 %v16785_v0  ;;  %7592 = vmatpush1.bf16.msra.mxu0 %v16795_v20 }
0x1323   :  { %7552 = vmatprep.subr.bf16.mxu1 %v16805_v33  ;;  %7593 = vmatprep.subr.bf16.mxu0 %v16811_v27 }
0x1326   :  { %7553 = vmatpush1.bf16.msra.mxu1 %v16818_v21  ;;  %7594 = vmatpush1.bf16.msra.mxu0 %v16825_v41 }
0x1327   :  { %7554 = vmatprep.subr.bf16.mxu1 %v16830_v28  ;;  %7595 = vmatprep.subr.bf16.mxu0 %v16836_v54 }
0x132a   :  { %7555 = vmatpush1.bf16.msra.mxu1 %v16842_v18  ;;  %7596 = vmatpush1.bf16.msra.mxu0 %v16849_v29 }
0x132b   :  { %7556 = vmatprep.subr.bf16.mxu1 %v16854_v40  ;;  %7597 = vmatprep.subr.bf16.mxu0 %v16860_v32 }
0x132e   :  { %7557 = vmatpush1.bf16.msra.mxu1 %v16866_v19  ;;  %7598 = vmatpush1.bf16.msra.mxu0 %v16873_v11 }
0x132f   :  { %7558 = vmatprep.subr.bf16.mxu1 %v16878_v10  ;;  %7599 = vmatprep.subr.bf16.mxu0 %v16884_v2 }
0x1332   :  { %7559 = vmatpush1.bf16.msra.mxu1 %v16890_v58  ;;  %7600 = vmatpush1.bf16.msra.mxu0 %v16897_v3 }
0x1333   :  { %7560 = vmatprep.subr.bf16.mxu1 %v16902_v38  ;;  %7601 = vmatprep.subr.bf16.mxu0 %v16908_v24 }
0x1336   :  { %7561 = vmatpush1.bf16.msra.mxu1 %v16914_v44  ;;  %7602 = vmatpush1.bf16.msra.mxu0 %v16921_v45 }
0x1337   :  { %7562 = vmatprep.subr.bf16.mxu1 %v16926_v46  ;;  %7603 = vmatprep.subr.bf16.mxu0 %v16932_v42 }
0x133a   :  { %7563 = vmatpush1.bf16.msra.mxu1 %v16938_v49  ;;  %7604 = vmatpush1.bf16.msra.mxu0 %v16945_v7 }
0x133b   :  { %7564 = vmatprep.subr.bf16.mxu1 %v16950_v63  ;;  %7605 = vmatprep.subr.bf16.mxu0 %v16956_v25 }
0x133e   :  { %7565 = vmatpush1.bf16.msra.mxu1 %v16962_v35  ;;  %7606 = vmatpush1.bf16.msra.mxu0 %v16969_v51 }
0x133f   :  { %7871 = vmatprep.subr.bf16.mxu1 %v16790_v26  ;;  %7912 = vmatprep.subr.bf16.mxu0 %v16800_v37 }
0x13f3   :  { %v7251_v61 = vpop.f32.mrb[120].mxu1  ;;  %v7292_v13 = vpop.f32.mrb[136].mxu0 }
0x13f4   :  { %v7252_v15 = vadd.f32 %v7251_v61, %v7209_v8  ;;  %v7253_v16 = vpop.f32.mrb[121].mxu1  ;;  %v7294_v6 = vpop.f32.mrb[137].mxu0  ;;  %v7293_v56 = vadd.f32 %v7292_v13, %v7211_v53  ;;  %v7359_v53 = vld [vmem:[#allocation2 + $0x68] sm:$0x3] }
0x13f5   :  { %v7254_v62 = vadd.f32 %v7253_v16, %v7210_v14  ;;  %v7255_v39 = vpop.f32.mrb[122].mxu1  ;;  %v7296_v1 = vpop.f32.mrb[138].mxu0  ;;  %v7295_v34 = vadd.f32 %v7294_v6, %v7212_v22 }
0x13f6   :  { %v7299_v52 = vmul.f32 0.5, %v7252_v15  ;;  %v7256_v55 = vpop.f32.mrb[123].mxu1  ;;  %v7297_v4 = vpop.f32.mrb[139].mxu0 }
0x13f7   :  { %v7303_v5 = vmul.f32 0.5, %v7254_v62  ;;  %v7308_v50 = vmul.f32 0.5, %v7295_v34  ;;  %v7354_v55 = vld [vmem:[#allocation2 + $0x80] sm:$0xc0]  ;;  %v7356_v34 = vld [vmem:[#allocation2 + $0x90] sm:$0xc0] }
0x13f8   :  { %14046 = vtanh.f32 %v7299_v52 }
0x13f9   :  { %14048 = vtanh.f32 %v7303_v5  ;;  %v7355_v5 = vld [vmem:[#allocation2 + $0x88] sm:$0xc0] }
0x13fa   :  { %14050 = vtanh.f32 %v7293_v56  ;;  %v7367_v56 = vrot.slane %v7359_v53, 2 }
0x13fb   :  { %14052 = vtanh.f32 %v7308_v50 }
0x13fc   :  { %v7375_v50 = vsel %vm15265_vm2, %v7355_v5, %v7367_v56 }
0x1402   :  { %v14047_v23 = vpop.eup %14046 }
0x1403   :  { %v14049_v8 = vpop.eup %14048  ;;  %v7301_v12 = vmul.f32 0.5, %v14047_v23  ;;  %v7368_v23 = vrot.slane %v7360_v36, 2 }
0x1404   :  { %v7305_v61 = vmul.f32 0.5, %v14049_v8  ;;  %v14051_v9 = vpop.eup %14050 }
0x1405   :  { %v7302_v14 = vadd.f32 0.5, %v7301_v12  ;;  %v14053_v13 = vpop.eup %14052  ;;  %v7361_v12 = vld [vmem:[#allocation2 + $0x78] sm:$0x3] }
0x1406   :  { %v7306_v15 = vadd.f32 0.5, %v7305_v61  ;;  %v7310_v30 = vmul.f32 0.5, %v14053_v13  ;;  %v7357_v13 = vld [vmem:[#allocation2 + $0x98] sm:$0xc0] }
0x1407   :  { %v7313_v16 = vmul.f32 %v14051_v9, %v7302_v14  ;;  %v7376_v14 = vsel %vm15271_vm3, %v7356_v34, %v7368_v23 }
0x1408   :  { %v7312_v62 = vmul.f32 %v7306_v15, %v16773_v31  ;;  %v7311_v17 = vadd.f32 0.5, %v7310_v30  ;;  %v7358_v31 = vld [vmem:[#allocation2 + $0x60] sm:$0x3]  ;;  %v7543_v15 = vrot.slane %v7375_v50, 6  ;;  %v7544_v53 = vrot.slane %v7376_v14, 6 }
0x1409   :  { %v7366_v4 = vrot.slane %v7358_v31, 2 }
0x140a   :  { %v16985_v39 = vadd.f32 %v7313_v16, %v7312_v62 }
0x140b   :  { %v7374_v22 = vsel %vm1047_vm1, %v7354_v55, %v7366_v4 }
0x140c   :  { %14054 = vtanh.f32 %v16985_v39  ;;  %v7542_v8 = vrot.slane %v7374_v22, 6 }
0x1416   :  { %v14055_v6 = vpop.eup %14054 }
0x1417   :  { %v7316_v1 = vmul.f32 %v14055_v6, %v7311_v17  ;;  %v7369_v6 = vrot.slane %v7361_v12, 2 }
0x1419   :  { %7317 = vst.msk [vmem:[#allocation3 + $0x12] sm:$0x1] %vm1367_vm5, %v7316_v1  ;;  %v7321_v52 = vpack.c.bf16 %v7316_v1, %v7316_v1  ;;  %v7377_v36 = vsel %vm15279_vm4, %v7357_v13, %v7369_v6 }
0x141a   :  { %7318 = vst.msk [vmem:[#allocation3 + $0xd] sm:$0x1] %vm1369_vm6, %v7316_v1  ;;  %v7545_v22 = vrot.slane %v7377_v36, 6  ;;  %v7693_v36 = vld [vmem:[#allocation2 + $0x50] sm:$0xc0] }
0x141b   :  { %7319 = vst.msk [vmem:[#allocation3 + $0x31] sm:$0x2] %vm1371_vm7, %v7316_v1  ;;  %7583 = vmatmul.mubr.bf16.vlgmr.msra.gmra.mrb[124].mxu1 %v7321_v52  ;;  %7624 = vmatmul.mubr.bf16.vlgmr.msra.gmra.mrb[140].mxu0 %v7321_v52 }
0x141c   :  { %7320 = vst.msk [vmem:[#allocation3 + $0x2c] sm:$0x2] %vm1373_vm8, %v7316_v1  ;;  %7872 = vmatpush1.bf16.msra.mxu1 %v16785_v0  ;;  %7913 = vmatpush1.bf16.msra.mxu0 %v16795_v20 }
0x141d   :  { %7873 = vmatprep.subr.bf16.mxu1 %v16805_v33  ;;  %7914 = vmatprep.subr.bf16.mxu0 %v16811_v27 }
0x141e   :  { %7903 = vmatprep.mubr.bf16.mxu1 %v14235_v60  ;;  %7944 = vmatprep.mubr.bf16.mxu0 %v14235_v60 }
0x1420   :  { %7874 = vmatpush1.bf16.msra.mxu1 %v16818_v21  ;;  %7915 = vmatpush1.bf16.msra.mxu0 %v16825_v41 }
0x1421   :  { %7875 = vmatprep.subr.bf16.mxu1 %v16830_v28  ;;  %7916 = vmatprep.subr.bf16.mxu0 %v16836_v54 }
0x1424   :  { %7876 = vmatpush1.bf16.msra.mxu1 %v16842_v18  ;;  %7917 = vmatpush1.bf16.msra.mxu0 %v16849_v29 }
0x1425   :  { %7877 = vmatprep.subr.bf16.mxu1 %v16854_v40  ;;  %7918 = vmatprep.subr.bf16.mxu0 %v16860_v32 }
0x1428   :  { %7878 = vmatpush1.bf16.msra.mxu1 %v16866_v19  ;;  %7919 = vmatpush1.bf16.msra.mxu0 %v16873_v11 }
0x1429   :  { %7879 = vmatprep.subr.bf16.mxu1 %v16878_v10  ;;  %7920 = vmatprep.subr.bf16.mxu0 %v16884_v2 }
0x142c   :  { %7880 = vmatpush1.bf16.msra.mxu1 %v16890_v58  ;;  %7921 = vmatpush1.bf16.msra.mxu0 %v16897_v3 }
0x142d   :  { %7881 = vmatprep.subr.bf16.mxu1 %v16902_v38  ;;  %7922 = vmatprep.subr.bf16.mxu0 %v16908_v24 }
0x1430   :  { %7882 = vmatpush1.bf16.msra.mxu1 %v16914_v44  ;;  %7923 = vmatpush1.bf16.msra.mxu0 %v16921_v45 }
0x1431   :  { %7883 = vmatprep.subr.bf16.mxu1 %v16926_v46  ;;  %7924 = vmatprep.subr.bf16.mxu0 %v16932_v42 }
0x1434   :  { %7884 = vmatpush1.bf16.msra.mxu1 %v16938_v49  ;;  %7925 = vmatpush1.bf16.msra.mxu0 %v16945_v7 }
0x1435   :  { %7885 = vmatprep.subr.bf16.mxu1 %v16950_v63  ;;  %7926 = vmatprep.subr.bf16.mxu0 %v16956_v25 }
0x1438   :  { %7886 = vmatpush1.bf16.msra.mxu1 %v16962_v35  ;;  %7927 = vmatpush1.bf16.msra.mxu0 %v16969_v51 }
0x1439   :  { %8204 = vmatprep.subr.bf16.mxu1 %v16790_v26  ;;  %8245 = vmatprep.subr.bf16.mxu0 %v16800_v37 }
0x14ee   :  { %v7584_v61 = vpop.f32.mrb[124].mxu1  ;;  %v7625_v9 = vpop.f32.mrb[140].mxu0 }
0x14ef   :  { %v7585_v16 = vadd.f32 %v7584_v61, %v7542_v8  ;;  %v7586_v62 = vpop.f32.mrb[125].mxu1  ;;  %v7627_v30 = vpop.f32.mrb[141].mxu0  ;;  %v7626_v56 = vadd.f32 %v7625_v9, %v7544_v53  ;;  %v7692_v53 = vld [vmem:[#allocation2 + $0x48] sm:$0xc0] }
0x14f0   :  { %v7587_v17 = vadd.f32 %v7586_v62, %v7543_v15  ;;  %v7588_v1 = vpop.f32.mrb[126].mxu1  ;;  %v7629_v52 = vpop.f32.mrb[142].mxu0  ;;  %v7628_v34 = vadd.f32 %v7627_v30, %v7545_v22 }
0x14f1   :  { %v7632_v31 = vmul.f32 0.5, %v7585_v16  ;;  %v7589_v55 = vpop.f32.mrb[127].mxu1  ;;  %v7630_v4 = vpop.f32.mrb[143].mxu0 }
0x14f2   :  { %v7636_v5 = vmul.f32 0.5, %v7587_v17  ;;  %v7641_v50 = vmul.f32 0.5, %v7628_v34  ;;  %v7687_v55 = vld [vmem:[#allocation2 + $0xa0] sm:$0x3] }
0x14f3   :  { %14056 = vtanh.f32 %v7632_v31 }
0x14f4   :  { %14058 = vtanh.f32 %v7636_v5  ;;  %v7688_v5 = vld [vmem:[#allocation2 + $0xa8] sm:$0x3] }
0x14f5   :  { %14060 = vtanh.f32 %v7626_v56  ;;  %v7700_v56 = vrot.slane %v7692_v53, 6 }
0x14f6   :  { %14062 = vtanh.f32 %v7641_v50 }
0x14fd   :  { %v14057_v23 = vpop.eup %14056 }
0x14fe   :  { %v14059_v8 = vpop.eup %14058  ;;  %v7634_v12 = vmul.f32 0.5, %v14057_v23 }
0x14ff   :  { %v7638_v61 = vmul.f32 0.5, %v14059_v8  ;;  %v14061_v14 = vpop.eup %14060  ;;  %v7689_v8 = vld [vmem:[#allocation2 + $0xb0] sm:$0x3] }
0x1500   :  { %v7635_v15 = vadd.f32 0.5, %v7634_v12  ;;  %v14063_v9 = vpop.eup %14062  ;;  %v7708_v12 = vsel %vm15265_vm2, %v7688_v5, %v7700_v56 }
0x1501   :  { %v7639_v16 = vadd.f32 0.5, %v7638_v61  ;;  %v7643_v13 = vmul.f32 0.5, %v14063_v9 }
0x1502   :  { %v7646_v62 = vmul.f32 %v14061_v14, %v7635_v15 }
0x1503   :  { %v7645_v17 = vmul.f32 %v7639_v16, %v16985_v39  ;;  %v7644_v6 = vadd.f32 0.5, %v7643_v13  ;;  %v7691_v39 = vld [vmem:[#allocation2 + $0x40] sm:$0xc0] }
0x1504   :  { %v7699_v4 = vrot.slane %v7691_v39, 6 }
0x1505   :  { %v17035_v1 = vadd.f32 %v7646_v62, %v7645_v17  ;;  %v7694_v17 = vld [vmem:[#allocation2 + $0x58] sm:$0xc0] }
0x1506   :  { %v7707_v22 = vsel %vm1047_vm1, %v7687_v55, %v7699_v4  ;;  %v7702_v39 = vrot.slane %v7694_v17, 6 }
0x1507   :  { %14064 = vtanh.f32 %v17035_v1 }
0x1511   :  { %v14065_v30 = vpop.eup %14064 }
0x1512   :  { %v7649_v52 = vmul.f32 %v14065_v30, %v7644_v6 }
0x1514   :  { %7650 = vst.msk [vmem:[#allocation3 + $0x13] sm:$0x1] %vm1367_vm5, %v7649_v52  ;;  %v7654_v31 = vpack.c.bf16 %v7649_v52, %v7649_v52 }
0x1515   :  { %7651 = vst.msk [vmem:[#allocation3 + $0xc] sm:$0x1] %vm1369_vm6, %v7649_v52 }
0x1516   :  { %7652 = vst.msk [vmem:[#allocation3 + $0x32] sm:$0x2] %vm1371_vm7, %v7649_v52  ;;  %7904 = vmatmul.mubr.bf16.vlgmr.msra.gmra.mrb[128].mxu1 %v7654_v31  ;;  %7945 = vmatmul.mubr.bf16.vlgmr.msra.gmra.mrb[144].mxu0 %v7654_v31  ;;  %v7690_v31 = vld [vmem:[#allocation2 + $0xb8] sm:$0x3] }
0x1517   :  { %7653 = vst.msk [vmem:[#allocation3 + $0x2b] sm:$0x2] %vm1373_vm8, %v7649_v52  ;;  %8205 = vmatpush1.bf16.msra.mxu1 %v16785_v0  ;;  %8246 = vmatpush1.bf16.msra.mxu0 %v16795_v20  ;;  %v7710_v53 = vsel %vm15279_vm4, %v7690_v31, %v7702_v39 }
0x1518   :  { %8206 = vmatprep.subr.bf16.mxu1 %v16805_v33  ;;  %8247 = vmatprep.subr.bf16.mxu0 %v16811_v27 }
0x1519   :  { %8236 = vmatprep.mubr.bf16.mxu1 %v14235_v60  ;;  %8277 = vmatprep.mubr.bf16.mxu0 %v14235_v60 }
0x151b   :  { %8207 = vmatpush1.bf16.msra.mxu1 %v16818_v21  ;;  %8248 = vmatpush1.bf16.msra.mxu0 %v16825_v41 }
0x151c   :  { %8208 = vmatprep.subr.bf16.mxu1 %v16830_v28  ;;  %8249 = vmatprep.subr.bf16.mxu0 %v16836_v54 }
0x151f   :  { %8209 = vmatpush1.bf16.msra.mxu1 %v16842_v18  ;;  %8250 = vmatpush1.bf16.msra.mxu0 %v16849_v29 }
0x1520   :  { %8210 = vmatprep.subr.bf16.mxu1 %v16854_v40  ;;  %8251 = vmatprep.subr.bf16.mxu0 %v16860_v32 }
0x1523   :  { %8211 = vmatpush1.bf16.msra.mxu1 %v16866_v19  ;;  %8252 = vmatpush1.bf16.msra.mxu0 %v16873_v11 }
0x1524   :  { %8212 = vmatprep.subr.bf16.mxu1 %v16878_v10  ;;  %8253 = vmatprep.subr.bf16.mxu0 %v16884_v2 }
0x1527   :  { %8213 = vmatpush1.bf16.msra.mxu1 %v16890_v58  ;;  %8254 = vmatpush1.bf16.msra.mxu0 %v16897_v3 }
0x1528   :  { %8214 = vmatprep.subr.bf16.mxu1 %v16902_v38  ;;  %8255 = vmatprep.subr.bf16.mxu0 %v16908_v24 }
0x152b   :  { %8215 = vmatpush1.bf16.msra.mxu1 %v16914_v44  ;;  %8256 = vmatpush1.bf16.msra.mxu0 %v16921_v45 }
0x152c   :  { %8216 = vmatprep.subr.bf16.mxu1 %v16926_v46  ;;  %8257 = vmatprep.subr.bf16.mxu0 %v16932_v42 }
0x152f   :  { %8217 = vmatpush1.bf16.msra.mxu1 %v16938_v49  ;;  %8258 = vmatpush1.bf16.msra.mxu0 %v16945_v7 }
0x1530   :  { %8218 = vmatprep.subr.bf16.mxu1 %v16950_v63  ;;  %8259 = vmatprep.subr.bf16.mxu0 %v16956_v25 }
0x1533   :  { %8219 = vmatpush1.bf16.msra.mxu1 %v16962_v35  ;;  %8260 = vmatpush1.bf16.msra.mxu0 %v16969_v51 }
0x1534   :  { %8537 = vmatprep.subr.bf16.mxu1 %v16790_v26  ;;  %8578 = vmatprep.subr.bf16.mxu0 %v16800_v37  ;;  %v7701_v37 = vrot.slane %v7693_v36, 6 }
0x1536   :  { %v7709_v6 = vsel %vm15271_vm3, %v7689_v8, %v7701_v37 }
0x15e9   :  { %v7905_v34 = vpop.f32.mrb[128].mxu1  ;;  %v7946_v50 = vpop.f32.mrb[144].mxu0 }
0x15ea   :  { %v7906_v23 = vadd.f32 %v7905_v34, %v7707_v22  ;;  %v7907_v26 = vpop.f32.mrb[129].mxu1  ;;  %v7948_v61 = vpop.f32.mrb[145].mxu0  ;;  %v7947_v52 = vadd.f32 %v7946_v50, %v7709_v6 }
0x15eb   :  { %v7908_v15 = vadd.f32 %v7907_v26, %v7708_v12  ;;  %v7909_v14 = vpop.f32.mrb[130].mxu1  ;;  %v7950_v16 = vpop.f32.mrb[146].mxu0  ;;  %v7949_v55 = vadd.f32 %v7948_v61, %v7710_v53 }
0x15ec   :  { %v7953_v62 = vmul.f32 0.5, %v7906_v23  ;;  %v7910_v9 = vpop.f32.mrb[131].mxu1  ;;  %v7951_v13 = vpop.f32.mrb[147].mxu0 }
0x15ed   :  { %v7957_v30 = vmul.f32 0.5, %v7908_v15  ;;  %v7962_v4 = vmul.f32 0.5, %v7949_v55 }
0x15ee   :  { %14066 = vtanh.f32 %v7953_v62 }
0x15ef   :  { %14068 = vtanh.f32 %v7957_v30 }
0x15f0   :  { %14070 = vtanh.f32 %v7947_v52 }
0x15f1   :  { %14072 = vtanh.f32 %v7962_v4 }
0x15f8   :  { %v14067_v5 = vpop.eup %14066 }
0x15f9   :  { %v14069_v36 = vpop.eup %14068  ;;  %v7955_v56 = vmul.f32 0.5, %v14067_v5 }
0x15fa   :  { %v7959_v22 = vmul.f32 0.5, %v14069_v36  ;;  %v14071_v23 = vpop.eup %14070 }
0x15fb   :  { %v7956_v34 = vadd.f32 0.5, %v7955_v56  ;;  %v14073_v37 = vpop.eup %14072 }
0x15fc   :  { %v7960_v8 = vadd.f32 0.5, %v7959_v22  ;;  %v7964_v15 = vmul.f32 0.5, %v14073_v37  ;;  %v17150_v37 = vld [vmem:[%s18094_s5 + $0x4] ss:$16 sps:$4 sm:$0xff]  }
0x15fd   :  { %v7967_v12 = vmul.f32 %v14071_v23, %v7956_v34 }
0x15fe   :  { %v7966_v50 = vmul.f32 %v7960_v8, %v17035_v1  ;;  %v7965_v14 = vadd.f32 0.5, %v7964_v15  ;;  %v17155_v15 = vld [vmem:[%s18094_s5 + $0x8] ss:$16 sps:$4 sm:$0xff]  }
0x1600   :  { %v17085_v26 = vadd.f32 %v7967_v12, %v7966_v50 }
0x1602   :  { %14074 = vtanh.f32 %v17085_v26 }
0x160c   :  { %v14075_v61 = vpop.eup %14074 }
0x160d   :  { %v7970_v16 = vmul.f32 %v14075_v61, %v7965_v14  ;;  %v17160_v14 = vld [vmem:[%s18094_s5 + $0xc] ss:$16 sps:$4 sm:$0xff]   ;;  %v17165_v61 = vld [vmem:[%s18094_s5 + $0x24] ss:$16 sps:$4 sm:$0xff]  }
0x160f   :  { %7971 = vst.msk [vmem:[#allocation3 + $0x14] sm:$0x1] %vm1367_vm5, %v7970_v16  ;;  %v7975_v62 = vpack.c.bf16 %v7970_v16, %v7970_v16 }
0x1610   :  { %7972 = vst.msk [vmem:[#allocation3 + $0xb] sm:$0x1] %vm1369_vm6, %v7970_v16 }
0x1611   :  { %7973 = vst.msk [vmem:[#allocation3 + $0x33] sm:$0x2] %vm1371_vm7, %v7970_v16  ;;  %8237 = vmatmul.mubr.bf16.vlgmr.msra.gmra.mrb[132].mxu1 %v7975_v62  ;;  %8278 = vmatmul.mubr.bf16.vlgmr.msra.gmra.mrb[148].mxu0 %v7975_v62  ;;  %v17178_v62 = vld [vmem:[%s18094_s5 + $0x20] ss:$16 sps:$4 sm:$0xff]  }
0x1612   :  { %7974 = vst.msk [vmem:[#allocation3 + $0x2a] sm:$0x2] %vm1373_vm8, %v7970_v16  ;;  %8538 = vmatpush1.bf16.msra.mxu1 %v16785_v0  ;;  %8579 = vmatpush1.bf16.msra.mxu0 %v16795_v20  ;;  %v8012_v0 = vld [vmem:[#allocation2 + $0x40] sm:$0x30]  ;;  %v8013_v20 = vld [vmem:[#allocation2 + $0x48] sm:$0x30] }
0x1613   :  { %8539 = vmatprep.subr.bf16.mxu1 %v16805_v33  ;;  %8580 = vmatprep.subr.bf16.mxu0 %v16811_v27  ;;  %v8008_v33 = vld [vmem:[#allocation2 + $0xa0] sm:$0xc]  ;;  %v8020_v27 = vrot.slane %v8012_v0, 2  ;;  %v17171_v16 = vld [vmem:[%s18094_s5 + $0x2c] ss:$16 sps:$4 sm:$0xff]  }
0x1614   :  { %8569 = vmatprep.mubr.bf16.mxu1 %v14235_v60  ;;  %8610 = vmatprep.mubr.bf16.mxu0 %v14235_v60  ;;  %v17185_v0 = vld [vmem:[%s18094_s5 + $0x28] ss:$16 sps:$4 sm:$0xff]  }
0x1616   :  { %8540 = vmatpush1.bf16.msra.mxu1 %v16818_v21  ;;  %8581 = vmatpush1.bf16.msra.mxu0 %v16825_v41  ;;  %v8009_v21 = vld [vmem:[#allocation2 + $0xa8] sm:$0xc]  ;;  %v8014_v41 = vld [vmem:[#allocation2 + $0x50] sm:$0x30] }
0x1617   :  { %8541 = vmatprep.subr.bf16.mxu1 %v16830_v28  ;;  %8582 = vmatprep.subr.bf16.mxu0 %v16836_v54  ;;  %v8021_v28 = vrot.slane %v8013_v20, 2  ;;  %v8028_v54 = vsel %vm1047_vm1, %v8008_v33, %v8020_v27  ;;  %v17190_v20 = vld [vmem:[%s18094_s5 + $0x44] ss:$16 sps:$4 sm:$0xff]   ;;  %v17196_v33 = vld [vmem:[%s18094_s5 + $0x4c] ss:$16 sps:$4 sm:$0xff]  }
0x1618   :  { %v17202_v27 = vld [vmem:[%s18094_s5 + $0x40] ss:$16 sps:$4 sm:$0xff]  }
0x161a   :  { %8542 = vmatpush1.bf16.msra.mxu1 %v16842_v18  ;;  %8583 = vmatpush1.bf16.msra.mxu0 %v16849_v29  ;;  %v8010_v18 = vld [vmem:[#allocation2 + $0xb0] sm:$0xc]  ;;  %v8029_v29 = vsel %vm15265_vm2, %v8009_v21, %v8021_v28  ;;  %v17209_v21 = vld [vmem:[%s18094_s5 + $0x48] ss:$16 sps:$4 sm:$0xff]   ;;  %v17220_v28 = vld [vmem:[%s18094_s5 + $0x6c] ss:$16 sps:$4 sm:$0xff]  }
0x161b   :  { %8543 = vmatprep.subr.bf16.mxu1 %v16854_v40  ;;  %8584 = vmatprep.subr.bf16.mxu0 %v16860_v32  ;;  %v8022_v40 = vrot.slane %v8014_v41, 2  ;;  %v8196_v32 = vrot.slane %v8028_v54, 2  ;;  %v17214_v41 = vld [vmem:[%s18094_s5 + $0x64] ss:$16 sps:$4 sm:$0xff]   ;;  %v17226_v54 = vld [vmem:[%s18094_s5 + $0x60] ss:$16 sps:$4 sm:$0xff]  }
0x161e   :  { %8544 = vmatpush1.bf16.msra.mxu1 %v16866_v19  ;;  %8585 = vmatpush1.bf16.msra.mxu0 %v16873_v11  ;;  %v8015_v19 = vld [vmem:[#allocation2 + $0x58] sm:$0x30] }
0x161f   :  { %8545 = vmatprep.subr.bf16.mxu1 %v16878_v10  ;;  %8586 = vmatprep.subr.bf16.mxu0 %v16884_v2  ;;  %v8030_v10 = vsel %vm15271_vm3, %v8010_v18, %v8022_v40  ;;  %v17233_v18 = vld [vmem:[%s18094_s5 + $0x68] ss:$16 sps:$4 sm:$0xff]   ;;  %v17244_v40 = vld [vmem:[%s18094_s5 + $0x8c] ss:$16 sps:$4 sm:$0xff]  }
0x1622   :  { %8546 = vmatpush1.bf16.msra.mxu1 %v16890_v58  ;;  %8587 = vmatpush1.bf16.msra.mxu0 %v16897_v3  ;;  %v8197_v58 = vrot.slane %v8029_v29, 2  ;;  %v17238_v29 = vld [vmem:[%s18094_s5 + $0x84] ss:$16 sps:$4 sm:$0xff]  }
0x1623   :  { %8547 = vmatprep.subr.bf16.mxu1 %v16902_v38  ;;  %8588 = vmatprep.subr.bf16.mxu0 %v16908_v24  ;;  %v8011_v24 = vld [vmem:[#allocation2 + $0xb8] sm:$0xc] }
0x1626   :  { %8548 = vmatpush1.bf16.msra.mxu1 %v16914_v44  ;;  %8589 = vmatpush1.bf16.msra.mxu0 %v16921_v45 }
0x1627   :  { %8549 = vmatprep.subr.bf16.mxu1 %v16926_v46  ;;  %8590 = vmatprep.subr.bf16.mxu0 %v16932_v42  ;;  %v8023_v46 = vrot.slane %v8015_v19, 2  ;;  %v17257_v19 = vld [vmem:[%s18094_s5 + $0x88] ss:$16 sps:$4 sm:$0xff]  }
0x1629   :  { %v8031_v1 = vsel %vm15279_vm4, %v8011_v24, %v8023_v46  ;;  %v17298_v24 = vld [vmem:[%s18094_s5 + $0xc0] ss:$16 sps:$4 sm:$0xff]   ;;  %v17316_v46 = vld [vmem:[%s18094_s5 + $0xec] ss:$16 sps:$4 sm:$0xff]  }
0x162a   :  { %8550 = vmatpush1.bf16.msra.mxu1 %v16938_v49  ;;  %8591 = vmatpush1.bf16.msra.mxu0 %v16945_v7  ;;  %v8199_v9 = vrot.slane %v8031_v1, 2  ;;  %v8347_v1 = vld [vmem:[#allocation2 + $0x50] sm:$0xc] }
0x162b   :  { %8551 = vmatprep.subr.bf16.mxu1 %v16950_v63  ;;  %8592 = vmatprep.subr.bf16.mxu0 %v16956_v25  ;;  %v8198_v63 = vrot.slane %v8030_v10, 2  ;;  %v17268_v10 = vld [vmem:[%s18094_s5 + $0xac] ss:$16 sps:$4 sm:$0xff]  }
0x162e   :  { %8552 = vmatpush1.bf16.msra.mxu1 %v16962_v35  ;;  %8593 = vmatpush1.bf16.msra.mxu0 %v16969_v51 }
0x162f   :  { %8870 = vmatprep.subr.bf16.mxu1 %v17150_v37  ;;  %8911 = vmatprep.subr.bf16.mxu0 %v17160_v14 }
0x16e4   :  { %v8238_v11 = vpop.f32.mrb[132].mxu1  ;;  %v8279_v2 = vpop.f32.mrb[148].mxu0 }
0x16e5   :  { %v8239_v3 = vadd.f32 %v8238_v11, %v8196_v32  ;;  %v8240_v38 = vpop.f32.mrb[133].mxu1  ;;  %v8281_v44 = vpop.f32.mrb[149].mxu0  ;;  %v8280_v17 = vadd.f32 %v8279_v2, %v8198_v63  ;;  %v17250_v32 = vld [vmem:[%s18094_s5 + $0x80] ss:$16 sps:$4 sm:$0xff]   ;;  %v17262_v11 = vld [vmem:[%s18094_s5 + $0xa4] ss:$16 sps:$4 sm:$0xff]  }
0x16e6   :  { %v8241_v45 = vadd.f32 %v8240_v38, %v8197_v58  ;;  %v8242_v42 = vpop.f32.mrb[134].mxu1  ;;  %v8283_v49 = vpop.f32.mrb[150].mxu0  ;;  %v8282_v13 = vadd.f32 %v8281_v44, %v8199_v9  ;;  %v17274_v2 = vld [vmem:[%s18094_s5 + $0xa0] ss:$16 sps:$4 sm:$0xff]   ;;  %v17281_v58 = vld [vmem:[%s18094_s5 + $0xa8] ss:$16 sps:$4 sm:$0xff]  }
0x16e7   :  { %v8286_v7 = vmul.f32 0.5, %v8239_v3  ;;  %v8243_v25 = vpop.f32.mrb[135].mxu1  ;;  %v8284_v35 = vpop.f32.mrb[151].mxu0  ;;  %v17286_v3 = vld [vmem:[%s18094_s5 + $0xc4] ss:$16 sps:$4 sm:$0xff]  }
0x16e8   :  { %v8290_v51 = vmul.f32 0.5, %v8241_v45  ;;  %v8295_v6 = vmul.f32 0.5, %v8282_v13  ;;  %v17292_v38 = vld [vmem:[%s18094_s5 + $0xcc] ss:$16 sps:$4 sm:$0xff]   ;;  %v17305_v44 = vld [vmem:[%s18094_s5 + $0xc8] ss:$16 sps:$4 sm:$0xff]  }
0x16e9   :  { %14076 = vtanh.f32 %v8286_v7  ;;  %v17310_v45 = vld [vmem:[%s18094_s5 + $0xe4] ss:$16 sps:$4 sm:$0xff]   ;;  %v17322_v42 = vld [vmem:[%s18094_s5 + $0xe0] ss:$16 sps:$4 sm:$0xff]   ;;  %v17329_v49 = vld [vmem:[%s18094_s5 + $0xe8] ss:$16 sps:$4 sm:$0xff]  }
0x16ea   :  { %14078 = vtanh.f32 %v8290_v51  ;;  %v8345_v7 = vld [vmem:[#allocation2 + $0x40] sm:$0xc]  ;;  %v8346_v63 = vld [vmem:[#allocation2 + $0x48] sm:$0xc]  ;;  %v8341_v25 = vld [vmem:[#allocation2 + $0xa0] sm:$0x30] }
0x16eb   :  { %14080 = vtanh.f32 %v8280_v17  ;;  %v8353_v35 = vrot.slane %v8345_v7, 6  ;;  %v8342_v51 = vld [vmem:[#allocation2 + $0xa8] sm:$0x30]  ;;  %v8354_v17 = vrot.slane %v8346_v63, 6  ;;  %v8343_v13 = vld [vmem:[#allocation2 + $0xb0] sm:$0x30] }
0x16ec   :  { %14082 = vtanh.f32 %v8295_v6 }
0x16ed   :  { %v8361_v9 = vsel %vm1047_vm1, %v8341_v25, %v8353_v35  ;;  %v8362_v6 = vsel %vm15265_vm2, %v8342_v51, %v8354_v17 }
0x16f3   :  { %v14077_v30 = vpop.eup %14076 }
0x16f4   :  { %v14079_v52 = vpop.eup %14078  ;;  %v8288_v31 = vmul.f32 0.5, %v14077_v30  ;;  %v8355_v30 = vrot.slane %v8347_v1, 6 }
0x16f5   :  { %v8292_v39 = vmul.f32 0.5, %v14079_v52  ;;  %v14081_v55 = vpop.eup %14080  ;;  %v8529_v52 = vrot.slane %v8361_v9, 4 }
0x16f6   :  { %v8289_v53 = vadd.f32 0.5, %v8288_v31  ;;  %v14083_v22 = vpop.eup %14082  ;;  %v8348_v31 = vld [vmem:[#allocation2 + $0x58] sm:$0xc] }
0x16f7   :  { %v8293_v4 = vadd.f32 0.5, %v8292_v39  ;;  %v8297_v34 = vmul.f32 0.5, %v14083_v22  ;;  %v8344_v22 = vld [vmem:[#allocation2 + $0xb8] sm:$0x30] }
0x16f8   :  { %v8300_v5 = vmul.f32 %v14081_v55, %v8289_v53  ;;  %v8363_v53 = vsel %vm15271_vm3, %v8343_v13, %v8355_v30 }
0x16f9   :  { %v8299_v36 = vmul.f32 %v8293_v4, %v17085_v26  ;;  %v8298_v23 = vadd.f32 0.5, %v8297_v34  ;;  %v17145_v26 = vld [vmem:[%s18094_s5] ss:$16 sps:$4 sm:$0xff]   ;;  %v8530_v4 = vrot.slane %v8362_v6, 4  ;;  %v8531_v63 = vrot.slane %v8363_v53, 4 }
0x16fb   :  { %v17133_v56 = vadd.f32 %v8300_v5, %v8299_v36 }
0x16fd   :  { %14084 = vtanh.f32 %v17133_v56 }
0x1707   :  { %v14085_v8 = vpop.eup %14084 }
0x1708   :  { %v8303_v12 = vmul.f32 %v14085_v8, %v8298_v23  ;;  %v8356_v8 = vrot.slane %v8348_v31, 6 }
0x170a   :  { %8304 = vst.msk [vmem:[#allocation3 + $0x15] sm:$0x1] %vm1367_vm5, %v8303_v12  ;;  %v8308_v50 = vpack.c.bf16 %v8303_v12, %v8303_v12  ;;  %v8364_v1 = vsel %vm15279_vm4, %v8344_v22, %v8356_v8 }
0x170b   :  { %8305 = vst.msk [vmem:[#allocation3 + $0xa] sm:$0x1] %vm1369_vm6, %v8303_v12  ;;  %v8532_v9 = vrot.slane %v8364_v1, 4  ;;  %v8680_v1 = vld [vmem:[#allocation2 + $0x50] sm:$0x3] }
0x170c   :  { %8306 = vst.msk [vmem:[#allocation3 + $0x34] sm:$0x2] %vm1371_vm7, %v8303_v12  ;;  %8570 = vmatmul.mubr.bf16.vlgmr.msra.gmra.mrb[136].mxu1 %v8308_v50  ;;  %8611 = vmatmul.mubr.bf16.vlgmr.msra.gmra.mrb[152].mxu0 %v8308_v50 }
0x170d   :  { %8307 = vst.msk [vmem:[#allocation3 + $0x29] sm:$0x2] %vm1373_vm8, %v8303_v12  ;;  %8902 = vmatprep.mubr.bf16.mxu1 %v14235_v60  ;;  %8943 = vmatprep.mubr.bf16.mxu0 %v14235_v60 }
0x170e   :  { %8871 = vmatpush1.bf16.msra.mxu1 %v17145_v26  ;;  %8912 = vmatpush1.bf16.msra.mxu0 %v17155_v15 }
0x170f   :  { %8872 = vmatprep.subr.bf16.mxu1 %v17165_v61  ;;  %8913 = vmatprep.subr.bf16.mxu0 %v17171_v16 }
0x1712   :  { %8873 = vmatpush1.bf16.msra.mxu1 %v17178_v62  ;;  %8914 = vmatpush1.bf16.msra.mxu0 %v17185_v0 }
0x1713   :  { %8874 = vmatprep.subr.bf16.mxu1 %v17190_v20  ;;  %8915 = vmatprep.subr.bf16.mxu0 %v17196_v33 }
0x1716   :  { %8875 = vmatpush1.bf16.msra.mxu1 %v17202_v27  ;;  %8916 = vmatpush1.bf16.msra.mxu0 %v17209_v21 }
0x1717   :  { %8876 = vmatprep.subr.bf16.mxu1 %v17214_v41  ;;  %8917 = vmatprep.subr.bf16.mxu0 %v17220_v28 }
0x171a   :  { %8877 = vmatpush1.bf16.msra.mxu1 %v17226_v54  ;;  %8918 = vmatpush1.bf16.msra.mxu0 %v17233_v18 }
0x171b   :  { %8878 = vmatprep.subr.bf16.mxu1 %v17238_v29  ;;  %8919 = vmatprep.subr.bf16.mxu0 %v17244_v40 }
0x171e   :  { %8879 = vmatpush1.bf16.msra.mxu1 %v17250_v32  ;;  %8920 = vmatpush1.bf16.msra.mxu0 %v17257_v19 }
0x171f   :  { %8880 = vmatprep.subr.bf16.mxu1 %v17262_v11  ;;  %8921 = vmatprep.subr.bf16.mxu0 %v17268_v10 }
0x1722   :  { %8881 = vmatpush1.bf16.msra.mxu1 %v17274_v2  ;;  %8922 = vmatpush1.bf16.msra.mxu0 %v17281_v58 }
0x1723   :  { %8882 = vmatprep.subr.bf16.mxu1 %v17286_v3  ;;  %8923 = vmatprep.subr.bf16.mxu0 %v17292_v38 }
0x1726   :  { %8883 = vmatpush1.bf16.msra.mxu1 %v17298_v24  ;;  %8924 = vmatpush1.bf16.msra.mxu0 %v17305_v44 }
0x1727   :  { %8884 = vmatprep.subr.bf16.mxu1 %v17310_v45  ;;  %8925 = vmatprep.subr.bf16.mxu0 %v17316_v46 }
0x172a   :  { %8885 = vmatpush1.bf16.msra.mxu1 %v17322_v42  ;;  %8926 = vmatpush1.bf16.msra.mxu0 %v17329_v49 }
0x172b   :  { %9191 = vmatprep.subr.bf16.mxu1 %v17150_v37  ;;  %9232 = vmatprep.subr.bf16.mxu0 %v17160_v14 }
0x17df   :  { %v8571_v39 = vpop.f32.mrb[136].mxu1  ;;  %v8612_v55 = vpop.f32.mrb[152].mxu0 }
0x17e0   :  { %v8572_v5 = vadd.f32 %v8571_v39, %v8529_v52  ;;  %v8573_v36 = vpop.f32.mrb[137].mxu1  ;;  %v8614_v34 = vpop.f32.mrb[153].mxu0  ;;  %v8613_v17 = vadd.f32 %v8612_v55, %v8531_v63  ;;  %v8679_v63 = vld [vmem:[#allocation2 + $0x48] sm:$0x3] }
0x17e1   :  { %v8574_v23 = vadd.f32 %v8573_v36, %v8530_v4  ;;  %v8575_v12 = vpop.f32.mrb[138].mxu1  ;;  %v8616_v50 = vpop.f32.mrb[154].mxu0  ;;  %v8615_v13 = vadd.f32 %v8614_v34, %v8532_v9 }
0x17e2   :  { %v8619_v7 = vmul.f32 0.5, %v8572_v5  ;;  %v8576_v25 = vpop.f32.mrb[139].mxu1  ;;  %v8617_v35 = vpop.f32.mrb[155].mxu0 }
0x17e3   :  { %v8623_v51 = vmul.f32 0.5, %v8574_v23  ;;  %v8628_v6 = vmul.f32 0.5, %v8615_v13  ;;  %v8674_v25 = vld [vmem:[#allocation2 + $0xa0] sm:$0xc0]  ;;  %v8676_v13 = vld [vmem:[#allocation2 + $0xb0] sm:$0xc0] }
0x17e4   :  { %14086 = vtanh.f32 %v8619_v7 }
0x17e5   :  { %14088 = vtanh.f32 %v8623_v51  ;;  %v8675_v51 = vld [vmem:[#allocation2 + $0xa8] sm:$0xc0] }
0x17e6   :  { %14090 = vtanh.f32 %v8613_v17  ;;  %v8687_v17 = vrot.slane %v8679_v63, 2 }
0x17e7   :  { %14092 = vtanh.f32 %v8628_v6 }
0x17e8   :  { %v8695_v6 = vsel %vm15265_vm2, %v8675_v51, %v8687_v17 }
0x17ee   :  { %v14087_v30 = vpop.eup %14086 }
0x17ef   :  { %v14089_v52 = vpop.eup %14088  ;;  %v8621_v31 = vmul.f32 0.5, %v14087_v30  ;;  %v8688_v30 = vrot.slane %v8680_v1, 2 }
0x17f0   :  { %v8625_v39 = vmul.f32 0.5, %v14089_v52  ;;  %v14091_v53 = vpop.eup %14090 }
0x17f1   :  { %v8622_v4 = vadd.f32 0.5, %v8621_v31  ;;  %v14093_v55 = vpop.eup %14092  ;;  %v8681_v31 = vld [vmem:[#allocation2 + $0x58] sm:$0x3] }
0x17f2   :  { %v8626_v5 = vadd.f32 0.5, %v8625_v39  ;;  %v8630_v22 = vmul.f32 0.5, %v14093_v55  ;;  %v8677_v55 = vld [vmem:[#allocation2 + $0xb8] sm:$0xc0] }
0x17f3   :  { %v8633_v36 = vmul.f32 %v14091_v53, %v8622_v4  ;;  %v8696_v4 = vsel %vm15271_vm3, %v8676_v13, %v8688_v30 }
0x17f4   :  { %v8632_v23 = vmul.f32 %v8626_v5, %v17133_v56  ;;  %v8631_v8 = vadd.f32 0.5, %v8630_v22  ;;  %v8678_v56 = vld [vmem:[#allocation2 + $0x40] sm:$0x3]  ;;  %v8863_v5 = vrot.slane %v8695_v6, 6  ;;  %v8864_v63 = vrot.slane %v8696_v4, 6 }
0x17f5   :  { %v8686_v35 = vrot.slane %v8678_v56, 2 }
0x17f6   :  { %v17345_v12 = vadd.f32 %v8633_v36, %v8632_v23 }
0x17f7   :  { %v8694_v9 = vsel %vm1047_vm1, %v8674_v25, %v8686_v35 }
0x17f8   :  { %14094 = vtanh.f32 %v17345_v12  ;;  %v8862_v52 = vrot.slane %v8694_v9, 6 }
0x1802   :  { %v14095_v34 = vpop.eup %14094 }
0x1803   :  { %v8636_v50 = vmul.f32 %v14095_v34, %v8631_v8  ;;  %v8689_v34 = vrot.slane %v8681_v31, 2 }
0x1805   :  { %8637 = vst.msk [vmem:[#allocation3 + $0x16] sm:$0x1] %vm1367_vm5, %v8636_v50  ;;  %v8641_v7 = vpack.c.bf16 %v8636_v50, %v8636_v50  ;;  %v8697_v1 = vsel %vm15279_vm4, %v8677_v55, %v8689_v34 }
0x1806   :  { %8638 = vst.msk [vmem:[#allocation3 + $0x9] sm:$0x1] %vm1369_vm6, %v8636_v50  ;;  %v8865_v9 = vrot.slane %v8697_v1, 6 }
0x1807   :  { %8639 = vst.msk [vmem:[#allocation3 + $0x35] sm:$0x2] %vm1371_vm7, %v8636_v50  ;;  %8903 = vmatmul.mubr.bf16.vlgmr.msra.gmra.mrb[140].mxu1 %v8641_v7  ;;  %8944 = vmatmul.mubr.bf16.vlgmr.msra.gmra.mrb[156].mxu0 %v8641_v7 }
0x1808   :  { %8640 = vst.msk [vmem:[#allocation3 + $0x28] sm:$0x2] %vm1373_vm8, %v8636_v50  ;;  %9192 = vmatpush1.bf16.msra.mxu1 %v17145_v26  ;;  %9233 = vmatpush1.bf16.msra.mxu0 %v17155_v15 }
0x1809   :  { %9193 = vmatprep.subr.bf16.mxu1 %v17165_v61  ;;  %9234 = vmatprep.subr.bf16.mxu0 %v17171_v16 }
0x180a   :  { %9223 = vmatprep.mubr.bf16.mxu1 %v14235_v60  ;;  %9264 = vmatprep.mubr.bf16.mxu0 %v14235_v60 }
0x180c   :  { %9194 = vmatpush1.bf16.msra.mxu1 %v17178_v62  ;;  %9235 = vmatpush1.bf16.msra.mxu0 %v17185_v0 }
0x180d   :  { %9195 = vmatprep.subr.bf16.mxu1 %v17190_v20  ;;  %9236 = vmatprep.subr.bf16.mxu0 %v17196_v33 }
0x1810   :  { %9196 = vmatpush1.bf16.msra.mxu1 %v17202_v27  ;;  %9237 = vmatpush1.bf16.msra.mxu0 %v17209_v21 }
0x1811   :  { %9197 = vmatprep.subr.bf16.mxu1 %v17214_v41  ;;  %9238 = vmatprep.subr.bf16.mxu0 %v17220_v28 }
0x1814   :  { %9198 = vmatpush1.bf16.msra.mxu1 %v17226_v54  ;;  %9239 = vmatpush1.bf16.msra.mxu0 %v17233_v18 }
0x1815   :  { %9199 = vmatprep.subr.bf16.mxu1 %v17238_v29  ;;  %9240 = vmatprep.subr.bf16.mxu0 %v17244_v40 }
0x1818   :  { %9200 = vmatpush1.bf16.msra.mxu1 %v17250_v32  ;;  %9241 = vmatpush1.bf16.msra.mxu0 %v17257_v19 }
0x1819   :  { %9201 = vmatprep.subr.bf16.mxu1 %v17262_v11  ;;  %9242 = vmatprep.subr.bf16.mxu0 %v17268_v10 }
0x181c   :  { %9202 = vmatpush1.bf16.msra.mxu1 %v17274_v2  ;;  %9243 = vmatpush1.bf16.msra.mxu0 %v17281_v58 }
0x181d   :  { %9203 = vmatprep.subr.bf16.mxu1 %v17286_v3  ;;  %9244 = vmatprep.subr.bf16.mxu0 %v17292_v38 }
0x1820   :  { %9204 = vmatpush1.bf16.msra.mxu1 %v17298_v24  ;;  %9245 = vmatpush1.bf16.msra.mxu0 %v17305_v44 }
0x1821   :  { %9205 = vmatprep.subr.bf16.mxu1 %v17310_v45  ;;  %9246 = vmatprep.subr.bf16.mxu0 %v17316_v46 }
0x1824   :  { %9206 = vmatpush1.bf16.msra.mxu1 %v17322_v42  ;;  %9247 = vmatpush1.bf16.msra.mxu0 %v17329_v49 }
0x1825   :  { %9524 = vmatprep.subr.bf16.mxu1 %v17150_v37  ;;  %9565 = vmatprep.subr.bf16.mxu0 %v17160_v14 }
0x18da   :  { %v8904_v39 = vpop.f32.mrb[140].mxu1  ;;  %v8945_v53 = vpop.f32.mrb[156].mxu0 }
0x18db   :  { %v8905_v36 = vadd.f32 %v8904_v39, %v8862_v52  ;;  %v8906_v23 = vpop.f32.mrb[141].mxu1  ;;  %v8947_v22 = vpop.f32.mrb[157].mxu0  ;;  %v8946_v17 = vadd.f32 %v8945_v53, %v8864_v63 }
0x18dc   :  { %v8907_v8 = vadd.f32 %v8906_v23, %v8863_v5  ;;  %v8908_v50 = vpop.f32.mrb[142].mxu1  ;;  %v8949_v7 = vpop.f32.mrb[158].mxu0  ;;  %v8948_v13 = vadd.f32 %v8947_v22, %v8865_v9  ;;  %v9011_v9 = vld [vmem:[#allocation2 + $0x20] sm:$0xc0] }
0x18dd   :  { %v8952_v56 = vmul.f32 0.5, %v8905_v36  ;;  %v8909_v25 = vpop.f32.mrb[143].mxu1  ;;  %v8950_v35 = vpop.f32.mrb[159].mxu0 }
0x18de   :  { %v8956_v51 = vmul.f32 0.5, %v8907_v8  ;;  %v8961_v6 = vmul.f32 0.5, %v8948_v13  ;;  %v9012_v13 = vld [vmem:[#allocation2 + $0x28] sm:$0xc0] }
0x18df   :  { %14096 = vtanh.f32 %v8952_v56 }
0x18e0   :  { %14098 = vtanh.f32 %v8956_v51 }
0x18e1   :  { %14100 = vtanh.f32 %v8946_v17 }
0x18e2   :  { %14102 = vtanh.f32 %v8961_v6  ;;  %v9007_v6 = vld [vmem:[#allocation2 + $0xc0] sm:$0x3] }
0x18e9   :  { %v14097_v30 = vpop.eup %14096 }
0x18ea   :  { %v14099_v52 = vpop.eup %14098  ;;  %v8954_v31 = vmul.f32 0.5, %v14097_v30  ;;  %v9019_v30 = vrot.slane %v9011_v9, 6 }
0x18eb   :  { %v8958_v39 = vmul.f32 0.5, %v14099_v52  ;;  %v14101_v4 = vpop.eup %14100  ;;  %v9008_v52 = vld [vmem:[#allocation2 + $0xc8] sm:$0x3] }
0x18ec   :  { %v8955_v5 = vadd.f32 0.5, %v8954_v31  ;;  %v14103_v53 = vpop.eup %14102  ;;  %v9013_v31 = vld [vmem:[#allocation2 + $0x30] sm:$0xc0] }
0x18ed   :  { %v8959_v36 = vadd.f32 0.5, %v8958_v39  ;;  %v8963_v55 = vmul.f32 0.5, %v14103_v53  ;;  %v9020_v39 = vrot.slane %v9012_v13, 6 }
0x18ee   :  { %v8966_v23 = vmul.f32 %v14101_v4, %v8955_v5  ;;  %v9027_v5 = vsel %vm1047_vm1, %v9007_v6, %v9019_v30 }
0x18ef   :  { %v8965_v8 = vmul.f32 %v8959_v36, %v17345_v12  ;;  %v8964_v34 = vadd.f32 0.5, %v8963_v55  ;;  %v12972_v12 = vld [vmem:[%s18095_s6] ss:$0 sm:$0xff]  ;;  %v9028_v53 = vsel %vm15265_vm2, %v9008_v52, %v9020_v39 }
0x18f1   :  { %v17395_v50 = vadd.f32 %v8966_v23, %v8965_v8  ;;  %v9009_v8 = vld [vmem:[#allocation2 + $0xd0] sm:$0x3] }
0x18f3   :  { %14104 = vtanh.f32 %v17395_v50 }
0x18fd   :  { %v14105_v22 = vpop.eup %14104 }
0x18fe   :  { %v8969_v7 = vmul.f32 %v14105_v22, %v8964_v34 }
0x1900   :  { %8970 = vst.msk [vmem:[#allocation3 + $0x17] sm:$0x1] %vm1367_vm5, %v8969_v7  ;;  %v8974_v56 = vpack.c.bf16 %v8969_v7, %v8969_v7 }
0x1901   :  { %8971 = vst.msk [vmem:[#allocation3 + $0x8] sm:$0x1] %vm1369_vm6, %v8969_v7 }
0x1902   :  { %8972 = vst.msk [vmem:[#allocation3 + $0x36] sm:$0x2] %vm1371_vm7, %v8969_v7  ;;  %9224 = vmatmul.mubr.bf16.vlgmr.msra.gmra.mrb[144].mxu1 %v8974_v56  ;;  %9265 = vmatmul.mubr.bf16.vlgmr.msra.gmra.mrb[160].mxu0 %v8974_v56 }
0x1903   :  { %8973 = vst.msk [vmem:[#allocation3 + $0x27] sm:$0x2] %vm1373_vm8, %v8969_v7  ;;  %9525 = vmatpush1.bf16.msra.mxu1 %v17145_v26  ;;  %9566 = vmatpush1.bf16.msra.mxu0 %v17155_v15 }
0x1904   :  { %9526 = vmatprep.subr.bf16.mxu1 %v17165_v61  ;;  %9567 = vmatprep.subr.bf16.mxu0 %v17171_v16 }
0x1905   :  { %9556 = vmatprep.mubr.bf16.mxu1 %v14235_v60  ;;  %9597 = vmatprep.mubr.bf16.mxu0 %v14235_v60 }
0x1907   :  { %v11616_v63 = vld [vmem:[#allocation3 + $0x10] sm:$0xff]  ;;  %9527 = vmatpush1.bf16.msra.mxu1 %v17178_v62  ;;  %9568 = vmatpush1.bf16.msra.mxu0 %v17185_v0 }
0x1908   :  { %v11615_v25 = vld [vmem:[#allocation3 + $0x8] sm:$0xff]  ;;  %v11627_v35 = vmul.f32 %v12972_v12, %v11616_v63  ;;  %9528 = vmatprep.subr.bf16.mxu1 %v17190_v20  ;;  %9569 = vmatprep.subr.bf16.mxu0 %v17196_v33 }
0x1909   :  { %v11626_v51 = vmul.f32 %v12972_v12, %v11615_v25 }
0x190a   :  { %v11726_v1 = vld [vmem:[#allocation3 + $0x28] sm:$0xff]  ;;  %11633 = vadd.xlane.f32.xlu1 %v11627_v35 }
0x190b   :  { %11631 = vadd.xlane.f32.xlu0 %v11626_v51  ;;  %9529 = vmatpush1.bf16.msra.mxu1 %v17202_v27  ;;  %v11730_v17 = vmul.f32 %v12972_v12, %v11726_v1  ;;  %v9014_v12 = vld [vmem:[#allocation2 + $0x38] sm:$0xc0] }
0x190c   :  { %9570 = vmatpush1.bf16.msra.mxu0 %v17209_v21  ;;  %9530 = vmatprep.subr.bf16.mxu1 %v17214_v41  ;;  %v9022_v9 = vrot.slane %v9014_v12, 6 }
0x190d   :  { %9571 = vmatprep.subr.bf16.mxu0 %v17220_v28 }
0x190e   :  { %11735 = vadd.xlane.f32.xlu1 %v11730_v17  ;;  %v9010_v17 = vld [vmem:[#allocation2 + $0xd8] sm:$0x3] }
0x190f   :  { %9531 = vmatpush1.bf16.msra.mxu1 %v17226_v54  ;;  %v9030_v13 = vsel %vm15279_vm4, %v9010_v17, %v9022_v9 }
0x1910   :  { %9572 = vmatpush1.bf16.msra.mxu0 %v17233_v18  ;;  %9532 = vmatprep.subr.bf16.mxu1 %v17238_v29 }
0x1911   :  { %9573 = vmatprep.subr.bf16.mxu0 %v17244_v40 }
0x1913   :  { %9533 = vmatpush1.bf16.msra.mxu1 %v17250_v32 }
0x1914   :  { %9574 = vmatpush1.bf16.msra.mxu0 %v17257_v19  ;;  %9534 = vmatprep.subr.bf16.mxu1 %v17262_v11 }
0x1915   :  { %9575 = vmatprep.subr.bf16.mxu0 %v17268_v10 }
0x1917   :  { %9535 = vmatpush1.bf16.msra.mxu1 %v17274_v2 }
0x1918   :  { %9576 = vmatpush1.bf16.msra.mxu0 %v17281_v58  ;;  %9536 = vmatprep.subr.bf16.mxu1 %v17286_v3 }
0x1919   :  { %9577 = vmatprep.subr.bf16.mxu0 %v17292_v38 }
0x191b   :  { %9537 = vmatpush1.bf16.msra.mxu1 %v17298_v24 }
0x191c   :  { %9578 = vmatpush1.bf16.msra.mxu0 %v17305_v44  ;;  %9538 = vmatprep.subr.bf16.mxu1 %v17310_v45 }
0x191d   :  { %9579 = vmatprep.subr.bf16.mxu0 %v17316_v46 }
0x191f   :  { %9539 = vmatpush1.bf16.msra.mxu1 %v17322_v42 }
0x1920   :  { %9580 = vmatpush1.bf16.msra.mxu0 %v17329_v49  ;;  %9857 = vmatprep.subr.bf16.mxu1 %v17150_v37 }
0x1921   :  { %9898 = vmatprep.subr.bf16.mxu0 %v17160_v14  ;;  %v9021_v14 = vrot.slane %v9013_v31, 6 }
0x1923   :  { %v9029_v35 = vsel %vm15271_vm3, %v9009_v8, %v9021_v14 }
0x19d5   :  { %v9225_v4 = vpop.f32.mrb[144].mxu1  ;;  %v9266_v36 = vpop.f32.mrb[160].mxu0 }
0x19d6   :  { %v9226_v23 = vadd.f32 %v9225_v4, %v9027_v5  ;;  %v9227_v37 = vpop.f32.mrb[145].mxu1  ;;  %v9268_v55 = vpop.f32.mrb[161].mxu0  ;;  %v9267_v1 = vadd.f32 %v9266_v36, %v9029_v35 }
0x19d7   :  { %v9228_v34 = vadd.f32 %v9227_v37, %v9028_v53  ;;  %v9229_v22 = vpop.f32.mrb[146].mxu1  ;;  %v9270_v7 = vpop.f32.mrb[162].mxu0  ;;  %v9269_v6 = vadd.f32 %v9268_v55, %v9030_v13 }
0x19d8   :  { %v9273_v56 = vmul.f32 0.5, %v9226_v23  ;;  %v9230_v63 = vpop.f32.mrb[147].mxu1  ;;  %v9271_v25 = vpop.f32.mrb[163].mxu0 }
0x19d9   :  { %v9277_v51 = vmul.f32 0.5, %v9228_v34  ;;  %v9282_v30 = vmul.f32 0.5, %v9269_v6 }
0x19da   :  { %14106 = vtanh.f32 %v9273_v56 }
0x19db   :  { %14108 = vtanh.f32 %v9277_v51 }
0x19dc   :  { %14110 = vtanh.f32 %v9267_v1 }
0x19dd   :  { %14112 = vtanh.f32 %v9282_v30 }
0x19e4   :  { %v14107_v52 = vpop.eup %14106 }
0x19e5   :  { %v14109_v31 = vpop.eup %14108  ;;  %v9275_v39 = vmul.f32 0.5, %v14107_v52 }
0x19e6   :  { %v9279_v5 = vmul.f32 0.5, %v14109_v31  ;;  %v14111_v23 = vpop.eup %14110 }
0x19e7   :  { %v9276_v4 = vadd.f32 0.5, %v9275_v39  ;;  %v14113_v14 = vpop.eup %14112 }
0x19e8   :  { %v9280_v8 = vadd.f32 0.5, %v9279_v5  ;;  %v9284_v34 = vmul.f32 0.5, %v14113_v14  ;;  %v17513_v14 = vld [vmem:[%s18094_s5 + $0x4] ss:$16 sps:$4 sm:$0xff]  }
0x19e9   :  { %v9287_v53 = vmul.f32 %v14111_v23, %v9276_v4 }
0x19ea   :  { %v9286_v36 = vmul.f32 %v9280_v8, %v17395_v50  ;;  %v9285_v22 = vadd.f32 0.5, %v9284_v34  ;;  %v17518_v34 = vld [vmem:[%s18094_s5 + $0x8] ss:$16 sps:$4 sm:$0xff]  }
0x19ec   :  { %v17448_v37 = vadd.f32 %v9287_v53, %v9286_v36 }
0x19ee   :  { %14114 = vtanh.f32 %v17448_v37 }
0x19f8   :  { %v14115_v55 = vpop.eup %14114 }
0x19f9   :  { %v9290_v7 = vmul.f32 %v14115_v55, %v9285_v22  ;;  %v17523_v22 = vld [vmem:[%s18094_s5 + $0xc] ss:$16 sps:$4 sm:$0xff]   ;;  %v17528_v55 = vld [vmem:[%s18094_s5 + $0x24] ss:$16 sps:$4 sm:$0xff]  }
0x19fb   :  { %9291 = vst.msk [vmem:[#allocation3 + $0x18] sm:$0x1] %vm1367_vm5, %v9290_v7  ;;  %v9295_v56 = vpack.c.bf16 %v9290_v7, %v9290_v7 }
0x19fc   :  { %9292 = vst.msk [vmem:[#allocation3 + $0x7] sm:$0x1] %vm1369_vm6, %v9290_v7 }
0x19fd   :  { %9293 = vst.msk [vmem:[#allocation3 + $0x37] sm:$0x2] %vm1371_vm7, %v9290_v7  ;;  %9557 = vmatmul.mubr.bf16.vlgmr.msra.gmra.mrb[148].mxu1 %v9295_v56  ;;  %9598 = vmatmul.mubr.bf16.vlgmr.msra.gmra.mrb[164].mxu0 %v9295_v56  ;;  %v17541_v56 = vld [vmem:[%s18094_s5 + $0x20] ss:$16 sps:$4 sm:$0xff]  }
0x19fe   :  { %9294 = vst.msk [vmem:[#allocation3 + $0x26] sm:$0x2] %vm1373_vm8, %v9290_v7  ;;  %9858 = vmatpush1.bf16.msra.mxu1 %v17145_v26  ;;  %9899 = vmatpush1.bf16.msra.mxu0 %v17155_v15  ;;  %v9332_v26 = vld [vmem:[#allocation2 + $0x20] sm:$0x30]  ;;  %v9333_v15 = vld [vmem:[#allocation2 + $0x28] sm:$0x30] }
0x19ff   :  { %9859 = vmatprep.subr.bf16.mxu1 %v17165_v61  ;;  %9900 = vmatprep.subr.bf16.mxu0 %v17171_v16  ;;  %v9328_v61 = vld [vmem:[#allocation2 + $0xc0] sm:$0xc]  ;;  %v9340_v16 = vrot.slane %v9332_v26, 2  ;;  %v17534_v7 = vld [vmem:[%s18094_s5 + $0x2c] ss:$16 sps:$4 sm:$0xff]  }
0x1a00   :  { %9889 = vmatprep.mubr.bf16.mxu1 %v14235_v60  ;;  %9930 = vmatprep.mubr.bf16.mxu0 %v14235_v60  ;;  %v17548_v26 = vld [vmem:[%s18094_s5 + $0x28] ss:$16 sps:$4 sm:$0xff]  }
0x1a02   :  { %9860 = vmatpush1.bf16.msra.mxu1 %v17178_v62  ;;  %9901 = vmatpush1.bf16.msra.mxu0 %v17185_v0  ;;  %v9329_v62 = vld [vmem:[#allocation2 + $0xc8] sm:$0xc]  ;;  %v9334_v0 = vld [vmem:[#allocation2 + $0x30] sm:$0x30] }
0x1a03   :  { %9861 = vmatprep.subr.bf16.mxu1 %v17190_v20  ;;  %9902 = vmatprep.subr.bf16.mxu0 %v17196_v33  ;;  %v9341_v20 = vrot.slane %v9333_v15, 2  ;;  %v9348_v33 = vsel %vm1047_vm1, %v9328_v61, %v9340_v16  ;;  %v17553_v15 = vld [vmem:[%s18094_s5 + $0x44] ss:$16 sps:$4 sm:$0xff]   ;;  %v17559_v61 = vld [vmem:[%s18094_s5 + $0x4c] ss:$16 sps:$4 sm:$0xff]  }
0x1a04   :  { %v17565_v16 = vld [vmem:[%s18094_s5 + $0x40] ss:$16 sps:$4 sm:$0xff]  }
0x1a06   :  { %9862 = vmatpush1.bf16.msra.mxu1 %v17202_v27  ;;  %9903 = vmatpush1.bf16.msra.mxu0 %v17209_v21  ;;  %v9330_v27 = vld [vmem:[#allocation2 + $0xd0] sm:$0xc]  ;;  %v9349_v21 = vsel %vm15265_vm2, %v9329_v62, %v9341_v20  ;;  %v17572_v62 = vld [vmem:[%s18094_s5 + $0x48] ss:$16 sps:$4 sm:$0xff]   ;;  %v17583_v20 = vld [vmem:[%s18094_s5 + $0x6c] ss:$16 sps:$4 sm:$0xff]  }
0x1a07   :  { %9863 = vmatprep.subr.bf16.mxu1 %v17214_v41  ;;  %9904 = vmatprep.subr.bf16.mxu0 %v17220_v28  ;;  %v9342_v41 = vrot.slane %v9334_v0, 2  ;;  %v9516_v28 = vrot.slane %v9348_v33, 2  ;;  %v17577_v0 = vld [vmem:[%s18094_s5 + $0x64] ss:$16 sps:$4 sm:$0xff]   ;;  %v17589_v33 = vld [vmem:[%s18094_s5 + $0x60] ss:$16 sps:$4 sm:$0xff]  }
0x1a0a   :  { %9864 = vmatpush1.bf16.msra.mxu1 %v17226_v54  ;;  %9905 = vmatpush1.bf16.msra.mxu0 %v17233_v18  ;;  %v9335_v54 = vld [vmem:[#allocation2 + $0x38] sm:$0x30] }
0x1a0b   :  { %9865 = vmatprep.subr.bf16.mxu1 %v17238_v29  ;;  %9906 = vmatprep.subr.bf16.mxu0 %v17244_v40  ;;  %v9350_v29 = vsel %vm15271_vm3, %v9330_v27, %v9342_v41  ;;  %v17596_v27 = vld [vmem:[%s18094_s5 + $0x68] ss:$16 sps:$4 sm:$0xff]   ;;  %v17607_v41 = vld [vmem:[%s18094_s5 + $0x8c] ss:$16 sps:$4 sm:$0xff]  }
0x1a0e   :  { %9866 = vmatpush1.bf16.msra.mxu1 %v17250_v32  ;;  %9907 = vmatpush1.bf16.msra.mxu0 %v17257_v19  ;;  %v9517_v32 = vrot.slane %v9349_v21, 2  ;;  %v17601_v21 = vld [vmem:[%s18094_s5 + $0x84] ss:$16 sps:$4 sm:$0xff]  }
0x1a0f   :  { %9867 = vmatprep.subr.bf16.mxu1 %v17262_v11  ;;  %9908 = vmatprep.subr.bf16.mxu0 %v17268_v10  ;;  %v9331_v10 = vld [vmem:[#allocation2 + $0xd8] sm:$0xc] }
0x1a12   :  { %9868 = vmatpush1.bf16.msra.mxu1 %v17274_v2  ;;  %9909 = vmatpush1.bf16.msra.mxu0 %v17281_v58 }
0x1a13   :  { %9869 = vmatprep.subr.bf16.mxu1 %v17286_v3  ;;  %9910 = vmatprep.subr.bf16.mxu0 %v17292_v38  ;;  %v9343_v3 = vrot.slane %v9335_v54, 2  ;;  %v17620_v54 = vld [vmem:[%s18094_s5 + $0x88] ss:$16 sps:$4 sm:$0xff]  }
0x1a15   :  { %v9351_v50 = vsel %vm15279_vm4, %v9331_v10, %v9343_v3  ;;  %v17661_v10 = vld [vmem:[%s18094_s5 + $0xc0] ss:$16 sps:$4 sm:$0xff]   ;;  %v17679_v3 = vld [vmem:[%s18094_s5 + $0xec] ss:$16 sps:$4 sm:$0xff]  }
0x1a16   :  { %9870 = vmatpush1.bf16.msra.mxu1 %v17298_v24  ;;  %9911 = vmatpush1.bf16.msra.mxu0 %v17305_v44  ;;  %v9519_v63 = vrot.slane %v9351_v50, 2  ;;  %v9667_v50 = vld [vmem:[#allocation2 + $0x30] sm:$0xc] }
0x1a17   :  { %9871 = vmatprep.subr.bf16.mxu1 %v17310_v45  ;;  %9912 = vmatprep.subr.bf16.mxu0 %v17316_v46  ;;  %v9518_v45 = vrot.slane %v9350_v29, 2  ;;  %v17631_v29 = vld [vmem:[%s18094_s5 + $0xac] ss:$16 sps:$4 sm:$0xff]  }
0x1a1a   :  { %9872 = vmatpush1.bf16.msra.mxu1 %v17322_v42  ;;  %9913 = vmatpush1.bf16.msra.mxu0 %v17329_v49 }
0x1a1b   :  { %10190 = vmatprep.subr.bf16.mxu1 %v17513_v14  ;;  %10231 = vmatprep.subr.bf16.mxu0 %v17523_v22 }
0x1ad0   :  { %v9558_v18 = vpop.f32.mrb[148].mxu1  ;;  %v9599_v40 = vpop.f32.mrb[164].mxu0 }
0x1ad1   :  { %v9559_v19 = vadd.f32 %v9558_v18, %v9516_v28  ;;  %v9560_v11 = vpop.f32.mrb[149].mxu1  ;;  %v9601_v2 = vpop.f32.mrb[165].mxu0  ;;  %v9600_v12 = vadd.f32 %v9599_v40, %v9518_v45  ;;  %v17613_v28 = vld [vmem:[%s18094_s5 + $0x80] ss:$16 sps:$4 sm:$0xff]   ;;  %v17625_v18 = vld [vmem:[%s18094_s5 + $0xa4] ss:$16 sps:$4 sm:$0xff]  }
0x1ad2   :  { %v9561_v58 = vadd.f32 %v9560_v11, %v9517_v32  ;;  %v9562_v38 = vpop.f32.mrb[150].mxu1  ;;  %v9603_v24 = vpop.f32.mrb[166].mxu0  ;;  %v9602_v25 = vadd.f32 %v9601_v2, %v9519_v63  ;;  %v17637_v40 = vld [vmem:[%s18094_s5 + $0xa0] ss:$16 sps:$4 sm:$0xff]   ;;  %v17644_v32 = vld [vmem:[%s18094_s5 + $0xa8] ss:$16 sps:$4 sm:$0xff]  }
0x1ad3   :  { %v9606_v44 = vmul.f32 0.5, %v9559_v19  ;;  %v9563_v46 = vpop.f32.mrb[151].mxu1  ;;  %v9604_v42 = vpop.f32.mrb[167].mxu0  ;;  %v17649_v19 = vld [vmem:[%s18094_s5 + $0xc4] ss:$16 sps:$4 sm:$0xff]  }
0x1ad4   :  { %v9610_v49 = vmul.f32 0.5, %v9561_v58  ;;  %v9615_v35 = vmul.f32 0.5, %v9602_v25  ;;  %v17655_v11 = vld [vmem:[%s18094_s5 + $0xcc] ss:$16 sps:$4 sm:$0xff]   ;;  %v17668_v2 = vld [vmem:[%s18094_s5 + $0xc8] ss:$16 sps:$4 sm:$0xff]  }
0x1ad5   :  { %14116 = vtanh.f32 %v9606_v44  ;;  %v17673_v58 = vld [vmem:[%s18094_s5 + $0xe4] ss:$16 sps:$4 sm:$0xff]   ;;  %v17685_v38 = vld [vmem:[%s18094_s5 + $0xe0] ss:$16 sps:$4 sm:$0xff]   ;;  %v17692_v24 = vld [vmem:[%s18094_s5 + $0xe8] ss:$16 sps:$4 sm:$0xff]  }
0x1ad6   :  { %14118 = vtanh.f32 %v9610_v49  ;;  %v9665_v44 = vld [vmem:[#allocation2 + $0x20] sm:$0xc]  ;;  %v9666_v45 = vld [vmem:[#allocation2 + $0x28] sm:$0xc]  ;;  %v9661_v46 = vld [vmem:[#allocation2 + $0xc0] sm:$0x30] }
0x1ad7   :  { %14120 = vtanh.f32 %v9600_v12  ;;  %v9673_v42 = vrot.slane %v9665_v44, 6  ;;  %v9662_v49 = vld [vmem:[#allocation2 + $0xc8] sm:$0x30]  ;;  %v9674_v12 = vrot.slane %v9666_v45, 6  ;;  %v9663_v25 = vld [vmem:[#allocation2 + $0xd0] sm:$0x30] }
0x1ad8   :  { %14122 = vtanh.f32 %v9615_v35 }
0x1ad9   :  { %v9681_v63 = vsel %vm1047_vm1, %v9661_v46, %v9673_v42  ;;  %v9682_v35 = vsel %vm15265_vm2, %v9662_v49, %v9674_v12 }
0x1adf   :  { %v14117_v51 = vpop.eup %14116 }
0x1ae0   :  { %v14119_v1 = vpop.eup %14118  ;;  %v9608_v17 = vmul.f32 0.5, %v14117_v51  ;;  %v9675_v51 = vrot.slane %v9667_v50, 6 }
0x1ae1   :  { %v9612_v9 = vmul.f32 0.5, %v14119_v1  ;;  %v14121_v6 = vpop.eup %14120  ;;  %v9849_v1 = vrot.slane %v9681_v63, 4 }
0x1ae2   :  { %v9609_v13 = vadd.f32 0.5, %v9608_v17  ;;  %v14123_v5 = vpop.eup %14122  ;;  %v9668_v17 = vld [vmem:[#allocation2 + $0x38] sm:$0xc] }
0x1ae3   :  { %v9613_v30 = vadd.f32 0.5, %v9612_v9  ;;  %v9617_v4 = vmul.f32 0.5, %v14123_v5  ;;  %v9664_v5 = vld [vmem:[#allocation2 + $0xd8] sm:$0x30] }
0x1ae4   :  { %v9620_v52 = vmul.f32 %v14121_v6, %v9609_v13  ;;  %v9683_v13 = vsel %vm15271_vm3, %v9663_v25, %v9675_v51 }
0x1ae5   :  { %v9619_v31 = vmul.f32 %v9613_v30, %v17448_v37  ;;  %v9618_v23 = vadd.f32 0.5, %v9617_v4  ;;  %v17508_v37 = vld [vmem:[%s18094_s5] ss:$16 sps:$4 sm:$0xff]   ;;  %v9850_v30 = vrot.slane %v9682_v35, 4  ;;  %v9851_v45 = vrot.slane %v9683_v13, 4 }
0x1ae7   :  { %v17496_v39 = vadd.f32 %v9620_v52, %v9619_v31 }
0x1ae9   :  { %14124 = vtanh.f32 %v17496_v39 }
0x1af3   :  { %v14125_v8 = vpop.eup %14124 }
0x1af4   :  { %v9623_v53 = vmul.f32 %v14125_v8, %v9618_v23  ;;  %v9676_v8 = vrot.slane %v9668_v17, 6 }
0x1af6   :  { %9624 = vst.msk [vmem:[#allocation3 + $0x19] sm:$0x1] %vm1367_vm5, %v9623_v53  ;;  %v9628_v36 = vpack.c.bf16 %v9623_v53, %v9623_v53  ;;  %v9684_v50 = vsel %vm15279_vm4, %v9664_v5, %v9676_v8 }
0x1af7   :  { %9625 = vst.msk [vmem:[#allocation3 + $0x6] sm:$0x1] %vm1369_vm6, %v9623_v53  ;;  %v9852_v63 = vrot.slane %v9684_v50, 4  ;;  %v10000_v50 = vld [vmem:[#allocation2 + $0x30] sm:$0x3] }
0x1af8   :  { %9626 = vst.msk [vmem:[#allocation3 + $0x38] sm:$0x2] %vm1371_vm7, %v9623_v53  ;;  %9890 = vmatmul.mubr.bf16.vlgmr.msra.gmra.mrb[152].mxu1 %v9628_v36  ;;  %9931 = vmatmul.mubr.bf16.vlgmr.msra.gmra.mrb[168].mxu0 %v9628_v36 }
0x1af9   :  { %9627 = vst.msk [vmem:[#allocation3 + $0x25] sm:$0x2] %vm1373_vm8, %v9623_v53  ;;  %10222 = vmatprep.mubr.bf16.mxu1 %v14235_v60  ;;  %10263 = vmatprep.mubr.bf16.mxu0 %v14235_v60 }
0x1afa   :  { %10191 = vmatpush1.bf16.msra.mxu1 %v17508_v37  ;;  %10232 = vmatpush1.bf16.msra.mxu0 %v17518_v34 }
0x1afb   :  { %10192 = vmatprep.subr.bf16.mxu1 %v17528_v55  ;;  %10233 = vmatprep.subr.bf16.mxu0 %v17534_v7 }
0x1afe   :  { %10193 = vmatpush1.bf16.msra.mxu1 %v17541_v56  ;;  %10234 = vmatpush1.bf16.msra.mxu0 %v17548_v26 }
0x1aff   :  { %10194 = vmatprep.subr.bf16.mxu1 %v17553_v15  ;;  %10235 = vmatprep.subr.bf16.mxu0 %v17559_v61 }
0x1b02   :  { %10195 = vmatpush1.bf16.msra.mxu1 %v17565_v16  ;;  %10236 = vmatpush1.bf16.msra.mxu0 %v17572_v62 }
0x1b03   :  { %10196 = vmatprep.subr.bf16.mxu1 %v17577_v0  ;;  %10237 = vmatprep.subr.bf16.mxu0 %v17583_v20 }
0x1b06   :  { %10197 = vmatpush1.bf16.msra.mxu1 %v17589_v33  ;;  %10238 = vmatpush1.bf16.msra.mxu0 %v17596_v27 }
0x1b07   :  { %10198 = vmatprep.subr.bf16.mxu1 %v17601_v21  ;;  %10239 = vmatprep.subr.bf16.mxu0 %v17607_v41 }
0x1b0a   :  { %10199 = vmatpush1.bf16.msra.mxu1 %v17613_v28  ;;  %10240 = vmatpush1.bf16.msra.mxu0 %v17620_v54 }
0x1b0b   :  { %10200 = vmatprep.subr.bf16.mxu1 %v17625_v18  ;;  %10241 = vmatprep.subr.bf16.mxu0 %v17631_v29 }
0x1b0e   :  { %10201 = vmatpush1.bf16.msra.mxu1 %v17637_v40  ;;  %10242 = vmatpush1.bf16.msra.mxu0 %v17644_v32 }
0x1b0f   :  { %10202 = vmatprep.subr.bf16.mxu1 %v17649_v19  ;;  %10243 = vmatprep.subr.bf16.mxu0 %v17655_v11 }
0x1b12   :  { %10203 = vmatpush1.bf16.msra.mxu1 %v17661_v10  ;;  %10244 = vmatpush1.bf16.msra.mxu0 %v17668_v2 }
0x1b13   :  { %10204 = vmatprep.subr.bf16.mxu1 %v17673_v58  ;;  %10245 = vmatprep.subr.bf16.mxu0 %v17679_v3 }
0x1b16   :  { %10205 = vmatpush1.bf16.msra.mxu1 %v17685_v38  ;;  %10246 = vmatpush1.bf16.msra.mxu0 %v17692_v24 }
0x1b17   :  { %10511 = vmatprep.subr.bf16.mxu1 %v17513_v14  ;;  %10552 = vmatprep.subr.bf16.mxu0 %v17523_v22 }
0x1bcb   :  { %v9891_v9 = vpop.f32.mrb[152].mxu1  ;;  %v9932_v6 = vpop.f32.mrb[168].mxu0 }
0x1bcc   :  { %v9892_v52 = vadd.f32 %v9891_v9, %v9849_v1  ;;  %v9893_v31 = vpop.f32.mrb[153].mxu1  ;;  %v9934_v4 = vpop.f32.mrb[169].mxu0  ;;  %v9933_v12 = vadd.f32 %v9932_v6, %v9851_v45  ;;  %v9999_v45 = vld [vmem:[#allocation2 + $0x28] sm:$0x3] }
0x1bcd   :  { %v9894_v23 = vadd.f32 %v9893_v31, %v9850_v30  ;;  %v9895_v53 = vpop.f32.mrb[154].mxu1  ;;  %v9936_v36 = vpop.f32.mrb[170].mxu0  ;;  %v9935_v25 = vadd.f32 %v9934_v4, %v9852_v63 }
0x1bce   :  { %v9939_v44 = vmul.f32 0.5, %v9892_v52  ;;  %v9896_v46 = vpop.f32.mrb[155].mxu1  ;;  %v9937_v42 = vpop.f32.mrb[171].mxu0 }
0x1bcf   :  { %v9943_v49 = vmul.f32 0.5, %v9894_v23  ;;  %v9948_v35 = vmul.f32 0.5, %v9935_v25  ;;  %v9994_v46 = vld [vmem:[#allocation2 + $0xc0] sm:$0xc0]  ;;  %v9996_v25 = vld [vmem:[#allocation2 + $0xd0] sm:$0xc0] }
0x1bd0   :  { %14126 = vtanh.f32 %v9939_v44 }
0x1bd1   :  { %14128 = vtanh.f32 %v9943_v49  ;;  %v9995_v49 = vld [vmem:[#allocation2 + $0xc8] sm:$0xc0] }
0x1bd2   :  { %14130 = vtanh.f32 %v9933_v12  ;;  %v10007_v12 = vrot.slane %v9999_v45, 2 }
0x1bd3   :  { %14132 = vtanh.f32 %v9948_v35 }
0x1bd4   :  { %v10015_v35 = vsel %vm15265_vm2, %v9995_v49, %v10007_v12 }
0x1bda   :  { %v14127_v51 = vpop.eup %14126 }
0x1bdb   :  { %v14129_v1 = vpop.eup %14128  ;;  %v9941_v17 = vmul.f32 0.5, %v14127_v51  ;;  %v10008_v51 = vrot.slane %v10000_v50, 2 }
0x1bdc   :  { %v9945_v9 = vmul.f32 0.5, %v14129_v1  ;;  %v14131_v13 = vpop.eup %14130 }
0x1bdd   :  { %v9942_v30 = vadd.f32 0.5, %v9941_v17  ;;  %v14133_v6 = vpop.eup %14132  ;;  %v10001_v17 = vld [vmem:[#allocation2 + $0x38] sm:$0x3] }
0x1bde   :  { %v9946_v52 = vadd.f32 0.5, %v9945_v9  ;;  %v9950_v5 = vmul.f32 0.5, %v14133_v6  ;;  %v9997_v6 = vld [vmem:[#allocation2 + $0xd8] sm:$0xc0] }
0x1bdf   :  { %v9953_v31 = vmul.f32 %v14131_v13, %v9942_v30  ;;  %v10016_v30 = vsel %vm15271_vm3, %v9996_v25, %v10008_v51 }
0x1be0   :  { %v9952_v23 = vmul.f32 %v9946_v52, %v17496_v39  ;;  %v9951_v8 = vadd.f32 0.5, %v9950_v5  ;;  %v9998_v39 = vld [vmem:[#allocation2 + $0x20] sm:$0x3]  ;;  %v10183_v52 = vrot.slane %v10015_v35, 6  ;;  %v10184_v45 = vrot.slane %v10016_v30, 6 }
0x1be1   :  { %v10006_v42 = vrot.slane %v9998_v39, 2 }
0x1be2   :  { %v17708_v53 = vadd.f32 %v9953_v31, %v9952_v23 }
0x1be3   :  { %v10014_v63 = vsel %vm1047_vm1, %v9994_v46, %v10006_v42 }
0x1be4   :  { %14134 = vtanh.f32 %v17708_v53  ;;  %v10182_v1 = vrot.slane %v10014_v63, 6 }
0x1bee   :  { %v14135_v4 = vpop.eup %14134 }
0x1bef   :  { %v9956_v36 = vmul.f32 %v14135_v4, %v9951_v8  ;;  %v10009_v4 = vrot.slane %v10001_v17, 2 }
0x1bf1   :  { %9957 = vst.msk [vmem:[#allocation3 + $0x1a] sm:$0x1] %vm1367_vm5, %v9956_v36  ;;  %v9961_v44 = vpack.c.bf16 %v9956_v36, %v9956_v36  ;;  %v10017_v50 = vsel %vm15279_vm4, %v9997_v6, %v10009_v4 }
0x1bf2   :  { %9958 = vst.msk [vmem:[#allocation3 + $0x5] sm:$0x1] %vm1369_vm6, %v9956_v36  ;;  %v10185_v63 = vrot.slane %v10017_v50, 6  ;;  %v10333_v50 = vld [vmem:[#allocation2 + $0x10] sm:$0xc0] }
0x1bf3   :  { %9959 = vst.msk [vmem:[#allocation3 + $0x39] sm:$0x2] %vm1371_vm7, %v9956_v36  ;;  %10223 = vmatmul.mubr.bf16.vlgmr.msra.gmra.mrb[156].mxu1 %v9961_v44  ;;  %10264 = vmatmul.mubr.bf16.vlgmr.msra.gmra.mrb[172].mxu0 %v9961_v44 }
0x1bf4   :  { %9960 = vst.msk [vmem:[#allocation3 + $0x24] sm:$0x2] %vm1373_vm8, %v9956_v36  ;;  %10512 = vmatpush1.bf16.msra.mxu1 %v17508_v37  ;;  %10553 = vmatpush1.bf16.msra.mxu0 %v17518_v34 }
0x1bf5   :  { %10513 = vmatprep.subr.bf16.mxu1 %v17528_v55  ;;  %10554 = vmatprep.subr.bf16.mxu0 %v17534_v7 }
0x1bf6   :  { %10543 = vmatprep.mubr.bf16.mxu1 %v14235_v60  ;;  %10584 = vmatprep.mubr.bf16.mxu0 %v14235_v60 }
0x1bf8   :  { %10514 = vmatpush1.bf16.msra.mxu1 %v17541_v56  ;;  %10555 = vmatpush1.bf16.msra.mxu0 %v17548_v26 }
0x1bf9   :  { %10515 = vmatprep.subr.bf16.mxu1 %v17553_v15  ;;  %10556 = vmatprep.subr.bf16.mxu0 %v17559_v61 }
0x1bfc   :  { %10516 = vmatpush1.bf16.msra.mxu1 %v17565_v16  ;;  %10557 = vmatpush1.bf16.msra.mxu0 %v17572_v62 }
0x1bfd   :  { %10517 = vmatprep.subr.bf16.mxu1 %v17577_v0  ;;  %10558 = vmatprep.subr.bf16.mxu0 %v17583_v20 }
0x1c00   :  { %10518 = vmatpush1.bf16.msra.mxu1 %v17589_v33  ;;  %10559 = vmatpush1.bf16.msra.mxu0 %v17596_v27 }
0x1c01   :  { %10519 = vmatprep.subr.bf16.mxu1 %v17601_v21  ;;  %10560 = vmatprep.subr.bf16.mxu0 %v17607_v41 }
0x1c04   :  { %10520 = vmatpush1.bf16.msra.mxu1 %v17613_v28  ;;  %10561 = vmatpush1.bf16.msra.mxu0 %v17620_v54 }
0x1c05   :  { %10521 = vmatprep.subr.bf16.mxu1 %v17625_v18  ;;  %10562 = vmatprep.subr.bf16.mxu0 %v17631_v29 }
0x1c08   :  { %10522 = vmatpush1.bf16.msra.mxu1 %v17637_v40  ;;  %10563 = vmatpush1.bf16.msra.mxu0 %v17644_v32 }
0x1c09   :  { %10523 = vmatprep.subr.bf16.mxu1 %v17649_v19  ;;  %10564 = vmatprep.subr.bf16.mxu0 %v17655_v11 }
0x1c0c   :  { %10524 = vmatpush1.bf16.msra.mxu1 %v17661_v10  ;;  %10565 = vmatpush1.bf16.msra.mxu0 %v17668_v2 }
0x1c0d   :  { %10525 = vmatprep.subr.bf16.mxu1 %v17673_v58  ;;  %10566 = vmatprep.subr.bf16.mxu0 %v17679_v3 }
0x1c10   :  { %10526 = vmatpush1.bf16.msra.mxu1 %v17685_v38  ;;  %10567 = vmatpush1.bf16.msra.mxu0 %v17692_v24 }
0x1c11   :  { %10844 = vmatprep.subr.bf16.mxu1 %v17513_v14  ;;  %10885 = vmatprep.subr.bf16.mxu0 %v17523_v22 }
0x1cc6   :  { %v10224_v9 = vpop.f32.mrb[156].mxu1  ;;  %v10265_v13 = vpop.f32.mrb[172].mxu0 }
0x1cc7   :  { %v10225_v31 = vadd.f32 %v10224_v9, %v10182_v1  ;;  %v10226_v23 = vpop.f32.mrb[157].mxu1  ;;  %v10267_v5 = vpop.f32.mrb[173].mxu0  ;;  %v10266_v12 = vadd.f32 %v10265_v13, %v10184_v45  ;;  %v10332_v45 = vld [vmem:[#allocation2 + $0x8] sm:$0xc0] }
0x1cc8   :  { %v10227_v8 = vadd.f32 %v10226_v23, %v10183_v52  ;;  %v10228_v36 = vpop.f32.mrb[158].mxu1  ;;  %v10269_v44 = vpop.f32.mrb[174].mxu0  ;;  %v10268_v25 = vadd.f32 %v10267_v5, %v10185_v63 }
0x1cc9   :  { %v10272_v39 = vmul.f32 0.5, %v10225_v31  ;;  %v10229_v46 = vpop.f32.mrb[159].mxu1  ;;  %v10270_v42 = vpop.f32.mrb[175].mxu0 }
0x1cca   :  { %v10276_v49 = vmul.f32 0.5, %v10227_v8  ;;  %v10281_v35 = vmul.f32 0.5, %v10268_v25  ;;  %v10327_v46 = vld [vmem:[#allocation2 + $0xe0] sm:$0x3] }
0x1ccb   :  { %14136 = vtanh.f32 %v10272_v39 }
0x1ccc   :  { %14138 = vtanh.f32 %v10276_v49  ;;  %v10328_v49 = vld [vmem:[#allocation2 + $0xe8] sm:$0x3] }
0x1ccd   :  { %14140 = vtanh.f32 %v10266_v12  ;;  %v10340_v12 = vrot.slane %v10332_v45, 6 }
0x1cce   :  { %14142 = vtanh.f32 %v10281_v35 }
0x1cd5   :  { %v14137_v51 = vpop.eup %14136 }
0x1cd6   :  { %v14139_v1 = vpop.eup %14138  ;;  %v10274_v17 = vmul.f32 0.5, %v14137_v51 }
0x1cd7   :  { %v10278_v9 = vmul.f32 0.5, %v14139_v1  ;;  %v14141_v30 = vpop.eup %14140  ;;  %v10329_v1 = vld [vmem:[#allocation2 + $0xf0] sm:$0x3] }
0x1cd8   :  { %v10275_v52 = vadd.f32 0.5, %v10274_v17  ;;  %v14143_v13 = vpop.eup %14142  ;;  %v10348_v17 = vsel %vm15265_vm2, %v10328_v49, %v10340_v12 }
0x1cd9   :  { %v10279_v31 = vadd.f32 0.5, %v10278_v9  ;;  %v10283_v6 = vmul.f32 0.5, %v14143_v13 }
0x1cda   :  { %v10286_v23 = vmul.f32 %v14141_v30, %v10275_v52 }
0x1cdb   :  { %v10285_v8 = vmul.f32 %v10279_v31, %v17708_v53  ;;  %v10284_v4 = vadd.f32 0.5, %v10283_v6  ;;  %v10331_v53 = vld [vmem:[#allocation2] sm:$0xc0] }
0x1cdc   :  { %v10339_v42 = vrot.slane %v10331_v53, 6 }
0x1cdd   :  { %v17758_v36 = vadd.f32 %v10286_v23, %v10285_v8  ;;  %v10334_v8 = vld [vmem:[#allocation2 + $0x18] sm:$0xc0] }
0x1cde   :  { %v10347_v63 = vsel %vm1047_vm1, %v10327_v46, %v10339_v42  ;;  %v10342_v53 = vrot.slane %v10334_v8, 6 }
0x1cdf   :  { %14144 = vtanh.f32 %v17758_v36 }
0x1ce9   :  { %v14145_v5 = vpop.eup %14144 }
0x1cea   :  { %v10289_v44 = vmul.f32 %v14145_v5, %v10284_v4 }
0x1cec   :  { %10290 = vst.msk [vmem:[#allocation3 + $0x1b] sm:$0x1] %vm1367_vm5, %v10289_v44  ;;  %v10294_v39 = vpack.c.bf16 %v10289_v44, %v10289_v44 }
0x1ced   :  { %10291 = vst.msk [vmem:[#allocation3 + $0x4] sm:$0x1] %vm1369_vm6, %v10289_v44 }
0x1cee   :  { %10292 = vst.msk [vmem:[#allocation3 + $0x3a] sm:$0x2] %vm1371_vm7, %v10289_v44  ;;  %10544 = vmatmul.mubr.bf16.vlgmr.msra.gmra.mrb[160].mxu1 %v10294_v39  ;;  %10585 = vmatmul.mubr.bf16.vlgmr.msra.gmra.mrb[176].mxu0 %v10294_v39  ;;  %v10330_v39 = vld [vmem:[#allocation2 + $0xf8] sm:$0x3] }
0x1cef   :  { %10293 = vst.msk [vmem:[#allocation3 + $0x23] sm:$0x2] %vm1373_vm8, %v10289_v44  ;;  %10845 = vmatpush1.bf16.msra.mxu1 %v17508_v37  ;;  %10886 = vmatpush1.bf16.msra.mxu0 %v17518_v34  ;;  %v10350_v45 = vsel %vm15279_vm4, %v10330_v39, %v10342_v53 }
0x1cf0   :  { %10846 = vmatprep.subr.bf16.mxu1 %v17528_v55  ;;  %10887 = vmatprep.subr.bf16.mxu0 %v17534_v7 }
0x1cf1   :  { %10876 = vmatprep.mubr.bf16.mxu1 %v14235_v60  ;;  %10917 = vmatprep.mubr.bf16.mxu0 %v14235_v60 }
0x1cf3   :  { %10847 = vmatpush1.bf16.msra.mxu1 %v17541_v56  ;;  %10888 = vmatpush1.bf16.msra.mxu0 %v17548_v26 }
0x1cf4   :  { %10848 = vmatprep.subr.bf16.mxu1 %v17553_v15  ;;  %10889 = vmatprep.subr.bf16.mxu0 %v17559_v61 }
0x1cf7   :  { %10849 = vmatpush1.bf16.msra.mxu1 %v17565_v16  ;;  %10890 = vmatpush1.bf16.msra.mxu0 %v17572_v62 }
0x1cf8   :  { %10850 = vmatprep.subr.bf16.mxu1 %v17577_v0  ;;  %10891 = vmatprep.subr.bf16.mxu0 %v17583_v20 }
0x1cfb   :  { %10851 = vmatpush1.bf16.msra.mxu1 %v17589_v33  ;;  %10892 = vmatpush1.bf16.msra.mxu0 %v17596_v27 }
0x1cfc   :  { %10852 = vmatprep.subr.bf16.mxu1 %v17601_v21  ;;  %10893 = vmatprep.subr.bf16.mxu0 %v17607_v41 }
0x1cff   :  { %10853 = vmatpush1.bf16.msra.mxu1 %v17613_v28  ;;  %10894 = vmatpush1.bf16.msra.mxu0 %v17620_v54 }
0x1d00   :  { %10854 = vmatprep.subr.bf16.mxu1 %v17625_v18  ;;  %10895 = vmatprep.subr.bf16.mxu0 %v17631_v29 }
0x1d03   :  { %10855 = vmatpush1.bf16.msra.mxu1 %v17637_v40  ;;  %10896 = vmatpush1.bf16.msra.mxu0 %v17644_v32 }
0x1d04   :  { %10856 = vmatprep.subr.bf16.mxu1 %v17649_v19  ;;  %10897 = vmatprep.subr.bf16.mxu0 %v17655_v11 }
0x1d07   :  { %10857 = vmatpush1.bf16.msra.mxu1 %v17661_v10  ;;  %10898 = vmatpush1.bf16.msra.mxu0 %v17668_v2 }
0x1d08   :  { %10858 = vmatprep.subr.bf16.mxu1 %v17673_v58  ;;  %10899 = vmatprep.subr.bf16.mxu0 %v17679_v3 }
0x1d0b   :  { %10859 = vmatpush1.bf16.msra.mxu1 %v17685_v38  ;;  %10900 = vmatpush1.bf16.msra.mxu0 %v17692_v24 }
0x1d0c   :  { %11177 = vmatprep.subr.bf16.mxu1 %v17513_v14  ;;  %11218 = vmatprep.subr.bf16.mxu0 %v17523_v22  ;;  %v10341_v22 = vrot.slane %v10333_v50, 6 }
0x1d0e   :  { %v10349_v4 = vsel %vm15271_vm3, %v10329_v1, %v10341_v22 }
0x1dc1   :  { %v10545_v25 = vpop.f32.mrb[160].mxu1  ;;  %v10586_v35 = vpop.f32.mrb[176].mxu0 }
0x1dc2   :  { %v10546_v51 = vadd.f32 %v10545_v25, %v10347_v63  ;;  %v10547_v14 = vpop.f32.mrb[161].mxu1  ;;  %v10588_v9 = vpop.f32.mrb[177].mxu0  ;;  %v10587_v44 = vadd.f32 %v10586_v35, %v10349_v4 }
0x1dc3   :  { %v10548_v52 = vadd.f32 %v10547_v14, %v10348_v17  ;;  %v10549_v30 = vpop.f32.mrb[162].mxu1  ;;  %v10590_v31 = vpop.f32.mrb[178].mxu0  ;;  %v10589_v46 = vadd.f32 %v10588_v9, %v10350_v45 }
0x1dc4   :  { %v10593_v23 = vmul.f32 0.5, %v10546_v51  ;;  %v10550_v13 = vpop.f32.mrb[163].mxu1  ;;  %v10591_v6 = vpop.f32.mrb[179].mxu0 }
0x1dc5   :  { %v10597_v5 = vmul.f32 0.5, %v10548_v52  ;;  %v10602_v42 = vmul.f32 0.5, %v10589_v46 }
0x1dc6   :  { %14146 = vtanh.f32 %v10593_v23 }
0x1dc7   :  { %14148 = vtanh.f32 %v10597_v5 }
0x1dc8   :  { %14150 = vtanh.f32 %v10587_v44 }
0x1dc9   :  { %14152 = vtanh.f32 %v10602_v42 }
0x1dd0   :  { %v14147_v49 = vpop.eup %14146 }
0x1dd1   :  { %v14149_v50 = vpop.eup %14148  ;;  %v10595_v12 = vmul.f32 0.5, %v14147_v49 }
0x1dd2   :  { %v10599_v63 = vmul.f32 0.5, %v14149_v50  ;;  %v14151_v51 = vpop.eup %14150 }
0x1dd3   :  { %v10596_v25 = vadd.f32 0.5, %v10595_v12  ;;  %v14153_v22 = vpop.eup %14152 }
0x1dd4   :  { %v10600_v1 = vadd.f32 0.5, %v10599_v63  ;;  %v10604_v52 = vmul.f32 0.5, %v14153_v22  ;;  %v13820_v22 = vld [vmem:[%s18094_s5 + $0x4] ss:$16 sps:$4 sm:$0xff]  }
0x1dd5   :  { %v10607_v17 = vmul.f32 %v14151_v51, %v10596_v25 }
0x1dd6   :  { %v10606_v35 = vmul.f32 %v10600_v1, %v17758_v36  ;;  %v10605_v30 = vadd.f32 0.5, %v10604_v52  ;;  %v13821_v52 = vld [vmem:[%s18094_s5 + $0x8] ss:$16 sps:$4 sm:$0xff]  }
0x1dd8   :  { %v17808_v14 = vadd.f32 %v10607_v17, %v10606_v35 }
0x1dda   :  { %14154 = vtanh.f32 %v17808_v14 }
0x1de4   :  { %v14155_v9 = vpop.eup %14154 }
0x1de5   :  { %v10610_v31 = vmul.f32 %v14155_v9, %v10605_v30  ;;  %v13823_v30 = vld [vmem:[%s18094_s5 + $0xc] ss:$16 sps:$4 sm:$0xff]  }
0x1de6   :  { %v13829_v9 = vld [vmem:[%s18094_s5 + $0x2c] ss:$16 sps:$4 sm:$0xff]  }
0x1de7   :  { %10611 = vst.msk [vmem:[#allocation3 + $0x1c] sm:$0x1] %vm1367_vm5, %v10610_v31  ;;  %v10615_v23 = vpack.c.bf16 %v10610_v31, %v10610_v31 }
0x1de8   :  { %10612 = vst.msk [vmem:[#allocation3 + $0x3] sm:$0x1] %vm1369_vm6, %v10610_v31 }
0x1de9   :  { %10613 = vst.msk [vmem:[#allocation3 + $0x3b] sm:$0x2] %vm1371_vm7, %v10610_v31  ;;  %10877 = vmatmul.mubr.bf16.vlgmr.msra.gmra.mrb[164].mxu1 %v10615_v23  ;;  %10918 = vmatmul.mubr.bf16.vlgmr.msra.gmra.mrb[180].mxu0 %v10615_v23  ;;  %v13827_v23 = vld [vmem:[%s18094_s5 + $0x28] ss:$16 sps:$4 sm:$0xff]  }
0x1dea   :  { %10614 = vst.msk [vmem:[#allocation3 + $0x22] sm:$0x2] %vm1373_vm8, %v10610_v31  ;;  %11178 = vmatpush1.bf16.msra.mxu1 %v17508_v37  ;;  %11219 = vmatpush1.bf16.msra.mxu0 %v17518_v34  ;;  %v10652_v37 = vld [vmem:[#allocation2] sm:$0x30]  ;;  %v10653_v34 = vld [vmem:[#allocation2 + $0x8] sm:$0x30] }
0x1deb   :  { %11179 = vmatprep.subr.bf16.mxu1 %v17528_v55  ;;  %11220 = vmatprep.subr.bf16.mxu0 %v17534_v7  ;;  %v10648_v55 = vld [vmem:[#allocation2 + $0xe0] sm:$0xc]  ;;  %v10660_v7 = vrot.slane %v10652_v37, 2  ;;  %v13832_v37 = vld [vmem:[%s18094_s5 + $0x44] ss:$16 sps:$4 sm:$0xff]  }
0x1dec   :  { %11209 = vmatprep.mubr.bf16.mxu1 %v14235_v60  ;;  %11250 = vmatprep.mubr.bf16.mxu0 %v14235_v60  ;;  %v13824_v31 = vld [vmem:[%s18094_s5 + $0x20] ss:$16 sps:$4 sm:$0xff]  }
0x1dee   :  { %11180 = vmatpush1.bf16.msra.mxu1 %v17541_v56  ;;  %11221 = vmatpush1.bf16.msra.mxu0 %v17548_v26  ;;  %v10649_v56 = vld [vmem:[#allocation2 + $0xe8] sm:$0xc]  ;;  %v10654_v26 = vld [vmem:[#allocation2 + $0x10] sm:$0x30] }
0x1def   :  { %11181 = vmatprep.subr.bf16.mxu1 %v17553_v15  ;;  %11222 = vmatprep.subr.bf16.mxu0 %v17559_v61  ;;  %v10661_v15 = vrot.slane %v10653_v34, 2  ;;  %v10668_v61 = vsel %vm1047_vm1, %v10648_v55, %v10660_v7  ;;  %v13835_v34 = vld [vmem:[%s18094_s5 + $0x4c] ss:$16 sps:$4 sm:$0xff]   ;;  %v13830_v55 = vld [vmem:[%s18094_s5 + $0x40] ss:$16 sps:$4 sm:$0xff]  }
0x1df0   :  { %v13833_v7 = vld [vmem:[%s18094_s5 + $0x48] ss:$16 sps:$4 sm:$0xff]  }
0x1df2   :  { %11182 = vmatpush1.bf16.msra.mxu1 %v17565_v16  ;;  %11223 = vmatpush1.bf16.msra.mxu0 %v17572_v62  ;;  %v10650_v16 = vld [vmem:[#allocation2 + $0xf0] sm:$0xc]  ;;  %v10669_v62 = vsel %vm15265_vm2, %v10649_v56, %v10661_v15  ;;  %v13838_v56 = vld [vmem:[%s18094_s5 + $0x64] ss:$16 sps:$4 sm:$0xff]  }
0x1df3   :  { %11183 = vmatprep.subr.bf16.mxu1 %v17577_v0  ;;  %11224 = vmatprep.subr.bf16.mxu0 %v17583_v20  ;;  %v10662_v0 = vrot.slane %v10654_v26, 2  ;;  %v10836_v20 = vrot.slane %v10668_v61, 2  ;;  %v13841_v26 = vld [vmem:[%s18094_s5 + $0x6c] ss:$16 sps:$4 sm:$0xff]   ;;  %v13836_v15 = vld [vmem:[%s18094_s5 + $0x60] ss:$16 sps:$4 sm:$0xff]  }
0x1df4   :  { %v13839_v61 = vld [vmem:[%s18094_s5 + $0x68] ss:$16 sps:$4 sm:$0xff]  }
0x1df6   :  { %11184 = vmatpush1.bf16.msra.mxu1 %v17589_v33  ;;  %11225 = vmatpush1.bf16.msra.mxu0 %v17596_v27  ;;  %v10655_v33 = vld [vmem:[#allocation2 + $0x18] sm:$0x30] }
0x1df7   :  { %11185 = vmatprep.subr.bf16.mxu1 %v17601_v21  ;;  %11226 = vmatprep.subr.bf16.mxu0 %v17607_v41  ;;  %v10670_v21 = vsel %vm15271_vm3, %v10650_v16, %v10662_v0  ;;  %v13844_v16 = vld [vmem:[%s18094_s5 + $0x84] ss:$16 sps:$4 sm:$0xff]   ;;  %v13842_v0 = vld [vmem:[%s18094_s5 + $0x80] ss:$16 sps:$4 sm:$0xff]  }
0x1dfa   :  { %11186 = vmatpush1.bf16.msra.mxu1 %v17613_v28  ;;  %11227 = vmatpush1.bf16.msra.mxu0 %v17620_v54  ;;  %v10837_v28 = vrot.slane %v10669_v62, 2  ;;  %v13847_v62 = vld [vmem:[%s18094_s5 + $0x8c] ss:$16 sps:$4 sm:$0xff]  }
0x1dfb   :  { %11187 = vmatprep.subr.bf16.mxu1 %v17625_v18  ;;  %11228 = vmatprep.subr.bf16.mxu0 %v17631_v29  ;;  %v10651_v29 = vld [vmem:[#allocation2 + $0xf8] sm:$0xc] }
0x1dfe   :  { %11188 = vmatpush1.bf16.msra.mxu1 %v17637_v40  ;;  %11229 = vmatpush1.bf16.msra.mxu0 %v17644_v32 }
0x1dff   :  { %11189 = vmatprep.subr.bf16.mxu1 %v17649_v19  ;;  %11230 = vmatprep.subr.bf16.mxu0 %v17655_v11  ;;  %v10663_v19 = vrot.slane %v10655_v33, 2  ;;  %v13850_v33 = vld [vmem:[%s18094_s5 + $0xa4] ss:$16 sps:$4 sm:$0xff]  }
0x1e01   :  { %v10671_v36 = vsel %vm15279_vm4, %v10651_v29, %v10663_v19  ;;  %v13857_v29 = vld [vmem:[%s18094_s5 + $0xc8] ss:$16 sps:$4 sm:$0xff]   ;;  %v13860_v19 = vld [vmem:[%s18094_s5 + $0xe0] ss:$16 sps:$4 sm:$0xff]  }
0x1e02   :  { %11190 = vmatpush1.bf16.msra.mxu1 %v17661_v10  ;;  %11231 = vmatpush1.bf16.msra.mxu0 %v17668_v2  ;;  %v10839_v13 = vrot.slane %v10671_v36, 2 }
0x1e03   :  { %11191 = vmatprep.subr.bf16.mxu1 %v17673_v58  ;;  %11232 = vmatprep.subr.bf16.mxu0 %v17679_v3  ;;  %v10838_v58 = vrot.slane %v10670_v21, 2  ;;  %v13848_v21 = vld [vmem:[%s18094_s5 + $0xa0] ss:$16 sps:$4 sm:$0xff]  }
0x1e06   :  { %11192 = vmatpush1.bf16.msra.mxu1 %v17685_v38  ;;  %11233 = vmatpush1.bf16.msra.mxu0 %v17692_v24 }
0x1e07   :  { %11510 = vmatprep.subr.bf16.mxu1 %v13820_v22  ;;  %11551 = vmatprep.subr.bf16.mxu0 %v13823_v30 }
0x1ebc   :  { %v10878_v27 = vpop.f32.mrb[164].mxu1  ;;  %v10919_v41 = vpop.f32.mrb[180].mxu0 }
0x1ebd   :  { %v10879_v54 = vadd.f32 %v10878_v27, %v10836_v20  ;;  %v10880_v18 = vpop.f32.mrb[165].mxu1  ;;  %v10921_v40 = vpop.f32.mrb[181].mxu0  ;;  %v10920_v8 = vadd.f32 %v10919_v41, %v10838_v58  ;;  %v13845_v20 = vld [vmem:[%s18094_s5 + $0x88] ss:$16 sps:$4 sm:$0xff]   ;;  %v13853_v27 = vld [vmem:[%s18094_s5 + $0xac] ss:$16 sps:$4 sm:$0xff]  }
0x1ebe   :  { %v10881_v32 = vadd.f32 %v10880_v18, %v10837_v28  ;;  %v10882_v11 = vpop.f32.mrb[166].mxu1  ;;  %v10923_v10 = vpop.f32.mrb[182].mxu0  ;;  %v10922_v6 = vadd.f32 %v10921_v40, %v10839_v13  ;;  %v13851_v41 = vld [vmem:[%s18094_s5 + $0xa8] ss:$16 sps:$4 sm:$0xff]   ;;  %v13856_v28 = vld [vmem:[%s18094_s5 + $0xc4] ss:$16 sps:$4 sm:$0xff]  }
0x1ebf   :  { %v10926_v2 = vmul.f32 0.5, %v10879_v54  ;;  %v10883_v3 = vpop.f32.mrb[167].mxu1  ;;  %v10924_v38 = vpop.f32.mrb[183].mxu0  ;;  %v13859_v54 = vld [vmem:[%s18094_s5 + $0xcc] ss:$16 sps:$4 sm:$0xff]  }
0x1ec0   :  { %v10930_v24 = vmul.f32 0.5, %v10881_v32  ;;  %v10935_v4 = vmul.f32 0.5, %v10922_v6  ;;  %v13854_v18 = vld [vmem:[%s18094_s5 + $0xc0] ss:$16 sps:$4 sm:$0xff]   ;;  %v13862_v40 = vld [vmem:[%s18094_s5 + $0xe4] ss:$16 sps:$4 sm:$0xff]  }
0x1ec1   :  { %14156 = vtanh.f32 %v10926_v2  ;;  %v13865_v32 = vld [vmem:[%s18094_s5 + $0xec] ss:$16 sps:$4 sm:$0xff]   ;;  %v13863_v11 = vld [vmem:[%s18094_s5 + $0xe8] ss:$16 sps:$4 sm:$0xff]   ;;  %v10985_v10 = vld [vmem:[#allocation2] sm:$0xc] }
0x1ec2   :  { %14158 = vtanh.f32 %v10930_v24  ;;  %v10986_v2 = vld [vmem:[#allocation2 + $0x8] sm:$0xc]  ;;  %v10981_v58 = vld [vmem:[#allocation2 + $0xe0] sm:$0x30]  ;;  %v10993_v3 = vrot.slane %v10985_v10, 6 }
0x1ec3   :  { %14160 = vtanh.f32 %v10920_v8  ;;  %v10982_v38 = vld [vmem:[#allocation2 + $0xe8] sm:$0x30]  ;;  %v10987_v24 = vld [vmem:[#allocation2 + $0x10] sm:$0xc]  ;;  %v10994_v36 = vrot.slane %v10986_v2, 6 }
0x1ec4   :  { %14162 = vtanh.f32 %v10935_v4  ;;  %v11001_v8 = vsel %vm1047_vm1, %v10981_v58, %v10993_v3  ;;  %v10983_v13 = vld [vmem:[#allocation2 + $0xf0] sm:$0x30]  ;;  %v10995_v4 = vrot.slane %v10987_v24, 6  ;;  %v11316_v10 = vld [vmem:[#allocation2 + $0xf0] sm:$0xc0] }
0x1ec5   :  { %v11002_v6 = vsel %vm15265_vm2, %v10982_v38, %v10994_v36  ;;  %v11321_v38 = vld [vmem:[#allocation2 + $0x18] sm:$0x3] }
0x1ec6   :  { %v11329_v47 = vrot.slane %v11321_v38, 2 }
0x1ecb   :  { %v14157_v5 = vpop.eup %14156 }
0x1ecc   :  { %v14159_v44 = vpop.eup %14158  ;;  %v10928_v39 = vmul.f32 0.5, %v14157_v5  ;;  %v11169_v5 = vrot.slane %v11001_v8, 4 }
0x1ecd   :  { %v10932_v53 = vmul.f32 0.5, %v14159_v44  ;;  %v14161_v46 = vpop.eup %14160  ;;  %v10988_v44 = vld [vmem:[#allocation2 + $0x18] sm:$0xc] }
0x1ece   :  { %v10929_v45 = vadd.f32 0.5, %v10928_v39  ;;  %v14163_v63 = vpop.eup %14162 }
0x1ecf   :  { %v10933_v42 = vadd.f32 0.5, %v10932_v53  ;;  %v10937_v25 = vmul.f32 0.5, %v14163_v63  ;;  %v11003_v53 = vsel %vm15271_vm3, %v10983_v13, %v10995_v4 }
0x1ed0   :  { %v10940_v49 = vmul.f32 %v14161_v46, %v10929_v45  ;;  %v11170_v46 = vrot.slane %v11002_v6, 4 }
0x1ed1   :  { %v10939_v50 = vmul.f32 %v10933_v42, %v17808_v14  ;;  %v10938_v51 = vadd.f32 0.5, %v10937_v25  ;;  %v13818_v14 = vld [vmem:[%s18094_s5] ss:$16 sps:$4 sm:$0xff]  }
0x1ed3   :  { %v17856_v12 = vadd.f32 %v10940_v49, %v10939_v50  ;;  %v10984_v50 = vld [vmem:[#allocation2 + $0xf8] sm:$0x30] }
0x1ed5   :  { %14164 = vtanh.f32 %v17856_v12 }
0x1edf   :  { %v14165_v1 = vpop.eup %14164 }
0x1ee0   :  { %v10943_v17 = vmul.f32 %v14165_v1, %v10938_v51  ;;  %v10996_v51 = vrot.slane %v10988_v44, 6 }
0x1ee2   :  { %10944 = vst.msk [vmem:[#allocation3 + $0x1d] sm:$0x1] %vm1367_vm5, %v10943_v17  ;;  %v10948_v35 = vpack.c.bf16 %v10943_v17, %v10943_v17 }
0x1ee3   :  { %10945 = vst.msk [vmem:[#allocation3 + $0x2] sm:$0x1] %vm1369_vm6, %v10943_v17 }
0x1ee4   :  { %10946 = vst.msk [vmem:[#allocation3 + $0x3c] sm:$0x2] %vm1371_vm7, %v10943_v17  ;;  %11210 = vmatmul.mubr.bf16.vlgmr.msra.gmra.mrb[168].mxu1 %v10948_v35  ;;  %11251 = vmatmul.mubr.bf16.vlgmr.msra.gmra.mrb[184].mxu0 %v10948_v35 }
0x1ee5   :  { %10947 = vst.msk [vmem:[#allocation3 + $0x21] sm:$0x2] %vm1373_vm8, %v10943_v17  ;;  %11542 = vmatprep.mubr.bf16.mxu1 %v14235_v60  ;;  %11583 = vmatprep.mubr.bf16.mxu0 %v14235_v60  ;;  %v13826_v60 = vld [vmem:[%s18094_s5 + $0x24] ss:$16 sps:$4 sm:$0xff]  }
0x1ee6   :  { %11511 = vmatpush1.bf16.msra.mxu1 %v13818_v14  ;;  %11552 = vmatpush1.bf16.msra.mxu0 %v13821_v52  ;;  %v11171_v14 = vrot.slane %v11003_v53, 4 }
0x1ee7   :  { %11512 = vmatprep.subr.bf16.mxu1 %v13826_v60  ;;  %11553 = vmatprep.subr.bf16.mxu0 %v13829_v9  ;;  %v11004_v60 = vsel %vm15279_vm4, %v10984_v50, %v10996_v51 }
0x1eea   :  { %11513 = vmatpush1.bf16.msra.mxu1 %v13824_v31  ;;  %11554 = vmatpush1.bf16.msra.mxu0 %v13827_v23  ;;  %v11172_v31 = vrot.slane %v11004_v60, 4 }
0x1eeb   :  { %11514 = vmatprep.subr.bf16.mxu1 %v13832_v37  ;;  %11555 = vmatprep.subr.bf16.mxu0 %v13835_v34 }
0x1eee   :  { %11515 = vmatpush1.bf16.msra.mxu1 %v13830_v55  ;;  %11556 = vmatpush1.bf16.msra.mxu0 %v13833_v7 }
0x1eef   :  { %11516 = vmatprep.subr.bf16.mxu1 %v13838_v56  ;;  %11557 = vmatprep.subr.bf16.mxu0 %v13841_v26 }
0x1ef2   :  { %11517 = vmatpush1.bf16.msra.mxu1 %v13836_v15  ;;  %11558 = vmatpush1.bf16.msra.mxu0 %v13839_v61 }
0x1ef3   :  { %11518 = vmatprep.subr.bf16.mxu1 %v13844_v16  ;;  %11559 = vmatprep.subr.bf16.mxu0 %v13847_v62 }
0x1ef6   :  { %11519 = vmatpush1.bf16.msra.mxu1 %v13842_v0  ;;  %11560 = vmatpush1.bf16.msra.mxu0 %v13845_v20 }
0x1ef7   :  { %11520 = vmatprep.subr.bf16.mxu1 %v13850_v33  ;;  %11561 = vmatprep.subr.bf16.mxu0 %v13853_v27 }
0x1efa   :  { %11521 = vmatpush1.bf16.msra.mxu1 %v13848_v21  ;;  %11562 = vmatpush1.bf16.msra.mxu0 %v13851_v41 }
0x1efb   :  { %11522 = vmatprep.subr.bf16.mxu1 %v13856_v28  ;;  %11563 = vmatprep.subr.bf16.mxu0 %v13859_v54  ;;  %v11318_v54 = vld [vmem:[#allocation2] sm:$0x3] }
0x1efe   :  { %11523 = vmatpush1.bf16.msra.mxu1 %v13854_v18  ;;  %11564 = vmatpush1.bf16.msra.mxu0 %v13857_v29  ;;  %v11314_v18 = vld [vmem:[#allocation2 + $0xe0] sm:$0xc0]  ;;  %v11326_v29 = vrot.slane %v11318_v54, 2  ;;  %v11632_v54 = vpop.xlane.xlu0 %11631 }
0x1eff   :  { %11524 = vmatprep.subr.bf16.mxu1 %v13862_v40  ;;  %11565 = vmatprep.subr.bf16.mxu0 %v13865_v32  ;;  %v11315_v40 = vld [vmem:[#allocation2 + $0xe8] sm:$0xc0]  ;;  %v11320_v32 = vld [vmem:[#allocation2 + $0x10] sm:$0x3] }
0x1f00   :  { %v11328_v58 = vrot.slane %v11320_v32, 2 }
0x1f02   :  { %11525 = vmatpush1.bf16.msra.mxu1 %v13860_v19  ;;  %11566 = vmatpush1.bf16.msra.mxu0 %v13863_v11  ;;  %v11334_v11 = vsel %vm1047_vm1, %v11314_v18, %v11326_v29  ;;  %v11336_v36 = vsel %vm15271_vm3, %v11316_v10, %v11328_v58 }
0x1f03   :  { %v11502_v3 = vrot.slane %v11334_v11, 6  ;;  %v11504_v59 = vrot.slane %v11336_v36, 6 }
0x1fb7   :  { %v11211_v39 = vpop.f32.mrb[168].mxu1  ;;  %v11252_v45 = vpop.f32.mrb[184].mxu0 }
0x1fb8   :  { %v11212_v42 = vadd.f32 %v11211_v39, %v11169_v5  ;;  %v11213_v49 = vpop.f32.mrb[169].mxu1  ;;  %v11254_v63 = vpop.f32.mrb[185].mxu0  ;;  %v11253_v9 = vadd.f32 %v11252_v45, %v11171_v14  ;;  %v11317_v5 = vld [vmem:[#allocation2 + $0xf8] sm:$0xc0] }
0x1fb9   :  { %v11214_v25 = vadd.f32 %v11213_v49, %v11170_v46  ;;  %v11215_v1 = vpop.f32.mrb[170].mxu1  ;;  %v11256_v17 = vpop.f32.mrb[186].mxu0  ;;  %v11255_v23 = vadd.f32 %v11254_v63, %v11172_v31  ;;  %v11337_v63 = vsel %vm15279_vm4, %v11317_v5, %v11329_v47 }
0x1fba   :  { %v11259_v35 = vmul.f32 0.5, %v11212_v42  ;;  %v11216_v22 = vpop.f32.mrb[171].mxu1  ;;  %v11257_v52 = vpop.f32.mrb[187].mxu0 }
0x1fbb   :  { %v11263_v30 = vmul.f32 0.5, %v11214_v25  ;;  %v11268_v37 = vmul.f32 0.5, %v11255_v23  ;;  %v11505_v25 = vrot.slane %v11337_v63, 6 }
0x1fbc   :  { %14166 = vtanh.f32 %v11259_v35 }
0x1fbd   :  { %14168 = vtanh.f32 %v11263_v30 }
0x1fbe   :  { %14170 = vtanh.f32 %v11253_v9 }
0x1fbf   :  { %14172 = vtanh.f32 %v11268_v37 }
0x1fc6   :  { %v14167_v34 = vpop.eup %14166 }
0x1fc7   :  { %v14169_v55 = vpop.eup %14168  ;;  %v11261_v7 = vmul.f32 0.5, %v14167_v34 }
0x1fc8   :  { %v11265_v56 = vmul.f32 0.5, %v14169_v55  ;;  %v14171_v15 = vpop.eup %14170 }
0x1fc9   :  { %v11262_v26 = vadd.f32 0.5, %v11261_v7  ;;  %v14173_v20 = vpop.eup %14172 }
0x1fca   :  { %v11266_v61 = vadd.f32 0.5, %v11265_v56  ;;  %v11270_v33 = vmul.f32 0.5, %v14173_v20 }
0x1fcb   :  { %v11273_v16 = vmul.f32 %v14171_v15, %v11262_v26  ;;  %v14206_v15 = vld [vmem:[%s18095_s6] ss:$0 sm:$0xff] }
0x1fcc   :  { %v11272_v62 = vmul.f32 %v11266_v61, %v17856_v12  ;;  %v11271_v27 = vadd.f32 0.5, %v11270_v33  ;;  %v11319_v12 = vld [vmem:[#allocation2 + $0x8] sm:$0x3] }
0x1fcd   :  { %v11327_v19 = vrot.slane %v11319_v12, 2 }
0x1fce   :  { %v11274_v0 = vadd.f32 %v11273_v16, %v11272_v62 }
0x1fcf   :  { %v11335_v2 = vsel %vm15265_vm2, %v11315_v40, %v11327_v19 }
0x1fd0   :  { %14174 = vtanh.f32 %v11274_v0  ;;  %v11503_v13 = vrot.slane %v11335_v2, 6 }
0x1fda   :  { %v14175_v21 = vpop.eup %14174 }
0x1fdb   :  { %v11276_v41 = vmul.f32 %v14175_v21, %v11271_v27  ;;  %v18001_v27 = vld [vmem:[#allocation3 + $0x30] sm:$0xff] }
0x1fdc   :  { %v11731_v21 = vmul.f32 %v14206_v15, %v18001_v27 }
0x1fdd   :  { %11277 = vst.msk [vmem:[#allocation3 + $0x1e] sm:$0x1] %vm1367_vm5, %v11276_v41  ;;  %v11281_v28 = vpack.c.bf16 %v11276_v41, %v11276_v41 }
0x1fde   :  { %11278 = vst.msk [vmem:[#allocation3 + $0x1] sm:$0x1] %vm1369_vm6, %v11276_v41 }
0x1fdf   :  { %11279 = vst.msk [vmem:[#allocation3 + $0x3d] sm:$0x2] %vm1371_vm7, %v11276_v41  ;;  %11543 = vmatmul.mubr.bf16.vlgmr.msra.gmra.mrb[172].mxu1 %v11281_v28  ;;  %11584 = vmatmul.mubr.bf16.vlgmr.msra.gmra.mrb[188].mxu0 %v11281_v28  ;;  %v12973_v28 = vld [vmem:[#allocation4] ss:$0 sm:$0xff] }
0x1fe0   :  { %11280 = vst.msk [vmem:[#allocation3 + $0x20] sm:$0x2] %vm1373_vm8, %v11276_v41  ;;  %v11634_v41 = vpop.xlane.xlu1 %11633  ;;  %v11645_v29 = vadd.f32 %v12973_v28, %v11632_v54  ;;  %13272 = vmatprep.mubr.msk.f32.mxu1 %vm14237_vm10, %v14234_v57  ;;  %v11838_v57 = vld [vmem:[%s18097_s8 + $0x78] sm:$0xff] }
0x1fe1   :  { %v11646_v18 = vadd.f32 %v12973_v28, %v11634_v41 }
0x1fe2   :  { %v11650_v2 = vsel %vm11648_vm9, %v11645_v29, -inf }
0x1fe3   :  { %v11651_v10 = vsel %vm11648_vm9, %v11646_v18, -inf }
0x1fe4   :  { %v11736_v12 = vpop.xlane.xlu1 %11735 }
0x20b2   :  { %v11544_v24 = vpop.f32.mrb[172].mxu1  ;;  %v11585_v8 = vpop.f32.mrb[188].mxu0 }
0x20b3   :  { %v11545_v6 = vadd.f32 %v11544_v24, %v11502_v3  ;;  %v11546_v4 = vpop.f32.mrb[173].mxu1  ;;  %v11587_v44 = vpop.f32.mrb[189].mxu0  ;;  %v11586_v48 = vadd.f32 %v11585_v8, %v11504_v59 }
0x20b4   :  { %v11547_v39 = vadd.f32 %v11546_v4, %v11503_v13  ;;  %v11548_v53 = vpop.f32.mrb[174].mxu1  ;;  %v11589_v45 = vpop.f32.mrb[190].mxu0  ;;  %v11588_v51 = vadd.f32 %v11587_v44, %v11505_v25  ;;  %v11742_v4 = vadd.f32 %v12973_v28, %v11736_v12 }
0x20b5   :  { %v11592_v46 = vmul.f32 0.5, %v11545_v6  ;;  %v11549_v42 = vpop.f32.mrb[175].mxu1  ;;  %v11590_v49 = vpop.f32.mrb[191].mxu0 }
0x20b6   :  { %v11596_v50 = vmul.f32 0.5, %v11547_v39  ;;  %v11601_v1 = vmul.f32 0.5, %v11588_v51 }
0x20b7   :  { %14176 = vtanh.f32 %v11592_v46  ;;  %v11746_v46 = vsel %vm11648_vm9, %v11742_v4, -inf }
0x20b8   :  { %14178 = vtanh.f32 %v11596_v50 }
0x20b9   :  { %14180 = vtanh.f32 %v11586_v48 }
0x20ba   :  { %14182 = vtanh.f32 %v11601_v1 }
0x20c1   :  { %v14177_v17 = vpop.eup %14176 }
0x20c2   :  { %v14179_v35 = vpop.eup %14178  ;;  %v11594_v14 = vmul.f32 0.5, %v14177_v17 }
0x20c3   :  { %v11598_v22 = vmul.f32 0.5, %v14179_v35  ;;  %v14181_v30 = vpop.eup %14180 }
0x20c4   :  { %v11595_v52 = vadd.f32 0.5, %v11594_v14  ;;  %v14183_v43 = vpop.eup %14182 }
0x20c5   :  { %v11599_v60 = vadd.f32 0.5, %v11598_v22  ;;  %v11603_v37 = vmul.f32 0.5, %v14183_v43 }
0x20c6   :  { %v11606_v9 = vmul.f32 %v14181_v30, %v11595_v52 }
0x20c7   :  { %v11605_v31 = vmul.f32 %v11599_v60, %v11274_v0  ;;  %v11604_v34 = vadd.f32 0.5, %v11603_v37 }
0x20c9   :  { %v11607_v23 = vadd.f32 %v11606_v9, %v11605_v31 }
0x20cb   :  { %14184 = vtanh.f32 %v11607_v23 }
0x20d5   :  { %v14185_v55 = vpop.eup %14184 }
0x20d6   :  { %v11609_v7 = vmul.f32 %v14185_v55, %v11604_v34 }
0x20d8   :  { %11610 = vst.msk [vmem:[#allocation3 + $0x1f] sm:$0x1] %vm1367_vm5, %v11609_v7 }
0x20d9   :  { %11611 = vst.msk [vmem:[#allocation3] sm:$0x1] %vm1369_vm6, %v11609_v7 }
0x20da   :  { %11612 = vst.msk [vmem:[#allocation3 + $0x3e] sm:$0x2] %vm1371_vm7, %v11609_v7 }
0x20db   :  { %11613 = vst.msk [vmem:[#allocation3 + $0x1f] sm:$0x2] %vm1373_vm8, %v11609_v7 }
0x20df   :  { %v17986_v56 = vld [vmem:[#allocation3 + $0x18] sm:$0xff] }
0x20e0   :  { %v17988_v26 = vld [vmem:[#allocation3] sm:$0xff]  ;;  %v11628_v61 = vmul.f32 %v14206_v15, %v17986_v56 }
0x20e1   :  { %v11625_v16 = vmul.f32 %v14206_v15, %v17988_v26  ;;  %v17995_v62 = vld [vmem:[#allocation3 + $0x38] sm:$0xff] }
0x20e2   :  { %v17997_v0 = vld [vmem:[#allocation3 + $0x20] sm:$0xff]  ;;  %11635 = vadd.xlane.f32.xlu1 %v11628_v61  ;;  %v11732_v20 = vmul.f32 %v14206_v15, %v17995_v62 }
0x20e3   :  { %11629 = vadd.xlane.f32.xlu0 %v11625_v16  ;;  %v11729_v33 = vmul.f32 %v14206_v15, %v17997_v0 }
0x20e6   :  { %11739 = vadd.xlane.f32.xlu1 %v11732_v20 }
0x20e7   :  { %11733 = vadd.xlane.f32.xlu0 %v11729_v33 }
0x20eb   :  { %11737 = vadd.xlane.f32.xlu0 %v11731_v21 }
0x216f   :  { %v11636_v40 = vpop.xlane.xlu1 %11635 }
0x2170   :  { %v11630_v32 = vpop.xlane.xlu0 %11629  ;;  %v11647_v19 = vadd.f32 %v12973_v28, %v11636_v40 }
0x2171   :  { %v11644_v11 = vadd.f32 %v12973_v28, %v11630_v32 }
0x2172   :  { %v11652_v58 = vsel %vm11648_vm9, %v11647_v19, -inf }
0x2173   :  { %v11649_v3 = vsel %vm11648_vm9, %v11644_v11, -inf  ;;  %v11654_v38 = vmax.f32 %v11651_v10, %v11652_v58  ;;  %v11740_v36 = vpop.xlane.xlu1 %11739 }
0x2174   :  { %v11653_v24 = vmax.f32 %v11649_v3, %v11650_v2  ;;  %v11734_v8 = vpop.xlane.xlu0 %11733  ;;  %v11744_v5 = vadd.f32 %v12973_v28, %v11740_v36 }
0x2175   :  { %v11741_v13 = vadd.f32 %v12973_v28, %v11734_v8 }
0x2176   :  { %v11655_v6 = vmax.f32 %v11653_v24, %v11654_v38  ;;  %v11748_v59 = vsel %vm11648_vm9, %v11744_v5, -inf }
0x2177   :  { %v11745_v47 = vsel %vm11648_vm9, %v11741_v13, -inf }
0x2178   :  { %v11656_v44 = vrot.slane %v11655_v6, 4  ;;  %v11738_v39 = vpop.xlane.xlu0 %11737  ;;  %v11749_v50 = vmax.f32 %v11745_v47, %v11746_v46 }
0x2179   :  { %v11743_v53 = vadd.f32 %v12973_v28, %v11738_v39 }
0x217a   :  { %v11657_v45 = vmax.f32 %v11655_v6, %v11656_v44 }
0x217b   :  { %v11747_v42 = vsel %vm11648_vm9, %v11743_v53, -inf }
0x217c   :  { %v11658_v49 = vrot.slane %v11657_v45, 2  ;;  %v11750_v63 = vmax.f32 %v11747_v42, %v11748_v59 }
0x217e   :  { %v11659_v48 = vmax.f32 %v11657_v45, %v11658_v49  ;;  %v11751_v25 = vmax.f32 %v11749_v50, %v11750_v63 }
0x2180   :  { %v11660_v51 = vrot.slane %v11659_v48, 1  ;;  %v11752_v1 = vrot.slane %v11751_v25, 4 }
0x2182   :  { %v11661_v17 = vmax.f32 %v11659_v48, %v11660_v51  ;;  %v11753_v35 = vmax.f32 %v11751_v25, %v11752_v1 }
0x2184   :  { %v11662_v14 = vsub.f32 %v11644_v11, %v11661_v17  ;;  %v11664_v22 = vsub.f32 %v11646_v18, %v11661_v17  ;;  %v11754_v52 = vrot.slane %v11753_v35, 2  ;;  %v11665_v30 = vsub.f32 %v11647_v19, %v11661_v17 }
0x2185   :  { %v11663_v60 = vsub.f32 %v11645_v29, %v11661_v17 }
0x2186   :  { %v11666_v9 = vmul.f32 1.442695, %v11662_v14  ;;  %v11670_v31 = vmul.f32 1.442695, %v11664_v22  ;;  %v11755_v23 = vmax.f32 %v11753_v35, %v11754_v52  ;;  %v11672_v34 = vmul.f32 1.442695, %v11665_v30 }
0x2187   :  { %v11668_v43 = vmul.f32 1.442695, %v11663_v60  ;;  %v11823_v30 = vld [vmem:[%s18097_s8] sm:$0xff]  ;;  %v11824_v60 = vld [vmem:[%s18097_s8 + $0x8] sm:$0xff] }
0x2188   :  { %14186 = vpow2.f32 %v11666_v9  ;;  %v11756_v37 = vrot.slane %v11755_v23, 1  ;;  %v14236_v9 = vmov 0.0|0.0  }
0x2189   :  { %14188 = vpow2.f32 %v11670_v31  ;;  %13403 = vmatprep.subr.bf16.mxu1 %v14236_v9  ;;  %v13404_v31 = vpack.c.bf16 %v11824_v60, %v11823_v30 }
0x218a   :  { %v11757_v55 = vmax.f32 %v11755_v23, %v11756_v37  ;;  %14190 = vpow2.f32 %v11668_v43  ;;  %v11825_v43 = vld [vmem:[%s18097_s8 + $0x10] sm:$0xff]  ;;  %v11826_v37 = vld [vmem:[%s18097_s8 + $0x18] sm:$0xff] }
0x218b   :  { %14192 = vpow2.f32 %v11672_v34  ;;  %13405 = vmatpush3.bf16.msra.mxu1 %v13404_v31  ;;  %v13407_v34 = vpack.c.bf16 %v11826_v37, %v11825_v43  ;;  %v12974_v31 = vld [vmem:[%s18098_s9] ss:$0 sm:$0xff] }
0x218c   :  { %v11759_v7 = vsub.f32 %v11742_v4, %v11757_v55  ;;  %v11760_v15 = vsub.f32 %v11743_v53, %v11757_v55  ;;  %v11758_v61 = vsub.f32 %v11741_v13, %v11757_v55  ;;  %v11761_v16 = vsub.f32 %v11744_v5, %v11757_v55  ;;  %13406 = vmatprep.subr.bf16.mxu1 %v14236_v9 }
0x218e   :  { %v11764_v20 = vmul.f32 1.442695, %v11759_v7  ;;  %v11766_v33 = vmul.f32 1.442695, %v11760_v15  ;;  %v11762_v21 = vmul.f32 1.442695, %v11758_v61 }
0x218f   :  { %v11768_v41 = vmul.f32 1.442695, %v11761_v16  ;;  %13408 = vmatpush3.bf16.msra.mxu1 %v13407_v34  ;;  %v11827_v7 = vld [vmem:[%s18097_s8 + $0x20] sm:$0xff]  ;;  %v11828_v15 = vld [vmem:[%s18097_s8 + $0x28] sm:$0xff] }
0x2190   :  { %14194 = vpow2.f32 %v11764_v20  ;;  %13409 = vmatprep.subr.bf16.mxu1 %v14236_v9  ;;  %v13410_v61 = vpack.c.bf16 %v11828_v15, %v11827_v7  ;;  %v11829_v20 = vld [vmem:[%s18097_s8 + $0x30] sm:$0xff] }
0x2191   :  { %14196 = vpow2.f32 %v11766_v33  ;;  %v11830_v33 = vld [vmem:[%s18097_s8 + $0x38] sm:$0xff] }
0x2192   :  { %v14187_v28 = vpop.eup %14186  ;;  %14198 = vpow2.f32 %v11762_v21  ;;  %v13413_v21 = vpack.c.bf16 %v11830_v33, %v11829_v20 }
0x2193   :  { %v14189_v54 = vpop.eup %14188  ;;  %v11674_v12 = vsel %vm11648_vm9, %v14187_v28, 0.0  ;;  %14200 = vpow2.f32 %v11768_v41  ;;  %13411 = vmatpush3.bf16.msra.mxu1 %v13410_v61  ;;  %v11831_v41 = vld [vmem:[%s18097_s8 + $0x40] sm:$0xff] }
0x2194   :  { %v14191_v18 = vpop.eup %14190  ;;  %v11677_v19 = vsel %vm11648_vm9, %v14189_v54, 0.0  ;;  %13412 = vmatprep.subr.bf16.mxu1 %v14236_v9 }
0x2195   :  { %v11675_v29 = vsel %vm11648_vm9, %v14191_v18, 0.0  ;;  %v14193_v40 = vpop.eup %14192 }
0x2196   :  { %v11676_v32 = vadd.f32 %v11675_v29, %v11674_v12  ;;  %v11679_v2 = vsel %vm11648_vm9, %v14193_v40, 0.0 }
0x2197   :  { %13414 = vmatpush3.bf16.msra.mxu1 %v13413_v21 }
0x2198   :  { %v11678_v11 = vadd.f32 %v11677_v19, %v11676_v32  ;;  %13415 = vmatprep.subr.bf16.mxu1 %v14236_v9  ;;  %v11836_v32 = vld [vmem:[%s18097_s8 + $0x68] sm:$0xff] }
0x219a   :  { %v14195_v10 = vpop.eup %14194  ;;  %v11680_v58 = vadd.f32 %v11679_v2, %v11678_v11  ;;  %v11837_v11 = vld [vmem:[%s18097_s8 + $0x70] sm:$0xff] }
0x219b   :  { %v14197_v3 = vpop.eup %14196  ;;  %v11771_v38 = vsel %vm11648_vm9, %v14195_v10, 0.0 }
0x219c   :  { %v14199_v24 = vpop.eup %14198  ;;  %v11681_v36 = vrot.slane %v11680_v58, 4  ;;  %v11773_v5 = vsel %vm11648_vm9, %v14197_v3, 0.0 }
0x219d   :  { %v11770_v8 = vsel %vm11648_vm9, %v14199_v24, 0.0  ;;  %v14201_v13 = vpop.eup %14200 }
0x219e   :  { %v11682_v6 = vadd.f32 %v11681_v36, %v11680_v58  ;;  %v11772_v4 = vadd.f32 %v11771_v38, %v11770_v8  ;;  %v11775_v47 = vsel %vm11648_vm9, %v14201_v13, 0.0  ;;  %v14207_v36 = vld [vmem:[#allocation3 + $0x8] sm:$0xff] }
0x21a0   :  { %v11683_v44 = vrot.slane %v11682_v6, 2  ;;  %v11774_v39 = vadd.f32 %v11773_v5, %v11772_v4  ;;  %v14208_v4 = vld [vmem:[#allocation3 + $0x10] sm:$0xff] }
0x21a2   :  { %v11684_v53 = vadd.f32 %v11683_v44, %v11682_v6  ;;  %v11776_v45 = vadd.f32 %v11775_v47, %v11774_v39  ;;  %v14209_v39 = vld [vmem:[#allocation3 + $0x28] sm:$0xff] }
0x21a4   :  { %v11685_v46 = vrot.slane %v11684_v53, 1  ;;  %v11777_v59 = vrot.slane %v11776_v45, 4 }
0x21a6   :  { %v11686_v42 = vadd.f32 %v11685_v46, %v11684_v53  ;;  %v11778_v49 = vadd.f32 %v11777_v59, %v11776_v45 }
0x21a8   :  { %14202 = vrcp.f32 %v11686_v42  ;;  %v11779_v50 = vrot.slane %v11778_v49, 2 }
0x21aa   :  { %v11780_v63 = vadd.f32 %v11779_v50, %v11778_v49 }
0x21ac   :  { %v11781_v48 = vrot.slane %v11780_v63, 1 }
0x21ae   :  { %v11782_v25 = vadd.f32 %v11781_v48, %v11780_v63 }
0x21b0   :  { %14204 = vrcp.f32 %v11782_v25 }
0x21b2   :  { %v14203_v51 = vpop.eup %14202 }
0x21b3   :  { %v11689_v1 = vmul.f32 %v14203_v51, %v14191_v18  ;;  %v11688_v17 = vmul.f32 %v14203_v51, %v14187_v28  ;;  %v11690_v52 = vmul.f32 %v14203_v51, %v14189_v54  ;;  %v11691_v55 = vmul.f32 %v14203_v51, %v14193_v40  ;;  %v11832_v28 = vld [vmem:[%s18097_s8 + $0x48] sm:$0xff]  ;;  %v11833_v54 = vld [vmem:[%s18097_s8 + $0x50] sm:$0xff]  ;;  %v11834_v18 = vld [vmem:[%s18097_s8 + $0x58] sm:$0xff] }
0x21b4   :  { %v13416_v12 = vpack.c.bf16 %v11832_v28, %v11831_v41  ;;  %v13419_v29 = vpack.c.bf16 %v11834_v18, %v11833_v54  ;;  %v11835_v40 = vld [vmem:[%s18097_s8 + $0x60] sm:$0xff] }
0x21b5   :  { %11699 = vperm.xlu1 %13433, %v11689_v1   ;;  %11694 = vperm.xlu0 %13432, %v11688_v17   ;;  %v13422_v19 = vpack.c.bf16 %v11836_v32, %v11835_v40 }
0x21b6   :  { %13417 = vmatpush3.bf16.msra.mxu1 %v13416_v12 }
0x21b7   :  { %13418 = vmatprep.subr.bf16.mxu1 %v14236_v9 }
0x21ba   :  { %v14205_v35 = vpop.eup %14204  ;;  %13420 = vmatpush3.bf16.msra.mxu1 %v13419_v29 }
0x21bb   :  { %v11784_v14 = vmul.f32 %v14205_v35, %v14199_v24  ;;  %v11785_v22 = vmul.f32 %v14205_v35, %v14195_v10  ;;  %v11786_v23 = vmul.f32 %v14205_v35, %v14197_v3  ;;  %v11787_v16 = vmul.f32 %v14205_v35, %v14201_v13  ;;  %13421 = vmatprep.subr.bf16.mxu1 %v14236_v9 }
0x21bc   :  { %v13425_v10 = vpack.c.bf16 %v11838_v57, %v11837_v11 }
0x21bd   :  { %11790 = vperm.xlu1 %13433, %v11784_v14  }
0x21be   :  { %13423 = vmatpush3.bf16.msra.mxu1 %v13422_v19 }
0x21bf   :  { %13424 = vmatprep.subr.bf16.mxu1 %v14236_v9 }
0x21c1   :  { %11795 = vperm.xlu1 %13433, %v11785_v22  }
0x21c2   :  { %13426 = vmatpush3.bf16.msra.mxu1 %v13425_v10 }
0x21c5   :  { %11704 = vperm.xlu1 %13433, %v11690_v52  }
0x21c9   :  { %11800 = vperm.xlu1 %13433, %v11786_v23  }
0x21cd   :  { %11709 = vperm.xlu1 %13433, %v11691_v55  }
0x21d1   :  { %11805 = vperm.xlu1 %13433, %v11787_v16  }
0x2234   :  { %v11700_v2 = vpop.permute.xlu1 %11699  ;;  %v11695_v38 = vpop.permute.xlu0 %11694 }
0x2235   :  { %v11713_v8 = vmul.f32 %v14207_v36, %v11700_v2  ;;  %v11712_v13 = vmul.f32 %v11695_v38, %v17988_v26 }
0x2237   :  { %v11716_v44 = vadd.f32 %v11713_v8, %v11712_v13 }
0x223c   :  { %v11791_v58 = vpop.permute.xlu1 %11790 }
0x223d   :  { %v11808_v45 = vmul.f32 %v11791_v58, %v17997_v0 }
0x2240   :  { %v11796_v3 = vpop.permute.xlu1 %11795 }
0x2241   :  { %v11809_v47 = vmul.f32 %v14209_v39, %v11796_v3 }
0x2243   :  { %v11812_v49 = vadd.f32 %v11809_v47, %v11808_v45 }
0x2244   :  { %v11705_v24 = vpop.permute.xlu1 %11704 }
0x2245   :  { %v11714_v5 = vmul.f32 %v14208_v4, %v11705_v24 }
0x2247   :  { %v11717_v46 = vadd.f32 %v11716_v44, %v11714_v5 }
0x2248   :  { %v11801_v6 = vpop.permute.xlu1 %11800 }
0x2249   :  { %v11810_v59 = vmul.f32 %v11801_v6, %v18001_v27 }
0x224b   :  { %v11813_v48 = vadd.f32 %v11812_v49, %v11810_v59 }
0x224c   :  { %v11710_v53 = vpop.permute.xlu1 %11709 }
0x224d   :  { %v11715_v42 = vmul.f32 %v11710_v53, %v17986_v56 }
0x224f   :  { %v11718_v50 = vadd.f32 %v11717_v46, %v11715_v42 }
0x2250   :  { %v11806_v63 = vpop.permute.xlu1 %11805 }
0x2251   :  { %v11719_v25 = vrot.slane %v11718_v50, 4  ;;  %v11811_v26 = vmul.f32 %v11806_v63, %v17995_v62 }
0x2253   :  { %v11720_v51 = vadd.f32 %v11719_v25, %v11718_v50  ;;  %v11814_v1 = vadd.f32 %v11813_v48, %v11811_v26 }
0x2255   :  { %v11721_v17 = vrot.slane %v11720_v51, 2  ;;  %v11815_v35 = vrot.slane %v11814_v1, 4 }
0x2257   :  { %v11722_v14 = vadd.f32 %v11721_v17, %v11720_v51  ;;  %v11816_v22 = vadd.f32 %v11815_v35, %v11814_v1 }
0x2259   :  { %v11817_v52 = vrot.slane %v11816_v22, 2  ;;  %v11723_v0 = vrot.slane %v11722_v14, 1 }
0x225b   :  { %v11818_v30 = vadd.f32 %v11817_v52, %v11816_v22  ;;  %v11724_v27 = vadd.f32 %v11723_v0, %v11722_v14 }
0x225d   :  { %v11819_v60 = vrot.slane %v11818_v30, 1 }
0x225f   :  { %v11820_v56 = vadd.f32 %v11819_v60, %v11818_v30 }
0x2261   :  { %v11822_v9 = vsel %vm11821_vm11, %v11724_v27, %v11820_v56 }
0x2262   :  { %13273 = vmatmul.mubr.f32.vlgmr.msra.gmra.mrb[176].mxu1 %v11822_v9 }
0x2335   :  { %v11912_v62 = vpop.f32.mrb[176].mxu1 }
0x2336   :  { %v11913_v23 = vadd.f32 %v12974_v31, %v11912_v62  ;;  %v13274_v43 = vpop.f32.mrb[177].mxu1 }
0x2338   :  { %11916 = vst [vmem:[#allocation5] sm:$0x3] %v11913_v23 }
0x2339   :  { %14221 = shalt.err (!%p14218_p4)
}
0x233a   :  { %s14222_s26 = scalar_lea.hbm %s18099_s10, 32 }
0x233b   :  { %p14223_p5 = scmp.ne.s32.totalorder %s18099_s10, %s14222_s26  ;;  %p14226_p6 = scmp.lt.u32.totalorder %s14222_s26, %s18099_s10 }
0x233d   :  { %p14228_p7 = pnand %p14226_p6, %p14223_p5 }
0x233f   :  { %14231 = shalt.err (!%p14228_p7)
}
0x2340   :  { %11926 = dma.vmem_to_hbm [thread:$0]  %s11924_s4, 32, %s18099_s10, [#allocation6]  }
0x2341   :  { %14232 = dma.done.wait [#allocation6], 32  }
0x2342   :  { %14233 = vsyncadd [#allocation6], 4294967264 }
0x2343   :  { %11930 = vsyncpa [#allocation6], 1 }

</bundles_post_ra>
